<compile_context>
chip_gen: v5e
topology: v5e:2x2
jax: 0.10.0
libtpu: 0.0.40
codegen_flags: <defaults>
</compile_context>

<pallas_src>
from functools import partial

import jax
import jax.numpy as jnp
from jax import lax
from jax.experimental import pallas as pl
from jax.experimental.pallas import tpu as pltpu

TN_MAX = 1024        # max point-tile rows (sublane-aligned)
BN_EPS = 1e-5


def _round_up(v, m):
    return (v + m - 1) // m * m


# ----------------------------------------------------------------------------
# Fused kernel:
#   per-point MLP (3 -> 64 -> 128 -> 1024, BN folded, ReLU)
#   + global_max_pool over `batch` (resident VMEM accumulator)
#   + on the last grid step: output MLP (1024 -> 512 -> 256 -> 9) + eye(3).
# ----------------------------------------------------------------------------
def fused_tnet_kernel(tb_ref,                       # scalar prefetch: (tiles, 2) int32
                      bid_ref, x_ref,
                      w1, b1, w2, b2, w3, b3,
                      w4, b4, w5, b5, w6, b6,
                      out_ref,                      # (B, 9)
                      pooled_acc,                   # VMEM scratch (B, 1024) f32
                      *, num_batches):
    i = pl.program_id(0)

    @pl.when(i == 0)
    def _():
        pooled_acc[...] = jnp.full_like(pooled_acc, -jnp.inf)

    # ---- Layer 1 (K=3): VPU broadcast-FMAs, keep the MXU free -------------
    x = x_ref[...].astype(jnp.float32)              # (tn, 3)
    w1v = w1[...]                                   # (3, 64) f32
    h = (x[:, 0:1] * w1v[0:1, :]
         + x[:, 1:2] * w1v[1:2, :]
         + x[:, 2:3] * w1v[2:3, :]
         + b1[...])
    h = jnp.maximum(h, 0.0)                         # (tn, 64)

    # ---- Layers 2-3 on the MXU: bf16 operands, f32 accumulation ------------
    h = jnp.dot(h.astype(jnp.bfloat16), w2[...],
                preferred_element_type=jnp.float32) + b2[...]
    h = jnp.maximum(h, 0.0)                         # (tn, 128)
    h = jnp.dot(h.astype(jnp.bfloat16), w3[...],
                preferred_element_type=jnp.float32) + b3[...]
    h = jnp.maximum(h, 0.0)                         # (tn, 1024) f32

    # ---- Segment max-pool; skip batch ids absent from this tile ------------
    bid = bid_ref[...]                              # (tn, 1) int32 (-1 == padding)
    tmin = tb_ref[i, 0]
    tmax = tb_ref[i, 1]
    for b in range(num_batches):                    # B is small & static
        @pl.when(jnp.logical_and(b >= tmin, b <= tmax))
        def _(b=b):
            seg = jnp.max(jnp.where(bid == b, h, -jnp.inf),
                          axis=0, keepdims=True)    # (1, 1024)
            pooled_acc[pl.ds(b, 1), :] = jnp.maximum(pooled_acc[pl.ds(b, 1), :], seg)

    # ---- Fused output MLP on the final grid step ---------------------------
    @pl.when(i == pl.num_programs(0) - 1)
    def _():
        p = pooled_acc[...]                         # (B, 1024) f32
        g = jnp.dot(p.astype(jnp.bfloat16), w4[...],
                    preferred_element_type=jnp.float32) + b4[...]
        g = jnp.maximum(g, 0.0)                     # (B, 512)
        g = jnp.dot(g.astype(jnp.bfloat16), w5[...],
                    preferred_element_type=jnp.float32) + b5[...]
        g = jnp.maximum(g, 0.0)                     # (B, 256)
        y = jnp.dot(g, w6[...],
                    preferred_element_type=jnp.float32) + b6[...]   # (B, 9)
        # flattened eye(3): ones at columns 0, 4, 8
        col = lax.broadcasted_iota(jnp.int32, y.shape, 1)
        out_ref[...] = y + jnp.where(col % 4 == 0, 1.0, 0.0)


# ----------------------------------------------------------------------------
# Parameter setup (deterministic, BN folded into the preceding Linear).
# Big weights stored in bf16 for native MXU rate + halved VMEM/DMA.
# ----------------------------------------------------------------------------
def _fold_linear_bn(key, fan_in, fan_out):
    kw, kb, kg, kbeta, km, kv = jax.random.split(key, 6)
    w = 0.1 * jax.random.normal(kw, (fan_in, fan_out), jnp.float32)   # = W.T of torch Linear
    b = 0.1 * jax.random.normal(kb, (fan_out,), jnp.float32)
    gamma = 1.0 + 0.1 * jax.random.normal(kg, (fan_out,), jnp.float32)
    beta = 0.1 * jax.random.normal(kbeta, (fan_out,), jnp.float32)
    mean = 0.1 * jax.random.normal(km, (fan_out,), jnp.float32)
    var = 1.0 + 0.1 * jax.random.uniform(kv, (fan_out,), jnp.float32)
    s = gamma / jnp.sqrt(var + BN_EPS)
    w_f = w * s[None, :]
    b_f = (b - mean) * s + beta
    return w_f, b_f.reshape(1, fan_out)


def _plain_linear(key, fan_in, fan_out):
    kw, kb = jax.random.split(key, 2)
    w = 0.1 * jax.random.normal(kw, (fan_in, fan_out), jnp.float32)
    b = 0.1 * jax.random.normal(kb, (fan_out,), jnp.float32)
    return w, b.reshape(1, fan_out)


def make_params(key):
    ks = jax.random.split(key, 6)
    p = {}
    p["w1"], p["b1"] = _fold_linear_bn(ks[0], 3, 64)
    w2, p["b2"] = _fold_linear_bn(ks[1], 64, 128)
    w3, p["b3"] = _fold_linear_bn(ks[2], 128, 1024)
    w4, p["b4"] = _fold_linear_bn(ks[3], 1024, 512)
    w5, p["b5"] = _fold_linear_bn(ks[4], 512, 256)
    p["w6"], p["b6"] = _plain_linear(ks[5], 256, 9)     # final Linear(256, 9), no BN
    p["w2"] = w2.astype(jnp.bfloat16)
    p["w3"] = w3.astype(jnp.bfloat16)
    p["w4"] = w4.astype(jnp.bfloat16)
    p["w5"] = w5.astype(jnp.bfloat16)
    return p


# ----------------------------------------------------------------------------
# Wrapper
# ----------------------------------------------------------------------------
def input_tnet_forward(x, batch, params, num_batches):
    n = x.shape[0]
    # Tile size driven by N: one big tile for small clouds, up to 1024 rows.
    tn = min(TN_MAX, _round_up(max(n, 8), 8))
    n_pad = _round_up(n, tn)
    num_tiles = n_pad // tn

    x_p = jnp.pad(x.astype(jnp.float32), ((0, n_pad - n), (0, 0)))
    bid_flat = jnp.pad(batch.astype(jnp.int32), (0, n_pad - n), constant_values=-1)
    bid_p = bid_flat.reshape(n_pad, 1)

    # Per-tile (min, max) batch id present (padding rows excluded) -> lets the
    # kernel skip absent batches; scalar-prefetched into SMEM.
    bid_tiles = bid_flat.reshape(num_tiles, tn)
    valid = bid_tiles >= 0
    tmin = jnp.min(jnp.where(valid, bid_tiles, jnp.int32(num_batches)), axis=1)
    tmax = jnp.max(jnp.where(valid, bid_tiles, jnp.int32(-1)), axis=1)
    tile_bounds = jnp.stack([tmin, tmax], axis=1).astype(jnp.int32)   # (tiles, 2)

    wspec = lambda shape: pl.BlockSpec(shape, lambda i, tb: (0, 0))

    out9 = pl.pallas_call(
        partial(fused_tnet_kernel, num_batches=num_batches),
        out_shape=jax.ShapeDtypeStruct((num_batches, 9), jnp.float32),
        grid_spec=pltpu.PrefetchScalarGridSpec(
            num_scalar_prefetch=1,
            grid=(num_tiles,),
            in_specs=[
                pl.BlockSpec((tn, 1), lambda i, tb: (i, 0)),    # batch ids
                pl.BlockSpec((tn, 3), lambda i, tb: (i, 0)),    # points
                wspec((3, 64)), wspec((1, 64)),
                wspec((64, 128)), wspec((1, 128)),
                wspec((128, 1024)), wspec((1, 1024)),
                wspec((1024, 512)), wspec((1, 512)),
                wspec((512, 256)), wspec((1, 256)),
                wspec((256, 9)), wspec((1, 9)),
            ],
            out_specs=pl.BlockSpec((num_batches, 9), lambda i, tb: (0, 0)),
            scratch_shapes=[pltpu.VMEM((num_batches, 1024), jnp.float32)],
        ),
        compiler_params=pltpu.CompilerParams(
            dimension_semantics=("arbitrary",),         # resident max-accumulator
            vmem_limit_bytes=64 * 1024 * 1024,          # above v5e's 16 MiB default
        ),
    )(tile_bounds, bid_p, x_p,
      params["w1"], params["b1"], params["w2"], params["b2"],
      params["w3"], params["b3"], params["w4"], params["b4"],
      params["w5"], params["b5"], params["w6"], params["b6"])

    return out9.reshape(num_batches, 3, 3)


# ----------------------------------------------------------------------------
# Pure-JAX reference (same folded params, f32 activations) for a sanity check.
# ----------------------------------------------------------------------------
def reference_forward(x, batch, params, num_batches):
    w2 = params["w2"].astype(jnp.float32)
    w3 = params["w3"].astype(jnp.float32)
    w4 = params["w4"].astype(jnp.float32)
    w5 = params["w5"].astype(jnp.float32)
    h = jnp.maximum(x @ params["w1"] + params["b1"], 0.0)
    h = jnp.maximum(h @ w2 + params["b2"], 0.0)
    h = jnp.maximum(h @ w3 + params["b3"], 0.0)
    pooled = jnp.stack([
        jnp.max(jnp.where((batch == b)[:, None], h, -jnp.inf), axis=0)
        for b in range(num_batches)
    ])
    g = jnp.maximum(pooled @ w4 + params["b4"], 0.0)
    g = jnp.maximum(g @ w5 + params["b5"], 0.0)
    y = g @ params["w6"] + params["b6"]
    y = y.reshape(num_batches, 3, 3)
    return y + jnp.eye(3, dtype=jnp.float32)[None]


if __name__ == "__main__":
    key = jax.random.PRNGKey(0)
    k_x, k_p = jax.random.split(key)

    num_batches = 2
    n_points = 300
    x = jax.random.normal(k_x, (n_points, 3), jnp.float32)
    batch = jnp.concatenate([
        jnp.zeros((150,), jnp.int32),
        jnp.ones((n_points - 150,), jnp.int32),
    ])

    params = make_params(k_p)

    out = input_tnet_forward(x, batch, params, num_batches)
    out = jax.block_until_ready(out)

    ref = reference_forward(x, batch, params, num_batches)
    assert out.shape == (num_batches, 3, 3)
    # bf16 MXU operands -> tolerance relaxed vs the pure-f32 reference.
    assert jnp.allclose(out, ref, atol=5e-2, rtol=5e-2), "mismatch vs reference"

    print("KERNEL_OK")
</pallas_src>

<mosaic_0001>
module attributes {stable_mosaic.version = 11 : i64} {
  func.func @fused_tnet_kernel(%arg0: i32, %arg1: memref<1x2xi32, #tpu.memory_space<smem>>, %arg2: memref<304x1xi32, #tpu.memory_space<vmem>>, %arg3: memref<304x3xf32, #tpu.memory_space<vmem>>, %arg4: memref<3x64xf32, #tpu.memory_space<vmem>>, %arg5: memref<1x64xf32, #tpu.memory_space<vmem>>, %arg6: memref<64x128xbf16, #tpu.memory_space<vmem>>, %arg7: memref<1x128xf32, #tpu.memory_space<vmem>>, %arg8: memref<128x1024xbf16, #tpu.memory_space<vmem>>, %arg9: memref<1x1024xf32, #tpu.memory_space<vmem>>, %arg10: memref<1024x512xbf16, #tpu.memory_space<vmem>>, %arg11: memref<1x512xf32, #tpu.memory_space<vmem>>, %arg12: memref<512x256xbf16, #tpu.memory_space<vmem>>, %arg13: memref<1x256xf32, #tpu.memory_space<vmem>>, %arg14: memref<256x9xf32, #tpu.memory_space<vmem>>, %arg15: memref<1x9xf32, #tpu.memory_space<vmem>>, %arg16: memref<2x9xf32, #tpu.memory_space<vmem>>, %arg17: memref<2x1024xf32, #tpu.memory_space<vmem>>) attributes {dimension_semantics = [#tpu.dimension_semantics<arbitrary>], iteration_bounds = array<i64: 1>, scalar_prefetch = 1 : i64, scratch_operands = 1 : i64, tpu.core_type = #tpu.core_type<tc>, window_params = [{transform_indices = @transform_0, window_bounds = array<i64: 304, 1>}, {transform_indices = @transform_1, window_bounds = array<i64: 304, 3>}, {pipeline_mode = #tpu.pipeline_mode<synchronous>, transform_indices = @transform_2, window_bounds = array<i64: 3, 64>}, {pipeline_mode = #tpu.pipeline_mode<synchronous>, transform_indices = @transform_3, window_bounds = array<i64: 1, 64>}, {pipeline_mode = #tpu.pipeline_mode<synchronous>, transform_indices = @transform_4, window_bounds = array<i64: 64, 128>}, {pipeline_mode = #tpu.pipeline_mode<synchronous>, transform_indices = @transform_5, window_bounds = array<i64: 1, 128>}, {pipeline_mode = #tpu.pipeline_mode<synchronous>, transform_indices = @transform_6, window_bounds = array<i64: 128, 1024>}, {pipeline_mode = #tpu.pipeline_mode<synchronous>, transform_indices = @transform_7, window_bounds = array<i64: 1, 1024>}, {pipeline_mode = #tpu.pipeline_mode<synchronous>, transform_indices = @transform_8, window_bounds = array<i64: 1024, 512>}, {pipeline_mode = #tpu.pipeline_mode<synchronous>, transform_indices = @transform_9, window_bounds = array<i64: 1, 512>}, {pipeline_mode = #tpu.pipeline_mode<synchronous>, transform_indices = @transform_10, window_bounds = array<i64: 512, 256>}, {pipeline_mode = #tpu.pipeline_mode<synchronous>, transform_indices = @transform_11, window_bounds = array<i64: 1, 256>}, {pipeline_mode = #tpu.pipeline_mode<synchronous>, transform_indices = @transform_12, window_bounds = array<i64: 256, 9>}, {pipeline_mode = #tpu.pipeline_mode<synchronous>, transform_indices = @transform_13, window_bounds = array<i64: 1, 9>}, {pipeline_mode = #tpu.pipeline_mode<synchronous>, transform_indices = @transform_14, window_bounds = array<i64: 2, 9>}]} {
    %c0_i32 = arith.constant 0 : i32
    %0 = arith.cmpi eq, %arg0, %c0_i32 : i32
    %1 = arith.extui %0 : i1 to i32
    %c0_i32_0 = arith.constant 0 : i32
    %2 = arith.cmpi ne, %1, %c0_i32_0 : i32
    scf.if %2 {
      %cst_28 = arith.constant 0xFF800000 : f32
      %61 = vector.broadcast %cst_28 : f32 to vector<2x1024xf32>
      %c0_29 = arith.constant 0 : index
      %c0_30 = arith.constant 0 : index
      %62 = vector.load %arg17[%c0_29, %c0_30] : memref<2x1024xf32, #tpu.memory_space<vmem>>, vector<2x1024xf32>
      tpu.vector_store %arg17[%c0_29, %c0_30], %61 {strides = array<i32>} : memref<2x1024xf32, #tpu.memory_space<vmem>>, vector<2x1024xf32>,
    } else {
    }
    %c0 = arith.constant 0 : index
    %c0_1 = arith.constant 0 : index
    %3 = vector.load %arg3[%c0, %c0_1] : memref<304x3xf32, #tpu.memory_space<vmem>>, vector<304x3xf32>
    %c0_2 = arith.constant 0 : index
    %c0_3 = arith.constant 0 : index
    %4 = vector.load %arg4[%c0_2, %c0_3] : memref<3x64xf32, #tpu.memory_space<vmem>>, vector<3x64xf32>
    %5 = vector.extract_strided_slice %3 {offsets = [0, 0], sizes = [304, 1], strides = [1, 1]} : vector<304x3xf32> to vector<304x1xf32>
    %6 = vector.extract_strided_slice %4 {offsets = [0, 0], sizes = [1, 64], strides = [1, 1]} : vector<3x64xf32> to vector<1x64xf32>
    %7 = vector.broadcast %5 : vector<304x1xf32> to vector<304x64xf32>
    %8 = vector.broadcast %6 : vector<1x64xf32> to vector<304x64xf32>
    %9 = arith.mulf %7, %8 : vector<304x64xf32>
    %10 = vector.extract_strided_slice %3 {offsets = [0, 1], sizes = [304, 1], strides = [1, 1]} : vector<304x3xf32> to vector<304x1xf32>
    %11 = vector.extract_strided_slice %4 {offsets = [1, 0], sizes = [1, 64], strides = [1, 1]} : vector<3x64xf32> to vector<1x64xf32>
    %12 = vector.broadcast %10 : vector<304x1xf32> to vector<304x64xf32>
    %13 = vector.broadcast %11 : vector<1x64xf32> to vector<304x64xf32>
    %14 = arith.mulf %12, %13 : vector<304x64xf32>
    %15 = arith.addf %9, %14 : vector<304x64xf32>
    %16 = vector.extract_strided_slice %3 {offsets = [0, 2], sizes = [304, 1], strides = [1, 1]} : vector<304x3xf32> to vector<304x1xf32>
    %17 = vector.extract_strided_slice %4 {offsets = [2, 0], sizes = [1, 64], strides = [1, 1]} : vector<3x64xf32> to vector<1x64xf32>
    %18 = vector.broadcast %16 : vector<304x1xf32> to vector<304x64xf32>
    %19 = vector.broadcast %17 : vector<1x64xf32> to vector<304x64xf32>
    %20 = arith.mulf %18, %19 : vector<304x64xf32>
    %21 = arith.addf %15, %20 : vector<304x64xf32>
    %c0_4 = arith.constant 0 : index
    %c0_5 = arith.constant 0 : index
    %22 = vector.load %arg5[%c0_4, %c0_5] : memref<1x64xf32, #tpu.memory_space<vmem>>, vector<1x64xf32>
    %23 = vector.broadcast %22 : vector<1x64xf32> to vector<304x64xf32>
    %24 = arith.addf %21, %23 : vector<304x64xf32>
    %cst = arith.constant 0.000000e+00 : f32
    %25 = vector.broadcast %cst : f32 to vector<304x64xf32>
    %26 = arith.maximumf %24, %25 : vector<304x64xf32>
    %27 = arith.truncf %26 : vector<304x64xf32> to vector<304x64xbf16>
    %c0_6 = arith.constant 0 : index
    %c0_7 = arith.constant 0 : index
    %28 = vector.load %arg6[%c0_6, %c0_7] : memref<64x128xbf16, #tpu.memory_space<vmem>>, vector<64x128xbf16>
    %cst_8 = arith.constant dense<0.000000e+00> : vector<304x128xf32>
    %29 = tpu.matmul %27, %28, %cst_8 {dimension_numbers = #tpu.dot_dimension_numbers<[1], [0], [0], [1], [0, 0, 1, 1], [], []>} : vector<304x64xbf16>, vector<64x128xbf16>, vector<304x128xf32> -> vector<304x128xf32>
    %c0_9 = arith.constant 0 : index
    %c0_10 = arith.constant 0 : index
    %30 = vector.load %arg7[%c0_9, %c0_10] : memref<1x128xf32, #tpu.memory_space<vmem>>, vector<1x128xf32>
    %31 = vector.broadcast %30 : vector<1x128xf32> to vector<304x128xf32>
    %32 = arith.addf %29, %31 : vector<304x128xf32>
    %cst_11 = arith.constant 0.000000e+00 : f32
    %33 = vector.broadcast %cst_11 : f32 to vector<304x128xf32>
    %34 = arith.maximumf %32, %33 : vector<304x128xf32>
    %35 = arith.truncf %34 : vector<304x128xf32> to vector<304x128xbf16>
    %c0_12 = arith.constant 0 : index
    %c0_13 = arith.constant 0 : index
    %36 = vector.load %arg8[%c0_12, %c0_13] : memref<128x1024xbf16, #tpu.memory_space<vmem>>, vector<128x1024xbf16>
    %cst_14 = arith.constant dense<0.000000e+00> : vector<304x1024xf32>
    %37 = tpu.matmul %35, %36, %cst_14 {dimension_numbers = #tpu.dot_dimension_numbers<[1], [0], [0], [1], [0, 0, 1, 1], [], []>} : vector<304x128xbf16>, vector<128x1024xbf16>, vector<304x1024xf32> -> vector<304x1024xf32>
    %c0_15 = arith.constant 0 : index
    %c0_16 = arith.constant 0 : index
    %38 = vector.load %arg9[%c0_15, %c0_16] : memref<1x1024xf32, #tpu.memory_space<vmem>>, vector<1x1024xf32>
    %39 = vector.broadcast %38 : vector<1x1024xf32> to vector<304x1024xf32>
    %40 = arith.addf %37, %39 : vector<304x1024xf32>
    %cst_17 = arith.constant 0.000000e+00 : f32
    %41 = vector.broadcast %cst_17 : f32 to vector<304x1024xf32>
    %42 = arith.maximumf %40, %41 : vector<304x1024xf32>
    %c0_18 = arith.constant 0 : index
    %c0_19 = arith.constant 0 : index
    %43 = vector.load %arg2[%c0_18, %c0_19] : memref<304x1xi32, #tpu.memory_space<vmem>>, vector<304x1xi32>
    %44 = arith.index_cast %arg0 : i32 to index
    %c0_20 = arith.constant 0 : index
    %45 = memref.load %arg1[%44, %c0_20] : memref<1x2xi32, #tpu.memory_space<smem>>
    %46 = arith.index_cast %arg0 : i32 to index
    %c1 = arith.constant 1 : index
    %47 = memref.load %arg1[%46, %c1] : memref<1x2xi32, #tpu.memory_space<smem>>
    %c0_i32_21 = arith.constant 0 : i32
    %48 = arith.cmpi sle, %45, %c0_i32_21 : i32
    %c0_i32_22 = arith.constant 0 : i32
    %49 = arith.cmpi sge, %47, %c0_i32_22 : i32
    %50 = arith.andi %48, %49 : i1
    %51 = arith.extui %50 : i1 to i32
    %c0_i32_23 = arith.constant 0 : i32
    %52 = arith.cmpi ne, %51, %c0_i32_23 : i32
    scf.if %52 {
      %c0_i32_28 = arith.constant 0 : i32
      %61 = vector.broadcast %c0_i32_28 : i32 to vector<304x1xi32>
      %62 = arith.cmpi eq, %43, %61 : vector<304x1xi32>
      %cst_29 = arith.constant 0xFF800000 : f32
      %63 = vector.shape_cast %62 : vector<304x1xi1> to vector<304x1xi1>
      %64 = vector.broadcast %63 : vector<304x1xi1> to vector<304x1024xi1>
      %65 = vector.broadcast %cst_29 : f32 to vector<304x1024xf32>
      %66 = arith.select %64, %42, %65 : vector<304x1024xi1>, vector<304x1024xf32>
      %cst_30 = arith.constant dense<0xFF800000> : vector<1024xf32>
      %67 = vector.multi_reduction <maximumf>, %66, %cst_30 [0] : vector<304x1024xf32> to vector<1024xf32>
      %68 = vector.shape_cast %67 : vector<1024xf32> to vector<1x1024xf32>
      %c0_31 = arith.constant 0 : index
      %c0_32 = arith.constant 0 : index
      %69 = vector.load %arg17[%c0_31, %c0_32] : memref<2x1024xf32, #tpu.memory_space<vmem>>, vector<1x1024xf32>
      %70 = arith.maximumf %69, %68 : vector<1x1024xf32>
      %c0_33 = arith.constant 0 : index
      %c0_34 = arith.constant 0 : index
      %71 = vector.load %arg17[%c0_33, %c0_34] : memref<2x1024xf32, #tpu.memory_space<vmem>>, vector<1x1024xf32>
      tpu.vector_store %arg17[%c0_33, %c0_34], %70 {strides = array<i32>} : memref<2x1024xf32, #tpu.memory_space<vmem>>, vector<1x1024xf32>,
    } else {
    }
    %c1_i32 = arith.constant 1 : i32
    %53 = arith.cmpi sle, %45, %c1_i32 : i32
    %c1_i32_24 = arith.constant 1 : i32
    %54 = arith.cmpi sge, %47, %c1_i32_24 : i32
    %55 = arith.andi %53, %54 : i1
    %56 = arith.extui %55 : i1 to i32
    %c0_i32_25 = arith.constant 0 : i32
    %57 = arith.cmpi ne, %56, %c0_i32_25 : i32
    scf.if %57 {
      %c1_i32_28 = arith.constant 1 : i32
      %61 = vector.broadcast %c1_i32_28 : i32 to vector<304x1xi32>
      %62 = arith.cmpi eq, %43, %61 : vector<304x1xi32>
      %cst_29 = arith.constant 0xFF800000 : f32
      %63 = vector.shape_cast %62 : vector<304x1xi1> to vector<304x1xi1>
      %64 = vector.broadcast %63 : vector<304x1xi1> to vector<304x1024xi1>
      %65 = vector.broadcast %cst_29 : f32 to vector<304x1024xf32>
      %66 = arith.select %64, %42, %65 : vector<304x1024xi1>, vector<304x1024xf32>
      %cst_30 = arith.constant dense<0xFF800000> : vector<1024xf32>
      %67 = vector.multi_reduction <maximumf>, %66, %cst_30 [0] : vector<304x1024xf32> to vector<1024xf32>
      %68 = vector.shape_cast %67 : vector<1024xf32> to vector<1x1024xf32>
      %c1_31 = arith.constant 1 : index
      %c0_32 = arith.constant 0 : index
      %69 = vector.load %arg17[%c1_31, %c0_32] : memref<2x1024xf32, #tpu.memory_space<vmem>>, vector<1x1024xf32>
      %70 = arith.maximumf %69, %68 : vector<1x1024xf32>
      %c1_33 = arith.constant 1 : index
      %c0_34 = arith.constant 0 : index
      %71 = vector.load %arg17[%c1_33, %c0_34] : memref<2x1024xf32, #tpu.memory_space<vmem>>, vector<1x1024xf32>
      tpu.vector_store %arg17[%c1_33, %c0_34], %70 {strides = array<i32>} : memref<2x1024xf32, #tpu.memory_space<vmem>>, vector<1x1024xf32>,
    } else {
    }
    %c0_i32_26 = arith.constant 0 : i32
    %58 = arith.cmpi eq, %arg0, %c0_i32_26 : i32
    %59 = arith.extui %58 : i1 to i32
    %c0_i32_27 = arith.constant 0 : i32
    %60 = arith.cmpi ne, %59, %c0_i32_27 : i32
    scf.if %60 {
      %c0_28 = arith.constant 0 : index
      %c0_29 = arith.constant 0 : index
      %61 = vector.load %arg17[%c0_28, %c0_29] : memref<2x1024xf32, #tpu.memory_space<vmem>>, vector<2x1024xf32>
      %62 = arith.truncf %61 : vector<2x1024xf32> to vector<2x1024xbf16>
      %c0_30 = arith.constant 0 : index
      %c0_31 = arith.constant 0 : index
      %63 = vector.load %arg10[%c0_30, %c0_31] : memref<1024x512xbf16, #tpu.memory_space<vmem>>, vector<1024x512xbf16>
      %cst_32 = arith.constant dense<0.000000e+00> : vector<2x512xf32>
      %64 = tpu.matmul %62, %63, %cst_32 {dimension_numbers = #tpu.dot_dimension_numbers<[1], [0], [0], [1], [0, 0, 1, 1], [], []>} : vector<2x1024xbf16>, vector<1024x512xbf16>, vector<2x512xf32> -> vector<2x512xf32>
      %c0_33 = arith.constant 0 : index
      %c0_34 = arith.constant 0 : index
      %65 = vector.load %arg11[%c0_33, %c0_34] : memref<1x512xf32, #tpu.memory_space<vmem>>, vector<1x512xf32>
      %66 = vector.broadcast %65 : vector<1x512xf32> to vector<2x512xf32>
      %67 = arith.addf %64, %66 : vector<2x512xf32>
      %cst_35 = arith.constant 0.000000e+00 : f32
      %68 = vector.broadcast %cst_35 : f32 to vector<2x512xf32>
      %69 = arith.maximumf %67, %68 : vector<2x512xf32>
      %70 = arith.truncf %69 : vector<2x512xf32> to vector<2x512xbf16>
      %c0_36 = arith.constant 0 : index
      %c0_37 = arith.constant 0 : index
      %71 = vector.load %arg12[%c0_36, %c0_37] : memref<512x256xbf16, #tpu.memory_space<vmem>>, vector<512x256xbf16>
      %cst_38 = arith.constant dense<0.000000e+00> : vector<2x256xf32>
      %72 = tpu.matmul %70, %71, %cst_38 {dimension_numbers = #tpu.dot_dimension_numbers<[1], [0], [0], [1], [0, 0, 1, 1], [], []>} : vector<2x512xbf16>, vector<512x256xbf16>, vector<2x256xf32> -> vector<2x256xf32>
      %c0_39 = arith.constant 0 : index
      %c0_40 = arith.constant 0 : index
      %73 = vector.load %arg13[%c0_39, %c0_40] : memref<1x256xf32, #tpu.memory_space<vmem>>, vector<1x256xf32>
      %74 = vector.broadcast %73 : vector<1x256xf32> to vector<2x256xf32>
      %75 = arith.addf %72, %74 : vector<2x256xf32>
      %cst_41 = arith.constant 0.000000e+00 : f32
      %76 = vector.broadcast %cst_41 : f32 to vector<2x256xf32>
      %77 = arith.maximumf %75, %76 : vector<2x256xf32>
      %c0_42 = arith.constant 0 : index
      %c0_43 = arith.constant 0 : index
      %78 = vector.load %arg14[%c0_42, %c0_43] : memref<256x9xf32, #tpu.memory_space<vmem>>, vector<256x9xf32>
      %cst_44 = arith.constant dense<0.000000e+00> : vector<2x9xf32>
      %79 = tpu.matmul %77, %78, %cst_44 {dimension_numbers = #tpu.dot_dimension_numbers<[1], [0], [0], [1], [0, 0, 1, 1], [], []>} : vector<2x256xf32>, vector<256x9xf32>, vector<2x9xf32> -> vector<2x9xf32>
      %c0_45 = arith.constant 0 : index
      %c0_46 = arith.constant 0 : index
      %80 = vector.load %arg15[%c0_45, %c0_46] : memref<1x9xf32, #tpu.memory_space<vmem>>, vector<1x9xf32>
      %81 = vector.broadcast %80 : vector<1x9xf32> to vector<2x9xf32>
      %82 = arith.addf %79, %81 : vector<2x9xf32>
      %83 = tpu.iota {dimensions = array<i32: 1>} : vector<2x9xi32>
      %c4_i32 = arith.constant 4 : i32
      %c0_i32_47 = arith.constant 0 : i32
      %84 = arith.cmpi eq, %c4_i32, %c0_i32_47 : i32
      %c1_i32_48 = arith.constant 1 : i32
      %85 = arith.select %84, %c1_i32_48, %c4_i32 : i32
      %86 = vector.broadcast %85 : i32 to vector<2x9xi32>
      %87 = arith.remsi %83, %86 : vector<2x9xi32>
      %c0_i32_49 = arith.constant 0 : i32
      %88 = vector.broadcast %c0_i32_49 : i32 to vector<2x9xi32>
      %89 = arith.cmpi ne, %87, %88 : vector<2x9xi32>
      %c0_i32_50 = arith.constant 0 : i32
      %90 = vector.broadcast %c0_i32_50 : i32 to vector<2x9xi32>
      %91 = arith.cmpi slt, %87, %90 : vector<2x9xi32>
      %c0_i32_51 = arith.constant 0 : i32
      %92 = arith.cmpi slt, %85, %c0_i32_51 : i32
      %93 = vector.broadcast %92 : i1 to vector<2x9xi1>
      %94 = vector.broadcast %93 : vector<2x9xi1> to vector<2x9xi1>
      %95 = arith.xori %91, %94 : vector<2x9xi1>
      %96 = arith.andi %95, %89 : vector<2x9xi1>
      %97 = vector.broadcast %85 : i32 to vector<2x9xi32>
      %98 = arith.addi %87, %97 : vector<2x9xi32>
      %99 = arith.select %96, %98, %87 : vector<2x9xi1>, vector<2x9xi32>
      %c0_i32_52 = arith.constant 0 : i32
      %100 = vector.broadcast %c0_i32_52 : i32 to vector<2x9xi32>
      %101 = arith.cmpi eq, %99, %100 : vector<2x9xi32>
      %cst_53 = arith.constant 1.000000e+00 : f32
      %cst_54 = arith.constant 0.000000e+00 : f32
      %102 = vector.broadcast %cst_53 : f32 to vector<2x9xf32>
      %103 = vector.broadcast %cst_54 : f32 to vector<2x9xf32>
      %104 = arith.select %101, %102, %103 : vector<2x9xi1>, vector<2x9xf32>
      %105 = arith.addf %82, %104 : vector<2x9xf32>
      %c0_55 = arith.constant 0 : index
      %c0_56 = arith.constant 0 : index
      %106 = vector.load %arg16[%c0_55, %c0_56] : memref<2x9xf32, #tpu.memory_space<vmem>>, vector<2x9xf32>
      tpu.vector_store %arg16[%c0_55, %c0_56], %105 {strides = array<i32>} : memref<2x9xf32, #tpu.memory_space<vmem>>, vector<2x9xf32>,
    } else {
    }
    return
  }
  func.func @transform_0(%arg0: i32, %arg1: memref<1x2xi32, #tpu.memory_space<smem>>) -> (i32, i32) {
    %c0_i32 = arith.constant 0 : i32
    %c0_i32_0 = arith.constant 0 : i32
    return %arg0, %c0_i32 : i32, i32
  }
  func.func @transform_1(%arg0: i32, %arg1: memref<1x2xi32, #tpu.memory_space<smem>>) -> (i32, i32) {
    %c0_i32 = arith.constant 0 : i32
    %c0_i32_0 = arith.constant 0 : i32
    return %arg0, %c0_i32 : i32, i32
  }
  func.func @transform_2(%arg0: i32, %arg1: memref<1x2xi32, #tpu.memory_space<smem>>) -> (i32, i32) {
    %c0_i32 = arith.constant 0 : i32
    %c0_i32_0 = arith.constant 0 : i32
    %c0_i32_1 = arith.constant 0 : i32
    return %c0_i32, %c0_i32_0 : i32, i32
  }
  func.func @transform_3(%arg0: i32, %arg1: memref<1x2xi32, #tpu.memory_space<smem>>) -> (i32, i32) {
    %c0_i32 = arith.constant 0 : i32
    %c0_i32_0 = arith.constant 0 : i32
    %c0_i32_1 = arith.constant 0 : i32
    return %c0_i32, %c0_i32_0 : i32, i32
  }
  func.func @transform_4(%arg0: i32, %arg1: memref<1x2xi32, #tpu.memory_space<smem>>) -> (i32, i32) {
    %c0_i32 = arith.constant 0 : i32
    %c0_i32_0 = arith.constant 0 : i32
    %c0_i32_1 = arith.constant 0 : i32
    return %c0_i32, %c0_i32_0 : i32, i32
  }
  func.func @transform_5(%arg0: i32, %arg1: memref<1x2xi32, #tpu.memory_space<smem>>) -> (i32, i32) {
    %c0_i32 = arith.constant 0 : i32
    %c0_i32_0 = arith.constant 0 : i32
    %c0_i32_1 = arith.constant 0 : i32
    return %c0_i32, %c0_i32_0 : i32, i32
  }
  func.func @transform_6(%arg0: i32, %arg1: memref<1x2xi32, #tpu.memory_space<smem>>) -> (i32, i32) {
    %c0_i32 = arith.constant 0 : i32
    %c0_i32_0 = arith.constant 0 : i32
    %c0_i32_1 = arith.constant 0 : i32
    return %c0_i32, %c0_i32_0 : i32, i32
  }
  func.func @transform_7(%arg0: i32, %arg1: memref<1x2xi32, #tpu.memory_space<smem>>) -> (i32, i32) {
    %c0_i32 = arith.constant 0 : i32
    %c0_i32_0 = arith.constant 0 : i32
    %c0_i32_1 = arith.constant 0 : i32
    return %c0_i32, %c0_i32_0 : i32, i32
  }
  func.func @transform_8(%arg0: i32, %arg1: memref<1x2xi32, #tpu.memory_space<smem>>) -> (i32, i32) {
    %c0_i32 = arith.constant 0 : i32
    %c0_i32_0 = arith.constant 0 : i32
    %c0_i32_1 = arith.constant 0 : i32
    return %c0_i32, %c0_i32_0 : i32, i32
  }
  func.func @transform_9(%arg0: i32, %arg1: memref<1x2xi32, #tpu.memory_space<smem>>) -> (i32, i32) {
    %c0_i32 = arith.constant 0 : i32
    %c0_i32_0 = arith.constant 0 : i32
    %c0_i32_1 = arith.constant 0 : i32
    return %c0_i32, %c0_i32_0 : i32, i32
  }
  func.func @transform_10(%arg0: i32, %arg1: memref<1x2xi32, #tpu.memory_space<smem>>) -> (i32, i32) {
    %c0_i32 = arith.constant 0 : i32
    %c0_i32_0 = arith.constant 0 : i32
    %c0_i32_1 = arith.constant 0 : i32
    return %c0_i32, %c0_i32_0 : i32, i32
  }
  func.func @transform_11(%arg0: i32, %arg1: memref<1x2xi32, #tpu.memory_space<smem>>) -> (i32, i32) {
    %c0_i32 = arith.constant 0 : i32
    %c0_i32_0 = arith.constant 0 : i32
    %c0_i32_1 = arith.constant 0 : i32
    return %c0_i32, %c0_i32_0 : i32, i32
  }
  func.func @transform_12(%arg0: i32, %arg1: memref<1x2xi32, #tpu.memory_space<smem>>) -> (i32, i32) {
    %c0_i32 = arith.constant 0 : i32
    %c0_i32_0 = arith.constant 0 : i32
    %c0_i32_1 = arith.constant 0 : i32
    return %c0_i32, %c0_i32_0 : i32, i32
  }
  func.func @transform_13(%arg0: i32, %arg1: memref<1x2xi32, #tpu.memory_space<smem>>) -> (i32, i32) {
    %c0_i32 = arith.constant 0 : i32
    %c0_i32_0 = arith.constant 0 : i32
    %c0_i32_1 = arith.constant 0 : i32
    return %c0_i32, %c0_i32_0 : i32, i32
  }
  func.func @transform_14(%arg0: i32, %arg1: memref<1x2xi32, #tpu.memory_space<smem>>) -> (i32, i32) {
    %c0_i32 = arith.constant 0 : i32
    %c0_i32_0 = arith.constant 0 : i32
    %c0_i32_1 = arith.constant 0 : i32
    return %c0_i32, %c0_i32_0 : i32, i32
  }
}

</mosaic_0001>

<bundles_post_ra>
// kernel: tpu_custom_call.1
= control target key start
LH: loop header
LB: loop body
LE: loop exit
PB: predicated region body
PF: predicated region fallthrough
CT: control target
= control target key end

     0   :  { %s9378_s21 = smov [#allocation4]   ;;  %s14428_s0 = inlined_call_operand.vmem [shape: s32[1,2], index: 0, kind: input, shape index: {}]   ;;  %s14429_s1 = inlined_call_operand.vmem [shape: s32[304,1], index: 1, kind: input, shape index: {}]   ;;  %s14430_s2 = inlined_call_operand.vmem [shape: f32[304,3], index: 2, kind: input, shape index: {}]   ;;  %s14431_s3 = inlined_call_operand.vmem [shape: f32[3,64], index: 3, kind: input, shape index: {}]   ;;  %s14432_s4 = inlined_call_operand.vmem [shape: f32[1,64], index: 4, kind: input, shape index: {}]   ;;  %s14433_s5 = inlined_call_operand.vmem [shape: bf16[64,128], index: 5, kind: input, shape index: {}]   ;;  %s14434_s6 = inlined_call_operand.vmem [shape: f32[1,128], index: 6, kind: input, shape index: {}]   ;;  %s14435_s7 = inlined_call_operand.vmem [shape: bf16[128,1024], index: 7, kind: input, shape index: {}]   ;;  %s14436_s8 = inlined_call_operand.vmem [shape: f32[1,1024], index: 8, kind: input, shape index: {}]   ;;  %s14437_s9 = inlined_call_operand.hbm [shape: bf16[1024,512], index: 9, kind: input, shape index: {}]   ;;  %s14438_s10 = inlined_call_operand.vmem [shape: f32[1,512], index: 10, kind: input, shape index: {}]   ;;  %s14439_s11 = inlined_call_operand.hbm [shape: bf16[512,256], index: 11, kind: input, shape index: {}]   ;;  %s14440_s12 = inlined_call_operand.vmem [shape: f32[1,256], index: 12, kind: input, shape index: {}]   ;;  %s14441_s13 = inlined_call_operand.vmem [shape: f32[256,9], index: 13, kind: input, shape index: {}]   ;;  %s14442_s14 = inlined_call_operand.vmem [shape: f32[1,9], index: 14, kind: input, shape index: {}]   ;;  %s14443_s15 = inlined_call_operand.hbm [shape: f32[2,9], index: 15, kind: output, shape index: {}]  }
   0x1   :  { %s21_s20 = sshll.u32 %s14428_s0, 4  ;;  %s22_s20 = int_to_ptr.vmem [resolvable:$true] %s21_s20 }
   0x2   :  { %24 = dma.vmem_to_smem %s22_s20, 16, %s9378_s21, [#allocation3] }
   0x3   :  { %9370 = dma.done.wait [#allocation3], 16 }
   0x4   :  { %9371 = vsyncadd [#allocation3], 4294967280 }
   0x5   :  { %27 = sfence }
   0x6   :  { %28 = vsyncpa [#allocation6], 0 }
   0x7   :  { %29 = vsyncpa [#allocation9], 0 }
   0x8   :  { %30 = vsyncpa [#allocation7], 0  ;;  %s51_s24 = sshll.u32 %s14437_s9, 4  ;;  %s9379_s25 = smov [#allocation5]   ;;  %s52_s24 = int_to_ptr.hbm [resolvable:$true] %s51_s24 }
   0x9   :  { %s53_s26 = sshll.u32 %s9379_s25, 4  ;;  %s66_s0 = sshll.u32 %s14439_s11, 4  ;;  %s54_s26 = int_to_ptr.vmem [resolvable:$true] %s53_s26  ;;  %s67_s0 = int_to_ptr.hbm [resolvable:$true] %s66_s0 }
   0xa   :  { %s9380_s29 = smov 256   ;;  %s9381_s30 = smov 16  }
   0xb   :  { %59 = dma.hbm_to_vmem [thread:$0]  %s52_s24, 32768, %s54_s26, [#allocation6], %s9380_s29, %s9380_s29, %s9381_s30  }
   0xc   :  { %s9382_s16 = smov [#allocation8]   ;;  %s9383_s18 = smov 128  }
   0xd   :  { %s68_s17 = sshll.u32 %s9382_s16, 4  ;;  %s9384_s19 = smov 8   ;;  %s69_s17 = int_to_ptr.vmem [resolvable:$true] %s68_s17 }
   0xe   :  { %74 = dma.hbm_to_vmem [thread:$0]  %s67_s0, 8192, %s69_s17, [#allocation9], %s9383_s18, %s9383_s18, %s9384_s19  }
   0xf   :  { %9372 = dma.done.wait [#allocation6], 32768  }
  0x10   :  { %9373 = vsyncadd [#allocation6], 4294934528 }
  0x11   :  { %9374 = dma.done.wait [#allocation9], 8192  }
  0x12   :  { %9375 = vsyncadd [#allocation9], 4294959104  ;;  %v9385_v0 = vmov -inf   ;;  %s9482_s9 = sld [smem:[#allocation4]]  ;;  %v14448_v1 = vmov 1   ;;  %v14444_v2 = vmov 0  }
  0x13   :  { %94 = vst [vmem:[#allocation2] sm:$0xff] %v9385_v0  ;;  %9176 = vset.pattern.permute.xlu1 %v14448_v1  ;;  %9175 = vset.pattern.permute.xlu0 %v14444_v2  ;;  %s9486_s11 = sld [smem:[#allocation4 + $0x1]]  ;;  %v14446_v3 = vmov 2   ;;  %v9492_v4 = vld [vmem:[%s14429_s1] sm:$0xff]  ;;  %v9497_v5 = vld [vmem:[%s14429_s1 + $0x8] sm:$0xff]  ;;  %v9502_v6 = vld [vmem:[%s14429_s1 + $0x10] sm:$0xff] }
  0x14   :  { %95 = vst [vmem:[#allocation2 + $0x8] sm:$0xff] %v9385_v0  ;;  %9177 = vset.pattern.permute.xlu2 %v14446_v3  ;;  %v9508_v7 = vld [vmem:[%s14429_s1 + $0x18] sm:$0xff]  ;;  %v9513_v8 = vld [vmem:[%s14429_s1 + $0x20] sm:$0xff]  ;;  %v9518_v9 = vld [vmem:[%s14429_s1 + $0x28] sm:$0xff]  ;;  %vm957_vm0 = vcmask 523264  }
  0x15   :  { %14771 = vst [vmem:[#allocation15_spill] sm:$0xff] %v9492_v4  ;;  %v9524_v10 = vld [vmem:[%s14429_s1 + $0x30] sm:$0xff]  ;;  %v9529_v11 = vld [vmem:[%s14429_s1 + $0x38] sm:$0xff]  ;;  %v9534_v12 = vld [vmem:[%s14429_s1 + $0x40] sm:$0xff] }
  0x16   :  { %14772 = vst [vmem:[#allocation16_spill] sm:$0xff] %v9497_v5  ;;  %v9539_v13 = vld [vmem:[%s14429_s1 + $0x48] sm:$0xff]  ;;  %v9544_v14 = vld [vmem:[%s14429_s1 + $0x50] sm:$0xff]  ;;  %v9549_v15 = vld [vmem:[%s14429_s1 + $0x58] sm:$0xff] }
  0x17   :  { %14773 = vst [vmem:[#allocation17_spill] sm:$0xff] %v9502_v6  ;;  %v9558_v16 = vld [vmem:[%s14429_s1 + $0x60] sm:$0xff]  ;;  %v9563_v17 = vld [vmem:[%s14429_s1 + $0x68] sm:$0xff]  ;;  %v9568_v18 = vld [vmem:[%s14429_s1 + $0x70] sm:$0xff] }
  0x18   :  { %p2756_p0 = scmp.le.s32.totalorder %s9482_s9, 0  ;;  %14774 = vst [vmem:[#allocation18_spill] sm:$0xff] %v9508_v7  ;;  %v9573_v19 = vld [vmem:[%s14429_s1 + $0x78] sm:$0xff]  ;;  %v9578_v20 = vld [vmem:[%s14429_s1 + $0x80] sm:$0xff]  ;;  %v9583_v21 = vld [vmem:[%s14429_s1 + $0x88] sm:$0xff] }
  0x19   :  { %14775 = vst [vmem:[#allocation19_spill] sm:$0xff] %v9513_v8  ;;  %p2757_p1 = scmp.ge.s32.totalorder %s9486_s11, 0  ;;  %v9588_v22 = vld [vmem:[%s14429_s1 + $0x90] sm:$0xff]  ;;  %v9593_v23 = vld [vmem:[%s14429_s1 + $0x98] sm:$0xff]  ;;  %v9598_v24 = vld [vmem:[%s14429_s1 + $0xa0] sm:$0xff] }
  0x1a   :  { %14776 = vst [vmem:[#allocation20_spill] sm:$0xff] %v9518_v9  ;;  %v9603_v25 = vld [vmem:[%s14429_s1 + $0xa8] sm:$0xff]  ;;  %v9608_v26 = vld [vmem:[%s14429_s1 + $0xb0] sm:$0xff]  ;;  %v9613_v27 = vld [vmem:[%s14429_s1 + $0xb8] sm:$0xff] }
  0x1b   :  { %14777 = vst [vmem:[#allocation21_spill] sm:$0xff] %v9524_v10  ;;  %p9551_p2 = pnand %p2757_p1, %p2756_p0  ;;  %v9618_v28 = vld [vmem:[%s14429_s1 + $0xc0] sm:$0xff]  ;;  %v9623_v29 = vld [vmem:[%s14429_s1 + $0xc8] sm:$0xff]  ;;  %v9628_v30 = vld [vmem:[%s14429_s1 + $0xd0] sm:$0xff] }
  0x1c   :  { %14778 = vst [vmem:[#allocation22_spill] sm:$0xff] %v9529_v11  ;;  %v9633_v31 = vld [vmem:[%s14429_s1 + $0xd8] sm:$0xff]  ;;  %v9638_v32 = vld [vmem:[%s14429_s1 + $0xe0] sm:$0xff]  ;;  %v9643_v33 = vld [vmem:[%s14429_s1 + $0xe8] sm:$0xff] }
  0x1d   :  { %14779 = vst [vmem:[#allocation23_spill] sm:$0xff] %v9534_v12  ;;  %v9648_v34 = vld [vmem:[%s14429_s1 + $0xf0] sm:$0xff]  ;;  %v9653_v35 = vld [vmem:[%s14429_s1 + $0xf8] sm:$0xff]  ;;  %v9658_v36 = vld [vmem:[%s14429_s1 + $0x100] sm:$0xff] }
  0x1e   :  { %14780 = vst [vmem:[#allocation24_spill] sm:$0xff] %v9539_v13  ;;  %v9663_v37 = vld [vmem:[%s14429_s1 + $0x108] sm:$0xff]  ;;  %v9668_v38 = vld [vmem:[%s14429_s1 + $0x110] sm:$0xff]  ;;  %v9673_v39 = vld [vmem:[%s14429_s1 + $0x118] sm:$0xff] }
  0x1f   :  { %14781 = vst [vmem:[#allocation25_spill] sm:$0xff] %v9544_v14  ;;  %v9678_v40 = vld [vmem:[%s14429_s1 + $0x120] sm:$0xff]  ;;  %v9683_v41 = vld [vmem:[%s14429_s1 + $0x128] sm:$0xff]  ;;  %v98_v44 = vld [vmem:[%s14430_s2 + $0x10] sm:$0xff] }
  0x20   :  { %14782 = vst [vmem:[#allocation26_spill] sm:$0xff] %v9549_v15  ;;  %v96_v42 = vld [vmem:[%s14430_s2] sm:$0xff]  ;;  %v97_v43 = vld [vmem:[%s14430_s2 + $0x8] sm:$0xff]  ;;  %v99_v45 = vld [vmem:[%s14430_s2 + $0x18] sm:$0xff] }
  0x21   :  { %14784 = vst [vmem:[#allocation27_spill] sm:$0xff] %v9558_v16  ;;  %365 = vperm.xlu1 %9176, %v96_v42   ;;  %137 = vperm.xlu0 %9175, %v96_v42   ;;  %v100_v46 = vld [vmem:[%s14430_s2 + $0x20] sm:$0xff]  ;;  %v101_v47 = vld [vmem:[%s14430_s2 + $0x28] sm:$0xff]  ;;  %v102_v48 = vld [vmem:[%s14430_s2 + $0x30] sm:$0xff] }
  0x22   :  { %14785 = vst [vmem:[#allocation28_spill] sm:$0xff] %v9563_v17  ;;  %594 = vperm.xlu2 %9177, %v96_v42   ;;  %v103_v49 = vld [vmem:[%s14430_s2 + $0x38] sm:$0xff]  ;;  %v105_v50 = vld [vmem:[%s14430_s2 + $0x48] sm:$0xff]  ;;  %v106_v51 = vld [vmem:[%s14430_s2 + $0x50] sm:$0xff] }
  0x23   :  { %14786 = vst [vmem:[#allocation29_spill] sm:$0xff] %v9568_v18  ;;  %v104_v52 = vld [vmem:[%s14430_s2 + $0x40] sm:$0xff]  ;;  %v107_v53 = vld [vmem:[%s14430_s2 + $0x58] sm:$0xff]  ;;  %v8774_v56 = vld [vmem:[%s14433_s5 + $0x10] sm:$0xff] }
  0x24   :  { %14787 = vst [vmem:[#allocation30_spill] sm:$0xff] %v9573_v19  ;;  %v108_v54 = vld [vmem:[%s14430_s2 + $0x60] sm:$0xff]  ;;  %v8775_v55 = vld [vmem:[%s14433_s5 + $0x18] sm:$0xff]  ;;  %v109_v58 = vld [vmem:[%s14430_s2 + $0x68] sm:$0xff] }
  0x25   :  { %14788 = vst [vmem:[#allocation31_spill] sm:$0xff] %v9578_v20  ;;  %1019 = vmatpush.bf16.msra.mxu0 %v8775_v55  ;;  %v8773_v59 = vld [vmem:[%s14433_s5 + $0x8] sm:$0xff]  ;;  %v8772_v60 = vld [vmem:[%s14433_s5] sm:$0xff]  ;;  %v9767_v62 = vld [vmem:[%s14430_s2 + $0x70] sm:$0xff] }
  0x26   :  { %14789 = vst [vmem:[#allocation32_spill] sm:$0xff] %v9583_v21  ;;  %v134_v63 = vld [vmem:[%s14431_s3] sm:$0x7] }
  0x27   :  { %14790 = vst [vmem:[#allocation33_spill] sm:$0xff] %v9588_v22  ;;  %v9776_v42 = vperm.slane %v134_v63, 1 }
  0x28   :  { %14791 = vst [vmem:[#allocation34_spill] sm:$0xff] %v9593_v23 }
  0x29   :  { %14792 = vst [vmem:[#allocation35_spill] sm:$0xff] %v9598_v24  ;;  %369 = vperm.xlu1 %9176, %v97_v43   ;;  %142 = vperm.xlu0 %9175, %v97_v43  }
  0x2a   :  { %14793 = vst [vmem:[#allocation36_spill] sm:$0xff] %v9603_v25  ;;  %598 = vperm.xlu2 %9177, %v97_v43   ;;  %1020 = vmatpush.bf16.msra.mxu0 %v8774_v56  ;;  %v9778_v43 = vperm.slane %v134_v63, 0 }
  0x2b   :  { %14794 = vst [vmem:[#allocation37_spill] sm:$0xff] %v9608_v26 }
  0x2c   :  { %14795 = vst [vmem:[#allocation38_spill] sm:$0xff] %v9613_v27 }
  0x2d   :  { %14796 = vst [vmem:[#allocation39_spill] sm:$0xff] %v9618_v28 }
  0x2e   :  { %14797 = vst [vmem:[#allocation40_spill] sm:$0xff] %v9623_v29  ;;  %1021 = vmatpush.bf16.msra.mxu0 %v8773_v59 }
  0x2f   :  { %14798 = vst [vmem:[#allocation41_spill] sm:$0xff] %v9628_v30 }
  0x30   :  { %14799 = vst [vmem:[#allocation42_spill] sm:$0xff] %v9633_v31 }
  0x31   :  { %14800 = vst [vmem:[#allocation43_spill] sm:$0xff] %v9638_v32  ;;  %9178 = vset.pattern.permute.xlu1 %v14444_v2  ;;  %147 = vperm.xlu0 %9175, %v98_v44  }
  0x32   :  { %14801 = vst [vmem:[#allocation44_spill] sm:$0xff] %v9643_v33  ;;  %152 = vperm.xlu1 %9178, %v99_v45   ;;  %9179 = vset.pattern.permute.xlu2 %v14448_v1 }
  0x33   :  { %14802 = vst [vmem:[#allocation45_spill] sm:$0xff] %v9648_v34  ;;  %373 = vperm.xlu2 %9179, %v98_v44   ;;  %1022 = vmatpush.bf16.msra.mxu0 %v8772_v60  ;;  %v9792_v60 = vld [vmem:[%s14432_s4] ss:$0 sm:$0xff] }
  0x34   :  { %14803 = vst [vmem:[#allocation46_spill] sm:$0xff] %v9653_v35 }
  0x35   :  { %14804 = vst [vmem:[#allocation47_spill] sm:$0xff] %v9658_v36 }
  0x36   :  { %14805 = vst [vmem:[#allocation48_spill] sm:$0xff] %v9663_v37  ;;  %v14812_v37 = vmov 1  }
  0x37   :  { %14806 = vst [vmem:[#allocation49_spill] sm:$0xff] %v9668_v38 }
  0x38   :  { %14807 = vst [vmem:[#allocation50_spill] sm:$0xff] %v9673_v39 }
  0x39   :  { %14808 = vst [vmem:[#allocation51_spill] sm:$0xff] %v9678_v40  ;;  %9180 = vset.pattern.permute.xlu0 %v14448_v1 }
  0x3a   :  { %14809 = vst [vmem:[#allocation52_spill] sm:$0xff] %v9683_v41  ;;  %9181 = vset.pattern.permute.xlu1 %v14446_v3  ;;  %377 = vperm.xlu0 %9180, %v99_v45  }
  0x3b   :  { %602 = vperm.xlu1 %9181, %v98_v44   ;;  %9182 = vset.pattern.permute.xlu2 %v14446_v3 }
  0x3c   :  { %606 = vperm.xlu2 %9182, %v99_v45  }
  0x42   :  { %381 = vperm.xlu0 %9180, %v100_v46  }
  0x43   :  { %9183 = vset.pattern.permute.xlu1 %v14444_v2 }
  0x44   :  { %157 = vperm.xlu1 %9183, %v100_v46   ;;  %9184 = vset.pattern.permute.xlu2 %v14444_v2 }
  0x45   :  { %162 = vperm.xlu2 %9184, %v101_v47  }
  0x4a   :  { %9187 = vset.pattern.permute.xlu0 %v14446_v3 }
  0x4b   :  { %614 = vperm.xlu0 %9187, %v101_v47  }
  0x4c   :  { %9185 = vset.pattern.permute.xlu1 %v14448_v1 }
  0x4d   :  { %385 = vperm.xlu1 %9185, %v101_v47   ;;  %9186 = vset.pattern.permute.xlu2 %v14446_v3 }
  0x4e   :  { %610 = vperm.xlu2 %9186, %v100_v46   ;;  %v9780_v46 = vperm.slane %v134_v63, 2 }
  0x53   :  { %618 = vperm.xlu0 %9187, %v102_v48  }
  0x55   :  { %9188 = vset.pattern.permute.xlu1 %v14444_v2 }
  0x56   :  { %167 = vperm.xlu1 %9188, %v102_v48   ;;  %9189 = vset.pattern.permute.xlu2 %v14444_v2 }
  0x57   :  { %172 = vperm.xlu2 %9189, %v103_v49  }
  0x5b   :  { %9194 = vset.pattern.permute.xlu0 %v14444_v2 }
  0x5c   :  { %182 = vperm.xlu0 %9194, %v105_v50  }
  0x5e   :  { %9190 = vset.pattern.permute.xlu1 %v14448_v1 }
  0x5f   :  { %389 = vperm.xlu1 %9190, %v102_v48   ;;  %9191 = vset.pattern.permute.xlu2 %v14448_v1 }
  0x60   :  { %393 = vperm.xlu2 %9191, %v103_v49  }
  0x64   :  { %187 = vperm.xlu0 %9194, %v106_v51  }
  0x67   :  { %9192 = vset.pattern.permute.xlu1 %v14446_v3 }
  0x68   :  { %622 = vperm.xlu1 %9192, %v103_v49   ;;  %9193 = vset.pattern.permute.xlu2 %v14444_v2 }
  0x69   :  { %177 = vperm.xlu2 %9193, %v104_v52  }
  0x6c   :  { %9201 = vset.pattern.permute.xlu0 %v14448_v1 }
  0x6d   :  { %409 = vperm.xlu0 %9201, %v107_v53  }
  0x70   :  { %9195 = vset.pattern.permute.xlu1 %v14448_v1 }
  0x71   :  { %397 = vperm.xlu1 %9195, %v104_v52   ;;  %9196 = vset.pattern.permute.xlu2 %v14448_v1 }
  0x72   :  { %401 = vperm.xlu2 %9196, %v105_v50  }
  0x75   :  { %413 = vperm.xlu0 %9201, %v108_v54  }
  0x79   :  { %9197 = vset.pattern.permute.xlu1 %v14446_v3 }
  0x7a   :  { %626 = vperm.xlu1 %9197, %v104_v52   ;;  %9198 = vset.pattern.permute.xlu2 %v14446_v3 }
  0x7b   :  { %630 = vperm.xlu2 %9198, %v105_v50  }
  0x7c   :  { %v595_v57 = vpop.permute.xlu2 %594 }
  0x7d   :  { %9208 = vset.pattern.permute.xlu0 %v14446_v3  ;;  %v746_v50 = vmul.f32 %v9780_v46, %v595_v57 }
  0x7e   :  { %646 = vperm.xlu0 %9208, %v109_v58  }
  0x82   :  { %9199 = vset.pattern.permute.xlu1 %v14444_v2 }
  0x83   :  { %192 = vperm.xlu1 %9199, %v107_v53   ;;  %9200 = vset.pattern.permute.xlu2 %v14448_v1 }
  0x84   :  { %405 = vperm.xlu2 %9200, %v106_v51   ;;  %v599_v61 = vpop.permute.xlu2 %598 }
  0x85   :  { %v747_v63 = vmul.f32 %v9780_v46, %v599_v61 }
  0x86   :  { %650 = vperm.xlu0 %9208, %v9767_v62  }
  0x8b   :  { %9202 = vset.pattern.permute.xlu1 %v14446_v3 }
  0x8c   :  { %634 = vperm.xlu1 %9202, %v106_v51   ;;  %9203 = vset.pattern.permute.xlu2 %v14446_v3 }
  0x8d   :  { %638 = vperm.xlu2 %9203, %v107_v53   ;;  %v374_v0 = vpop.permute.xlu2 %373 }
  0x8e   :  { %9215 = vset.pattern.permute.xlu0 %v14444_v2 }
  0x93   :  { %v366_v44 = vpop.permute.xlu1 %365  ;;  %v138_v45 = vpop.permute.xlu0 %137 }
  0x94   :  { %v517_v47 = vmul.f32 %v9776_v42, %v366_v44  ;;  %v326_v48 = vmul.f32 %v9778_v43, %v138_v45  ;;  %9204 = vset.pattern.permute.xlu1 %v14444_v2 }
  0x95   :  { %197 = vperm.xlu1 %9204, %v108_v54   ;;  %9205 = vset.pattern.permute.xlu2 %v14444_v2 }
  0x96   :  { %202 = vperm.xlu2 %9205, %v109_v58   ;;  %v607_v49 = vpop.permute.xlu2 %606  ;;  %v555_v51 = vadd.f32 %v517_v47, %v326_v48 }
  0x98   :  { %v784_v55 = vadd.f32 %v746_v50, %v555_v51  ;;  %v9802_v50 = vld [vmem:[%s14430_s2 + $0x88] sm:$0xff] }
  0x99   :  { %222 = vperm.xlu0 %9215, %v9802_v50  }
  0x9a   :  { %v826_v45 = vadd.f32 %v9792_v60, %v784_v55  ;;  %v519_v55 = vmul.f32 %v9776_v42, %v374_v0 }
  0x9b   :  { %v370_v52 = vpop.permute.xlu1 %369  ;;  %v143_v53 = vpop.permute.xlu0 %142 }
  0x9c   :  { %v518_v56 = vmul.f32 %v9776_v42, %v370_v52  ;;  %v327_v59 = vmul.f32 %v9778_v43, %v143_v53  ;;  %v864_v52 = vmax.f32 %v826_v45, 0.0  ;;  %v749_v45 = vmul.f32 %v9780_v46, %v607_v49 }
  0x9d   :  { %9206 = vset.pattern.permute.xlu1 %v14448_v1 }
  0x9e   :  { %v556_v44 = vadd.f32 %v518_v56, %v327_v59  ;;  %417 = vperm.xlu1 %9206, %v109_v58   ;;  %9207 = vset.pattern.permute.xlu2 %v14446_v3 }
  0x9f   :  { %642 = vperm.xlu2 %9207, %v108_v54   ;;  %v163_v47 = vpop.permute.xlu2 %162  ;;  %v111_v54 = vld [vmem:[%s14430_s2 + $0x78] sm:$0xff] }
  0xa0   :  { %v785_v57 = vadd.f32 %v747_v63, %v556_v44  ;;  %v9817_v63 = vld [vmem:[%s14430_s2 + $0x90] sm:$0xff] }
  0xa1   :  { %227 = vperm.xlu0 %9215, %v9817_v63  }
  0xa2   :  { %v827_v48 = vadd.f32 %v9792_v60, %v785_v57 }
  0xa3   :  { %v148_v51 = vpop.permute.xlu0 %147 }
  0xa4   :  { %v153_v61 = vpop.permute.xlu1 %152  ;;  %v865_v58 = vmax.f32 %v827_v48, 0.0  ;;  %v328_v56 = vmul.f32 %v9778_v43, %v148_v51 }
  0xa5   :  { %v329_v57 = vmul.f32 %v9778_v43, %v153_v61 }
  0xa6   :  { %9209 = vset.pattern.permute.xlu1 %v14444_v2  ;;  %v902_v53 = vpack.c.bf16 %v865_v58, %v864_v52  ;;  %v557_v58 = vadd.f32 %v519_v55, %v328_v56  ;;  %v9835_v55 = vld [vmem:[%s14430_s2 + $0x98] sm:$0xff] }
  0xa7   :  { %207 = vperm.xlu1 %9209, %v9767_v62   ;;  %9210 = vset.pattern.permute.xlu2 %v14444_v2 }
  0xa8   :  { %7216 = vmatmul.msk.bf16.vlgmr.msra.gmra.mxu0 %vm957_vm0, %v902_v53  ;;  %212 = vperm.xlu2 %9210, %v111_v54   ;;  %v611_v59 = vpop.permute.xlu2 %610 }
  0xa9   :  { %9222 = vset.pattern.permute.xlu0 %v14448_v1 }
  0xaa   :  { %441 = vperm.xlu0 %9222, %v9835_v55  }
  0xac   :  { %v378_v44 = vpop.permute.xlu0 %377 }
  0xad   :  { %v520_v48 = vmul.f32 %v9776_v42, %v378_v44  ;;  %v603_v52 = vpop.permute.xlu1 %602 }
  0xae   :  { %v748_v0 = vmul.f32 %v9780_v46, %v603_v52 }
  0xaf   :  { %v558_v51 = vadd.f32 %v520_v48, %v329_v57  ;;  %9211 = vset.pattern.permute.xlu1 %v14448_v1 }
  0xb0   :  { %v786_v53 = vadd.f32 %v748_v0, %v557_v58  ;;  %421 = vperm.xlu1 %9211, %v9767_v62   ;;  %9212 = vset.pattern.permute.xlu2 %v14448_v1  ;;  %v14810_v58 = vmov 2   ;;  %v14811_v0 = vmov 0  }
  0xb1   :  { %v787_v2 = vadd.f32 %v749_v45, %v558_v51  ;;  %425 = vperm.xlu2 %9212, %v111_v54   ;;  %v9828_v3 = vpop.permute.xlu2 %172 }
  0xb2   :  { %v828_v61 = vadd.f32 %v9792_v60, %v786_v53  ;;  %v750_v53 = vmul.f32 %v9780_v46, %v611_v59 }
  0xb3   :  { %v829_v49 = vadd.f32 %v9792_v60, %v787_v2  ;;  %v112_v2 = vld [vmem:[%s14430_s2 + $0x80] sm:$0xff] }
  0xb4   :  { %v866_v56 = vmax.f32 %v828_v61, 0.0  ;;  %v382_v62 = vpop.permute.xlu0 %381 }
  0xb5   :  { %v867_v44 = vmax.f32 %v829_v49, 0.0  ;;  %v521_v52 = vmul.f32 %v9776_v42, %v382_v62  ;;  %v331_v62 = vmul.f32 %v9778_v43, %v163_v47  ;;  %v9859_v47 = vld [vmem:[%s14430_s2 + $0xa0] sm:$0xff] }
  0xb6   :  { %v158_v57 = vpop.permute.xlu1 %157  ;;  %445 = vperm.xlu0 %9222, %v9859_v47  }
  0xb7   :  { %v903_v45 = vpack.c.bf16 %v867_v44, %v866_v56  ;;  %v330_v48 = vmul.f32 %v9778_v43, %v158_v57 }
  0xb8   :  { %9213 = vset.pattern.permute.xlu1 %v14810_v58 }
  0xb9   :  { %654 = vperm.xlu1 %9213, %v111_v54   ;;  %7217 = vmatmul.msk.bf16.gmra.mxu0 %vm957_vm0, %v903_v45  ;;  %v559_v51 = vadd.f32 %v521_v52, %v330_v48 }
  0xba   :  { %9214 = vset.pattern.permute.xlu2 %v14811_v0  ;;  %v394_v61 = vpop.permute.xlu2 %393 }
  0xbb   :  { %217 = vperm.xlu2 %9214, %v112_v2   ;;  %v788_v44 = vadd.f32 %v750_v53, %v559_v51 }
  0xbd   :  { %v615_v49 = vpop.permute.xlu0 %614  ;;  %v830_v48 = vadd.f32 %v9792_v60, %v788_v44 }
  0xbe   :  { %v751_v57 = vmul.f32 %v9780_v46, %v615_v49  ;;  %9229 = vset.pattern.permute.xlu0 %v14810_v58 }
  0xbf   :  { %v386_v56 = vpop.permute.xlu1 %385  ;;  %v868_v53 = vmax.f32 %v830_v48, 0.0 }
  0xc0   :  { %v522_v54 = vmul.f32 %v9776_v42, %v386_v56 }
  0xc1   :  { %9216 = vset.pattern.permute.xlu1 %v14448_v1 }
  0xc2   :  { %v560_v45 = vadd.f32 %v522_v54, %v331_v62  ;;  %429 = vperm.xlu1 %9216, %v112_v2   ;;  %v117_v54 = vld [vmem:[%s14430_s2 + $0xa8] sm:$0xff] }
  0xc3   :  { %9217 = vset.pattern.permute.xlu2 %v14448_v1  ;;  %v9854_v59 = vpop.permute.xlu2 %177  ;;  %678 = vperm.xlu0 %9229, %v117_v54  }
  0xc4   :  { %v789_v52 = vadd.f32 %v751_v57, %v560_v45  ;;  %433 = vperm.xlu2 %9217, %v9802_v50  }
  0xc5   :  { %v619_v48 = vpop.permute.xlu0 %618 }
  0xc6   :  { %v831_v51 = vadd.f32 %v9792_v60, %v789_v52  ;;  %v7471_v52 = vld [vmem:[%s14435_s7 + $0x1e8] sm:$0xf0] }
  0xc8   :  { %v869_v49 = vmax.f32 %v831_v51, 0.0  ;;  %v168_v56 = vpop.permute.xlu1 %167 }
  0xca   :  { %9218 = vset.pattern.permute.xlu1 %v14810_v58  ;;  %v904_v62 = vpack.c.bf16 %v869_v49, %v868_v53  ;;  %v752_v49 = vmul.f32 %v9780_v46, %v619_v48 }
  0xcb   :  { %658 = vperm.xlu1 %9218, %v112_v2   ;;  %v332_v2 = vmul.f32 %v9778_v43, %v168_v56  ;;  %v333_v56 = vmul.f32 %v9778_v43, %v9828_v3 }
  0xcc   :  { %7218 = vmatmul.msk.bf16.gmra.mxu0 %vm957_vm0, %v904_v62  ;;  %9219 = vset.pattern.permute.xlu2 %v14810_v58  ;;  %v402_v44 = vpop.permute.xlu2 %401  ;;  %v524_v62 = vmul.f32 %v9776_v42, %v394_v61 }
  0xcd   :  { %662 = vperm.xlu2 %9219, %v9802_v50   ;;  %v8833_v50 = vld [vmem:[%s14435_s7 + $0x1cc] sm:$0xf] }
  0xce   :  { %v7474_v51 = vor.u32 %v8833_v50, %v7471_v52  ;;  %v183_v61 = vpop.permute.xlu0 %182 }
  0xd0   :  { %1890 = vmatpush.bf16.msrb.mxu0 %v7474_v51 }
  0xd1   :  { %v390_v57 = vpop.permute.xlu1 %389 }
  0xd2   :  { %v523_v45 = vmul.f32 %v9776_v42, %v390_v57  ;;  %v9890_v57 = vld [vmem:[%s14430_s2 + $0xb0] sm:$0xff] }
  0xd3   :  { %9220 = vset.pattern.permute.xlu1 %v14811_v0  ;;  %682 = vperm.xlu0 %9229, %v9890_v57  }
  0xd4   :  { %232 = vperm.xlu1 %9220, %v9835_v55   ;;  %v561_v53 = vadd.f32 %v523_v45, %v332_v2  ;;  %v562_v2 = vadd.f32 %v524_v62, %v333_v56  ;;  %v526_v56 = vmul.f32 %v9776_v42, %v402_v44  ;;  %v335_v62 = vmul.f32 %v9778_v43, %v183_v61 }
  0xd5   :  { %9221 = vset.pattern.permute.xlu2 %v14448_v1  ;;  %v631_v40 = vpop.permute.xlu2 %630 }
  0xd6   :  { %437 = vperm.xlu2 %9221, %v9817_v63   ;;  %v790_v45 = vadd.f32 %v752_v49, %v561_v53 }
  0xd8   :  { %v832_v52 = vadd.f32 %v9792_v60, %v790_v45 }
  0xda   :  { %v623_v48 = vpop.permute.xlu1 %622  ;;  %v870_v53 = vmax.f32 %v832_v52, 0.0 }
  0xdb   :  { %v753_v50 = vmul.f32 %v9780_v46, %v623_v48  ;;  %9236 = vset.pattern.permute.xlu0 %v14811_v0 }
  0xdc   :  { %9223 = vset.pattern.permute.xlu1 %v14810_v58 }
  0xdd   :  { %v791_v3 = vadd.f32 %v753_v50, %v562_v2  ;;  %666 = vperm.xlu1 %9223, %v9817_v63   ;;  %v564_v63 = vadd.f32 %v526_v56, %v335_v62  ;;  %v9910_v50 = vpop.permute.xlu0 %187 }
  0xde   :  { %9224 = vset.pattern.permute.xlu2 %v14810_v58  ;;  %v9903_v48 = vpop.permute.xlu2 %405 }
  0xdf   :  { %v833_v51 = vadd.f32 %v9792_v60, %v791_v3  ;;  %670 = vperm.xlu2 %9224, %v9835_v55   ;;  %v755_v55 = vmul.f32 %v9780_v46, %v631_v40  ;;  %v334_v3 = vmul.f32 %v9778_v43, %v9854_v59  ;;  %v7461_v59 = vld [vmem:[%s14435_s7 + $0x1c0] sm:$0xf] }
  0xe1   :  { %v871_v49 = vmax.f32 %v833_v51, 0.0  ;;  %v793_v52 = vadd.f32 %v755_v55, %v564_v63  ;;  %v8836_v63 = vld [vmem:[%s14435_s7 + $0x1dc] sm:$0xf0] }
  0xe3   :  { %v398_v45 = vpop.permute.xlu1 %397  ;;  %v905_v2 = vpack.c.bf16 %v871_v49, %v870_v53  ;;  %v835_v56 = vadd.f32 %v9792_v60, %v793_v52  ;;  %v7463_v52 = vld [vmem:[%s14435_s7 + $0x1e0] sm:$0xf0] }
  0xe4   :  { %v525_v44 = vmul.f32 %v9776_v42, %v398_v45 }
  0xe5   :  { %9225 = vset.pattern.permute.xlu1 %v14811_v0  ;;  %7219 = vmatmul.msk.bf16.gmra.mxu0 %vm957_vm0, %v905_v2  ;;  %v873_v45 = vmax.f32 %v835_v56, 0.0  ;;  %v410_v2 = vpop.permute.xlu0 %409 }
  0xe6   :  { %237 = vperm.xlu1 %9225, %v9859_v47   ;;  %v563_v53 = vadd.f32 %v525_v44, %v334_v3  ;;  %v7462_v44 = vor.u32 %v8836_v63, %v7461_v59  ;;  %v9951_v59 = vld [vmem:[%s14430_s2 + $0xb8] sm:$0xff] }
  0xe7   :  { %9226 = vset.pattern.permute.xlu2 %v14811_v0  ;;  %v639_v51 = vpop.permute.xlu2 %638 }
  0xe8   :  { %242 = vperm.xlu2 %9226, %v117_v54   ;;  %1578 = vmatpush.bf16.msra.mxu1 %v7462_v44  ;;  %v7437_v44 = vld [vmem:[%s14435_s7 + $0x188] sm:$0xf] }
  0xec   :  { %v627_v61 = vpop.permute.xlu1 %626 }
  0xed   :  { %v754_v49 = vmul.f32 %v9780_v46, %v627_v61 }
  0xee   :  { %9227 = vset.pattern.permute.xlu1 %v14448_v1  ;;  %v8828_v1 = vld [vmem:[%s14435_s7 + $0x19c] sm:$0xf0] }
  0xef   :  { %v792_v40 = vadd.f32 %v754_v49, %v563_v53  ;;  %449 = vperm.xlu1 %9227, %v117_v54   ;;  %v9930_v54 = vld [vmem:[%s14430_s2 + $0xc8] sm:$0xff] }
  0xf0   :  { %9228 = vset.pattern.permute.xlu2 %v14810_v58  ;;  %v9938_v3 = vpop.permute.xlu2 %202  ;;  %262 = vperm.xlu0 %9236, %v9930_v54   ;;  %v7469_v53 = vld [vmem:[%s14435_s7 + $0x1c8] sm:$0xf] }
  0xf1   :  { %v834_v62 = vadd.f32 %v9792_v60, %v792_v40  ;;  %674 = vperm.xlu2 %9228, %v9859_v47   ;;  %v8832_v47 = vld [vmem:[%s14435_s7 + $0x1c4] sm:$0xf]  ;;  %v8837_v49 = vld [vmem:[%s14435_s7 + $0x1e4] sm:$0xf0]  ;;  %v528_v40 = vmul.f32 %v9776_v42, %v410_v2 }
  0xf2   :  { %v7466_v61 = vor.u32 %v8832_v47, %v7463_v52  ;;  %v7470_v63 = vor.u32 %v8837_v49, %v7469_v53  ;;  %v7429_v52 = vld [vmem:[%s14435_s7 + $0x180] sm:$0xf] }
  0xf3   :  { %v872_v55 = vmax.f32 %v834_v62, 0.0  ;;  %v7430_v2 = vor.u32 %v8828_v1, %v7429_v52  ;;  %v757_v1 = vmul.f32 %v9780_v46, %v639_v51  ;;  %v7439_v52 = vld [vmem:[%s14435_s7 + $0x1a8] sm:$0xf0]  ;;  %v8820_v51 = vld [vmem:[%s14435_s7 + $0x15c] sm:$0xf0] }
  0xf4   :  { %1682 = vmatpush.bf16.msra.mxu2 %v7466_v61  ;;  %v8829_v61 = vld [vmem:[%s14435_s7 + $0x1a4] sm:$0xf0]  ;;  %1786 = vmatpush.bf16.msra.mxu3 %v7470_v63  ;;  %v8816_v63 = vld [vmem:[%s14435_s7 + $0x144] sm:$0xf] }
  0xf5   :  { %v193_v56 = vpop.permute.xlu1 %192  ;;  %v906_v62 = vpack.c.bf16 %v873_v45, %v872_v55  ;;  %v8824_v45 = vld [vmem:[%s14435_s7 + $0x184] sm:$0xf]  ;;  %v7438_v49 = vor.u32 %v8829_v61, %v7437_v44  ;;  %1579 = vmatpush.bf16.msra.mxu1 %v7430_v2  ;;  %v10000_v2 = vld [vmem:[%s14430_s2 + $0xd0] sm:$0xff]  ;;  %v7405_v61 = vld [vmem:[%s14435_s7 + $0x148] sm:$0xf] }
  0xf6   :  { %v337_v47 = vmul.f32 %v9778_v43, %v193_v56  ;;  %v7431_v55 = vld [vmem:[%s14435_s7 + $0x1a0] sm:$0xf0] }
  0xf7   :  { %9230 = vset.pattern.permute.xlu1 %v14811_v0  ;;  %7220 = vmatmul.msk.bf16.gmra.mxu0 %vm957_vm0, %v906_v62  ;;  %v7434_v53 = vor.u32 %v8824_v45, %v7431_v55  ;;  %v8825_v62 = vld [vmem:[%s14435_s7 + $0x18c] sm:$0xf]  ;;  %v527_v45 = vmul.f32 %v9776_v42, %v9903_v48  ;;  %v7399_v44 = vld [vmem:[%s14435_s7 + $0x160] sm:$0xf0]  ;;  %v8821_v48 = vld [vmem:[%s14435_s7 + $0x164] sm:$0xf0] }
  0xf8   :  { %247 = vperm.xlu1 %9230, %v9890_v57   ;;  %v566_v56 = vadd.f32 %v528_v40, %v337_v47  ;;  %v7442_v41 = vor.u32 %v8825_v62, %v7439_v52  ;;  %v7397_v40 = vld [vmem:[%s14435_s7 + $0x140] sm:$0xf]  ;;  %v336_v47 = vmul.f32 %v9778_v43, %v9910_v50  ;;  %1787 = vmatpush.bf16.msra.mxu3 %v7438_v49 }
  0xf9   :  { %9231 = vset.pattern.permute.xlu2 %v14811_v0  ;;  %1683 = vmatpush.bf16.msra.mxu2 %v7434_v53  ;;  %v7398_v55 = vor.u32 %v8820_v51, %v7397_v40  ;;  %v7402_v50 = vor.u32 %v8816_v63, %v7399_v44  ;;  %v7406_v62 = vor.u32 %v8821_v48, %v7405_v61  ;;  %v7365_v52 = vld [vmem:[%s14435_s7 + $0x100] sm:$0xf]  ;;  %v10021_v51 = vpop.permute.xlu2 %642  ;;  %v7373_v63 = vld [vmem:[%s14435_s7 + $0x108] sm:$0xf] }
  0xfa   :  { %252 = vperm.xlu2 %9231, %v9951_v59   ;;  %1891 = vmatpush.bf16.msrb.mxu0 %v7442_v41  ;;  %v795_v53 = vadd.f32 %v757_v1, %v566_v56  ;;  %v8812_v40 = vld [vmem:[%s14435_s7 + $0x11c] sm:$0xf0]  ;;  %v8808_v41 = vld [vmem:[%s14435_s7 + $0x104] sm:$0xf]  ;;  %v8813_v48 = vld [vmem:[%s14435_s7 + $0x124] sm:$0xf0] }
  0xfb   :  { %267 = vperm.xlu0 %9236, %v10000_v2   ;;  %1580 = vmatpush.bf16.msra.mxu1 %v7398_v55  ;;  %v7366_v56 = vor.u32 %v8812_v40, %v7365_v52  ;;  %v7367_v1 = vld [vmem:[%s14435_s7 + $0x120] sm:$0xf0]  ;;  %v565_v55 = vadd.f32 %v527_v45, %v336_v47  ;;  %v7333_v47 = vld [vmem:[%s14435_s7 + $0xc0] sm:$0xf] }
  0xfc   :  { %v7370_v61 = vor.u32 %v8808_v41, %v7367_v1  ;;  %1788 = vmatpush.bf16.msra.mxu3 %v7406_v62  ;;  %v837_v52 = vadd.f32 %v9792_v60, %v795_v53  ;;  %v8804_v45 = vld [vmem:[%s14435_s7 + $0xdc] sm:$0xf0]  ;;  %v8800_v62 = vld [vmem:[%s14435_s7 + $0xc4] sm:$0xf] }
  0xfd   :  { %1684 = vmatpush.bf16.msra.mxu2 %v7402_v50  ;;  %v7374_v50 = vor.u32 %v8813_v48, %v7373_v63  ;;  %v7335_v41 = vld [vmem:[%s14435_s7 + $0xe0] sm:$0xf0]  ;;  %v414_v48 = vpop.permute.xlu0 %413 }
  0xfe   :  { %v635_v49 = vpop.permute.xlu1 %634  ;;  %v7338_v1 = vor.u32 %v8800_v62, %v7335_v41  ;;  %v7309_v41 = vld [vmem:[%s14435_s7 + $0x88] sm:$0xf] }
  0xff   :  { %v756_v44 = vmul.f32 %v9780_v46, %v635_v49  ;;  %1581 = vmatpush.bf16.msra.mxu1 %v7366_v56  ;;  %v7341_v49 = vld [vmem:[%s14435_s7 + $0xc8] sm:$0xf] }
 0x100   :  { %9232 = vset.pattern.permute.xlu1 %v14812_v37  ;;  %v8805_v56 = vld [vmem:[%s14435_s7 + $0xe4] sm:$0xf0]  ;;  %1789 = vmatpush.bf16.msra.mxu3 %v7374_v50  ;;  %v7301_v50 = vld [vmem:[%s14435_s7 + $0x80] sm:$0xf] }
 0x101   :  { %v794_v40 = vadd.f32 %v756_v44, %v565_v55  ;;  %453 = vperm.xlu1 %9232, %v9890_v57   ;;  %1685 = vmatpush.bf16.msra.mxu2 %v7370_v61  ;;  %v7334_v57 = vor.u32 %v8804_v45, %v7333_v47  ;;  %v7342_v63 = vor.u32 %v8805_v56, %v7341_v49  ;;  %v10060_v55 = vld [vmem:[%s14430_s2 + $0xd8] sm:$0xff]  ;;  %v875_v44 = vmax.f32 %v837_v52, 0.0  ;;  %v8796_v47 = vld [vmem:[%s14435_s7 + $0x9c] sm:$0xf0]  ;;  %v8792_v52 = vld [vmem:[%s14435_s7 + $0x84] sm:$0xf] }
 0x102   :  { %9233 = vset.pattern.permute.xlu2 %v14812_v37  ;;  %v8797_v49 = vld [vmem:[%s14435_s7 + $0xa4] sm:$0xf0] }
 0x103   :  { %v836_v53 = vadd.f32 %v9792_v60, %v794_v40  ;;  %457 = vperm.xlu2 %9233, %v9951_v59   ;;  %9243 = vset.pattern.permute.xlu0 %v14812_v37  ;;  %v10063_v40 = vpop.permute.xlu2 %212 }
 0x104   :  { %1582 = vmatpush.bf16.msra.mxu1 %v7334_v57  ;;  %473 = vperm.xlu0 %9243, %v10060_v55   ;;  %v7303_v57 = vld [vmem:[%s14435_s7 + $0xa0] sm:$0xf0] }
 0x105   :  { %v874_v61 = vmax.f32 %v836_v53, 0.0  ;;  %1686 = vmatpush.bf16.msra.mxu2 %v7338_v1  ;;  %v7302_v53 = vor.u32 %v8796_v47, %v7301_v50  ;;  %1790 = vmatpush.bf16.msra.mxu3 %v7342_v63  ;;  %v7306_v56 = vor.u32 %v8792_v52, %v7303_v57  ;;  %v7310_v1 = vor.u32 %v8797_v49, %v7309_v41  ;;  %v7269_v63 = vld [vmem:[%s14435_s7 + $0x40] sm:$0xf]  ;;  %v7277_v52 = vld [vmem:[%s14435_s7 + $0x48] sm:$0xf]  ;;  %v647_v49 = vpop.permute.xlu0 %646 }
 0x106   :  { %v8788_v50 = vld [vmem:[%s14435_s7 + $0x5c] sm:$0xf0]  ;;  %v758_v57 = vmul.f32 %v9780_v46, %v10021_v51  ;;  %v7239_v51 = vld [vmem:[%s14435_s7 + $0x20] sm:$0xf0] }
 0x107   :  { %v198_v45 = vpop.permute.xlu1 %197  ;;  %v907_v62 = vpack.c.bf16 %v875_v44, %v874_v61  ;;  %v529_v44 = vmul.f32 %v9776_v42, %v414_v48  ;;  %v120_v61 = vld [vmem:[%s14430_s2 + $0xc0] sm:$0xff]  ;;  %v7270_v47 = vor.u32 %v8788_v50, %v7269_v63  ;;  %v8781_v50 = vld [vmem:[%s14435_s7 + $0x24] sm:$0xf0] }
 0x108   :  { %v338_v38 = vmul.f32 %v9778_v43, %v198_v45  ;;  %1583 = vmatpush.bf16.msra.mxu1 %v7302_v53  ;;  %v8784_v48 = vld [vmem:[%s14435_s7 + $0x44] sm:$0xf]  ;;  %v8789_v45 = vld [vmem:[%s14435_s7 + $0x64] sm:$0xf0]  ;;  %v8780_v63 = vld [vmem:[%s14435_s7 + $0x1c] sm:$0xf0] }
 0x109   :  { %9234 = vset.pattern.permute.xlu1 %v14810_v58  ;;  %7221 = vmatmul.msk.bf16.gmra.mxu0 %vm957_vm0, %v907_v62  ;;  %v7278_v41 = vor.u32 %v8789_v45, %v7277_v52  ;;  %v339_v45 = vmul.f32 %v9778_v43, %v9938_v3 }
 0x10a   :  { %686 = vperm.xlu1 %9234, %v9951_v59   ;;  %1687 = vmatpush.bf16.msra.mxu2 %v7306_v56  ;;  %v7271_v59 = vld [vmem:[%s14435_s7 + $0x60] sm:$0xf0]  ;;  %v567_v53 = vadd.f32 %v529_v44, %v338_v38  ;;  %v7237_v56 = vld [vmem:[%s14435_s7] sm:$0xf]  ;;  %v7245_v44 = vld [vmem:[%s14435_s7 + $0x8] sm:$0xf] }
 0x10b   :  { %9235 = vset.pattern.permute.xlu2 %v14811_v0  ;;  %1791 = vmatpush.bf16.msra.mxu3 %v7310_v1  ;;  %v7274_v62 = vor.u32 %v8784_v48, %v7271_v59  ;;  %v8776_v1 = vld [vmem:[%s14435_s7 + $0x4] sm:$0xf]  ;;  %v7238_v38 = vor.u32 %v8780_v63, %v7237_v56  ;;  %v7246_v52 = vor.u32 %v8781_v50, %v7245_v44  ;;  %v7407_v44 = vld [vmem:[%s14435_s7 + $0x168] sm:$0xf0] }
 0x10c   :  { %257 = vperm.xlu2 %9235, %v120_v61   ;;  %1584 = vmatpush.bf16.msra.mxu1 %v7270_v47  ;;  %v426_v47 = vpop.permute.xlu2 %425  ;;  %v7242_v59 = vor.u32 %v8776_v1, %v7239_v51  ;;  %v759_v63 = vmul.f32 %v9780_v46, %v647_v49 }
 0x10e   :  { %1688 = vmatpush.bf16.msra.mxu2 %v7274_v62  ;;  %v796_v62 = vadd.f32 %v758_v57, %v567_v53  ;;  %v10143_v53 = vld [vmem:[%s14430_s2 + $0xe0] sm:$0xff] }
 0x10f   :  { %1792 = vmatpush.bf16.msra.mxu3 %v7278_v41  ;;  %477 = vperm.xlu0 %9243, %v10143_v53  }
 0x110   :  { %v418_v48 = vpop.permute.xlu1 %417  ;;  %1585 = vmatpush.bf16.msra.mxu1 %v7238_v38  ;;  %v838_v41 = vadd.f32 %v9792_v60, %v796_v62  ;;  %v651_v62 = vpop.permute.xlu0 %650 }
 0x111   :  { %v530_v56 = vmul.f32 %v9776_v42, %v418_v48 }
 0x112   :  { %9237 = vset.pattern.permute.xlu1 %v14812_v37  ;;  %1689 = vmatpush.bf16.msra.mxu2 %v7242_v59  ;;  %v876_v49 = vmax.f32 %v838_v41, 0.0  ;;  %v10161_v59 = vld [vmem:[%s14430_s2 + $0xe8] sm:$0xff]  ;;  %v760_v41 = vmul.f32 %v9780_v46, %v651_v62 }
 0x113   :  { %v568_v39 = vadd.f32 %v530_v56, %v339_v45  ;;  %461 = vperm.xlu1 %9237, %v120_v61   ;;  %1793 = vmatpush.bf16.msra.mxu3 %v7246_v52 }
 0x114   :  { %9238 = vset.pattern.permute.xlu2 %v14812_v37 }
 0x115   :  { %v797_v1 = vadd.f32 %v759_v63, %v568_v39  ;;  %465 = vperm.xlu2 %9238, %v9930_v54   ;;  %v10145_v57 = vpop.permute.xlu2 %217  ;;  %v8817_v39 = vld [vmem:[%s14435_s7 + $0x14c] sm:$0xf] }
 0x116   :  { %v7410_v50 = vor.u32 %v8817_v39, %v7407_v44 }
 0x117   :  { %v839_v3 = vadd.f32 %v9792_v60, %v797_v1  ;;  %9250 = vset.pattern.permute.xlu0 %v14810_v58  ;;  %v341_v1 = vmul.f32 %v9778_v43, %v10063_v40 }
 0x118   :  { %1892 = vmatpush.bf16.msrb.mxu0 %v7410_v50  ;;  %710 = vperm.xlu0 %9250, %v10161_v59  }
 0x119   :  { %v877_v38 = vmax.f32 %v839_v3, 0.0  ;;  %v208_v51 = vpop.permute.xlu1 %207  ;;  %v532_v3 = vmul.f32 %v9776_v42, %v426_v47 }
 0x11a   :  { %v340_v56 = vmul.f32 %v9778_v43, %v208_v51 }
 0x11b   :  { %9239 = vset.pattern.permute.xlu1 %v14810_v58  ;;  %v908_v48 = vpack.c.bf16 %v877_v38, %v876_v49  ;;  %v10178_v49 = vld [vmem:[%s14434_s6] ss:$0 sm:$0xff]  ;;  %v10183_v38 = vld [vmem:[%s14430_s2 + $0xf0] sm:$0xff]  ;;  %v570_v44 = vadd.f32 %v532_v3, %v341_v1 }
 0x11c   :  { %690 = vperm.xlu1 %9239, %v120_v61  }
 0x11d   :  { %7222 = vmatmul.msk.bf16.gmra.mxu0 %vm957_vm0, %v908_v48  ;;  %9240 = vset.pattern.permute.xlu2 %v14810_v58 }
 0x11e   :  { %694 = vperm.xlu2 %9240, %v9930_v54   ;;  %v434_v45 = vpop.permute.xlu2 %433 }
 0x120   :  { %714 = vperm.xlu0 %9250, %v10183_v38  }
 0x122   :  { %v422_v52 = vpop.permute.xlu1 %421 }
 0x123   :  { %v531_v61 = vmul.f32 %v9776_v42, %v422_v52 }
 0x124   :  { %9241 = vset.pattern.permute.xlu1 %v14811_v0 }
 0x125   :  { %272 = vperm.xlu1 %9241, %v10060_v55   ;;  %v1024_v54 = vpop.f32.mrf.mxu0  ;;  %v569_v63 = vadd.f32 %v531_v61, %v340_v56  ;;  %v223_v56 = vpop.permute.xlu0 %222 }
 0x126   :  { %9242 = vset.pattern.permute.xlu2 %v14812_v37  ;;  %v1025_v50 = vadd.f32 %v10178_v49, %v1024_v54 }
 0x127   :  { %469 = vperm.xlu2 %9242, %v10000_v2   ;;  %v798_v51 = vadd.f32 %v760_v41, %v569_v63  ;;  %v663_v47 = vpop.permute.xlu2 %662 }
 0x128   :  { %v1119_v63 = vmax.f32 %v1025_v50, 0.0  ;;  %9257 = vset.pattern.permute.xlu0 %v14811_v0  ;;  %v343_v50 = vmul.f32 %v9778_v43, %v223_v56 }
 0x129   :  { %v840_v52 = vadd.f32 %v9792_v60, %v798_v51  ;;  %v534_v51 = vmul.f32 %v9776_v42, %v434_v45  ;;  %v763_v45 = vmul.f32 %v9780_v46, %v663_v47 }
 0x12b   :  { %v655_v39 = vpop.permute.xlu1 %654  ;;  %v878_v1 = vmax.f32 %v840_v52, 0.0 }
 0x12c   :  { %v761_v40 = vmul.f32 %v9780_v46, %v655_v39 }
 0x12d   :  { %9244 = vset.pattern.permute.xlu1 %v14810_v58  ;;  %v1026_v48 = vpop.f32.mrf.mxu0  ;;  %v228_v52 = vpop.permute.xlu0 %227 }
 0x12e   :  { %v799_v61 = vadd.f32 %v761_v40, %v570_v44  ;;  %v1027_v62 = vadd.f32 %v10178_v49, %v1026_v48  ;;  %698 = vperm.xlu1 %9244, %v10000_v2   ;;  %v572_v48 = vadd.f32 %v534_v51, %v343_v50 }
 0x12f   :  { %9245 = vset.pattern.permute.xlu2 %v14810_v58 }
 0x130   :  { %v841_v41 = vadd.f32 %v9792_v60, %v799_v61  ;;  %v1120_v54 = vmax.f32 %v1027_v62, 0.0  ;;  %702 = vperm.xlu2 %9245, %v10060_v55   ;;  %v438_v40 = vpop.permute.xlu2 %437  ;;  %v342_v62 = vmul.f32 %v9778_v43, %v10145_v57  ;;  %v801_v56 = vadd.f32 %v763_v45, %v572_v48 }
 0x132   :  { %v879_v3 = vmax.f32 %v841_v41, 0.0  ;;  %v10195_v39 = vpack.c.bf16 %v1120_v54, %v1119_v63  ;;  %v843_v51 = vadd.f32 %v9792_v60, %v801_v56  ;;  %v8809_v56 = vld [vmem:[%s14435_s7 + $0x10c] sm:$0xf] }
 0x134   :  { %v430_v44 = vpop.permute.xlu1 %429  ;;  %1586 = vmatmul.bf16.vlgmr.msra.gmra.mxu1 %v10195_v39  ;;  %1690 = vmatmul.bf16.vlgmr.msra.gmra.mxu2 %v10195_v39  ;;  %v909_v2 = vpack.c.bf16 %v879_v3, %v878_v1 }
 0x135   :  { %1794 = vmatmul.bf16.vlgmr.msra.gmra.mxu3 %v10195_v39  ;;  %v533_v61 = vmul.f32 %v9776_v42, %v430_v44  ;;  %v442_v45 = vpop.permute.xlu0 %441 }
 0x136   :  { %9246 = vset.pattern.permute.xlu1 %v14811_v0  ;;  %v1029_v55 = vpop.f32.mrf.mxu0  ;;  %7223 = vmatmul.msk.bf16.gmra.mxu0 %vm957_vm0, %v909_v2 }
 0x137   :  { %277 = vperm.xlu1 %9246, %v10143_v53   ;;  %v1030_v63 = vadd.f32 %v10178_v49, %v1029_v55  ;;  %v571_v54 = vadd.f32 %v533_v61, %v342_v62  ;;  %v881_v61 = vmax.f32 %v843_v51, 0.0  ;;  %v127_v51 = vld [vmem:[%s14430_s2 + $0xf8] sm:$0xff] }
 0x138   :  { %9247 = vset.pattern.permute.xlu2 %v14811_v0 }
 0x139   :  { %282 = vperm.xlu2 %9247, %v10161_v59   ;;  %v671_v44 = vpop.permute.xlu2 %670  ;;  %v1121_v50 = vmax.f32 %v1030_v63, 0.0 }
 0x13d   :  { %v659_v41 = vpop.permute.xlu1 %658 }
 0x13e   :  { %v762_v1 = vmul.f32 %v9780_v46, %v659_v41  ;;  %v1031_v3 = vpop.f32.mrf.mxu0 }
 0x13f   :  { %v1032_v47 = vadd.f32 %v10178_v49, %v1031_v3  ;;  %9248 = vset.pattern.permute.xlu1 %v14812_v37 }
 0x140   :  { %v800_v2 = vadd.f32 %v762_v1, %v571_v54  ;;  %481 = vperm.xlu1 %9248, %v10161_v59   ;;  %v7375_v59 = vld [vmem:[%s14435_s7 + $0x128] sm:$0xf0]  ;;  %v536_v54 = vmul.f32 %v9776_v42, %v442_v45  ;;  %v535_v45 = vmul.f32 %v9776_v42, %v438_v40 }
 0x141   :  { %v1122_v57 = vmax.f32 %v1032_v47, 0.0  ;;  %9249 = vset.pattern.permute.xlu2 %v14810_v58  ;;  %v7378_v63 = vor.u32 %v8809_v56, %v7375_v59 }
 0x142   :  { %v842_v55 = vadd.f32 %v9792_v60, %v800_v2  ;;  %706 = vperm.xlu2 %9249, %v10143_v53   ;;  %v10234_v53 = vld [vmem:[%s14430_s2 + $0x108] sm:$0xff]  ;;  %v243_v47 = vpop.permute.xlu2 %242 }
 0x143   :  { %v10221_v48 = vpack.c.bf16 %v1122_v57, %v1121_v50  ;;  %302 = vperm.xlu0 %9257, %v10234_v53   ;;  %1893 = vmatpush.bf16.msrb.mxu0 %v7378_v63  ;;  %v765_v57 = vmul.f32 %v9780_v46, %v671_v44 }
 0x144   :  { %v880_v62 = vmax.f32 %v842_v55, 0.0  ;;  %v344_v55 = vmul.f32 %v9778_v43, %v228_v52 }
 0x145   :  { %1591 = vmatmul.bf16.gmra.mxu1 %v10221_v48  ;;  %1695 = vmatmul.bf16.gmra.mxu2 %v10221_v48 }
 0x146   :  { %1799 = vmatmul.bf16.gmra.mxu3 %v10221_v48  ;;  %v233_v41 = vpop.permute.xlu1 %232  ;;  %v910_v1 = vpack.c.bf16 %v881_v61, %v880_v62  ;;  %v10253_v61 = vld [vmem:[%s14430_s2 + $0x110] sm:$0xff]  ;;  %v573_v59 = vadd.f32 %v535_v45, %v344_v55 }
 0x147   :  { %v345_v3 = vmul.f32 %v9778_v43, %v233_v41 }
 0x148   :  { %9251 = vset.pattern.permute.xlu1 %v14811_v0  ;;  %7224 = vmatmul.msk.bf16.gmra.mxu0 %vm957_vm0, %v910_v1 }
 0x149   :  { %287 = vperm.xlu1 %9251, %v10183_v38   ;;  %v1034_v2 = vpop.f32.mrf.mxu0  ;;  %v574_v50 = vadd.f32 %v536_v54, %v345_v3 }
 0x14a   :  { %9252 = vset.pattern.permute.xlu2 %v14811_v0  ;;  %v1035_v63 = vadd.f32 %v10178_v49, %v1034_v2 }
 0x14b   :  { %292 = vperm.xlu2 %9252, %v127_v51   ;;  %v803_v62 = vadd.f32 %v765_v57, %v574_v50  ;;  %307 = vperm.xlu0 %9257, %v10253_v61   ;;  %v675_v1 = vpop.permute.xlu2 %674 }
 0x14c   :  { %v1123_v3 = vmax.f32 %v1035_v63, 0.0 }
 0x14d   :  { %v845_v52 = vadd.f32 %v9792_v60, %v803_v62  ;;  %v10270_v62 = vld [vmem:[%s14430_s2 + $0x118] sm:$0xff] }
 0x14f   :  { %v667_v56 = vpop.permute.xlu1 %666  ;;  %v883_v2 = vmax.f32 %v845_v52, 0.0  ;;  %v128_v52 = vld [vmem:[%s14430_s2 + $0x100] sm:$0xff] }
 0x150   :  { %v764_v44 = vmul.f32 %v9780_v46, %v667_v56 }
 0x151   :  { %9253 = vset.pattern.permute.xlu1 %v14812_v37  ;;  %v1036_v41 = vpop.f32.mrf.mxu0 }
 0x152   :  { %v802_v40 = vadd.f32 %v764_v44, %v573_v59  ;;  %v1037_v54 = vadd.f32 %v10178_v49, %v1036_v41  ;;  %485 = vperm.xlu1 %9253, %v10183_v38   ;;  %v446_v38 = vpop.permute.xlu0 %445 }
 0x153   :  { %9254 = vset.pattern.permute.xlu2 %v14812_v37  ;;  %9264 = vset.pattern.permute.xlu0 %v14812_v37  ;;  %v537_v44 = vmul.f32 %v9776_v42, %v446_v38 }
 0x154   :  { %v844_v50 = vadd.f32 %v9792_v60, %v802_v40  ;;  %v1124_v57 = vmax.f32 %v1037_v54, 0.0  ;;  %489 = vperm.xlu2 %9254, %v127_v51   ;;  %505 = vperm.xlu0 %9264, %v10270_v62   ;;  %v10280_v41 = vpop.permute.xlu2 %252  ;;  %v766_v54 = vmul.f32 %v9780_v46, %v675_v1 }
 0x156   :  { %v882_v55 = vmax.f32 %v844_v50, 0.0  ;;  %v10264_v45 = vpack.c.bf16 %v1124_v57, %v1123_v3  ;;  %v10290_v57 = vld [vmem:[%s14430_s2 + $0x120] sm:$0xff] }
 0x158   :  { %v238_v56 = vpop.permute.xlu1 %237  ;;  %1596 = vmatmul.bf16.gmra.mxu1 %v10264_v45  ;;  %1700 = vmatmul.bf16.gmra.mxu2 %v10264_v45  ;;  %v911_v59 = vpack.c.bf16 %v883_v2, %v882_v55  ;;  %v347_v2 = vmul.f32 %v9778_v43, %v243_v47 }
 0x159   :  { %1804 = vmatmul.bf16.gmra.mxu3 %v10264_v45  ;;  %v346_v63 = vmul.f32 %v9778_v43, %v238_v56 }
 0x15a   :  { %9255 = vset.pattern.permute.xlu1 %v14810_v58  ;;  %7225 = vmatmul.msk.bf16.gmra.mxu0 %vm957_vm0, %v911_v59  ;;  %v679_v3 = vpop.permute.xlu0 %678 }
 0x15b   :  { %718 = vperm.xlu1 %9255, %v127_v51   ;;  %v575_v40 = vadd.f32 %v537_v44, %v346_v63  ;;  %v767_v56 = vmul.f32 %v9780_v46, %v679_v3  ;;  %v7343_v3 = vld [vmem:[%s14435_s7 + $0xe8] sm:$0xf0] }
 0x15c   :  { %9256 = vset.pattern.permute.xlu2 %v14811_v0  ;;  %509 = vperm.xlu0 %9264, %v10290_v57  }
 0x15d   :  { %297 = vperm.xlu2 %9256, %v128_v52   ;;  %v804_v51 = vadd.f32 %v766_v54, %v575_v40  ;;  %v458_v59 = vpop.permute.xlu2 %457  ;;  %v8801_v54 = vld [vmem:[%s14435_s7 + $0xcc] sm:$0xf] }
 0x15f   :  { %v846_v63 = vadd.f32 %v9792_v60, %v804_v51  ;;  %v7346_v51 = vor.u32 %v8801_v54, %v7343_v3 }
 0x161   :  { %v450_v50 = vpop.permute.xlu1 %449  ;;  %1894 = vmatpush.bf16.msrb.mxu0 %v7346_v51  ;;  %v349_v51 = vmul.f32 %v9778_v43, %v10280_v41 }
 0x162   :  { %v538_v55 = vmul.f32 %v9776_v42, %v450_v50  ;;  %v1039_v38 = vpop.f32.mrf.mxu0  ;;  %v884_v50 = vmax.f32 %v846_v63, 0.0  ;;  %v683_v54 = vpop.permute.xlu0 %682 }
 0x163   :  { %9258 = vset.pattern.permute.xlu1 %v14812_v37  ;;  %v1040_v40 = vadd.f32 %v10178_v49, %v1039_v38 }
 0x164   :  { %v576_v1 = vadd.f32 %v538_v55, %v347_v2  ;;  %493 = vperm.xlu1 %9258, %v128_v52   ;;  %9271 = vset.pattern.permute.xlu0 %v14810_v58 }
 0x165   :  { %9259 = vset.pattern.permute.xlu2 %v14812_v37 }
 0x166   :  { %v805_v44 = vadd.f32 %v767_v56, %v576_v1  ;;  %497 = vperm.xlu2 %9259, %v10234_v53   ;;  %v10311_v38 = vpop.permute.xlu2 %257  ;;  %v1125_v1 = vmax.f32 %v1040_v40, 0.0 }
 0x168   :  { %v847_v47 = vadd.f32 %v9792_v60, %v805_v44 }
 0x16a   :  { %v885_v2 = vmax.f32 %v847_v47, 0.0  ;;  %v248_v55 = vpop.permute.xlu1 %247  ;;  %v1041_v34 = vpop.f32.mrf.mxu0 }
 0x16b   :  { %v1042_v56 = vadd.f32 %v10178_v49, %v1041_v34  ;;  %v10323_v34 = vld [vmem:[%s14430_s2 + $0x128] sm:$0xff] }
 0x16c   :  { %9260 = vset.pattern.permute.xlu1 %v14810_v58  ;;  %v912_v60 = vpack.c.bf16 %v885_v2, %v884_v50  ;;  %742 = vperm.xlu0 %9271, %v10323_v34   ;;  %v768_v2 = vmul.f32 %v9780_v46, %v683_v54 }
 0x16d   :  { %v1126_v44 = vmax.f32 %v1042_v56, 0.0  ;;  %722 = vperm.xlu1 %9260, %v128_v52   ;;  %v540_v56 = vmul.f32 %v9776_v42, %v458_v59 }
 0x16e   :  { %7226 = vmatmul.msk.bf16.gmra.mxu0 %vm957_vm0, %v912_v60  ;;  %9261 = vset.pattern.permute.xlu2 %v14810_v58 }
 0x16f   :  { %v10315_v63 = vpack.c.bf16 %v1126_v44, %v1125_v1  ;;  %726 = vperm.xlu2 %9261, %v10234_v53   ;;  %v348_v53 = vmul.f32 %v9778_v43, %v248_v55  ;;  %v466_v3 = vpop.permute.xlu2 %465 }
 0x171   :  { %1601 = vmatmul.bf16.gmra.mxu1 %v10315_v63  ;;  %1705 = vmatmul.bf16.gmra.mxu2 %v10315_v63 }
 0x172   :  { %1809 = vmatmul.bf16.gmra.mxu3 %v10315_v63 }
 0x173   :  { %v454_v52 = vpop.permute.xlu1 %453 }
 0x174   :  { %v539_v47 = vmul.f32 %v9776_v42, %v454_v52  ;;  %v1044_v40 = vpop.f32.mrf.mxu0  ;;  %v578_v52 = vadd.f32 %v540_v56, %v349_v51 }
 0x175   :  { %9262 = vset.pattern.permute.xlu1 %v14811_v0  ;;  %v1045_v60 = vadd.f32 %v10178_v49, %v1044_v40 }
 0x176   :  { %312 = vperm.xlu1 %9262, %v10270_v62   ;;  %v577_v50 = vadd.f32 %v539_v47, %v348_v53  ;;  %v10344_v53 = vld [vmem:[%s14432_s4] ss:$0 sm:$0xff] }
 0x177   :  { %9263 = vset.pattern.permute.xlu2 %v14812_v37  ;;  %v1127_v54 = vmax.f32 %v1045_v60, 0.0 }
 0x178   :  { %501 = vperm.xlu2 %9263, %v10253_v61   ;;  %v806_v55 = vadd.f32 %v768_v2, %v577_v50  ;;  %v263_v50 = vpop.permute.xlu0 %262  ;;  %v695_v2 = vpop.permute.xlu2 %694 }
 0x17a   :  { %v848_v41 = vadd.f32 %v10344_v53, %v806_v55 }
 0x17c   :  { %v687_v1 = vpop.permute.xlu1 %686  ;;  %v1046_v44 = vpop.f32.mrf.mxu0  ;;  %v886_v60 = vmax.f32 %v848_v41, 0.0 }
 0x17d   :  { %v769_v35 = vmul.f32 %v9780_v46, %v687_v1  ;;  %v1047_v47 = vadd.f32 %v10178_v49, %v1046_v44  ;;  %v351_v44 = vmul.f32 %v9778_v43, %v263_v50 }
 0x17e   :  { %9265 = vset.pattern.permute.xlu1 %v14810_v58 }
 0x17f   :  { %v807_v59 = vadd.f32 %v769_v35, %v578_v52  ;;  %v1128_v40 = vmax.f32 %v1047_v47, 0.0  ;;  %730 = vperm.xlu1 %9265, %v10253_v61   ;;  %v542_v35 = vmul.f32 %v9776_v42, %v466_v3  ;;  %v771_v47 = vmul.f32 %v9780_v46, %v695_v2 }
 0x180   :  { %9266 = vset.pattern.permute.xlu2 %v14810_v58 }
 0x181   :  { %v849_v51 = vadd.f32 %v10344_v53, %v807_v59  ;;  %v10350_v56 = vpack.c.bf16 %v1128_v40, %v1127_v54  ;;  %734 = vperm.xlu2 %9266, %v10270_v62   ;;  %v580_v62 = vadd.f32 %v542_v35, %v351_v44  ;;  %v268_v54 = vpop.permute.xlu0 %267  ;;  %v470_v41 = vpop.permute.xlu2 %469  ;;  %v350_v59 = vmul.f32 %v9778_v43, %v10311_v38  ;;  %v8793_v38 = vld [vmem:[%s14435_s7 + $0x8c] sm:$0xf] }
 0x183   :  { %v887_v1 = vmax.f32 %v849_v51, 0.0  ;;  %1606 = vmatmul.bf16.gmra.mxu1 %v10350_v56  ;;  %1710 = vmatmul.bf16.gmra.mxu2 %v10350_v56  ;;  %v809_v50 = vadd.f32 %v771_v47, %v580_v62 }
 0x184   :  { %1814 = vmatmul.bf16.gmra.mxu3 %v10350_v56 }
 0x185   :  { %v462_v61 = vpop.permute.xlu1 %461  ;;  %v913_v55 = vpack.c.bf16 %v887_v1, %v886_v60 }
 0x186   :  { %v1049_v52 = vpop.f32.mrf.mxu0  ;;  %v541_v3 = vmul.f32 %v9776_v42, %v462_v61 }
 0x187   :  { %9267 = vset.pattern.permute.xlu1 %v14811_v0  ;;  %7227 = vmatmul.msk.bf16.gmra.mxu0 %vm957_vm0, %v913_v55  ;;  %v1050_v40 = vadd.f32 %v10178_v49, %v1049_v52  ;;  %v851_v55 = vadd.f32 %v10344_v53, %v809_v50  ;;  %v7311_v52 = vld [vmem:[%s14435_s7 + $0xa8] sm:$0xf0] }
 0x188   :  { %317 = vperm.xlu1 %9267, %v10290_v57   ;;  %v579_v1 = vadd.f32 %v541_v3, %v350_v59  ;;  %v7314_v47 = vor.u32 %v8793_v38, %v7311_v52 }
 0x189   :  { %9268 = vset.pattern.permute.xlu2 %v14811_v0  ;;  %v1129_v0 = vmax.f32 %v1050_v40, 0.0  ;;  %v474_v3 = vpop.permute.xlu0 %473 }
 0x18a   :  { %322 = vperm.xlu2 %9268, %v10323_v34   ;;  %v703_v59 = vpop.permute.xlu2 %702  ;;  %1895 = vmatpush.bf16.msrb.mxu0 %v7314_v47 }
 0x18e   :  { %v691_v51 = vpop.permute.xlu1 %690  ;;  %v1051_v60 = vpop.f32.mrf.mxu0 }
 0x18f   :  { %v770_v35 = vmul.f32 %v9780_v46, %v691_v51  ;;  %v1052_v2 = vadd.f32 %v10178_v49, %v1051_v60  ;;  %v544_v51 = vmul.f32 %v9776_v42, %v474_v3 }
 0x190   :  { %9269 = vset.pattern.permute.xlu1 %v14812_v37 }
 0x191   :  { %v808_v44 = vadd.f32 %v770_v35, %v579_v1  ;;  %v1130_v61 = vmax.f32 %v1052_v2, 0.0  ;;  %513 = vperm.xlu1 %9269, %v10323_v34   ;;  %v889_v34 = vmax.f32 %v851_v55, 0.0  ;;  %v773_v35 = vmul.f32 %v9780_v46, %v703_v59 }
 0x192   :  { %9270 = vset.pattern.permute.xlu2 %v14810_v58  ;;  %v543_v55 = vmul.f32 %v9776_v42, %v470_v41 }
 0x193   :  { %v850_v62 = vadd.f32 %v10344_v53, %v808_v44  ;;  %v10381_v37 = vpack.c.bf16 %v1130_v61, %v1129_v0  ;;  %738 = vperm.xlu2 %9270, %v10290_v57   ;;  %v283_v2 = vpop.permute.xlu2 %282  ;;  %v352_v0 = vmul.f32 %v9778_v43, %v268_v54 }
 0x195   :  { %v888_v40 = vmax.f32 %v850_v62, 0.0  ;;  %1611 = vmatmul.bf16.gmra.mxu1 %v10381_v37  ;;  %1715 = vmatmul.bf16.gmra.mxu2 %v10381_v37  ;;  %v581_v38 = vadd.f32 %v543_v55, %v352_v0 }
 0x196   :  { %1819 = vmatmul.bf16.gmra.mxu3 %v10381_v37 }
 0x197   :  { %v914_v58 = vpack.c.bf16 %v889_v34, %v888_v40  ;;  %v273_v50 = vpop.permute.xlu1 %272 }
 0x198   :  { %v353_v60 = vmul.f32 %v9778_v43, %v273_v50 }
 0x199   :  { %7228 = vmatmul.msk.bf16.gmra.mxu0 %vm957_vm0, %v914_v58 }
 0x19a   :  { %v1054_v57 = vpop.f32.mrf.mxu0  ;;  %v582_v1 = vadd.f32 %v544_v51, %v353_v60 }
 0x19b   :  { %v1055_v52 = vadd.f32 %v10178_v49, %v1054_v57 }
 0x19c   :  { %v811_v44 = vadd.f32 %v773_v35, %v582_v1  ;;  %v707_v54 = vpop.permute.xlu2 %706  ;;  %v478_v1 = vpop.permute.xlu0 %477 }
 0x19d   :  { %v1131_v58 = vmax.f32 %v1055_v52, 0.0  ;;  %v545_v55 = vmul.f32 %v9776_v42, %v478_v1 }
 0x19e   :  { %v853_v3 = vadd.f32 %v10344_v53, %v811_v44  ;;  %v1240_v44 = vld [vmem:[%s14436_s8] sm:$0xff] }
 0x1a0   :  { %v699_v61 = vpop.permute.xlu1 %698  ;;  %v891_v51 = vmax.f32 %v853_v3, 0.0 }
 0x1a1   :  { %v772_v62 = vmul.f32 %v9780_v46, %v699_v61  ;;  %v10409_v61 = vperm.slane %v1240_v44, 0 }
 0x1a2   :  { %v1056_v47 = vpop.f32.mrf.mxu0 }
 0x1a3   :  { %v810_v34 = vadd.f32 %v772_v62, %v581_v38  ;;  %v1057_v40 = vadd.f32 %v10178_v49, %v1056_v47  ;;  %v774_v62 = vmul.f32 %v9780_v46, %v707_v54  ;;  %v10423_v54 = vperm.slane %v1240_v44, 2 }
 0x1a4   :  { %v711_v47 = vpop.permute.xlu0 %710 }
 0x1a5   :  { %v852_v59 = vadd.f32 %v10344_v53, %v810_v34  ;;  %v1132_v50 = vmax.f32 %v1057_v40, 0.0  ;;  %v10411_v38 = vpop.permute.xlu2 %292 }
 0x1a7   :  { %v890_v41 = vmax.f32 %v852_v59, 0.0  ;;  %v10398_v60 = vpack.c.bf16 %v1132_v50, %v1131_v58  ;;  %v355_v58 = vmul.f32 %v9778_v43, %v283_v2  ;;  %v7279_v2 = vld [vmem:[%s14435_s7 + $0x68] sm:$0xf0] }
 0x1a9   :  { %v915_v35 = vpack.c.bf16 %v891_v51, %v890_v41  ;;  %v278_v57 = vpop.permute.xlu1 %277  ;;  %1616 = vmatmul.bf16.gmra.mxu1 %v10398_v60  ;;  %1720 = vmatmul.bf16.gmra.mxu2 %v10398_v60  ;;  %v775_v41 = vmul.f32 %v9780_v46, %v711_v47 }
 0x1aa   :  { %1824 = vmatmul.bf16.gmra.mxu3 %v10398_v60  ;;  %v354_v0 = vmul.f32 %v9778_v43, %v278_v57 }
 0x1ab   :  { %7229 = vmatmul.msk.bf16.gmra.mxu0 %vm957_vm0, %v915_v35  ;;  %v10421_v35 = vperm.slane %v1240_v44, 1 }
 0x1ac   :  { %v583_v52 = vadd.f32 %v545_v55, %v354_v0  ;;  %v8785_v0 = vld [vmem:[%s14435_s7 + $0x4c] sm:$0xf] }
 0x1ad   :  { %v7282_v47 = vor.u32 %v8785_v0, %v7279_v2 }
 0x1ae   :  { %v812_v59 = vadd.f32 %v774_v62, %v583_v52 }
 0x1af   :  { %1896 = vmatpush.bf16.msrb.mxu0 %v7282_v47 }
 0x1b0   :  { %v854_v55 = vadd.f32 %v10344_v53, %v812_v59 }
 0x1b1   :  { %v1587_v3 = vpop.f32.mrf.mxu1 }
 0x1b2   :  { %v10415_v34 = vadd.f32 %v1587_v3, %v10409_v61  ;;  %v482_v40 = vpop.permute.xlu1 %481 }
 0x1b3   :  { %v546_v50 = vmul.f32 %v9776_v42, %v482_v40  ;;  %v1059_v51 = vpop.f32.mrf.mxu0 }
 0x1b4   :  { %14813 = vst [vmem:[#allocation53_spill] sm:$0xff] %v10415_v34  ;;  %v1060_v34 = vadd.f32 %v10178_v49, %v1059_v51 }
 0x1b5   :  { %v584_v57 = vadd.f32 %v546_v50, %v355_v58  ;;  %v490_v58 = vpop.permute.xlu2 %489 }
 0x1b6   :  { %v1133_v32 = vmax.f32 %v1060_v34, 0.0 }
 0x1b7   :  { %v813_v52 = vadd.f32 %v775_v41, %v584_v57  ;;  %v1691_v62 = vpop.f32.mrf.mxu2  ;;  %v892_v41 = vmax.f32 %v854_v55, 0.0 }
 0x1b8   :  { %v10433_v3 = vadd.f32 %v1691_v62, %v10421_v35  ;;  %v1795_v40 = vpop.f32.mrf.mxu3 }
 0x1b9   :  { %v855_v44 = vadd.f32 %v10344_v53, %v813_v52  ;;  %v10437_v50 = vadd.f32 %v1795_v40, %v10423_v54  ;;  %v1589_v1 = vpop.f32.mrf.mxu1 }
 0x1ba   :  { %14814 = vst [vmem:[#allocation54_spill] sm:$0xff] %v10433_v3  ;;  %v10442_v59 = vadd.f32 %v1589_v1, %v10409_v61 }
 0x1bb   :  { %14815 = vst [vmem:[#allocation55_spill] sm:$0xff] %v10437_v50  ;;  %v893_v57 = vmax.f32 %v855_v44, 0.0  ;;  %v288_v2 = vpop.permute.xlu1 %287  ;;  %v1061_v62 = vpop.f32.mrf.mxu0 }
 0x1bc   :  { %14816 = vst [vmem:[#allocation56_spill] sm:$0xff] %v10442_v59  ;;  %v1062_v40 = vadd.f32 %v10178_v49, %v1061_v62  ;;  %v548_v59 = vmul.f32 %v9776_v42, %v490_v58 }
 0x1bd   :  { %v916_v31 = vpack.c.bf16 %v893_v57, %v892_v41  ;;  %v10453_v44 = vpop.permute.xlu2 %297 }
 0x1be   :  { %v1134_v47 = vmax.f32 %v1062_v40, 0.0 }
 0x1bf   :  { %7230 = vmatmul.msk.bf16.gmra.mxu0 %vm957_vm0, %v916_v31  ;;  %v1693_v51 = vpop.f32.mrf.mxu2 }
 0x1c0   :  { %v10448_v36 = vpack.c.bf16 %v1134_v47, %v1133_v32  ;;  %v10451_v1 = vadd.f32 %v1693_v51, %v10421_v35  ;;  %v1797_v55 = vpop.f32.mrf.mxu3  ;;  %v715_v47 = vpop.permute.xlu0 %714  ;;  %v356_v51 = vmul.f32 %v9778_v43, %v288_v2 }
 0x1c1   :  { %v10456_v0 = vadd.f32 %v1797_v55, %v10423_v54  ;;  %v776_v52 = vmul.f32 %v9780_v46, %v715_v47 }
 0x1c2   :  { %14817 = vst [vmem:[#allocation57_spill] sm:$0xff] %v10451_v1  ;;  %v1592_v62 = vpop.f32.mrf.mxu1  ;;  %1621 = vmatmul.bf16.gmra.mxu1 %v10448_v36  ;;  %1725 = vmatmul.bf16.gmra.mxu2 %v10448_v36 }
 0x1c3   :  { %14818 = vst [vmem:[#allocation58_spill] sm:$0xff] %v10456_v0  ;;  %v10463_v32 = vadd.f32 %v1592_v62, %v10409_v61  ;;  %1829 = vmatmul.bf16.gmra.mxu3 %v10448_v36  ;;  %v357_v0 = vmul.f32 %v9778_v43, %v10411_v38 }
 0x1c4   :  { %v486_v34 = vpop.permute.xlu1 %485 }
 0x1c5   :  { %14819 = vst [vmem:[#allocation59_spill] sm:$0xff] %v10463_v32  ;;  %v547_v57 = vmul.f32 %v9776_v42, %v486_v34  ;;  %v1064_v40 = vpop.f32.mrf.mxu0  ;;  %v498_v50 = vpop.permute.xlu2 %497  ;;  %v586_v58 = vadd.f32 %v548_v59, %v357_v0 }
 0x1c6   :  { %v1065_v47 = vadd.f32 %v10178_v49, %v1064_v40 }
 0x1c7   :  { %v585_v55 = vadd.f32 %v547_v57, %v356_v51 }
 0x1c8   :  { %v1696_v1 = vpop.f32.mrf.mxu2  ;;  %v1135_v28 = vmax.f32 %v1065_v47, 0.0 }
 0x1c9   :  { %v10471_v31 = vadd.f32 %v1696_v1, %v10421_v35  ;;  %v1800_v62 = vpop.f32.mrf.mxu3  ;;  %v814_v1 = vadd.f32 %v776_v52, %v585_v55  ;;  %v303_v55 = vpop.permute.xlu0 %302 }
 0x1ca   :  { %v10477_v41 = vadd.f32 %v1800_v62, %v10423_v54  ;;  %v1594_v34 = vpop.f32.mrf.mxu1 }
 0x1cb   :  { %14820 = vst [vmem:[#allocation60_spill] sm:$0xff] %v10471_v31  ;;  %v10481_v57 = vadd.f32 %v1594_v34, %v10409_v61  ;;  %v856_v2 = vadd.f32 %v10344_v53, %v814_v1 }
 0x1cc   :  { %14821 = vst [vmem:[#allocation61_spill] sm:$0xff] %v10477_v41 }
 0x1cd   :  { %14822 = vst [vmem:[#allocation62_spill] sm:$0xff] %v10481_v57  ;;  %v719_v38 = vpop.permute.xlu1 %718  ;;  %v1066_v32 = vpop.f32.mrf.mxu0 }
 0x1ce   :  { %v777_v62 = vmul.f32 %v9780_v46, %v719_v38  ;;  %v1067_v33 = vadd.f32 %v10178_v49, %v1066_v32  ;;  %v894_v32 = vmax.f32 %v856_v2, 0.0  ;;  %v359_v2 = vmul.f32 %v9778_v43, %v303_v55 }
 0x1d0   :  { %v815_v31 = vadd.f32 %v777_v62, %v586_v58  ;;  %v1136_v34 = vmax.f32 %v1067_v33, 0.0  ;;  %v1698_v29 = vpop.f32.mrf.mxu2 }
 0x1d1   :  { %v10490_v40 = vadd.f32 %v1698_v29, %v10421_v35  ;;  %v1802_v52 = vpop.f32.mrf.mxu3  ;;  %v727_v29 = vpop.permute.xlu2 %726 }
 0x1d2   :  { %v857_v3 = vadd.f32 %v10344_v53, %v815_v31  ;;  %v10493_v51 = vpack.c.bf16 %v1136_v34, %v1135_v28  ;;  %v10496_v59 = vadd.f32 %v1802_v52, %v10423_v54  ;;  %v550_v28 = vmul.f32 %v9776_v42, %v498_v50  ;;  %v7247_v50 = vld [vmem:[%s14435_s7 + $0x28] sm:$0xf0] }
 0x1d3   :  { %14823 = vst [vmem:[#allocation63_spill] sm:$0xff] %v10490_v40  ;;  %v779_v52 = vmul.f32 %v9780_v46, %v727_v29  ;;  %v358_v29 = vmul.f32 %v9778_v43, %v10453_v44 }
 0x1d4   :  { %14824 = vst [vmem:[#allocation64_spill] sm:$0xff] %v10496_v59  ;;  %v895_v47 = vmax.f32 %v857_v3, 0.0  ;;  %1626 = vmatmul.bf16.gmra.mxu1 %v10493_v51  ;;  %1730 = vmatmul.bf16.gmra.mxu2 %v10493_v51  ;;  %v588_v34 = vadd.f32 %v550_v28, %v359_v2 }
 0x1d5   :  { %1834 = vmatmul.bf16.gmra.mxu3 %v10493_v51  ;;  %v1597_v33 = vpop.f32.mrf.mxu1 }
 0x1d6   :  { %v917_v31 = vpack.c.bf16 %v895_v47, %v894_v32  ;;  %v10505_v38 = vadd.f32 %v1597_v33, %v10409_v61  ;;  %v494_v58 = vpop.permute.xlu1 %493  ;;  %v8777_v32 = vld [vmem:[%s14435_s7 + $0xc] sm:$0xf]  ;;  %v308_v33 = vpop.permute.xlu0 %307  ;;  %v817_v59 = vadd.f32 %v779_v52, %v588_v34 }
 0x1d7   :  { %v1069_v3 = vpop.f32.mrf.mxu0  ;;  %v7250_v1 = vor.u32 %v8777_v32, %v7247_v50  ;;  %v549_v55 = vmul.f32 %v9776_v42, %v494_v58 }
 0x1d8   :  { %14825 = vst [vmem:[#allocation65_spill] sm:$0xff] %v10505_v38  ;;  %7231 = vmatmul.msk.bf16.gmra.mxu0 %vm957_vm0, %v917_v31  ;;  %v1070_v62 = vadd.f32 %v10178_v49, %v1069_v3  ;;  %v859_v3 = vadd.f32 %v10344_v53, %v817_v59 }
 0x1d9   :  { %1897 = vmatpush.bf16.msrb.mxu0 %v7250_v1  ;;  %v502_v58 = vpop.permute.xlu2 %501  ;;  %v587_v41 = vadd.f32 %v549_v55, %v358_v29 }
 0x1da   :  { %v1137_v38 = vmax.f32 %v1070_v62, 0.0  ;;  %v897_v44 = vmax.f32 %v859_v3, 0.0 }
 0x1db   :  { %v1701_v47 = vpop.f32.mrf.mxu2 }
 0x1dc   :  { %v10519_v0 = vadd.f32 %v1701_v47, %v10421_v35  ;;  %v1805_v31 = vpop.f32.mrf.mxu3 }
 0x1dd   :  { %v10524_v28 = vadd.f32 %v1805_v31, %v10423_v54  ;;  %v1599_v2 = vpop.f32.mrf.mxu1 }
 0x1de   :  { %14826 = vst [vmem:[#allocation66_spill] sm:$0xff] %v10519_v0  ;;  %v10529_v32 = vadd.f32 %v1599_v2, %v10409_v61 }
 0x1df   :  { %14827 = vst [vmem:[#allocation67_spill] sm:$0xff] %v10524_v28  ;;  %v723_v47 = vpop.permute.xlu1 %722  ;;  %v1071_v57 = vpop.f32.mrf.mxu0 }
 0x1e0   :  { %14828 = vst [vmem:[#allocation68_spill] sm:$0xff] %v10529_v32  ;;  %v778_v31 = vmul.f32 %v9780_v46, %v723_v47  ;;  %v1072_v1 = vadd.f32 %v10178_v49, %v1071_v57  ;;  %v506_v47 = vpop.permute.xlu0 %505 }
 0x1e2   :  { %v816_v34 = vadd.f32 %v778_v31, %v587_v41  ;;  %v1138_v52 = vmax.f32 %v1072_v1, 0.0  ;;  %v735_v1 = vpop.permute.xlu2 %734 }
 0x1e3   :  { %v1703_v40 = vpop.f32.mrf.mxu2 }
 0x1e4   :  { %v858_v2 = vadd.f32 %v10344_v53, %v816_v34  ;;  %v10537_v0 = vpack.c.bf16 %v1138_v52, %v1137_v38  ;;  %v10540_v50 = vadd.f32 %v1703_v40, %v10421_v35  ;;  %v1807_v55 = vpop.f32.mrf.mxu3  ;;  %v552_v38 = vmul.f32 %v9776_v42, %v506_v47 }
 0x1e5   :  { %v10543_v29 = vadd.f32 %v1807_v55, %v10423_v54  ;;  %v781_v52 = vmul.f32 %v9780_v46, %v735_v1  ;;  %v551_v55 = vmul.f32 %v9776_v42, %v502_v58 }
 0x1e6   :  { %14829 = vst [vmem:[#allocation69_spill] sm:$0xff] %v10540_v50  ;;  %v896_v57 = vmax.f32 %v858_v2, 0.0  ;;  %1631 = vmatmul.bf16.gmra.mxu1 %v10537_v0  ;;  %1735 = vmatmul.bf16.gmra.mxu2 %v10537_v0  ;;  %v360_v2 = vmul.f32 %v9778_v43, %v308_v33 }
 0x1e7   :  { %14830 = vst [vmem:[#allocation70_spill] sm:$0xff] %v10543_v29  ;;  %1839 = vmatmul.bf16.gmra.mxu3 %v10537_v0 }
 0x1e8   :  { %v918_v59 = vpack.c.bf16 %v897_v44, %v896_v57  ;;  %v313_v40 = vpop.permute.xlu1 %312 }
 0x1e9   :  { %v361_v31 = vmul.f32 %v9778_v43, %v313_v40  ;;  %v589_v40 = vadd.f32 %v551_v55, %v360_v2 }
 0x1ea   :  { %7232 = vmatmul.msk.bf16.gmra.mxu0 %vm957_vm0, %v918_v59 }
 0x1eb   :  { %v1074_v3 = vpop.f32.mrf.mxu0  ;;  %v590_v34 = vadd.f32 %v552_v38, %v361_v31  ;;  %v323_v31 = vpop.permute.xlu2 %322 }
 0x1ec   :  { %v1075_v29 = vadd.f32 %v10178_v49, %v1074_v3  ;;  %v363_v50 = vmul.f32 %v9778_v43, %v323_v31 }
 0x1ed   :  { %v819_v44 = vadd.f32 %v781_v52, %v590_v34 }
 0x1ee   :  { %v1602_v41 = vpop.f32.mrf.mxu1  ;;  %v1139_v52 = vmax.f32 %v1075_v29, 0.0 }
 0x1ef   :  { %v10557_v62 = vadd.f32 %v1602_v41, %v10409_v61  ;;  %v861_v1 = vadd.f32 %v10344_v53, %v819_v44 }
 0x1f1   :  { %14831 = vst [vmem:[#allocation71_spill] sm:$0xff] %v10557_v62  ;;  %v731_v57 = vpop.permute.xlu1 %730 }
 0x1f2   :  { %v780_v59 = vmul.f32 %v9780_v46, %v731_v57 }
 0x1f3   :  { %v1076_v38 = vpop.f32.mrf.mxu0 }
 0x1f4   :  { %v818_v33 = vadd.f32 %v780_v59, %v589_v40  ;;  %v1077_v58 = vadd.f32 %v10178_v49, %v1076_v38  ;;  %v1706_v28 = vpop.f32.mrf.mxu2  ;;  %v899_v40 = vmax.f32 %v861_v1, 0.0  ;;  %v510_v38 = vpop.permute.xlu0 %509 }
 0x1f5   :  { %v10565_v41 = vadd.f32 %v1706_v28, %v10421_v35  ;;  %v1810_v34 = vpop.f32.mrf.mxu3  ;;  %v739_v1 = vpop.permute.xlu2 %738  ;;  %v8839_v28 = vld [vmem:[%s14435_s7 + $0x1f4] sm:$0xf0] }
 0x1f6   :  { %v860_v47 = vadd.f32 %v10344_v53, %v818_v33  ;;  %v1140_v2 = vmax.f32 %v1077_v58, 0.0  ;;  %v10569_v3 = vadd.f32 %v1810_v34, %v10423_v54  ;;  %v1604_v55 = vpop.f32.mrf.mxu1 }
 0x1f7   :  { %14832 = vst [vmem:[#allocation72_spill] sm:$0xff] %v10565_v41  ;;  %v10573_v44 = vadd.f32 %v1604_v55, %v10409_v61  ;;  %v8834_v55 = vld [vmem:[%s14435_s7 + $0x1d4] sm:$0xf]  ;;  %v782_v41 = vmul.f32 %v9780_v46, %v739_v1 }
 0x1f8   :  { %14833 = vst [vmem:[#allocation73_spill] sm:$0xff] %v10569_v3  ;;  %v898_v49 = vmax.f32 %v860_v47, 0.0  ;;  %v10575_v59 = vpack.c.bf16 %v1140_v2, %v1139_v52 }
 0x1f9   :  { %14834 = vst [vmem:[#allocation74_spill] sm:$0xff] %v10573_v44 }
 0x1fa   :  { %v919_v33 = vpack.c.bf16 %v899_v40, %v898_v49  ;;  %v318_v58 = vpop.permute.xlu1 %317  ;;  %1636 = vmatmul.bf16.gmra.mxu1 %v10575_v59  ;;  %1740 = vmatmul.bf16.gmra.mxu2 %v10575_v59  ;;  %v7479_v40 = vld [vmem:[%s14435_s7 + $0x1f0] sm:$0xf0]  ;;  %v7485_v49 = vld [vmem:[%s14435_s7 + $0x1d8] sm:$0xf] }
 0x1fb   :  { %1844 = vmatmul.bf16.gmra.mxu3 %v10575_v59  ;;  %v362_v34 = vmul.f32 %v9778_v43, %v318_v58  ;;  %v7486_v29 = vor.u32 %v8839_v28, %v7485_v49  ;;  %v7477_v49 = vld [vmem:[%s14435_s7 + $0x1d0] sm:$0xf] }
 0x1fc   :  { %7233 = vmatmul.msk.bf16.gmra.mxu0 %vm957_vm0, %v919_v33  ;;  %v1708_v47 = vpop.f32.mrf.mxu2  ;;  %v553_v33 = vmul.f32 %v9776_v42, %v510_v38 }
 0x1fd   :  { %v10585_v52 = vadd.f32 %v1708_v47, %v10421_v35  ;;  %v1812_v2 = vpop.f32.mrf.mxu3  ;;  %v7482_v47 = vor.u32 %v8834_v55, %v7479_v40  ;;  %2202 = vmatpush.bf16.msrb.mxu3 %v7486_v29  ;;  %v8835_v29 = vld [vmem:[%s14435_s7 + $0x1dc] sm:$0xf] }
 0x1fe   :  { %v10598_v58 = vadd.f32 %v1812_v2, %v10423_v54  ;;  %v591_v3 = vadd.f32 %v553_v33, %v362_v34  ;;  %v743_v2 = vpop.permute.xlu0 %742 }
 0x1ff   :  { %14835 = vst [vmem:[#allocation75_spill] sm:$0xff] %v10585_v52  ;;  %2098 = vmatpush.bf16.msrb.mxu2 %v7482_v47  ;;  %v783_v1 = vmul.f32 %v9780_v46, %v743_v2 }
 0x200   :  { %14836 = vst [vmem:[#allocation76_spill] sm:$0xff] %v10598_v58  ;;  %v1607_v44 = vpop.f32.mrf.mxu1  ;;  %v820_v32 = vadd.f32 %v782_v41, %v591_v3 }
 0x201   :  { %v10607_v38 = vadd.f32 %v1607_v44, %v10409_v61  ;;  %v8838_v44 = vld [vmem:[%s14435_s7 + $0x1ec] sm:$0xf0] }
 0x202   :  { %v7478_v33 = vor.u32 %v8838_v44, %v7477_v49  ;;  %v862_v47 = vadd.f32 %v10344_v53, %v820_v32 }
 0x203   :  { %14837 = vst [vmem:[#allocation77_spill] sm:$0xff] %v10607_v38  ;;  %v514_v40 = vpop.permute.xlu1 %513 }
 0x204   :  { %v554_v28 = vmul.f32 %v9776_v42, %v514_v40  ;;  %v1079_v34 = vpop.f32.mrf.mxu0  ;;  %v7487_v42 = vld [vmem:[%s14435_s7 + $0x1f8] sm:$0xf0]  ;;  %1994 = vmatpush.bf16.msrb.mxu1 %v7478_v33  ;;  %v900_v33 = vmax.f32 %v862_v47, 0.0 }
 0x205   :  { %v7490_v46 = vor.u32 %v8835_v29, %v7487_v42  ;;  %v10641_v29 = vld [vmem:[%s14434_s6] ss:$0 sm:$0xff] }
 0x206   :  { %v592_v43 = vadd.f32 %v554_v28, %v363_v50  ;;  %v1711_v31 = vpop.f32.mrf.mxu2  ;;  %v1080_v32 = vadd.f32 %v10641_v29, %v1079_v34 }
 0x207   :  { %v10626_v41 = vadd.f32 %v1711_v31, %v10421_v35  ;;  %v1815_v3 = vpop.f32.mrf.mxu3  ;;  %2306 = vmatpush.bf16.msra.mxu0 %v7490_v46 }
 0x208   :  { %v821_v2 = vadd.f32 %v783_v1, %v592_v43  ;;  %v10630_v40 = vadd.f32 %v1815_v3, %v10423_v54  ;;  %v1609_v62 = vpop.f32.mrf.mxu1  ;;  %v1141_v3 = vmax.f32 %v1080_v32, 0.0 }
 0x209   :  { %14838 = vst [vmem:[#allocation78_spill] sm:$0xff] %v10626_v41  ;;  %v10634_v44 = vadd.f32 %v1609_v62, %v10409_v61 }
 0x20a   :  { %14839 = vst [vmem:[#allocation79_spill] sm:$0xff] %v10630_v40  ;;  %v863_v50 = vadd.f32 %v10344_v53, %v821_v2 }
 0x20b   :  { %14840 = vst [vmem:[#allocation80_spill] sm:$0xff] %v10634_v44 }
 0x20c   :  { %v901_v42 = vmax.f32 %v863_v50, 0.0  ;;  %v1081_v43 = vpop.f32.mrf.mxu0 }
 0x20d   :  { %v1082_v31 = vadd.f32 %v10641_v29, %v1081_v43 }
 0x20e   :  { %v920_v62 = vpack.c.bf16 %v901_v42, %v900_v33  ;;  %v1713_v46 = vpop.f32.mrf.mxu2 }
 0x20f   :  { %v1142_v53 = vmax.f32 %v1082_v31, 0.0  ;;  %v10647_v2 = vadd.f32 %v1713_v46, %v10421_v35  ;;  %v1817_v57 = vpop.f32.mrf.mxu3 }
 0x210   :  { %v10650_v28 = vadd.f32 %v1817_v57, %v10423_v54  ;;  %7234 = vmatmul.msk.bf16.gmra.mxu0 %vm957_vm0, %v920_v62 }
 0x211   :  { %14841 = vst [vmem:[#allocation81_spill] sm:$0xff] %v10647_v2  ;;  %v10653_v34 = vpack.c.bf16 %v1142_v53, %v1141_v3 }
 0x212   :  { %14842 = vst [vmem:[#allocation82_spill] sm:$0xff] %v10650_v28  ;;  %v1612_v43 = vpop.f32.mrf.mxu1 }
 0x213   :  { %v10658_v33 = vadd.f32 %v1612_v43, %v10409_v61  ;;  %1641 = vmatmul.bf16.gmra.mxu1 %v10653_v34  ;;  %1745 = vmatmul.bf16.gmra.mxu2 %v10653_v34 }
 0x214   :  { %1849 = vmatmul.bf16.gmra.mxu3 %v10653_v34 }
 0x215   :  { %14843 = vst [vmem:[#allocation83_spill] sm:$0xff] %v10658_v33 }
 0x216   :  { %v1084_v32 = vpop.f32.mrf.mxu0 }
 0x217   :  { %v1085_v47 = vadd.f32 %v10641_v29, %v1084_v32  ;;  %v8826_v32 = vld [vmem:[%s14435_s7 + $0x194] sm:$0xf] }
 0x218   :  { %v1716_v42 = vpop.f32.mrf.mxu2 }
 0x219   :  { %v10665_v31 = vadd.f32 %v1716_v42, %v10421_v35  ;;  %v1820_v62 = vpop.f32.mrf.mxu3 }
 0x21a   :  { %v10668_v46 = vadd.f32 %v1820_v62, %v10423_v54  ;;  %v1614_v3 = vpop.f32.mrf.mxu1  ;;  %v1143_v62 = vmax.f32 %v1085_v47, 0.0  ;;  %v7453_v47 = vld [vmem:[%s14435_s7 + $0x198] sm:$0xf] }
 0x21b   :  { %14844 = vst [vmem:[#allocation84_spill] sm:$0xff] %v10665_v31  ;;  %v10672_v43 = vadd.f32 %v1614_v3, %v10409_v61 }
 0x21c   :  { %14845 = vst [vmem:[#allocation85_spill] sm:$0xff] %v10668_v46 }
 0x21d   :  { %14846 = vst [vmem:[#allocation86_spill] sm:$0xff] %v10672_v43 }
 0x21e   :  { %v1086_v57 = vpop.f32.mrf.mxu0 }
 0x21f   :  { %v1087_v42 = vadd.f32 %v10641_v29, %v1086_v57  ;;  %v7447_v57 = vld [vmem:[%s14435_s7 + $0x1b0] sm:$0xf0] }
 0x220   :  { %v1718_v49 = vpop.f32.mrf.mxu2  ;;  %1898 = vmatmul.bf16.vlgmr.msrb.gmra.mxu0 %v10195_v39  ;;  %v7450_v50 = vor.u32 %v8826_v32, %v7447_v57  ;;  %v7445_v57 = vld [vmem:[%s14435_s7 + $0x190] sm:$0xf] }
 0x221   :  { %v1144_v55 = vmax.f32 %v1087_v42, 0.0  ;;  %v10680_v28 = vadd.f32 %v1718_v49, %v10421_v35  ;;  %v1822_v53 = vpop.f32.mrf.mxu3 }
 0x222   :  { %v10683_v3 = vadd.f32 %v1822_v53, %v10423_v54  ;;  %v8831_v53 = vld [vmem:[%s14435_s7 + $0x1b4] sm:$0xf0]  ;;  %2099 = vmatpush.bf16.msrb.mxu2 %v7450_v50  ;;  %v8827_v50 = vld [vmem:[%s14435_s7 + $0x19c] sm:$0xf] }
 0x223   :  { %14847 = vst [vmem:[#allocation87_spill] sm:$0xff] %v10680_v28  ;;  %v10694_v42 = vpack.c.bf16 %v1144_v55, %v1143_v62  ;;  %v7454_v2 = vor.u32 %v8831_v53, %v7453_v47  ;;  %v8830_v47 = vld [vmem:[%s14435_s7 + $0x1ac] sm:$0xf0] }
 0x224   :  { %14848 = vst [vmem:[#allocation88_spill] sm:$0xff] %v10683_v3  ;;  %v7446_v53 = vor.u32 %v8830_v47, %v7445_v57 }
 0x225   :  { %1646 = vmatmul.bf16.gmra.mxu1 %v10694_v42  ;;  %1750 = vmatmul.bf16.gmra.mxu2 %v10694_v42 }
 0x226   :  { %1854 = vmatmul.bf16.gmra.mxu3 %v10694_v42  ;;  %v1617_v44 = vpop.f32.mrf.mxu1  ;;  %1995 = vmatpush.bf16.msrb.mxu1 %v7446_v53 }
 0x227   :  { %v10705_v55 = vadd.f32 %v1617_v44, %v10409_v61  ;;  %2203 = vmatpush.bf16.msrb.mxu3 %v7454_v2  ;;  %v7455_v44 = vld [vmem:[%s14435_s7 + $0x1b8] sm:$0xf0] }
 0x228   :  { %v1089_v62 = vpop.f32.mrf.mxu0  ;;  %v7458_v2 = vor.u32 %v8827_v50, %v7455_v44 }
 0x229   :  { %14849 = vst [vmem:[#allocation89_spill] sm:$0xff] %v10705_v55  ;;  %v1090_v47 = vadd.f32 %v10641_v29, %v1089_v62 }
 0x22a   :  { %2307 = vmatpush.bf16.msra.mxu0 %v7458_v2 }
 0x22b   :  { %v1145_v2 = vmax.f32 %v1090_v47, 0.0 }
 0x22c   :  { %v1721_v1 = vpop.f32.mrf.mxu2 }
 0x22d   :  { %v10721_v32 = vadd.f32 %v1721_v1, %v10421_v35  ;;  %v1825_v49 = vpop.f32.mrf.mxu3 }
 0x22e   :  { %v10724_v55 = vadd.f32 %v1825_v49, %v10423_v54  ;;  %v1619_v57 = vpop.f32.mrf.mxu1 }
 0x22f   :  { %14850 = vst [vmem:[#allocation90_spill] sm:$0xff] %v10721_v32  ;;  %v10729_v31 = vadd.f32 %v1619_v57, %v10409_v61  ;;  %v8818_v32 = vld [vmem:[%s14435_s7 + $0x154] sm:$0xf] }
 0x230   :  { %14851 = vst [vmem:[#allocation91_spill] sm:$0xff] %v10724_v55  ;;  %v1091_v44 = vpop.f32.mrf.mxu0  ;;  %1903 = vmatmul.bf16.gmra.mxu0 %v10221_v48 }
 0x231   :  { %14852 = vst [vmem:[#allocation92_spill] sm:$0xff] %v10729_v31  ;;  %v1092_v53 = vadd.f32 %v10641_v29, %v1091_v44  ;;  %v8823_v31 = vld [vmem:[%s14435_s7 + $0x174] sm:$0xf0] }
 0x233   :  { %v1146_v49 = vmax.f32 %v1092_v53, 0.0 }
 0x234   :  { %v1723_v33 = vpop.f32.mrf.mxu2 }
 0x235   :  { %v10735_v58 = vpack.c.bf16 %v1146_v49, %v1145_v2  ;;  %v10738_v62 = vadd.f32 %v1723_v33, %v10421_v35  ;;  %v1827_v46 = vpop.f32.mrf.mxu3 }
 0x236   :  { %v10741_v57 = vadd.f32 %v1827_v46, %v10423_v54 }
 0x237   :  { %14853 = vst [vmem:[#allocation93_spill] sm:$0xff] %v10738_v62  ;;  %1651 = vmatmul.bf16.gmra.mxu1 %v10735_v58  ;;  %1755 = vmatmul.bf16.gmra.mxu2 %v10735_v58 }
 0x238   :  { %14854 = vst [vmem:[#allocation94_spill] sm:$0xff] %v10741_v57  ;;  %1859 = vmatmul.bf16.gmra.mxu3 %v10735_v58 }
 0x23c   :  { %v1094_v47 = vpop.f32.mrf.mxu0 }
 0x23d   :  { %v1095_v46 = vadd.f32 %v10641_v29, %v1094_v47  ;;  %v7421_v47 = vld [vmem:[%s14435_s7 + $0x158] sm:$0xf] }
 0x23e   :  { %v7422_v3 = vor.u32 %v8823_v31, %v7421_v47  ;;  %v7413_v31 = vld [vmem:[%s14435_s7 + $0x150] sm:$0xf]  ;;  %v7423_v47 = vld [vmem:[%s14435_s7 + $0x178] sm:$0xf0] }
 0x23f   :  { %v1622_v53 = vpop.f32.mrf.mxu1  ;;  %v1147_v33 = vmax.f32 %v1095_v46, 0.0 }
 0x240   :  { %v10749_v2 = vadd.f32 %v1622_v53, %v10409_v61  ;;  %1908 = vmatmul.bf16.gmra.mxu0 %v10264_v45  ;;  %v7415_v53 = vld [vmem:[%s14435_s7 + $0x170] sm:$0xf0]  ;;  %2204 = vmatpush.bf16.msrb.mxu3 %v7422_v3  ;;  %v8819_v3 = vld [vmem:[%s14435_s7 + $0x15c] sm:$0xf] }
 0x241   :  { %v7418_v62 = vor.u32 %v8818_v32, %v7415_v53 }
 0x242   :  { %14855 = vst [vmem:[#allocation95_spill] sm:$0xff] %v10749_v2 }
 0x243   :  { %2100 = vmatpush.bf16.msrb.mxu2 %v7418_v62  ;;  %v8822_v62 = vld [vmem:[%s14435_s7 + $0x16c] sm:$0xf0] }
 0x244   :  { %v1096_v49 = vpop.f32.mrf.mxu0 }
 0x245   :  { %v1097_v50 = vadd.f32 %v10641_v29, %v1096_v49  ;;  %v1726_v1 = vpop.f32.mrf.mxu2 }
 0x246   :  { %v10756_v55 = vadd.f32 %v1726_v1, %v10421_v35  ;;  %v1830_v44 = vpop.f32.mrf.mxu3 }
 0x247   :  { %v1148_v57 = vmax.f32 %v1097_v50, 0.0  ;;  %v10768_v49 = vadd.f32 %v1830_v44, %v10423_v54  ;;  %v1624_v1 = vpop.f32.mrf.mxu1 }
 0x248   :  { %14856 = vst [vmem:[#allocation96_spill] sm:$0xff] %v10756_v55  ;;  %v10775_v2 = vadd.f32 %v1624_v1, %v10409_v61 }
 0x249   :  { %14857 = vst [vmem:[#allocation97_spill] sm:$0xff] %v10768_v49  ;;  %v10777_v28 = vpack.c.bf16 %v1148_v57, %v1147_v33  ;;  %v7414_v33 = vor.u32 %v8822_v62, %v7413_v31 }
 0x24a   :  { %14858 = vst [vmem:[#allocation98_spill] sm:$0xff] %v10775_v2 }
 0x24b   :  { %1656 = vmatmul.bf16.gmra.mxu1 %v10777_v28  ;;  %1760 = vmatmul.bf16.gmra.mxu2 %v10777_v28 }
 0x24c   :  { %1864 = vmatmul.bf16.gmra.mxu3 %v10777_v28  ;;  %1996 = vmatpush.bf16.msrb.mxu1 %v7414_v33 }
 0x24d   :  { %v1728_v32 = vpop.f32.mrf.mxu2 }
 0x24e   :  { %v10785_v44 = vadd.f32 %v1728_v32, %v10421_v35  ;;  %v1832_v53 = vpop.f32.mrf.mxu3  ;;  %v7426_v32 = vor.u32 %v8819_v3, %v7423_v47 }
 0x24f   :  { %v10797_v57 = vadd.f32 %v1832_v53, %v10423_v54 }
 0x250   :  { %14859 = vst [vmem:[#allocation99_spill] sm:$0xff] %v10785_v44  ;;  %1913 = vmatmul.bf16.gmra.mxu0 %v10315_v63 }
 0x251   :  { %14860 = vst [vmem:[#allocation100_spill] sm:$0xff] %v10797_v57  ;;  %v1627_v46 = vpop.f32.mrf.mxu1  ;;  %2308 = vmatpush.bf16.msra.mxu0 %v7426_v32 }
 0x252   :  { %v10806_v52 = vadd.f32 %v1627_v46, %v10409_v61 }
 0x254   :  { %14861 = vst [vmem:[#allocation101_spill] sm:$0xff] %v10806_v52 }
 0x255   :  { %v1099_v31 = vpop.f32.mrf.mxu0 }
 0x256   :  { %v1100_v32 = vadd.f32 %v10641_v29, %v1099_v31 }
 0x257   :  { %v1731_v62 = vpop.f32.mrf.mxu2 }
 0x258   :  { %v10810_v2 = vadd.f32 %v1731_v62, %v10421_v35  ;;  %v1835_v49 = vpop.f32.mrf.mxu3  ;;  %v1149_v44 = vmax.f32 %v1100_v32, 0.0 }
 0x259   :  { %v10813_v1 = vadd.f32 %v1835_v49, %v10423_v54  ;;  %v1629_v3 = vpop.f32.mrf.mxu1 }
 0x25a   :  { %14862 = vst [vmem:[#allocation102_spill] sm:$0xff] %v10810_v2  ;;  %v10817_v33 = vadd.f32 %v1629_v3, %v10409_v61 }
 0x25b   :  { %14863 = vst [vmem:[#allocation103_spill] sm:$0xff] %v10813_v1 }
 0x25c   :  { %14864 = vst [vmem:[#allocation104_spill] sm:$0xff] %v10817_v33 }
 0x25d   :  { %v1101_v53 = vpop.f32.mrf.mxu0 }
 0x25e   :  { %v1102_v62 = vadd.f32 %v10641_v29, %v1101_v53 }
 0x25f   :  { %v1733_v57 = vpop.f32.mrf.mxu2 }
 0x260   :  { %v1150_v52 = vmax.f32 %v1102_v62, 0.0  ;;  %v10824_v49 = vadd.f32 %v1733_v57, %v10421_v35  ;;  %v1837_v55 = vpop.f32.mrf.mxu3  ;;  %1918 = vmatmul.bf16.gmra.mxu0 %v10350_v56  ;;  %v8815_v57 = vld [vmem:[%s14435_s7 + $0x134] sm:$0xf0] }
 0x261   :  { %v10828_v3 = vadd.f32 %v1837_v55, %v10423_v54 }
 0x262   :  { %14865 = vst [vmem:[#allocation105_spill] sm:$0xff] %v10824_v49  ;;  %v10830_v46 = vpack.c.bf16 %v1150_v52, %v1149_v44  ;;  %v8810_v52 = vld [vmem:[%s14435_s7 + $0x114] sm:$0xf] }
 0x263   :  { %14866 = vst [vmem:[#allocation106_spill] sm:$0xff] %v10828_v3  ;;  %v1632_v50 = vpop.f32.mrf.mxu1  ;;  %v7383_v44 = vld [vmem:[%s14435_s7 + $0x130] sm:$0xf0] }
 0x264   :  { %v10835_v53 = vadd.f32 %v1632_v50, %v10409_v61  ;;  %1661 = vmatmul.bf16.gmra.mxu1 %v10830_v46  ;;  %1765 = vmatmul.bf16.gmra.mxu2 %v10830_v46  ;;  %v7389_v50 = vld [vmem:[%s14435_s7 + $0x118] sm:$0xf]  ;;  %v7386_v31 = vor.u32 %v8810_v52, %v7383_v44 }
 0x265   :  { %1869 = vmatmul.bf16.gmra.mxu3 %v10830_v46  ;;  %v7390_v2 = vor.u32 %v8815_v57, %v7389_v50 }
 0x266   :  { %14867 = vst [vmem:[#allocation107_spill] sm:$0xff] %v10835_v53  ;;  %2101 = vmatpush.bf16.msrb.mxu2 %v7386_v31 }
 0x267   :  { %v1104_v55 = vpop.f32.mrf.mxu0  ;;  %2205 = vmatpush.bf16.msrb.mxu3 %v7390_v2  ;;  %v7381_v2 = vld [vmem:[%s14435_s7 + $0x110] sm:$0xf] }
 0x268   :  { %v1105_v52 = vadd.f32 %v10641_v29, %v1104_v55  ;;  %v8811_v55 = vld [vmem:[%s14435_s7 + $0x11c] sm:$0xf] }
 0x269   :  { %v1736_v32 = vpop.f32.mrf.mxu2 }
 0x26a   :  { %v10851_v62 = vadd.f32 %v1736_v32, %v10421_v35  ;;  %v1840_v47 = vpop.f32.mrf.mxu3  ;;  %v1151_v57 = vmax.f32 %v1105_v52, 0.0 }
 0x26b   :  { %v10857_v53 = vadd.f32 %v1840_v47, %v10423_v54  ;;  %v1634_v1 = vpop.f32.mrf.mxu1 }
 0x26c   :  { %14868 = vst [vmem:[#allocation108_spill] sm:$0xff] %v10851_v62  ;;  %v10861_v49 = vadd.f32 %v1634_v1, %v10409_v61 }
 0x26d   :  { %14869 = vst [vmem:[#allocation109_spill] sm:$0xff] %v10857_v53 }
 0x26e   :  { %14870 = vst [vmem:[#allocation110_spill] sm:$0xff] %v10861_v49  ;;  %v7317_v49 = vld [vmem:[%s14435_s7 + $0x90] sm:$0xf] }
 0x26f   :  { %v1106_v33 = vpop.f32.mrf.mxu0 }
 0x270   :  { %v1107_v43 = vadd.f32 %v10641_v29, %v1106_v33  ;;  %1923 = vmatmul.bf16.gmra.mxu0 %v10381_v37  ;;  %v8814_v33 = vld [vmem:[%s14435_s7 + $0x12c] sm:$0xf0] }
 0x271   :  { %v1738_v47 = vpop.f32.mrf.mxu2 }
 0x272   :  { %v1152_v50 = vmax.f32 %v1107_v43, 0.0  ;;  %v10869_v3 = vadd.f32 %v1738_v47, %v10421_v35  ;;  %v1842_v1 = vpop.f32.mrf.mxu3  ;;  %v7382_v47 = vor.u32 %v8814_v33, %v7381_v2  ;;  %v7349_v33 = vld [vmem:[%s14435_s7 + $0xd0] sm:$0xf]  ;;  %v8807_v2 = vld [vmem:[%s14435_s7 + $0xf4] sm:$0xf0] }
 0x273   :  { %v10872_v31 = vadd.f32 %v1842_v1, %v10423_v54  ;;  %v7391_v1 = vld [vmem:[%s14435_s7 + $0x138] sm:$0xf0] }
 0x274   :  { %14871 = vst [vmem:[#allocation111_spill] sm:$0xff] %v10869_v3  ;;  %v10883_v43 = vpack.c.bf16 %v1152_v50, %v1151_v57  ;;  %v7394_v44 = vor.u32 %v8811_v55, %v7391_v1  ;;  %1997 = vmatpush.bf16.msrb.mxu1 %v7382_v47  ;;  %v8806_v55 = vld [vmem:[%s14435_s7 + $0xec] sm:$0xf0]  ;;  %v8802_v1 = vld [vmem:[%s14435_s7 + $0xd4] sm:$0xf] }
 0x275   :  { %14872 = vst [vmem:[#allocation112_spill] sm:$0xff] %v10872_v31  ;;  %v7350_v47 = vor.u32 %v8806_v55, %v7349_v33 }
 0x276   :  { %1666 = vmatmul.bf16.gmra.mxu1 %v10883_v43  ;;  %1770 = vmatmul.bf16.gmra.mxu2 %v10883_v43 }
 0x277   :  { %1874 = vmatmul.bf16.gmra.mxu3 %v10883_v43  ;;  %v1637_v53 = vpop.f32.mrf.mxu1  ;;  %2309 = vmatpush.bf16.msra.mxu0 %v7394_v44  ;;  %v7357_v44 = vld [vmem:[%s14435_s7 + $0xd8] sm:$0xf] }
 0x278   :  { %v10894_v57 = vadd.f32 %v1637_v53, %v10409_v61  ;;  %v7351_v53 = vld [vmem:[%s14435_s7 + $0xf0] sm:$0xf0]  ;;  %1998 = vmatpush.bf16.msrb.mxu1 %v7350_v47  ;;  %v7358_v33 = vor.u32 %v8807_v2, %v7357_v44  ;;  %v7325_v44 = vld [vmem:[%s14435_s7 + $0x98] sm:$0xf] }
 0x279   :  { %v1109_v50 = vpop.f32.mrf.mxu0  ;;  %v7354_v52 = vor.u32 %v8802_v1, %v7351_v53  ;;  %v8798_v1 = vld [vmem:[%s14435_s7 + $0xac] sm:$0xf0]  ;;  %v7319_v53 = vld [vmem:[%s14435_s7 + $0xb0] sm:$0xf0] }
 0x27a   :  { %14873 = vst [vmem:[#allocation113_spill] sm:$0xff] %v10894_v57  ;;  %v1110_v47 = vadd.f32 %v10641_v29, %v1109_v50  ;;  %2206 = vmatpush.bf16.msrb.mxu3 %v7358_v33  ;;  %v8790_v57 = vld [vmem:[%s14435_s7 + $0x6c] sm:$0xf0] }
 0x27b   :  { %2102 = vmatpush.bf16.msrb.mxu2 %v7354_v52  ;;  %v7318_v52 = vor.u32 %v8798_v1, %v7317_v49  ;;  %v7285_v1 = vld [vmem:[%s14435_s7 + $0x50] sm:$0xf] }
 0x27c   :  { %v7286_v2 = vor.u32 %v8790_v57, %v7285_v1  ;;  %v7253_v1 = vld [vmem:[%s14435_s7 + $0x10] sm:$0xf] }
 0x27d   :  { %v1741_v32 = vpop.f32.mrf.mxu2  ;;  %1999 = vmatpush.bf16.msrb.mxu1 %v7318_v52  ;;  %v7293_v52 = vld [vmem:[%s14435_s7 + $0x58] sm:$0xf] }
 0x27e   :  { %v10916_v62 = vadd.f32 %v1741_v32, %v10421_v35  ;;  %v1845_v31 = vpop.f32.mrf.mxu3  ;;  %v8794_v32 = vld [vmem:[%s14435_s7 + $0x94] sm:$0xf] }
 0x27f   :  { %v10919_v55 = vadd.f32 %v1845_v31, %v10423_v54  ;;  %v1639_v3 = vpop.f32.mrf.mxu1  ;;  %v7322_v40 = vor.u32 %v8794_v32, %v7319_v53  ;;  %v8786_v32 = vld [vmem:[%s14435_s7 + $0x54] sm:$0xf]  ;;  %v1153_v53 = vmax.f32 %v1110_v47, 0.0 }
 0x280   :  { %14874 = vst [vmem:[#allocation114_spill] sm:$0xff] %v10916_v62  ;;  %v10933_v31 = vadd.f32 %v1639_v3, %v10409_v61  ;;  %1928 = vmatmul.bf16.gmra.mxu0 %v10398_v60  ;;  %v8799_v3 = vld [vmem:[%s14435_s7 + $0xb4] sm:$0xf0] }
 0x281   :  { %14875 = vst [vmem:[#allocation115_spill] sm:$0xff] %v10919_v55  ;;  %v1111_v50 = vpop.f32.mrf.mxu0  ;;  %v7326_v33 = vor.u32 %v8799_v3, %v7325_v44  ;;  %2103 = vmatpush.bf16.msrb.mxu2 %v7322_v40  ;;  %v7287_v40 = vld [vmem:[%s14435_s7 + $0x70] sm:$0xf0]  ;;  %v8791_v3 = vld [vmem:[%s14435_s7 + $0x74] sm:$0xf0]  ;;  %2000 = vmatpush.bf16.msrb.mxu1 %v7286_v2 }
 0x282   :  { %14876 = vst [vmem:[#allocation116_spill] sm:$0xff] %v10933_v31  ;;  %v1112_v49 = vadd.f32 %v10641_v29, %v1111_v50  ;;  %v7290_v50 = vor.u32 %v8786_v32, %v7287_v40  ;;  %v8782_v32 = vld [vmem:[%s14435_s7 + $0x2c] sm:$0xf0]  ;;  %v7255_v40 = vld [vmem:[%s14435_s7 + $0x30] sm:$0xf0] }
 0x283   :  { %2207 = vmatpush.bf16.msrb.mxu3 %v7326_v33  ;;  %v7254_v2 = vor.u32 %v8782_v32, %v7253_v1 }
 0x284   :  { %v1154_v55 = vmax.f32 %v1112_v49, 0.0  ;;  %v7294_v49 = vor.u32 %v8791_v3, %v7293_v52  ;;  %v7261_v52 = vld [vmem:[%s14435_s7 + $0x18] sm:$0xf] }
 0x285   :  { %v1743_v44 = vpop.f32.mrf.mxu2  ;;  %2104 = vmatpush.bf16.msrb.mxu2 %v7290_v50  ;;  %v8783_v3 = vld [vmem:[%s14435_s7 + $0x34] sm:$0xf0]  ;;  %2001 = vmatpush.bf16.msrb.mxu1 %v7254_v2 }
 0x286   :  { %v10966_v31 = vpack.c.bf16 %v1154_v55, %v1153_v53  ;;  %v10969_v47 = vadd.f32 %v1743_v44, %v10421_v35  ;;  %v1847_v57 = vpop.f32.mrf.mxu3  ;;  %v8778_v55 = vld [vmem:[%s14435_s7 + $0x14] sm:$0xf] }
 0x287   :  { %v10972_v33 = vadd.f32 %v1847_v57, %v10423_v54  ;;  %v7258_v50 = vor.u32 %v8778_v55, %v7255_v40  ;;  %2208 = vmatpush.bf16.msrb.mxu3 %v7294_v49  ;;  %v7262_v57 = vor.u32 %v8783_v3, %v7261_v52 }
 0x288   :  { %14877 = vst [vmem:[#allocation117_spill] sm:$0xff] %v10969_v47  ;;  %1671 = vmatmul.bf16.gmra.mxu1 %v10966_v31  ;;  %1775 = vmatmul.bf16.gmra.mxu2 %v10966_v31 }
 0x289   :  { %14878 = vst [vmem:[#allocation118_spill] sm:$0xff] %v10972_v33  ;;  %1879 = vmatmul.bf16.gmra.mxu3 %v10966_v31  ;;  %2105 = vmatpush.bf16.msrb.mxu2 %v7258_v50 }
 0x28b   :  { %2209 = vmatpush.bf16.msrb.mxu3 %v7262_v57 }
 0x28d   :  { %v1114_v1 = vpop.f32.mrf.mxu0 }
 0x28e   :  { %v1115_v55 = vadd.f32 %v10641_v29, %v1114_v1  ;;  %v7359_v1 = vld [vmem:[%s14435_s7 + $0xf8] sm:$0xf0] }
 0x290   :  { %v1642_v32 = vpop.f32.mrf.mxu1  ;;  %1933 = vmatmul.bf16.gmra.mxu0 %v10448_v36  ;;  %v1155_v52 = vmax.f32 %v1115_v55, 0.0 }
 0x291   :  { %v10999_v53 = vadd.f32 %v1642_v32, %v10409_v61  ;;  %v8803_v32 = vld [vmem:[%s14435_s7 + $0xdc] sm:$0xf] }
 0x293   :  { %14879 = vst [vmem:[#allocation119_spill] sm:$0xff] %v10999_v53 }
 0x295   :  { %v1116_v40 = vpop.f32.mrf.mxu0 }
 0x296   :  { %v1117_v33 = vadd.f32 %v10641_v29, %v1116_v40  ;;  %v1746_v47 = vpop.f32.mrf.mxu2  ;;  %v7362_v40 = vor.u32 %v8803_v32, %v7359_v1 }
 0x297   :  { %v11005_v49 = vadd.f32 %v1746_v47, %v10421_v35  ;;  %v1850_v2 = vpop.f32.mrf.mxu3 }
 0x298   :  { %v1156_v50 = vmax.f32 %v1117_v33, 0.0  ;;  %v11008_v3 = vadd.f32 %v1850_v2, %v10423_v54  ;;  %v1644_v57 = vpop.f32.mrf.mxu1  ;;  %v11026_v2 = vld [vmem:[%s14436_s8] sm:$0xff]  ;;  %2310 = vmatpush.bf16.msra.mxu0 %v7362_v40 }
 0x299   :  { %14880 = vst [vmem:[#allocation120_spill] sm:$0xff] %v11005_v49  ;;  %v11018_v47 = vadd.f32 %v1644_v57, %v10409_v61  ;;  %v11029_v44 = vperm.slane %v11026_v2, 3 }
 0x29a   :  { %14881 = vst [vmem:[#allocation121_spill] sm:$0xff] %v11008_v3  ;;  %v11020_v55 = vpack.c.bf16 %v1156_v50, %v1155_v52 }
 0x29b   :  { %14882 = vst [vmem:[#allocation122_spill] sm:$0xff] %v11018_v47 }
 0x29c   :  { %1676 = vmatmul.bf16.gmra.mxu1 %v11020_v55  ;;  %1780 = vmatmul.bf16.gmra.mxu2 %v11020_v55 }
 0x29d   :  { %1884 = vmatmul.bf16.gmra.mxu3 %v11020_v55  ;;  %v1899_v52 = vpop.f32.mrf.mxu0 }
 0x29e   :  { %v11036_v50 = vadd.f32 %v1899_v52, %v11029_v44  ;;  %v1748_v57 = vpop.f32.mrf.mxu2 }
 0x29f   :  { %v11039_v32 = vadd.f32 %v1748_v57, %v10421_v35  ;;  %v1852_v1 = vpop.f32.mrf.mxu3 }
 0x2a0   :  { %14883 = vst [vmem:[#allocation123_spill] sm:$0xff] %v11036_v50  ;;  %v11043_v29 = vadd.f32 %v1852_v1, %v10423_v54  ;;  %1938 = vmatmul.bf16.gmra.mxu0 %v10493_v51 }
 0x2a1   :  { %14884 = vst [vmem:[#allocation124_spill] sm:$0xff] %v11039_v32 }
 0x2a2   :  { %14885 = vst [vmem:[#allocation125_spill] sm:$0xff] %v11043_v29  ;;  %v1647_v3 = vpop.f32.mrf.mxu1 }
 0x2a3   :  { %v11049_v52 = vadd.f32 %v1647_v3, %v10409_v61 }
 0x2a5   :  { %14886 = vst [vmem:[#allocation126_spill] sm:$0xff] %v11049_v52  ;;  %v1901_v57 = vpop.f32.mrf.mxu0 }
 0x2a6   :  { %v11053_v47 = vadd.f32 %v1901_v57, %v11029_v44 }
 0x2a8   :  { %14887 = vst [vmem:[#allocation127_spill] sm:$0xff] %v11053_v47  ;;  %v1751_v1 = vpop.f32.mrf.mxu2 }
 0x2a9   :  { %v11057_v62 = vadd.f32 %v1751_v1, %v10421_v35  ;;  %v1855_v50 = vpop.f32.mrf.mxu3 }
 0x2aa   :  { %v11060_v40 = vadd.f32 %v1855_v50, %v10423_v54  ;;  %v1649_v53 = vpop.f32.mrf.mxu1 }
 0x2ab   :  { %14888 = vst [vmem:[#allocation128_spill] sm:$0xff] %v11057_v62  ;;  %v11064_v29 = vadd.f32 %v1649_v53, %v10409_v61 }
 0x2ac   :  { %14889 = vst [vmem:[#allocation129_spill] sm:$0xff] %v11060_v40  ;;  %2002 = vmatmul.bf16.vlgmr.msrb.gmra.mxu1 %v10195_v39  ;;  %2106 = vmatmul.bf16.vlgmr.msrb.gmra.mxu2 %v10195_v39 }
 0x2ad   :  { %14890 = vst [vmem:[#allocation130_spill] sm:$0xff] %v11064_v29  ;;  %2210 = vmatmul.bf16.vlgmr.msrb.gmra.mxu3 %v10195_v39  ;;  %v1904_v1 = vpop.f32.mrf.mxu0 }
 0x2ae   :  { %v11072_v50 = vadd.f32 %v1904_v1, %v11029_v44 }
 0x2b0   :  { %14891 = vst [vmem:[#allocation131_spill] sm:$0xff] %v11072_v50  ;;  %v1753_v3 = vpop.f32.mrf.mxu2  ;;  %1943 = vmatmul.bf16.gmra.mxu0 %v10537_v0 }
 0x2b1   :  { %v11077_v53 = vadd.f32 %v1753_v3, %v10421_v35  ;;  %v1857_v49 = vpop.f32.mrf.mxu3 }
 0x2b2   :  { %v11080_v40 = vadd.f32 %v1857_v49, %v10423_v54 }
 0x2b3   :  { %14892 = vst [vmem:[#allocation132_spill] sm:$0xff] %v11077_v53 }
 0x2b4   :  { %14893 = vst [vmem:[#allocation133_spill] sm:$0xff] %v11080_v40  ;;  %v1652_v52 = vpop.f32.mrf.mxu1 }
 0x2b5   :  { %v11085_v1 = vadd.f32 %v1652_v52, %v10409_v61  ;;  %v1906_v29 = vpop.f32.mrf.mxu0 }
 0x2b6   :  { %v11088_v33 = vadd.f32 %v1906_v29, %v11029_v44  ;;  %v8795_v29 = vld [vmem:[%s14435_s7 + $0x9c] sm:$0xf] }
 0x2b7   :  { %14894 = vst [vmem:[#allocation134_spill] sm:$0xff] %v11085_v1 }
 0x2b8   :  { %14895 = vst [vmem:[#allocation135_spill] sm:$0xff] %v11088_v33 }
 0x2ba   :  { %v1756_v47 = vpop.f32.mrf.mxu2 }
 0x2bb   :  { %v11093_v49 = vadd.f32 %v1756_v47, %v10421_v35  ;;  %v1860_v50 = vpop.f32.mrf.mxu3 }
 0x2bc   :  { %v11096_v57 = vadd.f32 %v1860_v50, %v10423_v54  ;;  %v1654_v62 = vpop.f32.mrf.mxu1  ;;  %2007 = vmatmul.bf16.gmra.mxu1 %v10221_v48  ;;  %2111 = vmatmul.bf16.gmra.mxu2 %v10221_v48 }
 0x2bd   :  { %14896 = vst [vmem:[#allocation136_spill] sm:$0xff] %v11093_v49  ;;  %v11102_v52 = vadd.f32 %v1654_v62, %v10409_v61  ;;  %2215 = vmatmul.bf16.gmra.mxu3 %v10221_v48  ;;  %v1909_v32 = vpop.f32.mrf.mxu0  ;;  %v7327_v62 = vld [vmem:[%s14435_s7 + $0xb8] sm:$0xf0] }
 0x2be   :  { %14897 = vst [vmem:[#allocation137_spill] sm:$0xff] %v11096_v57  ;;  %v11107_v3 = vadd.f32 %v1909_v32, %v11029_v44  ;;  %v7330_v53 = vor.u32 %v8795_v29, %v7327_v62 }
 0x2bf   :  { %14898 = vst [vmem:[#allocation138_spill] sm:$0xff] %v11102_v52 }
 0x2c0   :  { %14899 = vst [vmem:[#allocation139_spill] sm:$0xff] %v11107_v3  ;;  %1948 = vmatmul.bf16.gmra.mxu0 %v10575_v59 }
 0x2c1   :  { %2311 = vmatpush.bf16.msra.mxu0 %v7330_v53 }
 0x2c2   :  { %v1758_v49 = vpop.f32.mrf.mxu2 }
 0x2c3   :  { %v11119_v47 = vadd.f32 %v1758_v49, %v10421_v35  ;;  %v1862_v32 = vpop.f32.mrf.mxu3 }
 0x2c4   :  { %v11122_v50 = vadd.f32 %v1862_v32, %v10423_v54 }
 0x2c5   :  { %14900 = vst [vmem:[#allocation140_spill] sm:$0xff] %v11119_v47  ;;  %v1911_v52 = vpop.f32.mrf.mxu0 }
 0x2c6   :  { %14901 = vst [vmem:[#allocation141_spill] sm:$0xff] %v11122_v50  ;;  %v11127_v1 = vadd.f32 %v1911_v52, %v11029_v44 }
 0x2c8   :  { %14902 = vst [vmem:[#allocation142_spill] sm:$0xff] %v11127_v1  ;;  %v1657_v29 = vpop.f32.mrf.mxu1 }
 0x2c9   :  { %v11131_v62 = vadd.f32 %v1657_v29, %v10409_v61 }
 0x2cb   :  { %14903 = vst [vmem:[#allocation143_spill] sm:$0xff] %v11131_v62 }
 0x2cc   :  { %2012 = vmatmul.bf16.gmra.mxu1 %v10264_v45  ;;  %2116 = vmatmul.bf16.gmra.mxu2 %v10264_v45 }
 0x2cd   :  { %2220 = vmatmul.bf16.gmra.mxu3 %v10264_v45  ;;  %v1914_v53 = vpop.f32.mrf.mxu0 }
 0x2ce   :  { %v11138_v32 = vadd.f32 %v1914_v53, %v11029_v44  ;;  %v1761_v52 = vpop.f32.mrf.mxu2 }
 0x2cf   :  { %v11141_v57 = vadd.f32 %v1761_v52, %v10421_v35  ;;  %v1865_v40 = vpop.f32.mrf.mxu3 }
 0x2d0   :  { %14904 = vst [vmem:[#allocation144_spill] sm:$0xff] %v11138_v32  ;;  %v11145_v33 = vadd.f32 %v1865_v40, %v10423_v54  ;;  %v1659_v49 = vpop.f32.mrf.mxu1  ;;  %1953 = vmatmul.bf16.gmra.mxu0 %v10653_v34 }
 0x2d1   :  { %14905 = vst [vmem:[#allocation145_spill] sm:$0xff] %v11141_v57  ;;  %v11150_v47 = vadd.f32 %v1659_v49, %v10409_v61 }
 0x2d2   :  { %14906 = vst [vmem:[#allocation146_spill] sm:$0xff] %v11145_v33  ;;  %v8787_v33 = vld [vmem:[%s14435_s7 + $0x5c] sm:$0xf] }
 0x2d3   :  { %14907 = vst [vmem:[#allocation147_spill] sm:$0xff] %v11150_v47 }
 0x2d5   :  { %v1916_v52 = vpop.f32.mrf.mxu0 }
 0x2d6   :  { %v11155_v41 = vadd.f32 %v1916_v52, %v11029_v44  ;;  %v1763_v29 = vpop.f32.mrf.mxu2 }
 0x2d7   :  { %v11158_v40 = vadd.f32 %v1763_v29, %v10421_v35  ;;  %v1867_v32 = vpop.f32.mrf.mxu3 }
 0x2d8   :  { %14908 = vst [vmem:[#allocation148_spill] sm:$0xff] %v11155_v41  ;;  %v11162_v50 = vadd.f32 %v1867_v32, %v10423_v54 }
 0x2d9   :  { %14909 = vst [vmem:[#allocation149_spill] sm:$0xff] %v11158_v40 }
 0x2da   :  { %14910 = vst [vmem:[#allocation150_spill] sm:$0xff] %v11162_v50 }
 0x2dc   :  { %2017 = vmatmul.bf16.gmra.mxu1 %v10315_v63  ;;  %2121 = vmatmul.bf16.gmra.mxu2 %v10315_v63 }
 0x2dd   :  { %2225 = vmatmul.bf16.gmra.mxu3 %v10315_v63  ;;  %v1919_v52 = vpop.f32.mrf.mxu0 }
 0x2de   :  { %v11170_v29 = vadd.f32 %v1919_v52, %v11029_v44  ;;  %v7295_v52 = vld [vmem:[%s14435_s7 + $0x78] sm:$0xf0] }
 0x2df   :  { %v7298_v62 = vor.u32 %v8787_v33, %v7295_v52 }
 0x2e0   :  { %14911 = vst [vmem:[#allocation151_spill] sm:$0xff] %v11170_v29  ;;  %1958 = vmatmul.bf16.gmra.mxu0 %v10694_v42 }
 0x2e1   :  { %v1662_v32 = vpop.f32.mrf.mxu1  ;;  %2312 = vmatpush.bf16.msra.mxu0 %v7298_v62 }
 0x2e2   :  { %v11175_v38 = vadd.f32 %v1662_v32, %v10409_v61 }
 0x2e4   :  { %14912 = vst [vmem:[#allocation152_spill] sm:$0xff] %v11175_v38 }
 0x2e5   :  { %v1921_v49 = vpop.f32.mrf.mxu0 }
 0x2e6   :  { %v11185_v57 = vadd.f32 %v1921_v49, %v11029_v44 }
 0x2e7   :  { %v1766_v50 = vpop.f32.mrf.mxu2 }
 0x2e8   :  { %14913 = vst [vmem:[#allocation153_spill] sm:$0xff] %v11185_v57  ;;  %v11189_v32 = vadd.f32 %v1766_v50, %v10421_v35  ;;  %v1870_v53 = vpop.f32.mrf.mxu3 }
 0x2e9   :  { %v11192_v38 = vadd.f32 %v1870_v53, %v10423_v54  ;;  %v1664_v47 = vpop.f32.mrf.mxu1 }
 0x2ea   :  { %14914 = vst [vmem:[#allocation154_spill] sm:$0xff] %v11189_v32  ;;  %v11196_v29 = vadd.f32 %v1664_v47, %v10409_v61 }
 0x2eb   :  { %14915 = vst [vmem:[#allocation155_spill] sm:$0xff] %v11192_v38 }
 0x2ec   :  { %14916 = vst [vmem:[#allocation156_spill] sm:$0xff] %v11196_v29  ;;  %2022 = vmatmul.bf16.gmra.mxu1 %v10350_v56  ;;  %2126 = vmatmul.bf16.gmra.mxu2 %v10350_v56 }
 0x2ed   :  { %2230 = vmatmul.bf16.gmra.mxu3 %v10350_v56  ;;  %v1924_v50 = vpop.f32.mrf.mxu0 }
 0x2ee   :  { %v11204_v62 = vadd.f32 %v1924_v50, %v11029_v44 }
 0x2ef   :  { %v1768_v53 = vpop.f32.mrf.mxu2 }
 0x2f0   :  { %14917 = vst [vmem:[#allocation157_spill] sm:$0xff] %v11204_v62  ;;  %v11208_v47 = vadd.f32 %v1768_v53, %v10421_v35  ;;  %v1872_v41 = vpop.f32.mrf.mxu3  ;;  %1963 = vmatmul.bf16.gmra.mxu0 %v10735_v58 }
 0x2f1   :  { %v11212_v49 = vadd.f32 %v1872_v41, %v10423_v54 }
 0x2f2   :  { %14918 = vst [vmem:[#allocation158_spill] sm:$0xff] %v11208_v47 }
 0x2f3   :  { %14919 = vst [vmem:[#allocation159_spill] sm:$0xff] %v11212_v49  ;;  %v1667_v38 = vpop.f32.mrf.mxu1 }
 0x2f4   :  { %v11217_v50 = vadd.f32 %v1667_v38, %v10409_v61 }
 0x2f5   :  { %v1926_v32 = vpop.f32.mrf.mxu0 }
 0x2f6   :  { %14920 = vst [vmem:[#allocation160_spill] sm:$0xff] %v11217_v50  ;;  %v11221_v53 = vadd.f32 %v1926_v32, %v11029_v44 }
 0x2f8   :  { %14921 = vst [vmem:[#allocation161_spill] sm:$0xff] %v11221_v53 }
 0x2f9   :  { %v1771_v57 = vpop.f32.mrf.mxu2 }
 0x2fa   :  { %v11225_v41 = vadd.f32 %v1771_v57, %v10421_v35  ;;  %v1875_v62 = vpop.f32.mrf.mxu3 }
 0x2fb   :  { %v11228_v33 = vadd.f32 %v1875_v62, %v10423_v54  ;;  %v1669_v40 = vpop.f32.mrf.mxu1 }
 0x2fc   :  { %14922 = vst [vmem:[#allocation162_spill] sm:$0xff] %v11225_v41  ;;  %v11232_v49 = vadd.f32 %v1669_v40, %v10409_v61  ;;  %2027 = vmatmul.bf16.gmra.mxu1 %v10381_v37  ;;  %2131 = vmatmul.bf16.gmra.mxu2 %v10381_v37 }
 0x2fd   :  { %14923 = vst [vmem:[#allocation163_spill] sm:$0xff] %v11228_v33  ;;  %2235 = vmatmul.bf16.gmra.mxu3 %v10381_v37  ;;  %v1929_v57 = vpop.f32.mrf.mxu0 }
 0x2fe   :  { %14924 = vst [vmem:[#allocation164_spill] sm:$0xff] %v11232_v49  ;;  %v11240_v62 = vadd.f32 %v1929_v57, %v11029_v44 }
 0x300   :  { %14925 = vst [vmem:[#allocation165_spill] sm:$0xff] %v11240_v62  ;;  %1968 = vmatmul.bf16.gmra.mxu0 %v10777_v28 }
 0x301   :  { %v1773_v40 = vpop.f32.mrf.mxu2 }
 0x302   :  { %v11245_v38 = vadd.f32 %v1773_v40, %v10421_v35  ;;  %v1877_v47 = vpop.f32.mrf.mxu3 }
 0x303   :  { %v11248_v41 = vadd.f32 %v1877_v47, %v10423_v54 }
 0x304   :  { %14926 = vst [vmem:[#allocation166_spill] sm:$0xff] %v11245_v38 }
 0x305   :  { %14927 = vst [vmem:[#allocation167_spill] sm:$0xff] %v11248_v41  ;;  %v1672_v52 = vpop.f32.mrf.mxu1  ;;  %v1931_v49 = vpop.f32.mrf.mxu0 }
 0x306   :  { %v11253_v57 = vadd.f32 %v1672_v52, %v10409_v61  ;;  %v11256_v29 = vadd.f32 %v1931_v49, %v11029_v44  ;;  %v8779_v52 = vld [vmem:[%s14435_s7 + $0x1c] sm:$0xf] }
 0x307   :  { %v7263_v49 = vld [vmem:[%s14435_s7 + $0x38] sm:$0xf0] }
 0x308   :  { %14928 = vst [vmem:[#allocation168_spill] sm:$0xff] %v11253_v57  ;;  %v7266_v50 = vor.u32 %v8779_v52, %v7263_v49 }
 0x309   :  { %14929 = vst [vmem:[#allocation169_spill] sm:$0xff] %v11256_v29 }
 0x30a   :  { %2313 = vmatpush.bf16.msra.mxu0 %v7266_v50 }
 0x30b   :  { %v1776_v62 = vpop.f32.mrf.mxu2 }
 0x30c   :  { %v11261_v47 = vadd.f32 %v1776_v62, %v10421_v35  ;;  %v1880_v53 = vpop.f32.mrf.mxu3  ;;  %2032 = vmatmul.bf16.gmra.mxu1 %v10398_v60  ;;  %2136 = vmatmul.bf16.gmra.mxu2 %v10398_v60 }
 0x30d   :  { %v11272_v33 = vadd.f32 %v1880_v53, %v10423_v54  ;;  %2240 = vmatmul.bf16.gmra.mxu3 %v10398_v60  ;;  %v1674_v62 = vpop.f32.mrf.mxu1  ;;  %v1934_v32 = vpop.f32.mrf.mxu0 }
 0x30e   :  { %14930 = vst [vmem:[#allocation170_spill] sm:$0xff] %v11261_v47  ;;  %v11277_v41 = vadd.f32 %v1674_v62, %v10409_v61  ;;  %v11280_v38 = vadd.f32 %v1934_v32, %v11029_v44 }
 0x30f   :  { %14931 = vst [vmem:[#allocation171_spill] sm:$0xff] %v11272_v33 }
 0x310   :  { %14932 = vst [vmem:[#allocation172_spill] sm:$0xff] %v11277_v41  ;;  %1973 = vmatmul.bf16.gmra.mxu0 %v10830_v46  ;;  %v11326_v41 = vperm.slane %v11026_v2, 4 }
 0x311   :  { %14933 = vst [vmem:[#allocation173_spill] sm:$0xff] %v11280_v38 }
 0x313   :  { %v1778_v1 = vpop.f32.mrf.mxu2 }
 0x314   :  { %v11287_v52 = vadd.f32 %v1778_v1, %v10421_v35  ;;  %v1882_v49 = vpop.f32.mrf.mxu3 }
 0x315   :  { %v11290_v62 = vadd.f32 %v1882_v49, %v10423_v54  ;;  %v1936_v40 = vpop.f32.mrf.mxu0 }
 0x316   :  { %14934 = vst [vmem:[#allocation174_spill] sm:$0xff] %v11287_v52  ;;  %v11294_v57 = vadd.f32 %v1936_v40, %v11029_v44 }
 0x317   :  { %14935 = vst [vmem:[#allocation175_spill] sm:$0xff] %v11290_v62 }
 0x318   :  { %14936 = vst [vmem:[#allocation176_spill] sm:$0xff] %v11294_v57 }
 0x319   :  { %v1677_v53 = vpop.f32.mrf.mxu1 }
 0x31a   :  { %v11299_v33 = vadd.f32 %v1677_v53, %v10409_v61 }
 0x31c   :  { %14937 = vst [vmem:[#allocation177_spill] sm:$0xff] %v11299_v33  ;;  %2037 = vmatmul.bf16.gmra.mxu1 %v10448_v36  ;;  %2141 = vmatmul.bf16.gmra.mxu2 %v10448_v36 }
 0x31d   :  { %2245 = vmatmul.bf16.gmra.mxu3 %v10448_v36  ;;  %v1939_v49 = vpop.f32.mrf.mxu0 }
 0x31e   :  { %v11306_v40 = vadd.f32 %v1939_v49, %v11029_v44 }
 0x31f   :  { %v1781_v32 = vpop.f32.mrf.mxu2 }
 0x320   :  { %14938 = vst [vmem:[#allocation178_spill] sm:$0xff] %v11306_v40  ;;  %v11310_v29 = vadd.f32 %v1781_v32, %v10421_v35  ;;  %v1885_v53 = vpop.f32.mrf.mxu3  ;;  %1978 = vmatmul.bf16.gmra.mxu0 %v10883_v43 }
 0x321   :  { %v11314_v1 = vadd.f32 %v1885_v53, %v10423_v54  ;;  %v1679_v33 = vpop.f32.mrf.mxu1 }
 0x322   :  { %14939 = vst [vmem:[#allocation179_spill] sm:$0xff] %v11310_v29  ;;  %v11318_v62 = vadd.f32 %v1679_v33, %v10409_v61 }
 0x323   :  { %14940 = vst [vmem:[#allocation180_spill] sm:$0xff] %v11314_v1 }
 0x324   :  { %14941 = vst [vmem:[#allocation181_spill] sm:$0xff] %v11318_v62 }
 0x325   :  { %v1941_v50 = vpop.f32.mrf.mxu0 }
 0x326   :  { %v11323_v32 = vadd.f32 %v1941_v50, %v11029_v44 }
 0x327   :  { %v1783_v57 = vpop.f32.mrf.mxu2 }
 0x328   :  { %14942 = vst [vmem:[#allocation182_spill] sm:$0xff] %v11323_v32  ;;  %v11330_v40 = vadd.f32 %v1783_v57, %v10421_v35  ;;  %v1887_v47 = vpop.f32.mrf.mxu3  ;;  %v11344_v35 = vperm.slane %v11026_v2, 5  ;;  %v11348_v57 = vperm.slane %v11026_v2, 6 }
 0x329   :  { %v11333_v61 = vadd.f32 %v1887_v47, %v10423_v54  ;;  %v2003_v33 = vpop.f32.mrf.mxu1 }
 0x32a   :  { %14943 = vst [vmem:[#allocation183_spill] sm:$0xff] %v11330_v40  ;;  %v11337_v52 = vadd.f32 %v2003_v33, %v11326_v41 }
 0x32b   :  { %14944 = vst [vmem:[#allocation184_spill] sm:$0xff] %v11333_v61 }
 0x32c   :  { %14945 = vst [vmem:[#allocation185_spill] sm:$0xff] %v11337_v52  ;;  %2042 = vmatmul.bf16.gmra.mxu1 %v10493_v51  ;;  %2146 = vmatmul.bf16.gmra.mxu2 %v10493_v51 }
 0x32d   :  { %2250 = vmatmul.bf16.gmra.mxu3 %v10493_v51  ;;  %v1944_v54 = vpop.f32.mrf.mxu0 }
 0x32e   :  { %v11351_v47 = vadd.f32 %v1944_v54, %v11029_v44 }
 0x32f   :  { %v2107_v33 = vpop.f32.mrf.mxu2 }
 0x330   :  { %14946 = vst [vmem:[#allocation186_spill] sm:$0xff] %v11351_v47  ;;  %v11355_v49 = vadd.f32 %v2107_v33, %v11344_v35  ;;  %v2211_v53 = vpop.f32.mrf.mxu3  ;;  %1983 = vmatmul.bf16.gmra.mxu0 %v10966_v31 }
 0x331   :  { %v11359_v1 = vadd.f32 %v2211_v53, %v11348_v57  ;;  %v2005_v29 = vpop.f32.mrf.mxu1 }
 0x332   :  { %14947 = vst [vmem:[#allocation187_spill] sm:$0xff] %v11355_v49  ;;  %v11363_v2 = vadd.f32 %v2005_v29, %v11326_v41 }
 0x333   :  { %14948 = vst [vmem:[#allocation188_spill] sm:$0xff] %v11359_v1 }
 0x334   :  { %14949 = vst [vmem:[#allocation189_spill] sm:$0xff] %v11363_v2 }
 0x335   :  { %v1946_v50 = vpop.f32.mrf.mxu0 }
 0x336   :  { %v11368_v33 = vadd.f32 %v1946_v50, %v11029_v44 }
 0x337   :  { %v2109_v62 = vpop.f32.mrf.mxu2 }
 0x338   :  { %14950 = vst [vmem:[#allocation190_spill] sm:$0xff] %v11368_v33  ;;  %v11372_v53 = vadd.f32 %v2109_v62, %v11344_v35  ;;  %v2213_v32 = vpop.f32.mrf.mxu3 }
 0x339   :  { %v11375_v61 = vadd.f32 %v2213_v32, %v11348_v57  ;;  %v2008_v29 = vpop.f32.mrf.mxu1 }
 0x33a   :  { %14951 = vst [vmem:[#allocation191_spill] sm:$0xff] %v11372_v53  ;;  %v11379_v54 = vadd.f32 %v2008_v29, %v11326_v41 }
 0x33b   :  { %14952 = vst [vmem:[#allocation192_spill] sm:$0xff] %v11375_v61 }
 0x33c   :  { %14953 = vst [vmem:[#allocation193_spill] sm:$0xff] %v11379_v54  ;;  %2047 = vmatmul.bf16.gmra.mxu1 %v10537_v0  ;;  %2151 = vmatmul.bf16.gmra.mxu2 %v10537_v0 }
 0x33d   :  { %2255 = vmatmul.bf16.gmra.mxu3 %v10537_v0  ;;  %v1949_v62 = vpop.f32.mrf.mxu0 }
 0x33e   :  { %v11387_v32 = vadd.f32 %v1949_v62, %v11029_v44 }
 0x33f   :  { %v2112_v47 = vpop.f32.mrf.mxu2 }
 0x340   :  { %14954 = vst [vmem:[#allocation194_spill] sm:$0xff] %v11387_v32  ;;  %v11391_v29 = vadd.f32 %v2112_v47, %v11344_v35  ;;  %v2216_v33 = vpop.f32.mrf.mxu3  ;;  %1988 = vmatmul.bf16.gmra.mxu0 %v11020_v55 }
 0x341   :  { %v11395_v40 = vadd.f32 %v2216_v33, %v11348_v57  ;;  %v2010_v50 = vpop.f32.mrf.mxu1 }
 0x342   :  { %14955 = vst [vmem:[#allocation195_spill] sm:$0xff] %v11391_v29  ;;  %v11399_v53 = vadd.f32 %v2010_v50, %v11326_v41 }
 0x343   :  { %14956 = vst [vmem:[#allocation196_spill] sm:$0xff] %v11395_v40 }
 0x344   :  { %14957 = vst [vmem:[#allocation197_spill] sm:$0xff] %v11399_v53 }
 0x345   :  { %v1951_v38 = vpop.f32.mrf.mxu0 }
 0x346   :  { %v11404_v47 = vadd.f32 %v1951_v38, %v11029_v44 }
 0x347   :  { %v2114_v32 = vpop.f32.mrf.mxu2 }
 0x348   :  { %14958 = vst [vmem:[#allocation198_spill] sm:$0xff] %v11404_v47  ;;  %v11408_v33 = vadd.f32 %v2114_v32, %v11344_v35  ;;  %v2218_v49 = vpop.f32.mrf.mxu3 }
 0x349   :  { %v11411_v61 = vadd.f32 %v2218_v49, %v11348_v57  ;;  %v2013_v50 = vpop.f32.mrf.mxu1 }
 0x34a   :  { %14959 = vst [vmem:[#allocation199_spill] sm:$0xff] %v11408_v33  ;;  %v11415_v62 = vadd.f32 %v2013_v50, %v11326_v41 }
 0x34b   :  { %14960 = vst [vmem:[#allocation200_spill] sm:$0xff] %v11411_v61 }
 0x34c   :  { %14961 = vst [vmem:[#allocation201_spill] sm:$0xff] %v11415_v62  ;;  %2052 = vmatmul.bf16.gmra.mxu1 %v10575_v59  ;;  %2156 = vmatmul.bf16.gmra.mxu2 %v10575_v59 }
 0x34d   :  { %2260 = vmatmul.bf16.gmra.mxu3 %v10575_v59  ;;  %v1954_v32 = vpop.f32.mrf.mxu0 }
 0x34e   :  { %v11423_v49 = vadd.f32 %v1954_v32, %v11029_v44 }
 0x34f   :  { %v2117_v1 = vpop.f32.mrf.mxu2 }
 0x350   :  { %14962 = vst [vmem:[#allocation202_spill] sm:$0xff] %v11423_v49  ;;  %v11427_v50 = vadd.f32 %v2117_v1, %v11344_v35  ;;  %v2221_v47 = vpop.f32.mrf.mxu3  ;;  %2314 = vmatmul.bf16.vlgmr.msra.gmra.mxu0 %v10195_v39 }
 0x351   :  { %v11431_v2 = vadd.f32 %v2221_v47, %v11348_v57  ;;  %v2015_v38 = vpop.f32.mrf.mxu1 }
 0x352   :  { %14963 = vst [vmem:[#allocation203_spill] sm:$0xff] %v11427_v50  ;;  %v11435_v33 = vadd.f32 %v2015_v38, %v11326_v41 }
 0x353   :  { %14964 = vst [vmem:[#allocation204_spill] sm:$0xff] %v11431_v2 }
 0x354   :  { %14965 = vst [vmem:[#allocation205_spill] sm:$0xff] %v11435_v33 }
 0x355   :  { %v1956_v52 = vpop.f32.mrf.mxu0 }
 0x356   :  { %v11440_v1 = vadd.f32 %v1956_v52, %v11029_v44 }
 0x357   :  { %v2119_v49 = vpop.f32.mrf.mxu2 }
 0x358   :  { %14966 = vst [vmem:[#allocation206_spill] sm:$0xff] %v11440_v1  ;;  %v11444_v47 = vadd.f32 %v2119_v49, %v11344_v35  ;;  %v2223_v40 = vpop.f32.mrf.mxu3 }
 0x359   :  { %v11447_v61 = vadd.f32 %v2223_v40, %v11348_v57  ;;  %v2018_v38 = vpop.f32.mrf.mxu1 }
 0x35a   :  { %14967 = vst [vmem:[#allocation207_spill] sm:$0xff] %v11444_v47  ;;  %v11451_v32 = vadd.f32 %v2018_v38, %v11326_v41 }
 0x35b   :  { %14968 = vst [vmem:[#allocation208_spill] sm:$0xff] %v11447_v61 }
 0x35c   :  { %14969 = vst [vmem:[#allocation209_spill] sm:$0xff] %v11451_v32  ;;  %2057 = vmatmul.bf16.gmra.mxu1 %v10653_v34  ;;  %2161 = vmatmul.bf16.gmra.mxu2 %v10653_v34 }
 0x35d   :  { %2265 = vmatmul.bf16.gmra.mxu3 %v10653_v34  ;;  %v1959_v49 = vpop.f32.mrf.mxu0 }
 0x35e   :  { %v11459_v40 = vadd.f32 %v1959_v49, %v11029_v44 }
 0x35f   :  { %v2122_v39 = vpop.f32.mrf.mxu2 }
 0x360   :  { %14970 = vst [vmem:[#allocation210_spill] sm:$0xff] %v11459_v40  ;;  %v11463_v38 = vadd.f32 %v2122_v39, %v11344_v35  ;;  %v2226_v1 = vpop.f32.mrf.mxu3  ;;  %2319 = vmatmul.bf16.gmra.mxu0 %v10221_v48 }
 0x361   :  { %v11467_v52 = vadd.f32 %v2226_v1, %v11348_v57  ;;  %v2020_v53 = vpop.f32.mrf.mxu1 }
 0x362   :  { %14971 = vst [vmem:[#allocation211_spill] sm:$0xff] %v11463_v38  ;;  %v11471_v54 = vadd.f32 %v2020_v53, %v11326_v41 }
 0x363   :  { %14972 = vst [vmem:[#allocation212_spill] sm:$0xff] %v11467_v52 }
 0x364   :  { %14973 = vst [vmem:[#allocation213_spill] sm:$0xff] %v11471_v54 }
 0x365   :  { %v1961_v29 = vpop.f32.mrf.mxu0 }
 0x366   :  { %v11476_v39 = vadd.f32 %v1961_v29, %v11029_v44 }
 0x367   :  { %v2124_v40 = vpop.f32.mrf.mxu2 }
 0x368   :  { %14974 = vst [vmem:[#allocation214_spill] sm:$0xff] %v11476_v39  ;;  %v11480_v1 = vadd.f32 %v2124_v40, %v11344_v35  ;;  %v2228_v47 = vpop.f32.mrf.mxu3 }
 0x369   :  { %v11483_v32 = vadd.f32 %v2228_v47, %v11348_v57  ;;  %v2023_v53 = vpop.f32.mrf.mxu1 }
 0x36a   :  { %14975 = vst [vmem:[#allocation215_spill] sm:$0xff] %v11480_v1  ;;  %v11487_v49 = vadd.f32 %v2023_v53, %v11326_v41 }
 0x36b   :  { %14976 = vst [vmem:[#allocation216_spill] sm:$0xff] %v11483_v32 }
 0x36c   :  { %14977 = vst [vmem:[#allocation217_spill] sm:$0xff] %v11487_v49  ;;  %2062 = vmatmul.bf16.gmra.mxu1 %v10694_v42  ;;  %2166 = vmatmul.bf16.gmra.mxu2 %v10694_v42 }
 0x36d   :  { %2270 = vmatmul.bf16.gmra.mxu3 %v10694_v42  ;;  %v1964_v40 = vpop.f32.mrf.mxu0 }
 0x36e   :  { %v11495_v47 = vadd.f32 %v1964_v40, %v11029_v44 }
 0x36f   :  { %v2127_v48 = vpop.f32.mrf.mxu2 }
 0x370   :  { %14978 = vst [vmem:[#allocation218_spill] sm:$0xff] %v11495_v47  ;;  %v11499_v53 = vadd.f32 %v2127_v48, %v11344_v35  ;;  %v2231_v39 = vpop.f32.mrf.mxu3  ;;  %2324 = vmatmul.bf16.gmra.mxu0 %v10264_v45 }
 0x371   :  { %v11503_v61 = vadd.f32 %v2231_v39, %v11348_v57  ;;  %v2025_v29 = vpop.f32.mrf.mxu1 }
 0x372   :  { %14979 = vst [vmem:[#allocation219_spill] sm:$0xff] %v11499_v53  ;;  %v11507_v32 = vadd.f32 %v2025_v29, %v11326_v41 }
 0x373   :  { %14980 = vst [vmem:[#allocation220_spill] sm:$0xff] %v11503_v61 }
 0x374   :  { %14981 = vst [vmem:[#allocation221_spill] sm:$0xff] %v11507_v32 }
 0x375   :  { %v1966_v38 = vpop.f32.mrf.mxu0 }
 0x376   :  { %v11512_v48 = vadd.f32 %v1966_v38, %v11029_v44 }
 0x377   :  { %v2129_v47 = vpop.f32.mrf.mxu2 }
 0x378   :  { %14982 = vst [vmem:[#allocation222_spill] sm:$0xff] %v11512_v48  ;;  %v11516_v39 = vadd.f32 %v2129_v47, %v11344_v35  ;;  %v2233_v54 = vpop.f32.mrf.mxu3 }
 0x379   :  { %v11519_v52 = vadd.f32 %v2233_v54, %v11348_v57  ;;  %v2028_v29 = vpop.f32.mrf.mxu1 }
 0x37a   :  { %14983 = vst [vmem:[#allocation223_spill] sm:$0xff] %v11516_v39  ;;  %v11523_v40 = vadd.f32 %v2028_v29, %v11326_v41 }
 0x37b   :  { %14984 = vst [vmem:[#allocation224_spill] sm:$0xff] %v11519_v52 }
 0x37c   :  { %14985 = vst [vmem:[#allocation225_spill] sm:$0xff] %v11523_v40  ;;  %2067 = vmatmul.bf16.gmra.mxu1 %v10735_v58  ;;  %2171 = vmatmul.bf16.gmra.mxu2 %v10735_v58 }
 0x37d   :  { %2275 = vmatmul.bf16.gmra.mxu3 %v10735_v58  ;;  %v1969_v47 = vpop.f32.mrf.mxu0 }
 0x37e   :  { %v11531_v54 = vadd.f32 %v1969_v47, %v11029_v44 }
 0x37f   :  { %v2132_v45 = vpop.f32.mrf.mxu2 }
 0x380   :  { %14986 = vst [vmem:[#allocation226_spill] sm:$0xff] %v11531_v54  ;;  %v11535_v29 = vadd.f32 %v2132_v45, %v11344_v35  ;;  %v2236_v48 = vpop.f32.mrf.mxu3  ;;  %2329 = vmatmul.bf16.gmra.mxu0 %v10315_v63 }
 0x381   :  { %v11539_v1 = vadd.f32 %v2236_v48, %v11348_v57  ;;  %v2030_v38 = vpop.f32.mrf.mxu1 }
 0x382   :  { %14987 = vst [vmem:[#allocation227_spill] sm:$0xff] %v11535_v29  ;;  %v11543_v39 = vadd.f32 %v2030_v38, %v11326_v41 }
 0x383   :  { %14988 = vst [vmem:[#allocation228_spill] sm:$0xff] %v11539_v1 }
 0x384   :  { %14989 = vst [vmem:[#allocation229_spill] sm:$0xff] %v11543_v39 }
 0x385   :  { %v1971_v53 = vpop.f32.mrf.mxu0 }
 0x386   :  { %v11548_v45 = vadd.f32 %v1971_v53, %v11029_v44 }
 0x387   :  { %v2134_v54 = vpop.f32.mrf.mxu2 }
 0x388   :  { %14990 = vst [vmem:[#allocation230_spill] sm:$0xff] %v11548_v45  ;;  %v11552_v48 = vadd.f32 %v2134_v54, %v11344_v35  ;;  %v2238_v40 = vpop.f32.mrf.mxu3 }
 0x389   :  { %v11555_v52 = vadd.f32 %v2238_v40, %v11348_v57  ;;  %v2033_v38 = vpop.f32.mrf.mxu1 }
 0x38a   :  { %14991 = vst [vmem:[#allocation231_spill] sm:$0xff] %v11552_v48  ;;  %v11559_v47 = vadd.f32 %v2033_v38, %v11326_v41 }
 0x38b   :  { %14992 = vst [vmem:[#allocation232_spill] sm:$0xff] %v11555_v52 }
 0x38c   :  { %14993 = vst [vmem:[#allocation233_spill] sm:$0xff] %v11559_v47  ;;  %2072 = vmatmul.bf16.gmra.mxu1 %v10777_v28  ;;  %2176 = vmatmul.bf16.gmra.mxu2 %v10777_v28 }
 0x38d   :  { %2280 = vmatmul.bf16.gmra.mxu3 %v10777_v28  ;;  %v1974_v54 = vpop.f32.mrf.mxu0 }
 0x38e   :  { %v11567_v40 = vadd.f32 %v1974_v54, %v11029_v44 }
 0x38f   :  { %v2137_v63 = vpop.f32.mrf.mxu2 }
 0x390   :  { %14994 = vst [vmem:[#allocation234_spill] sm:$0xff] %v11567_v40  ;;  %v11571_v38 = vadd.f32 %v2137_v63, %v11344_v35  ;;  %v2241_v45 = vpop.f32.mrf.mxu3  ;;  %2334 = vmatmul.bf16.gmra.mxu0 %v10350_v56 }
 0x391   :  { %v11575_v53 = vadd.f32 %v2241_v45, %v11348_v57  ;;  %v2035_v32 = vpop.f32.mrf.mxu1 }
 0x392   :  { %14995 = vst [vmem:[#allocation235_spill] sm:$0xff] %v11571_v38  ;;  %v11579_v1 = vadd.f32 %v2035_v32, %v11326_v41 }
 0x393   :  { %14996 = vst [vmem:[#allocation236_spill] sm:$0xff] %v11575_v53 }
 0x394   :  { %14997 = vst [vmem:[#allocation237_spill] sm:$0xff] %v11579_v1 }
 0x395   :  { %v1976_v29 = vpop.f32.mrf.mxu0 }
 0x396   :  { %v11584_v63 = vadd.f32 %v1976_v29, %v11029_v44 }
 0x397   :  { %v2139_v40 = vpop.f32.mrf.mxu2 }
 0x398   :  { %14998 = vst [vmem:[#allocation238_spill] sm:$0xff] %v11584_v63  ;;  %v11588_v45 = vadd.f32 %v2139_v40, %v11344_v35  ;;  %v2243_v48 = vpop.f32.mrf.mxu3 }
 0x399   :  { %v11591_v47 = vadd.f32 %v2243_v48, %v11348_v57  ;;  %v2038_v32 = vpop.f32.mrf.mxu1 }
 0x39a   :  { %14999 = vst [vmem:[#allocation239_spill] sm:$0xff] %v11588_v45  ;;  %v11595_v54 = vadd.f32 %v2038_v32, %v11326_v41 }
 0x39b   :  { %15000 = vst [vmem:[#allocation240_spill] sm:$0xff] %v11591_v47 }
 0x39c   :  { %15001 = vst [vmem:[#allocation241_spill] sm:$0xff] %v11595_v54  ;;  %2077 = vmatmul.bf16.gmra.mxu1 %v10830_v46  ;;  %2181 = vmatmul.bf16.gmra.mxu2 %v10830_v46 }
 0x39d   :  { %2285 = vmatmul.bf16.gmra.mxu3 %v10830_v46  ;;  %v1979_v40 = vpop.f32.mrf.mxu0 }
 0x39e   :  { %v11603_v48 = vadd.f32 %v1979_v40, %v11029_v44 }
 0x39f   :  { %v2142_v56 = vpop.f32.mrf.mxu2 }
 0x3a0   :  { %15002 = vst [vmem:[#allocation242_spill] sm:$0xff] %v11603_v48  ;;  %v11607_v32 = vadd.f32 %v2142_v56, %v11344_v35  ;;  %v2246_v63 = vpop.f32.mrf.mxu3  ;;  %2339 = vmatmul.bf16.gmra.mxu0 %v10381_v37 }
 0x3a1   :  { %v11611_v52 = vadd.f32 %v2246_v63, %v11348_v57  ;;  %v2040_v29 = vpop.f32.mrf.mxu1 }
 0x3a2   :  { %15003 = vst [vmem:[#allocation243_spill] sm:$0xff] %v11607_v32  ;;  %v11615_v47 = vadd.f32 %v2040_v29, %v11326_v41 }
 0x3a3   :  { %15004 = vst [vmem:[#allocation244_spill] sm:$0xff] %v11611_v52 }
 0x3a4   :  { %15005 = vst [vmem:[#allocation245_spill] sm:$0xff] %v11615_v47 }
 0x3a5   :  { %v1981_v38 = vpop.f32.mrf.mxu0 }
 0x3a6   :  { %v11620_v56 = vadd.f32 %v1981_v38, %v11029_v44 }
 0x3a7   :  { %v2144_v48 = vpop.f32.mrf.mxu2 }
 0x3a8   :  { %15006 = vst [vmem:[#allocation246_spill] sm:$0xff] %v11620_v56  ;;  %v11624_v63 = vadd.f32 %v2144_v48, %v11344_v35  ;;  %v2248_v1 = vpop.f32.mrf.mxu3 }
 0x3a9   :  { %v11627_v53 = vadd.f32 %v2248_v1, %v11348_v57  ;;  %v2043_v29 = vpop.f32.mrf.mxu1 }
 0x3aa   :  { %15007 = vst [vmem:[#allocation247_spill] sm:$0xff] %v11624_v63  ;;  %v11631_v40 = vadd.f32 %v2043_v29, %v11326_v41 }
 0x3ab   :  { %15008 = vst [vmem:[#allocation248_spill] sm:$0xff] %v11627_v53 }
 0x3ac   :  { %15009 = vst [vmem:[#allocation249_spill] sm:$0xff] %v11631_v40  ;;  %2082 = vmatmul.bf16.gmra.mxu1 %v10883_v43  ;;  %2186 = vmatmul.bf16.gmra.mxu2 %v10883_v43 }
 0x3ad   :  { %2290 = vmatmul.bf16.gmra.mxu3 %v10883_v43  ;;  %v1984_v48 = vpop.f32.mrf.mxu0 }
 0x3ae   :  { %v11639_v1 = vadd.f32 %v1984_v48, %v11029_v44 }
 0x3af   :  { %v2147_v37 = vpop.f32.mrf.mxu2 }
 0x3b0   :  { %15010 = vst [vmem:[#allocation250_spill] sm:$0xff] %v11639_v1  ;;  %v11643_v29 = vadd.f32 %v2147_v37, %v11344_v35  ;;  %v2251_v56 = vpop.f32.mrf.mxu3  ;;  %2344 = vmatmul.bf16.gmra.mxu0 %v10398_v60 }
 0x3b1   :  { %v11647_v45 = vadd.f32 %v2251_v56, %v11348_v57  ;;  %v2045_v38 = vpop.f32.mrf.mxu1 }
 0x3b2   :  { %15011 = vst [vmem:[#allocation251_spill] sm:$0xff] %v11643_v29  ;;  %v11651_v63 = vadd.f32 %v2045_v38, %v11326_v41 }
 0x3b3   :  { %15012 = vst [vmem:[#allocation252_spill] sm:$0xff] %v11647_v45 }
 0x3b4   :  { %15013 = vst [vmem:[#allocation253_spill] sm:$0xff] %v11651_v63 }
 0x3b5   :  { %v1986_v32 = vpop.f32.mrf.mxu0 }
 0x3b6   :  { %v11656_v37 = vadd.f32 %v1986_v32, %v11029_v44 }
 0x3b7   :  { %v2149_v1 = vpop.f32.mrf.mxu2 }
 0x3b8   :  { %15014 = vst [vmem:[#allocation254_spill] sm:$0xff] %v11656_v37  ;;  %v11660_v56 = vadd.f32 %v2149_v1, %v11344_v35  ;;  %v2253_v40 = vpop.f32.mrf.mxu3 }
 0x3b9   :  { %v11663_v53 = vadd.f32 %v2253_v40, %v11348_v57  ;;  %v2048_v38 = vpop.f32.mrf.mxu1 }
 0x3ba   :  { %15015 = vst [vmem:[#allocation255_spill] sm:$0xff] %v11660_v56  ;;  %v11667_v48 = vadd.f32 %v2048_v38, %v11326_v41 }
 0x3bb   :  { %15016 = vst [vmem:[#allocation256_spill] sm:$0xff] %v11663_v53 }
 0x3bc   :  { %15017 = vst [vmem:[#allocation257_spill] sm:$0xff] %v11667_v48  ;;  %2087 = vmatmul.bf16.gmra.mxu1 %v10966_v31  ;;  %2191 = vmatmul.bf16.gmra.mxu2 %v10966_v31 }
 0x3bd   :  { %2295 = vmatmul.bf16.gmra.mxu3 %v10966_v31  ;;  %v1989_v1 = vpop.f32.mrf.mxu0 }
 0x3be   :  { %v11675_v40 = vadd.f32 %v1989_v1, %v11029_v44 }
 0x3bf   :  { %v2152_v60 = vpop.f32.mrf.mxu2 }
 0x3c0   :  { %15018 = vst [vmem:[#allocation258_spill] sm:$0xff] %v11675_v40  ;;  %v11679_v38 = vadd.f32 %v2152_v60, %v11344_v35  ;;  %v2256_v37 = vpop.f32.mrf.mxu3  ;;  %2349 = vmatmul.bf16.gmra.mxu0 %v10448_v36 }
 0x3c1   :  { %v11683_v32 = vadd.f32 %v2256_v37, %v11348_v57  ;;  %v2050_v47 = vpop.f32.mrf.mxu1 }
 0x3c2   :  { %15019 = vst [vmem:[#allocation259_spill] sm:$0xff] %v11679_v38  ;;  %v11687_v45 = vadd.f32 %v2050_v47, %v11326_v41 }
 0x3c3   :  { %15020 = vst [vmem:[#allocation260_spill] sm:$0xff] %v11683_v32 }
 0x3c4   :  { %15021 = vst [vmem:[#allocation261_spill] sm:$0xff] %v11687_v45 }
 0x3c5   :  { %v1991_v29 = vpop.f32.mrf.mxu0 }
 0x3c6   :  { %v11692_v60 = vadd.f32 %v1991_v29, %v11029_v44  ;;  %v9277_v44 = vld [vmem:[%s14436_s8] sm:$0xff] }
 0x3c7   :  { %v2154_v40 = vpop.f32.mrf.mxu2  ;;  %v11708_v29 = vperm.slane %v9277_v44, 7 }
 0x3c8   :  { %15022 = vst [vmem:[#allocation262_spill] sm:$0xff] %v11692_v60  ;;  %v11696_v37 = vadd.f32 %v2154_v40, %v11344_v35  ;;  %v2258_v56 = vpop.f32.mrf.mxu3 }
 0x3c9   :  { %v11699_v48 = vadd.f32 %v2258_v56, %v11348_v57  ;;  %v2053_v47 = vpop.f32.mrf.mxu1 }
 0x3ca   :  { %15023 = vst [vmem:[#allocation263_spill] sm:$0xff] %v11696_v37  ;;  %v11703_v1 = vadd.f32 %v2053_v47, %v11326_v41 }
 0x3cb   :  { %15024 = vst [vmem:[#allocation264_spill] sm:$0xff] %v11699_v48 }
 0x3cc   :  { %15025 = vst [vmem:[#allocation265_spill] sm:$0xff] %v11703_v1  ;;  %2092 = vmatmul.bf16.gmra.mxu1 %v11020_v55  ;;  %2196 = vmatmul.bf16.gmra.mxu2 %v11020_v55 }
 0x3cd   :  { %2300 = vmatmul.bf16.gmra.mxu3 %v11020_v55  ;;  %v2315_v56 = vpop.f32.mrf.mxu0 }
 0x3ce   :  { %v11716_v47 = vadd.f32 %v2315_v56, %v11708_v29 }
 0x3cf   :  { %v2157_v38 = vpop.f32.mrf.mxu2 }
 0x3d0   :  { %15026 = vst [vmem:[#allocation266_spill] sm:$0xff] %v11716_v47  ;;  %v11720_v44 = vadd.f32 %v2157_v38, %v11344_v35  ;;  %v2261_v60 = vpop.f32.mrf.mxu3  ;;  %2354 = vmatmul.bf16.gmra.mxu0 %v10493_v51 }
 0x3d1   :  { %v11724_v36 = vadd.f32 %v2261_v60, %v11348_v57  ;;  %v2055_v40 = vpop.f32.mrf.mxu1 }
 0x3d2   :  { %15027 = vst [vmem:[#allocation267_spill] sm:$0xff] %v11720_v44  ;;  %v11728_v48 = vadd.f32 %v2055_v40, %v11326_v41 }
 0x3d3   :  { %15028 = vst [vmem:[#allocation268_spill] sm:$0xff] %v11724_v36 }
 0x3d4   :  { %15029 = vst [vmem:[#allocation269_spill] sm:$0xff] %v11728_v48 }
 0x3d5   :  { %v2317_v53 = vpop.f32.mrf.mxu0 }
 0x3d6   :  { %v11733_v38 = vadd.f32 %v2317_v53, %v11708_v29 }
 0x3d7   :  { %v2159_v45 = vpop.f32.mrf.mxu2 }
 0x3d8   :  { %15030 = vst [vmem:[#allocation270_spill] sm:$0xff] %v11733_v38  ;;  %v11737_v60 = vadd.f32 %v2159_v45, %v11344_v35  ;;  %v2263_v1 = vpop.f32.mrf.mxu3 }
 0x3d9   :  { %v11740_v32 = vadd.f32 %v2263_v1, %v11348_v57  ;;  %v2058_v40 = vpop.f32.mrf.mxu1 }
 0x3da   :  { %15031 = vst [vmem:[#allocation271_spill] sm:$0xff] %v11737_v60  ;;  %v11744_v56 = vadd.f32 %v2058_v40, %v11326_v41 }
 0x3db   :  { %15032 = vst [vmem:[#allocation272_spill] sm:$0xff] %v11740_v32 }
 0x3dc   :  { %15033 = vst [vmem:[#allocation273_spill] sm:$0xff] %v11744_v56 }
 0x3dd   :  { %v2320_v48 = vpop.f32.mrf.mxu0 }
 0x3de   :  { %v11749_v51 = vadd.f32 %v2320_v48, %v11708_v29 }
 0x3df   :  { %v2162_v45 = vpop.f32.mrf.mxu2 }
 0x3e0   :  { %15034 = vst [vmem:[#allocation274_spill] sm:$0xff] %v11749_v51  ;;  %v11753_v1 = vadd.f32 %v2162_v45, %v11344_v35  ;;  %v2266_v63 = vpop.f32.mrf.mxu3  ;;  %2359 = vmatmul.bf16.gmra.mxu0 %v10537_v0 }
 0x3e1   :  { %v11757_v40 = vadd.f32 %v2266_v63, %v11348_v57  ;;  %v2060_v44 = vpop.f32.mrf.mxu1 }
 0x3e2   :  { %15035 = vst [vmem:[#allocation275_spill] sm:$0xff] %v11753_v1  ;;  %v11761_v53 = vadd.f32 %v2060_v44, %v11326_v41 }
 0x3e3   :  { %15036 = vst [vmem:[#allocation276_spill] sm:$0xff] %v11757_v40 }
 0x3e4   :  { %15037 = vst [vmem:[#allocation277_spill] sm:$0xff] %v11761_v53 }
 0x3e5   :  { %v2322_v36 = vpop.f32.mrf.mxu0 }
 0x3e6   :  { %v11766_v45 = vadd.f32 %v2322_v36, %v11708_v29 }
 0x3e7   :  { %v2164_v60 = vpop.f32.mrf.mxu2 }
 0x3e8   :  { %15038 = vst [vmem:[#allocation278_spill] sm:$0xff] %v11766_v45  ;;  %v11770_v63 = vadd.f32 %v2164_v60, %v11344_v35  ;;  %v2268_v56 = vpop.f32.mrf.mxu3 }
 0x3e9   :  { %v11773_v37 = vadd.f32 %v2268_v56, %v11348_v57  ;;  %v2063_v44 = vpop.f32.mrf.mxu1 }
 0x3ea   :  { %15039 = vst [vmem:[#allocation279_spill] sm:$0xff] %v11770_v63  ;;  %v11777_v48 = vadd.f32 %v2063_v44, %v11326_v41 }
 0x3eb   :  { %15040 = vst [vmem:[#allocation280_spill] sm:$0xff] %v11773_v37 }
 0x3ec   :  { %15041 = vst [vmem:[#allocation281_spill] sm:$0xff] %v11777_v48 }
 0x3ed   :  { %v2325_v40 = vpop.f32.mrf.mxu0 }
 0x3ee   :  { %v11782_v0 = vadd.f32 %v2325_v40, %v11708_v29 }
 0x3ef   :  { %v2167_v60 = vpop.f32.mrf.mxu2 }
 0x3f0   :  { %15042 = vst [vmem:[#allocation282_spill] sm:$0xff] %v11782_v0  ;;  %v11786_v56 = vadd.f32 %v2167_v60, %v11344_v35  ;;  %v2271_v38 = vpop.f32.mrf.mxu3  ;;  %2364 = vmatmul.bf16.gmra.mxu0 %v10575_v59 }
 0x3f1   :  { %v11790_v44 = vadd.f32 %v2271_v38, %v11348_v57  ;;  %v2065_v1 = vpop.f32.mrf.mxu1 }
 0x3f2   :  { %15043 = vst [vmem:[#allocation283_spill] sm:$0xff] %v11786_v56  ;;  %v11794_v36 = vadd.f32 %v2065_v1, %v11326_v41 }
 0x3f3   :  { %15044 = vst [vmem:[#allocation284_spill] sm:$0xff] %v11790_v44 }
 0x3f4   :  { %15045 = vst [vmem:[#allocation285_spill] sm:$0xff] %v11794_v36 }
 0x3f5   :  { %v2327_v53 = vpop.f32.mrf.mxu0 }
 0x3f6   :  { %v11799_v60 = vadd.f32 %v2327_v53, %v11708_v29 }
 0x3f7   :  { %v2169_v37 = vpop.f32.mrf.mxu2 }
 0x3f8   :  { %15046 = vst [vmem:[#allocation286_spill] sm:$0xff] %v11799_v60  ;;  %v11803_v38 = vadd.f32 %v2169_v37, %v11344_v35  ;;  %v2273_v63 = vpop.f32.mrf.mxu3 }
 0x3f9   :  { %v11806_v32 = vadd.f32 %v2273_v63, %v11348_v57  ;;  %v2068_v1 = vpop.f32.mrf.mxu1 }
 0x3fa   :  { %15047 = vst [vmem:[#allocation287_spill] sm:$0xff] %v11803_v38  ;;  %v11810_v40 = vadd.f32 %v2068_v1, %v11326_v41 }
 0x3fb   :  { %15048 = vst [vmem:[#allocation288_spill] sm:$0xff] %v11806_v32 }
 0x3fc   :  { %15049 = vst [vmem:[#allocation289_spill] sm:$0xff] %v11810_v40 }
 0x3fd   :  { %v2330_v44 = vpop.f32.mrf.mxu0 }
 0x3fe   :  { %v11815_v59 = vadd.f32 %v2330_v44, %v11708_v29 }
 0x3ff   :  { %v2172_v37 = vpop.f32.mrf.mxu2 }
 0x400   :  { %15050 = vst [vmem:[#allocation290_spill] sm:$0xff] %v11815_v59  ;;  %v11819_v63 = vadd.f32 %v2172_v37, %v11344_v35  ;;  %v2276_v45 = vpop.f32.mrf.mxu3  ;;  %2369 = vmatmul.bf16.gmra.mxu0 %v10653_v34 }
 0x401   :  { %v11823_v1 = vadd.f32 %v2276_v45, %v11348_v57  ;;  %v2070_v56 = vpop.f32.mrf.mxu1 }
 0x402   :  { %15051 = vst [vmem:[#allocation291_spill] sm:$0xff] %v11819_v63  ;;  %v11827_v53 = vadd.f32 %v2070_v56, %v11326_v41 }
 0x403   :  { %15052 = vst [vmem:[#allocation292_spill] sm:$0xff] %v11823_v1 }
 0x404   :  { %15053 = vst [vmem:[#allocation293_spill] sm:$0xff] %v11827_v53 }
 0x405   :  { %v2332_v36 = vpop.f32.mrf.mxu0 }
 0x406   :  { %v11832_v37 = vadd.f32 %v2332_v36, %v11708_v29 }
 0x407   :  { %v2174_v38 = vpop.f32.mrf.mxu2 }
 0x408   :  { %v11836_v45 = vadd.f32 %v2174_v38, %v11344_v35  ;;  %v2278_v40 = vpop.f32.mrf.mxu3 }
 0x409   :  { %v11839_v48 = vadd.f32 %v2278_v40, %v11348_v57  ;;  %v2073_v56 = vpop.f32.mrf.mxu1 }
 0x40a   :  { %15054 = vst [vmem:[#allocation294_spill] sm:$0xff] %v11836_v45  ;;  %v11843_v44 = vadd.f32 %v2073_v56, %v11326_v41 }
 0x40b   :  { %15055 = vst [vmem:[#allocation295_spill] sm:$0xff] %v11839_v48 }
 0x40c   :  { %15056 = vst [vmem:[#allocation296_spill] sm:$0xff] %v11843_v44 }
 0x40d   :  { %v2335_v53 = vpop.f32.mrf.mxu0 }
 0x40e   :  { %v11848_v34 = vadd.f32 %v2335_v53, %v11708_v29 }
 0x40f   :  { %v2177_v38 = vpop.f32.mrf.mxu2 }
 0x410   :  { %15057 = vst [vmem:[#allocation297_spill] sm:$0xff] %v11848_v34  ;;  %v11852_v40 = vadd.f32 %v2177_v38, %v11344_v35  ;;  %v2281_v59 = vpop.f32.mrf.mxu3  ;;  %2374 = vmatmul.bf16.gmra.mxu0 %v10694_v42 }
 0x411   :  { %v11856_v56 = vadd.f32 %v2281_v59, %v11348_v57  ;;  %v2075_v63 = vpop.f32.mrf.mxu1 }
 0x412   :  { %15058 = vst [vmem:[#allocation298_spill] sm:$0xff] %v11852_v40  ;;  %v11860_v36 = vadd.f32 %v2075_v63, %v11326_v41 }
 0x413   :  { %15059 = vst [vmem:[#allocation299_spill] sm:$0xff] %v11856_v56 }
 0x414   :  { %15060 = vst [vmem:[#allocation300_spill] sm:$0xff] %v11860_v36 }
 0x415   :  { %v2337_v1 = vpop.f32.mrf.mxu0 }
 0x416   :  { %v11865_v38 = vadd.f32 %v2337_v1, %v11708_v29 }
 0x417   :  { %v2179_v45 = vpop.f32.mrf.mxu2 }
 0x418   :  { %15061 = vst [vmem:[#allocation301_spill] sm:$0xff] %v11865_v38  ;;  %v11869_v59 = vadd.f32 %v2179_v45, %v11344_v35  ;;  %v2283_v44 = vpop.f32.mrf.mxu3 }
 0x419   :  { %v11872_v32 = vadd.f32 %v2283_v44, %v11348_v57  ;;  %v2078_v63 = vpop.f32.mrf.mxu1 }
 0x41a   :  { %15062 = vst [vmem:[#allocation302_spill] sm:$0xff] %v11869_v59  ;;  %v11876_v53 = vadd.f32 %v2078_v63, %v11326_v41 }
 0x41b   :  { %15063 = vst [vmem:[#allocation303_spill] sm:$0xff] %v11872_v32 }
 0x41c   :  { %15064 = vst [vmem:[#allocation304_spill] sm:$0xff] %v11876_v53 }
 0x41d   :  { %v2340_v56 = vpop.f32.mrf.mxu0 }
 0x41e   :  { %v11881_v42 = vadd.f32 %v2340_v56, %v11708_v29 }
 0x41f   :  { %v2182_v45 = vpop.f32.mrf.mxu2 }
 0x420   :  { %15065 = vst [vmem:[#allocation305_spill] sm:$0xff] %v11881_v42  ;;  %v11885_v44 = vadd.f32 %v2182_v45, %v11344_v35  ;;  %v2286_v38 = vpop.f32.mrf.mxu3  ;;  %2379 = vmatmul.bf16.gmra.mxu0 %v10735_v58 }
 0x421   :  { %v11889_v63 = vadd.f32 %v2286_v38, %v11348_v57  ;;  %v2080_v40 = vpop.f32.mrf.mxu1 }
 0x422   :  { %15066 = vst [vmem:[#allocation306_spill] sm:$0xff] %v11885_v44  ;;  %v11893_v1 = vadd.f32 %v2080_v40, %v11326_v41 }
 0x423   :  { %15067 = vst [vmem:[#allocation307_spill] sm:$0xff] %v11889_v63 }
 0x424   :  { %15068 = vst [vmem:[#allocation308_spill] sm:$0xff] %v11893_v1 }
 0x425   :  { %v2342_v36 = vpop.f32.mrf.mxu0 }
 0x426   :  { %v11898_v45 = vadd.f32 %v2342_v36, %v11708_v29 }
 0x427   :  { %v2184_v32 = vpop.f32.mrf.mxu2 }
 0x428   :  { %15069 = vst [vmem:[#allocation309_spill] sm:$0xff] %v11898_v45  ;;  %v11902_v38 = vadd.f32 %v2184_v32, %v11344_v35  ;;  %v2288_v59 = vpop.f32.mrf.mxu3 }
 0x429   :  { %v11905_v48 = vadd.f32 %v2288_v59, %v11348_v57  ;;  %v2083_v40 = vpop.f32.mrf.mxu1 }
 0x42a   :  { %15070 = vst [vmem:[#allocation310_spill] sm:$0xff] %v11902_v38  ;;  %v11909_v56 = vadd.f32 %v2083_v40, %v11326_v41 }
 0x42b   :  { %15071 = vst [vmem:[#allocation311_spill] sm:$0xff] %v11905_v48 }
 0x42c   :  { %15072 = vst [vmem:[#allocation312_spill] sm:$0xff] %v11909_v56 }
 0x42d   :  { %v2345_v63 = vpop.f32.mrf.mxu0 }
 0x42e   :  { %v11914_v58 = vadd.f32 %v2345_v63, %v11708_v29 }
 0x42f   :  { %v2187_v32 = vpop.f32.mrf.mxu2 }
 0x430   :  { %15073 = vst [vmem:[#allocation313_spill] sm:$0xff] %v11914_v58  ;;  %v11918_v59 = vadd.f32 %v2187_v32, %v11344_v35  ;;  %v2291_v42 = vpop.f32.mrf.mxu3  ;;  %2384 = vmatmul.bf16.gmra.mxu0 %v10777_v28 }
 0x431   :  { %v11922_v40 = vadd.f32 %v2291_v42, %v11348_v57  ;;  %v2085_v44 = vpop.f32.mrf.mxu1 }
 0x432   :  { %15074 = vst [vmem:[#allocation314_spill] sm:$0xff] %v11918_v59  ;;  %v11926_v36 = vadd.f32 %v2085_v44, %v11326_v41 }
 0x433   :  { %15075 = vst [vmem:[#allocation315_spill] sm:$0xff] %v11922_v40 }
 0x434   :  { %15076 = vst [vmem:[#allocation316_spill] sm:$0xff] %v11926_v36 }
 0x435   :  { %v2347_v1 = vpop.f32.mrf.mxu0 }
 0x436   :  { %v11931_v32 = vadd.f32 %v2347_v1, %v11708_v29 }
 0x437   :  { %v2189_v38 = vpop.f32.mrf.mxu2 }
 0x438   :  { %v11935_v42 = vadd.f32 %v2189_v38, %v11344_v35  ;;  %v2293_v56 = vpop.f32.mrf.mxu3 }
 0x439   :  { %v11938_v53 = vadd.f32 %v2293_v56, %v11348_v57  ;;  %v2088_v44 = vpop.f32.mrf.mxu1 }
 0x43a   :  { %15077 = vst [vmem:[#allocation317_spill] sm:$0xff] %v11935_v42  ;;  %v11942_v63 = vadd.f32 %v2088_v44, %v11326_v41 }
 0x43b   :  { %15078 = vst [vmem:[#allocation318_spill] sm:$0xff] %v11938_v53 }
 0x43c   :  { %15079 = vst [vmem:[#allocation319_spill] sm:$0xff] %v11942_v63 }
 0x43d   :  { %v2350_v36 = vpop.f32.mrf.mxu0 }
 0x43e   :  { %v11947_v28 = vadd.f32 %v2350_v36, %v11708_v29 }
 0x43f   :  { %v2192_v38 = vpop.f32.mrf.mxu2 }
 0x440   :  { %15080 = vst [vmem:[#allocation320_spill] sm:$0xff] %v11947_v28  ;;  %v11951_v56 = vadd.f32 %v2192_v38, %v11344_v35  ;;  %v2296_v58 = vpop.f32.mrf.mxu3  ;;  %2389 = vmatmul.bf16.gmra.mxu0 %v10830_v46 }
 0x441   :  { %v11955_v44 = vadd.f32 %v2296_v58, %v11348_v57  ;;  %v2090_v59 = vpop.f32.mrf.mxu1 }
 0x442   :  { %15081 = vst [vmem:[#allocation321_spill] sm:$0xff] %v11951_v56  ;;  %v11959_v1 = vadd.f32 %v2090_v59, %v11326_v41 }
 0x443   :  { %15082 = vst [vmem:[#allocation322_spill] sm:$0xff] %v11955_v44 }
 0x444   :  { %15083 = vst [vmem:[#allocation323_spill] sm:$0xff] %v11959_v1 }
 0x445   :  { %v2352_v40 = vpop.f32.mrf.mxu0 }
 0x446   :  { %v11964_v38 = vadd.f32 %v2352_v40, %v11708_v29 }
 0x447   :  { %v2194_v42 = vpop.f32.mrf.mxu2 }
 0x448   :  { %15084 = vst [vmem:[#allocation324_spill] sm:$0xff] %v11964_v38  ;;  %v11968_v58 = vadd.f32 %v2194_v42, %v11344_v35  ;;  %v2298_v63 = vpop.f32.mrf.mxu3 }
 0x449   :  { %v11971_v48 = vadd.f32 %v2298_v63, %v11348_v57  ;;  %v2093_v59 = vpop.f32.mrf.mxu1 }
 0x44a   :  { %15085 = vst [vmem:[#allocation325_spill] sm:$0xff] %v11968_v58  ;;  %v11975_v36 = vadd.f32 %v2093_v59, %v11326_v41 }
 0x44b   :  { %15086 = vst [vmem:[#allocation326_spill] sm:$0xff] %v11971_v48 }
 0x44c   :  { %15087 = vst [vmem:[#allocation327_spill] sm:$0xff] %v11975_v36 }
 0x44d   :  { %v2355_v44 = vpop.f32.mrf.mxu0 }
 0x44e   :  { %v11980_v46 = vadd.f32 %v2355_v44, %v11708_v29 }
 0x44f   :  { %v2197_v42 = vpop.f32.mrf.mxu2 }
 0x450   :  { %v11984_v63 = vadd.f32 %v2197_v42, %v11344_v35  ;;  %v2301_v38 = vpop.f32.mrf.mxu3  ;;  %2394 = vmatmul.bf16.gmra.mxu0 %v10883_v43 }
 0x451   :  { %v11988_v59 = vadd.f32 %v2301_v38, %v11348_v57  ;;  %v2095_v56 = vpop.f32.mrf.mxu1 }
 0x452   :  { %15088 = vst [vmem:[#allocation328_spill] sm:$0xff] %v11984_v63  ;;  %v11992_v40 = vadd.f32 %v2095_v56, %v11326_v41 }
 0x453   :  { %15089 = vst [vmem:[#allocation329_spill] sm:$0xff] %v11988_v59 }
 0x454   :  { %15090 = vst [vmem:[#allocation330_spill] sm:$0xff] %v11992_v40 }
 0x455   :  { %v2357_v1 = vpop.f32.mrf.mxu0 }
 0x456   :  { %v11997_v42 = vadd.f32 %v2357_v1, %v11708_v29 }
 0x457   :  { %v2199_v48 = vpop.f32.mrf.mxu2 }
 0x458   :  { %v12001_v38 = vadd.f32 %v2199_v48, %v11344_v35  ;;  %v2303_v58 = vpop.f32.mrf.mxu3 }
 0x459   :  { %v12004_v53 = vadd.f32 %v2303_v58, %v11348_v57 }
 0x45a   :  { %15091 = vst [vmem:[#allocation331_spill] sm:$0xff] %v12001_v38 }
 0x45b   :  { %15092 = vst [vmem:[#allocation332_spill] sm:$0xff] %v12004_v53 }
 0x45d   :  { %v2360_v44 = vpop.f32.mrf.mxu0 }
 0x45e   :  { %v12009_v36 = vadd.f32 %v2360_v44, %v11708_v29 }
 0x460   :  { %15093 = vst [vmem:[#allocation333_spill] sm:$0xff] %v12009_v36  ;;  %2399 = vmatmul.bf16.gmra.mxu0 %v10966_v31 }
 0x465   :  { %v2362_v43 = vpop.f32.mrf.mxu0 }
 0x466   :  { %v12014_v35 = vadd.f32 %v2362_v43, %v11708_v29 }
 0x468   :  { %15094 = vst [vmem:[#allocation334_spill] sm:$0xff] %v12014_v35 }
 0x46d   :  { %v2365_v57 = vpop.f32.mrf.mxu0 }
 0x46e   :  { %v12018_v58 = vadd.f32 %v2365_v57, %v11708_v29 }
 0x470   :  { %2404 = vmatmul.bf16.gmra.mxu0 %v11020_v55 }
 0x475   :  { %v2367_v44 = vpop.f32.mrf.mxu0 }
 0x476   :  { %v12023_v41 = vadd.f32 %v2367_v44, %v11708_v29 }
 0x478   :  { %15095 = vst [vmem:[#allocation335_spill] sm:$0xff] %v12023_v41 }
 0x47d   :  { %v2370_v1 = vpop.f32.mrf.mxu0 }
 0x47e   :  { %v12027_v43 = vadd.f32 %v2370_v1, %v11708_v29 }
 0x480   :  { %15096 = vst [vmem:[#allocation336_spill] sm:$0xff] %v12027_v43 }
 0x485   :  { %v2372_v59 = vpop.f32.mrf.mxu0 }
 0x486   :  { %v12031_v57 = vadd.f32 %v2372_v59, %v11708_v29 }
 0x48d   :  { %v2375_v63 = vpop.f32.mrf.mxu0 }
 0x48e   :  { %v12035_v55 = vadd.f32 %v2375_v63, %v11708_v29 }
 0x490   :  { %15097 = vst [vmem:[#allocation337_spill] sm:$0xff] %v12035_v55 }
 0x495   :  { %v2377_v53 = vpop.f32.mrf.mxu0 }
 0x496   :  { %v12039_v31 = vadd.f32 %v2377_v53, %v11708_v29 }
 0x498   :  { %15098 = vst [vmem:[#allocation338_spill] sm:$0xff] %v12039_v31 }
 0x49d   :  { %v2380_v38 = vpop.f32.mrf.mxu0 }
 0x49e   :  { %v12043_v48 = vadd.f32 %v2380_v38, %v11708_v29 }
 0x4a5   :  { %v2382_v40 = vpop.f32.mrf.mxu0 }
 0x4a6   :  { %v12047_v56 = vadd.f32 %v2382_v40, %v11708_v29 }
 0x4a8   :  { %15099 = vst [vmem:[#allocation339_spill] sm:$0xff] %v12047_v56 }
 0x4ad   :  { %v2385_v41 = vpop.f32.mrf.mxu0 }
 0x4ae   :  { %v12051_v44 = vadd.f32 %v2385_v41, %v11708_v29 }
 0x4b0   :  { %15100 = vst [vmem:[#allocation340_spill] sm:$0xff] %v12051_v44 }
 0x4b5   :  { %v2387_v55 = vpop.f32.mrf.mxu0 }
 0x4b6   :  { %v12055_v1 = vadd.f32 %v2387_v55, %v11708_v29 }
 0x4bd   :  { %v2390_v31 = vpop.f32.mrf.mxu0 }
 0x4be   :  { %v12059_v59 = vadd.f32 %v2390_v31, %v11708_v29 }
 0x4c0   :  { %15101 = vst [vmem:[#allocation341_spill] sm:$0xff] %v12059_v59 }
 0x4c5   :  { %v2392_v43 = vpop.f32.mrf.mxu0 }
 0x4c6   :  { %v12063_v63 = vadd.f32 %v2392_v43, %v11708_v29 }
 0x4c8   :  { %15102 = vst [vmem:[#allocation342_spill] sm:$0xff] %v12063_v63 }
 0x4cd   :  { %v2395_v56 = vpop.f32.mrf.mxu0 }
 0x4ce   :  { %v12067_v53 = vadd.f32 %v2395_v56, %v11708_v29 }
 0x4d0   :  { %15103 = vst [vmem:[#allocation343_spill] sm:$0xff] %v12067_v53 }
 0x4d5   :  { %v2397_v44 = vpop.f32.mrf.mxu0 }
 0x4d6   :  { %v12071_v38 = vadd.f32 %v2397_v44, %v11708_v29 }
 0x4d8   :  { %15104 = vst [vmem:[#allocation344_spill] sm:$0xff] %v12071_v38 }
 0x4dd   :  { %v2400_v36 = vpop.f32.mrf.mxu0 }
 0x4de   :  { %v12075_v40 = vadd.f32 %v2400_v36, %v11708_v29 }
 0x4e0   :  { %15105 = vst [vmem:[#allocation345_spill] sm:$0xff] %v12075_v40 }
 0x4e5   :  { %v2402_v59 = vpop.f32.mrf.mxu0 }
 0x4e6   :  { %v12079_v41 = vadd.f32 %v2402_v59, %v11708_v29 }
 0x4e8   :  { %15106 = vst [vmem:[#allocation346_spill] sm:$0xff] %v12079_v41 }
 0x4ed   :  { %v2405_v63 = vpop.f32.mrf.mxu0 }
 0x4ee   :  { %v12083_v55 = vadd.f32 %v2405_v63, %v11708_v29 }
 0x4f0   :  { %15107 = vst [vmem:[#allocation347_spill] sm:$0xff] %v12083_v55 }
 0x4f4   :  { %2761 = sbr.rel (%p9551_p2) target bundleno = 1631 (0x65f), region = 73 }
 0x4f5   :  { %v2407_v53 = vpop.f32.mrf.mxu0 }
 0x4f6   :  { %v12087_v31 = vadd.f32 %v2407_v53, %v11708_v29 }
 0x4f8   :  { %15108 = vst [vmem:[#allocation348_spill] sm:$0xff] %v12087_v31 }
 0x4f9   :  { %vm2766_vm1 = vcmp.eq.s32.totalorder %v9513_v8, 0  ;;  %vm2764_vm2 = vcmp.eq.s32.totalorder %v9502_v6, 0  ;;  %vm2762_vm3 = vcmp.eq.s32.totalorder %v9492_v4, 0  ;;  %v9389_v59 = vmov 0   ;;  %v15213_v4 = vld [vmem:[#allocation243_spill] sm:$0xff]  ;;  %v15245_v55 = vld [vmem:[#allocation192_spill] sm:$0xff] }
 0x4fa   :  { %9280 = vset.pattern.permute.xlu2 %v9389_v59  ;;  %9279 = vset.pattern.permute.xlu1 %v9389_v59  ;;  %v2804_v63 = vsel %vm2766_vm1, 1, %v9389_v59  ;;  %v2802_v29 = vsel %vm2764_vm2, 1, %v9389_v59  ;;  %v2800_v53 = vsel %vm2762_vm3, 1, %v9389_v59  ;;  %vm2767_vm4 = vcmp.eq.s32.totalorder %v9518_v9, 0  ;;  %v15247_v31 = vld [vmem:[#allocation270_spill] sm:$0xff] }
 0x4fb   :  { %9278 = vset.pattern.permute.xlu0 %v9389_v59  ;;  %2851 = vperm.xlu2 %9280, %v2804_v63   ;;  %vm2765_vm5 = vcmp.eq.s32.totalorder %v9508_v7, 0  ;;  %vm2763_vm6 = vcmp.eq.s32.totalorder %v9497_v5, 0  ;;  %v2805_v44 = vsel %vm2767_vm4, 1, %v9389_v59  ;;  %vm2770_vm7 = vcmp.eq.s32.totalorder %v9534_v12, 0  ;;  %v15210_v5 = vld [vmem:[#allocation173_spill] sm:$0xff] }
 0x4fc   :  { %2845 = vperm.xlu1 %9279, %v2802_v29   ;;  %2839 = vperm.xlu0 %9278, %v2800_v53   ;;  %v2803_v36 = vsel %vm2765_vm5, 1, %v9389_v59  ;;  %v2801_v43 = vsel %vm2763_vm6, 1, %v9389_v59  ;;  %vm2769_vm8 = vcmp.eq.s32.totalorder %v9529_v11, 0  ;;  %vm2768_vm9 = vcmp.eq.s32.totalorder %v9524_v10, 0 }
 0x4fd   :  { %v2808_v63 = vsel %vm2770_vm7, 1, %v9389_v59  ;;  %v2807_v29 = vsel %vm2769_vm8, 1, %v9389_v59  ;;  %v2806_v53 = vsel %vm2768_vm9, 1, %v9389_v59  ;;  %vm2773_vm10 = vcmp.eq.s32.totalorder %v9549_v15, 0  ;;  %v15147_v15 = vld [vmem:[#allocation77_spill] sm:$0xff] }
 0x4fe   :  { %vm2772_vm11 = vcmp.eq.s32.totalorder %v9544_v14, 0  ;;  %vm2771_vm12 = vcmp.eq.s32.totalorder %v9539_v13, 0  ;;  %vm2776_vm13 = vcmp.eq.s32.totalorder %v9568_v18, 0  ;;  %vm2775_vm14 = vcmp.eq.s32.totalorder %v9563_v17, 0  ;;  %v15142_v13 = vld [vmem:[#allocation207_spill] sm:$0xff]  ;;  %v15144_v14 = vld [vmem:[#allocation208_spill] sm:$0xff] }
 0x4ff   :  { %vm2774_vm15 = vcmp.eq.s32.totalorder %v9558_v16, 0  ;;  %vm2779_vm0 = vcmp.eq.s32.totalorder %v9583_v21, 0  ;;  %vm2778_vm1 = vcmp.eq.s32.totalorder %v9578_v20, 0  ;;  %vm2777_vm2 = vcmp.eq.s32.totalorder %v9573_v19, 0 }
 0x500   :  { %vm2782_vm3 = vcmp.eq.s32.totalorder %v9598_v24, 0  ;;  %vm2781_vm4 = vcmp.eq.s32.totalorder %v9593_v23, 0  ;;  %vm2780_vm5 = vcmp.eq.s32.totalorder %v9588_v22, 0  ;;  %vm2785_vm6 = vcmp.eq.s32.totalorder %v9613_v27, 0  ;;  %v15120_v27 = vld [vmem:[#allocation52_spill] sm:$0xff]  ;;  %v15128_v24 = vld [vmem:[#allocation69_spill] sm:$0xff] }
 0x501   :  { %vm2784_vm7 = vcmp.eq.s32.totalorder %v9608_v26, 0  ;;  %vm2783_vm8 = vcmp.eq.s32.totalorder %v9603_v25, 0  ;;  %vm2788_vm9 = vcmp.eq.s32.totalorder %v9628_v30, 0  ;;  %v15111_v26 = vld [vmem:[#allocation44_spill] sm:$0xff]  ;;  %v15114_v30 = vld [vmem:[#allocation47_spill] sm:$0xff]  ;;  %v15129_v19 = vmax.f32 %v15128_v24, 0.0 }
 0x502   :  { %v15214_v6 = vmax.f32 %v15213_v4, 0.0  ;;  %v15221_v4 = vld [vmem:[#allocation64_spill] sm:$0xff] }
 0x503   :  { %2854 = vperm.xlu2 %9280, %v2805_v44   ;;  %v2810_v44 = vsel %vm2772_vm11, 1, %v9389_v59 }
 0x504   :  { %2848 = vperm.xlu1 %9279, %v2803_v36   ;;  %2842 = vperm.xlu0 %9278, %v2801_v43   ;;  %v2811_v43 = vsel %vm2773_vm10, 1, %v9389_v59  ;;  %v2809_v36 = vsel %vm2771_vm12, 1, %v9389_v59  ;;  %vm2791_vm12 = vcmp.eq.s32.totalorder %v15111_v26, 0 }
 0x50b   :  { %2863 = vperm.xlu2 %9280, %v2808_v63   ;;  %v2814_v63 = vsel %vm2776_vm13, 1, %v9389_v59 }
 0x50c   :  { %2860 = vperm.xlu1 %9279, %v2807_v29   ;;  %2857 = vperm.xlu0 %9278, %v2806_v53   ;;  %v2813_v29 = vsel %vm2775_vm14, 1, %v9389_v59  ;;  %v2812_v53 = vsel %vm2774_vm15, 1, %v9389_v59  ;;  %vm2794_vm15 = vcmp.eq.s32.totalorder %v15114_v30, 0 }
 0x50d   :  { %v2832_v26 = vsel %vm2794_vm15, 1, %v9389_v59 }
 0x513   :  { %2872 = vperm.xlu2 %9280, %v2811_v43   ;;  %v2817_v43 = vsel %vm2779_vm0, 1, %v9389_v59 }
 0x514   :  { %2869 = vperm.xlu1 %9279, %v2810_v44   ;;  %2866 = vperm.xlu0 %9278, %v2809_v36   ;;  %v2816_v44 = vsel %vm2778_vm1, 1, %v9389_v59  ;;  %v2815_v36 = vsel %vm2777_vm2, 1, %v9389_v59 }
 0x51b   :  { %2881 = vperm.xlu2 %9280, %v2814_v63   ;;  %v2820_v63 = vsel %vm2782_vm3, 1, %v9389_v59 }
 0x51c   :  { %2878 = vperm.xlu1 %9279, %v2813_v29   ;;  %2875 = vperm.xlu0 %9278, %v2812_v53   ;;  %v2819_v29 = vsel %vm2781_vm4, 1, %v9389_v59  ;;  %v2818_v53 = vsel %vm2780_vm5, 1, %v9389_v59  ;;  %vm2799_vm5 = vcmp.eq.s32.totalorder %v15120_v27, 0  ;;  %v15126_v27 = vld [vmem:[#allocation68_spill] sm:$0xff] }
 0x51d   :  { %v15127_v23 = vmax.f32 %v15126_v27, 0.0  ;;  %v15135_v27 = vld [vmem:[#allocation70_spill] sm:$0xff] }
 0x523   :  { %2890 = vperm.xlu2 %9280, %v2817_v43   ;;  %v2823_v43 = vsel %vm2785_vm6, 1, %v9389_v59 }
 0x524   :  { %2887 = vperm.xlu1 %9279, %v2816_v44   ;;  %2884 = vperm.xlu0 %9278, %v2815_v36   ;;  %v2822_v44 = vsel %vm2784_vm7, 1, %v9389_v59  ;;  %v2821_v36 = vsel %vm2783_vm8, 1, %v9389_v59 }
 0x52b   :  { %2899 = vperm.xlu2 %9280, %v2820_v63   ;;  %v15109_v63 = vld [vmem:[#allocation40_spill] sm:$0xff] }
 0x52c   :  { %2896 = vperm.xlu1 %9279, %v2819_v29   ;;  %2893 = vperm.xlu0 %9278, %v2818_v53   ;;  %vm2787_vm10 = vcmp.eq.s32.totalorder %v15109_v63, 0  ;;  %v15110_v29 = vld [vmem:[#allocation39_spill] sm:$0xff]  ;;  %v2826_v53 = vsel %vm2788_vm9, 1, %v9389_v59 }
 0x52d   :  { %vm2786_vm11 = vcmp.eq.s32.totalorder %v15110_v29, 0  ;;  %v2825_v56 = vsel %vm2787_vm10, 1, %v9389_v59 }
 0x52e   :  { %v2824_v25 = vsel %vm2786_vm11, 1, %v9389_v59 }
 0x533   :  { %2908 = vperm.xlu2 %9280, %v2823_v43   ;;  %v15112_v43 = vld [vmem:[#allocation43_spill] sm:$0xff] }
 0x534   :  { %2905 = vperm.xlu1 %9279, %v2822_v44   ;;  %2902 = vperm.xlu0 %9278, %v2821_v36   ;;  %vm2790_vm13 = vcmp.eq.s32.totalorder %v15112_v43, 0  ;;  %v15113_v44 = vld [vmem:[#allocation42_spill] sm:$0xff]  ;;  %v2829_v36 = vsel %vm2791_vm12, 1, %v9389_v59 }
 0x535   :  { %vm2789_vm14 = vcmp.eq.s32.totalorder %v15113_v44, 0  ;;  %v2828_v63 = vsel %vm2790_vm13, 1, %v9389_v59  ;;  %v15117_v44 = vld [vmem:[#allocation50_spill] sm:$0xff] }
 0x536   :  { %v2827_v29 = vsel %vm2789_vm14, 1, %v9389_v59  ;;  %vm2797_vm2 = vcmp.eq.s32.totalorder %v15117_v44, 0 }
 0x537   :  { %v2835_v30 = vsel %vm2797_vm2, 1, %v9389_v59 }
 0x53b   :  { %2917 = vperm.xlu2 %9280, %v2826_v53   ;;  %v15115_v53 = vld [vmem:[#allocation46_spill] sm:$0xff] }
 0x53c   :  { %2914 = vperm.xlu1 %9279, %v2825_v56   ;;  %2911 = vperm.xlu0 %9278, %v2824_v25   ;;  %vm2793_vm0 = vcmp.eq.s32.totalorder %v15115_v53, 0  ;;  %v15116_v25 = vld [vmem:[#allocation45_spill] sm:$0xff] }
 0x53d   :  { %vm2792_vm1 = vcmp.eq.s32.totalorder %v15116_v25, 0  ;;  %v2831_v56 = vsel %vm2793_vm0, 1, %v9389_v59 }
 0x53e   :  { %v2830_v43 = vsel %vm2792_vm1, 1, %v9389_v59 }
 0x543   :  { %2926 = vperm.xlu2 %9280, %v2829_v36   ;;  %v15118_v36 = vld [vmem:[#allocation49_spill] sm:$0xff] }
 0x544   :  { %2923 = vperm.xlu1 %9279, %v2828_v63   ;;  %2920 = vperm.xlu0 %9278, %v2827_v29   ;;  %vm2796_vm3 = vcmp.eq.s32.totalorder %v15118_v36, 0  ;;  %v15119_v63 = vld [vmem:[#allocation48_spill] sm:$0xff]  ;;  %v15122_v36 = vld [vmem:[#allocation65_spill] sm:$0xff] }
 0x545   :  { %vm2795_vm4 = vcmp.eq.s32.totalorder %v15119_v63, 0  ;;  %v2834_v29 = vsel %vm2796_vm3, 1, %v9389_v59  ;;  %v15123_v63 = vmax.f32 %v15122_v36, 0.0  ;;  %v15132_v36 = vmax.f32 %v11107_v3, 0.0 }
 0x546   :  { %v2833_v53 = vsel %vm2795_vm4, 1, %v9389_v59  ;;  %v15139_v3 = vmax.f32 %v11435_v33, 0.0 }
 0x54b   :  { %2935 = vperm.xlu2 %9280, %v2832_v26   ;;  %v15121_v26 = vld [vmem:[#allocation51_spill] sm:$0xff] }
 0x54c   :  { %2932 = vperm.xlu1 %9279, %v2831_v56   ;;  %2929 = vperm.xlu0 %9278, %v2830_v43   ;;  %vm2798_vm6 = vcmp.eq.s32.totalorder %v15121_v26, 0  ;;  %v2837_v56 = vsel %vm2799_vm5, 1, %v9389_v59 }
 0x54d   :  { %v2836_v43 = vsel %vm2798_vm6, 1, %v9389_v59 }
 0x553   :  { %2944 = vperm.xlu2 %9280, %v2835_v30  }
 0x554   :  { %2941 = vperm.xlu1 %9279, %v2834_v29   ;;  %2938 = vperm.xlu0 %9278, %v2833_v53   ;;  %v15124_v29 = vld [vmem:[#allocation66_spill] sm:$0xff] }
 0x555   :  { %v2852_v25 = vpop.permute.xlu2 %2851  ;;  %v15125_v53 = vmax.f32 %v15124_v29, 0.0  ;;  %v15133_v29 = vmax.f32 %v11415_v62, 0.0  ;;  %v15140_v62 = vmax.f32 %v11431_v2, 0.0 }
 0x556   :  { %vm2956_vm7 = vcmp.eq.s32.totalorder %v2852_v25, 1 }
 0x557   :  { %v3022_v30 = vsel %vm2956_vm7, %v15123_v63, -inf  ;;  %v3023_v22 = vsel %vm2956_vm7, %v15125_v53, -inf  ;;  %v3025_v63 = vsel %vm2956_vm7, %v15132_v36, -inf  ;;  %v3026_v53 = vsel %vm2956_vm7, %v15133_v29, -inf }
 0x558   :  { %v3028_v29 = vsel %vm2956_vm7, %v15140_v62, -inf  ;;  %v15148_v62 = vmax.f32 %v15147_v15, 0.0 }
 0x55c   :  { %2950 = vperm.xlu1 %9279, %v2837_v56   ;;  %2947 = vperm.xlu0 %9278, %v2836_v43   ;;  %v15130_v43 = vld [vmem:[#allocation67_spill] sm:$0xff] }
 0x55d   :  { %v2855_v44 = vpop.permute.xlu2 %2854  ;;  %v15131_v20 = vmax.f32 %v15130_v43, 0.0  ;;  %v15137_v43 = vld [vmem:[#allocation142_spill] sm:$0xff] }
 0x55e   :  { %vm2957_vm8 = vcmp.eq.s32.totalorder %v2855_v44, 1  ;;  %v15138_v17 = vmax.f32 %v15137_v43, 0.0 }
 0x55f   :  { %v3030_v26 = vsel %vm2957_vm8, %v15127_v23, -inf  ;;  %v3031_v59 = vsel %vm2957_vm8, %v15129_v19, -inf  ;;  %v3024_v21 = vsel %vm2956_vm7, %v15131_v20, -inf  ;;  %v15134_v23 = vmax.f32 %v11427_v50, 0.0 }
 0x560   :  { %v15136_v19 = vmax.f32 %v15135_v27, 0.0  ;;  %v3033_v20 = vsel %vm2957_vm8, %v15138_v17, -inf  ;;  %v3034_v36 = vsel %vm2957_vm8, %v15139_v3, -inf  ;;  %v15141_v50 = vmax.f32 %v11782_v0, 0.0 }
 0x561   :  { %v3027_v24 = vsel %vm2956_vm7, %v15134_v23, -inf  ;;  %v3297_v18 = vmax.f32 %v3030_v26, %v3022_v30  ;;  %v3340_v27 = vmax.f32 %v3031_v59, %v3023_v22  ;;  %v15145_v17 = vmax.f32 %v15144_v14, 0.0  ;;  %v15149_v22 = vld [vmem:[#allocation78_spill] sm:$0xff]  ;;  %v15151_v59 = vld [vmem:[#allocation79_spill] sm:$0xff] }
 0x562   :  { %v3032_v16 = vsel %vm2957_vm8, %v15136_v19, -inf  ;;  %v3029_v23 = vsel %vm2956_vm7, %v15141_v50, -inf  ;;  %v15143_v19 = vmax.f32 %v15142_v13, 0.0  ;;  %v15146_v3 = vmax.f32 %v11799_v60, 0.0 }
 0x563   :  { %v3036_v33 = vsel %vm2957_vm8, %v15145_v17, -inf  ;;  %v3383_v25 = vmax.f32 %v3032_v16, %v3024_v21  ;;  %v3426_v50 = vmax.f32 %v3033_v20, %v3025_v63  ;;  %v3469_v30 = vmax.f32 %v3034_v36, %v3026_v53  ;;  %v15153_v17 = vld [vmem:[#allocation151_spill] sm:$0xff] }
 0x564   :  { %v3035_v43 = vsel %vm2957_vm8, %v15143_v19, -inf  ;;  %v3037_v2 = vsel %vm2957_vm8, %v15146_v3, -inf  ;;  %v15150_v26 = vmax.f32 %v15149_v22, 0.0  ;;  %v15152_v19 = vmax.f32 %v15151_v59, 0.0  ;;  %v15156_v20 = vld [vmem:[#allocation219_spill] sm:$0xff] }
 0x565   :  { %v2864_v56 = vpop.permute.xlu2 %2863  ;;  %v15154_v10 = vmax.f32 %v15153_v17, 0.0  ;;  %v15155_v3 = vmax.f32 %v11487_v49, 0.0  ;;  %v3555_v16 = vmax.f32 %v3036_v33, %v3028_v29  ;;  %v3598_v21 = vmax.f32 %v3037_v2, %v3029_v23  ;;  %v15160_v33 = vld [vmem:[#allocation86_spill] sm:$0xff]  ;;  %v15162_v23 = vld [vmem:[#allocation87_spill] sm:$0xff] }
 0x566   :  { %vm2960_vm9 = vcmp.eq.s32.totalorder %v2864_v56, 1  ;;  %v15157_v36 = vmax.f32 %v15156_v20, 0.0 }
 0x567   :  { %v3054_v0 = vsel %vm2960_vm9, %v15148_v62, -inf  ;;  %v3055_v13 = vsel %vm2960_vm9, %v15150_v26, -inf  ;;  %v3056_v14 = vsel %vm2960_vm9, %v15152_v19, -inf  ;;  %v3057_v44 = vsel %vm2960_vm9, %v15154_v10, -inf }
 0x568   :  { %v3058_v15 = vsel %vm2960_vm9, %v15155_v3, -inf  ;;  %v3512_v62 = vmax.f32 %v3035_v43, %v3027_v24  ;;  %v3298_v63 = vmax.f32 %v3297_v18, %v3054_v0  ;;  %v3341_v53 = vmax.f32 %v3340_v27, %v3055_v13  ;;  %v15164_v13 = vld [vmem:[#allocation88_spill] sm:$0xff] }
 0x569   :  { %v3059_v22 = vsel %vm2960_vm9, %v15157_v36, -inf  ;;  %v15158_v26 = vmax.f32 %v11503_v61, 0.0  ;;  %v15159_v19 = vmax.f32 %v11848_v34, 0.0  ;;  %v3384_v49 = vmax.f32 %v3383_v25, %v3056_v14 }
 0x56a   :  { %v3427_v3 = vmax.f32 %v3426_v50, %v3057_v44  ;;  %v3470_v24 = vmax.f32 %v3469_v30, %v3058_v15  ;;  %v15161_v0 = vmax.f32 %v15160_v33, 0.0  ;;  %v15163_v27 = vmax.f32 %v15162_v23, 0.0  ;;  %v15169_v44 = vld [vmem:[#allocation231_spill] sm:$0xff]  ;;  %v15171_v33 = vld [vmem:[#allocation232_spill] sm:$0xff] }
 0x56b   :  { %v3060_v59 = vsel %vm2960_vm9, %v15158_v26, -inf  ;;  %v3061_v10 = vsel %vm2960_vm9, %v15159_v19, -inf  ;;  %v15165_v20 = vmax.f32 %v15164_v13, 0.0  ;;  %v15166_v26 = vld [vmem:[#allocation161_spill] sm:$0xff]  ;;  %v3513_v19 = vmax.f32 %v3512_v62, %v3059_v22 }
 0x56c   :  { %v15167_v34 = vmax.f32 %v15166_v26, 0.0  ;;  %v3556_v61 = vmax.f32 %v3555_v16, %v3060_v59  ;;  %v3599_v25 = vmax.f32 %v3598_v21, %v3061_v10  ;;  %v15168_v30 = vmax.f32 %v11543_v39, 0.0  ;;  %v15176_v10 = vld [vmem:[#allocation60_spill] sm:$0xff] }
 0x56d   :  { %v2873_v17 = vpop.permute.xlu2 %2872  ;;  %v15170_v15 = vmax.f32 %v15169_v44, 0.0  ;;  %v15178_v44 = vld [vmem:[#allocation61_spill] sm:$0xff]  ;;  %v15206_v39 = vld [vmem:[#allocation96_spill] sm:$0xff] }
 0x56e   :  { %vm2963_vm10 = vcmp.eq.s32.totalorder %v2873_v17, 1  ;;  %v2846_v2 = vpop.permute.xlu1 %2845  ;;  %v2840_v18 = vpop.permute.xlu0 %2839 }
 0x56f   :  { %v3078_v29 = vsel %vm2963_vm10, %v15161_v0, -inf  ;;  %v3079_v43 = vsel %vm2963_vm10, %v15163_v27, -inf  ;;  %v3080_v36 = vsel %vm2963_vm10, %v15165_v20, -inf  ;;  %v3081_v56 = vsel %vm2963_vm10, %v15167_v34, -inf }
 0x570   :  { %v3299_v50 = vmax.f32 %v3298_v63, %v3078_v29  ;;  %v3082_v14 = vsel %vm2963_vm10, %v15168_v30, -inf  ;;  %v3083_v17 = vsel %vm2963_vm10, %v15170_v15, -inf  ;;  %v15172_v0 = vmax.f32 %v15171_v33, 0.0  ;;  %v15174_v63 = vld [vmem:[#allocation59_spill] sm:$0xff] }
 0x571   :  { %v15173_v27 = vmax.f32 %v11898_v45, 0.0  ;;  %v3342_v20 = vmax.f32 %v3341_v53, %v3079_v43  ;;  %v3385_v60 = vmax.f32 %v3384_v49, %v3080_v36  ;;  %v3428_v26 = vmax.f32 %v3427_v3, %v3081_v56  ;;  %v15180_v49 = vld [vmem:[#allocation131_spill] sm:$0xff] }
 0x572   :  { %v3084_v23 = vsel %vm2963_vm10, %v15172_v0, -inf  ;;  %v3471_v34 = vmax.f32 %v3470_v24, %v3082_v14  ;;  %v3514_v62 = vmax.f32 %v3513_v19, %v3083_v17  ;;  %vm2954_vm11 = vcmp.eq.s32.totalorder %v2846_v2, 1  ;;  %v15184_v43 = vld [vmem:[#allocation195_spill] sm:$0xff]  ;;  %v15186_v19 = vld [vmem:[#allocation196_spill] sm:$0xff] }
 0x573   :  { %v3085_v13 = vsel %vm2963_vm10, %v15173_v27, -inf  ;;  %v3557_v16 = vmax.f32 %v3556_v61, %v3084_v23  ;;  %vm2952_vm12 = vcmp.eq.s32.totalorder %v2840_v18, 1  ;;  %v15175_v22 = vmax.f32 %v15174_v63, 0.0  ;;  %v15182_v61 = vld [vmem:[#allocation193_spill] sm:$0xff] }
 0x574   :  { %v3600_v21 = vmax.f32 %v3599_v25, %v3085_v13  ;;  %v15177_v29 = vmax.f32 %v15176_v10, 0.0  ;;  %v15179_v15 = vmax.f32 %v15178_v44, 0.0  ;;  %v15181_v53 = vmax.f32 %v15180_v49, 0.0  ;;  %v15189_v27 = vld [vmem:[#allocation53_spill] sm:$0xff]  ;;  %v15193_v44 = vld [vmem:[#allocation55_spill] sm:$0xff] }
 0x575   :  { %v12261_v59 = vsel %vm2954_vm11, %v15175_v22, -inf  ;;  %v15183_v24 = vmax.f32 %v15182_v61, 0.0  ;;  %v15185_v36 = vmax.f32 %v15184_v43, 0.0  ;;  %v15187_v25 = vmax.f32 %v15186_v19, 0.0  ;;  %v2882_v17 = vpop.permute.xlu2 %2881  ;;  %v15191_v22 = vld [vmem:[#allocation54_spill] sm:$0xff]  ;;  %v15197_v19 = vld [vmem:[#allocation185_spill] sm:$0xff] }
 0x576   :  { %v12265_v30 = vsel %vm2954_vm11, %v15177_v29, -inf  ;;  %v12269_v33 = vsel %vm2954_vm11, %v15179_v15, -inf  ;;  %v12273_v3 = vsel %vm2954_vm11, %v15181_v53, -inf  ;;  %v15188_v0 = vmax.f32 %v11749_v51, 0.0  ;;  %v2849_v53 = vpop.permute.xlu1 %2848  ;;  %v2843_v61 = vpop.permute.xlu0 %2842  ;;  %v15201_v51 = vld [vmem:[#allocation188_spill] sm:$0xff] }
 0x577   :  { %v12277_v2 = vsel %vm2954_vm11, %v15183_v24, -inf  ;;  %v12281_v56 = vsel %vm2954_vm11, %v15185_v36, -inf  ;;  %v12285_v14 = vsel %vm2954_vm11, %v15187_v25, -inf  ;;  %v15190_v13 = vmax.f32 %v15189_v27, 0.0  ;;  %v15195_v24 = vld [vmem:[#allocation123_spill] sm:$0xff] }
 0x578   :  { %v3013_v23 = vsel %vm2954_vm11, %v15188_v0, -inf  ;;  %v15192_v10 = vmax.f32 %v15191_v22, 0.0  ;;  %v15194_v15 = vmax.f32 %v15193_v44, 0.0  ;;  %v15196_v43 = vmax.f32 %v15195_v24, 0.0  ;;  %v15199_v27 = vld [vmem:[#allocation187_spill] sm:$0xff] }
 0x579   :  { %v2990_v63 = vsel %vm2952_vm12, %v15190_v13, -inf  ;;  %v15198_v25 = vmax.f32 %v15197_v19, 0.0  ;;  %v15200_v13 = vmax.f32 %v15199_v27, 0.0  ;;  %vm2966_vm13 = vcmp.eq.s32.totalorder %v2882_v17, 1  ;;  %v15204_v24 = vld [vmem:[#allocation95_spill] sm:$0xff]  ;;  %v15208_v27 = vld [vmem:[#allocation97_spill] sm:$0xff] }
 0x57a   :  { %v2991_v29 = vsel %vm2952_vm12, %v15192_v10, -inf  ;;  %v2992_v49 = vsel %vm2952_vm12, %v15194_v15, -inf  ;;  %v2993_v36 = vsel %vm2952_vm12, %v15196_v43, -inf  ;;  %v15202_v10 = vmax.f32 %v15201_v51, 0.0 }
 0x57b   :  { %v2994_v0 = vsel %vm2952_vm12, %v15198_v25, -inf  ;;  %v2995_v22 = vsel %vm2952_vm12, %v15200_v13, -inf  ;;  %v15203_v15 = vmax.f32 %v11716_v47, 0.0  ;;  %vm2955_vm14 = vcmp.eq.s32.totalorder %v2849_v53, 1 }
 0x57c   :  { %v2996_v44 = vsel %vm2952_vm12, %v15202_v10, -inf  ;;  %vm2953_vm15 = vcmp.eq.s32.totalorder %v2843_v61, 1  ;;  %v15205_v43 = vmax.f32 %v15204_v24, 0.0  ;;  %v15207_v25 = vmax.f32 %v15206_v39, 0.0 }
 0x57d   :  { %v2997_v45 = vsel %vm2952_vm12, %v15203_v15, -inf  ;;  %v15209_v12 = vmax.f32 %v15208_v27, 0.0  ;;  %v15211_v51 = vmax.f32 %v15210_v5, 0.0  ;;  %v15212_v17 = vmax.f32 %v11595_v54, 0.0  ;;  %v15243_v54 = vld [vmem:[#allocation191_spill] sm:$0xff] }
 0x57e   :  { %v3102_v19 = vsel %vm2966_vm13, %v15205_v43, -inf  ;;  %v3103_v11 = vsel %vm2966_vm13, %v15207_v25, -inf  ;;  %v3107_v24 = vsel %vm2966_vm13, %v15214_v6, -inf  ;;  %v15215_v43 = vmax.f32 %v11611_v52, 0.0 }
 0x57f   :  { %v3104_v13 = vsel %vm2966_vm13, %v15209_v12, -inf  ;;  %v3105_v7 = vsel %vm2966_vm13, %v15211_v51, -inf  ;;  %v3300_v10 = vmax.f32 %v3299_v50, %v3102_v19  ;;  %v3343_v9 = vmax.f32 %v3342_v20, %v3103_v11  ;;  %v15217_v50 = vld [vmem:[#allocation62_spill] sm:$0xff] }
 0x580   :  { %v3386_v47 = vmax.f32 %v3385_v60, %v3104_v13  ;;  %v3429_v18 = vmax.f32 %v3428_v26, %v3105_v7  ;;  %v3106_v15 = vsel %vm2966_vm13, %v15212_v17, -inf  ;;  %v3108_v39 = vsel %vm2966_vm13, %v15215_v43, -inf  ;;  %v15219_v60 = vld [vmem:[#allocation63_spill] sm:$0xff] }
 0x581   :  { %v15216_v25 = vmax.f32 %v11947_v28, 0.0  ;;  %v3472_v12 = vmax.f32 %v3471_v34, %v3106_v15  ;;  %v3515_v8 = vmax.f32 %v3514_v62, %v3107_v24  ;;  %v3558_v5 = vmax.f32 %v3557_v16, %v3108_v39  ;;  %v15223_v13 = vld [vmem:[#allocation135_spill] sm:$0xff]  ;;  %v15225_v34 = vld [vmem:[#allocation197_spill] sm:$0xff]  ;;  %v15229_v39 = vld [vmem:[#allocation200_spill] sm:$0xff] }
 0x582   :  { %v15218_v11 = vmax.f32 %v15217_v50, 0.0  ;;  %v15220_v20 = vmax.f32 %v15219_v60, 0.0  ;;  %v15222_v6 = vmax.f32 %v15221_v4, 0.0  ;;  %v15224_v17 = vmax.f32 %v15223_v13, 0.0  ;;  %v15231_v50 = vld [vmem:[#allocation278_spill] sm:$0xff]  ;;  %v15233_v4 = vld [vmem:[#allocation56_spill] sm:$0xff] }
 0x583   :  { %v3109_v27 = vsel %vm2966_vm13, %v15216_v25, -inf  ;;  %v15226_v62 = vmax.f32 %v15225_v34, 0.0  ;;  %v15230_v25 = vmax.f32 %v15229_v39, 0.0  ;;  %v15239_v39 = vld [vmem:[#allocation127_spill] sm:$0xff] }
 0x584   :  { %v3601_v51 = vmax.f32 %v3600_v21, %v3109_v27  ;;  %v3014_v7 = vsel %vm2955_vm14, %v15218_v11, -inf  ;;  %v3015_v26 = vsel %vm2955_vm14, %v15220_v20, -inf  ;;  %v3016_v19 = vsel %vm2955_vm14, %v15222_v6, -inf  ;;  %v15227_v21 = vld [vmem:[#allocation199_spill] sm:$0xff]  ;;  %v2891_v20 = vpop.permute.xlu2 %2890 }
 0x585   :  { %v3017_v43 = vsel %vm2955_vm14, %v15224_v17, -inf  ;;  %v3018_v16 = vsel %vm2955_vm14, %v15226_v62, -inf  ;;  %v15228_v15 = vmax.f32 %v15227_v21, 0.0  ;;  %v3020_v27 = vsel %vm2955_vm14, %v15230_v25, -inf  ;;  %v15235_v17 = vld [vmem:[#allocation57_spill] sm:$0xff]  ;;  %v15237_v21 = vld [vmem:[#allocation58_spill] sm:$0xff] }
 0x586   :  { %v15232_v11 = vmax.f32 %v15231_v50, 0.0  ;;  %v15234_v6 = vmax.f32 %v15233_v4, 0.0  ;;  %v15236_v34 = vmax.f32 %v15235_v17, 0.0  ;;  %v15238_v28 = vmax.f32 %v15237_v21, 0.0  ;;  %v15241_v50 = vld [vmem:[#allocation189_spill] sm:$0xff] }
 0x587   :  { %v3019_v24 = vsel %vm2955_vm14, %v15228_v15, -inf  ;;  %v15240_v52 = vmax.f32 %v15239_v39, 0.0  ;;  %v15242_v53 = vmax.f32 %v15241_v50, 0.0  ;;  %v15244_v4 = vmax.f32 %v15243_v54, 0.0 }
 0x588   :  { %v3021_v60 = vsel %vm2955_vm14, %v15232_v11, -inf  ;;  %v2998_v13 = vsel %vm2953_vm15, %v15234_v6, -inf  ;;  %v2999_v62 = vsel %vm2953_vm15, %v15236_v34, -inf  ;;  %v3000_v15 = vsel %vm2953_vm15, %v15238_v28, -inf }
 0x589   :  { %v3001_v25 = vsel %vm2953_vm15, %v15240_v52, -inf  ;;  %v3002_v11 = vsel %vm2953_vm15, %v15242_v53, -inf  ;;  %v3003_v6 = vsel %vm2953_vm15, %v15244_v4, -inf  ;;  %v15246_v17 = vmax.f32 %v15245_v55, 0.0 }
 0x58a   :  { %v15248_v21 = vmax.f32 %v15247_v31, 0.0  ;;  %v3294_v38 = vmax.f32 %v2990_v63, %v2998_v13  ;;  %v3337_v39 = vmax.f32 %v2991_v29, %v2999_v62  ;;  %v3380_v40 = vmax.f32 %v2992_v49, %v3000_v15  ;;  %v2858_v13 = vpop.permute.xlu0 %2857 }
 0x58b   :  { %v3004_v34 = vsel %vm2953_vm15, %v15246_v17, -inf  ;;  %v3423_v52 = vmax.f32 %v2993_v36, %v3001_v25  ;;  %v3466_v41 = vmax.f32 %v2994_v0, %v3002_v11  ;;  %v3509_v50 = vmax.f32 %v2995_v22, %v3003_v6  ;;  %v15259_v25 = vld [vmem:[#allocation255_spill] sm:$0xff] }
 0x58c   :  { %v3005_v28 = vsel %vm2953_vm15, %v15248_v21, -inf  ;;  %v3552_v35 = vmax.f32 %v2996_v44, %v3004_v34  ;;  %v3295_v54 = vmax.f32 %v3294_v38, %v12261_v59  ;;  %v3338_v4 = vmax.f32 %v3337_v39, %v12265_v30  ;;  %v12384_v15 = vpop.permute.xlu2 %2899  ;;  %v15261_v34 = vld [vmem:[#allocation256_spill] sm:$0xff] }
 0x58d   :  { %v3595_v53 = vmax.f32 %v2997_v45, %v3005_v28  ;;  %v3381_v55 = vmax.f32 %v3380_v40, %v12269_v33  ;;  %v3424_v17 = vmax.f32 %v3423_v52, %v12273_v3  ;;  %v3467_v31 = vmax.f32 %v3466_v41, %v12277_v2  ;;  %v2861_v45 = vpop.permute.xlu1 %2860 }
 0x58e   :  { %v3510_v61 = vmax.f32 %v3509_v50, %v12281_v56  ;;  %v3553_v63 = vmax.f32 %v3552_v35, %v12285_v14  ;;  %v3296_v49 = vmax.f32 %v3295_v54, %v3014_v7  ;;  %v3339_v36 = vmax.f32 %v3338_v4, %v3015_v26  ;;  %v15249_v14 = vld [vmem:[#allocation104_spill] sm:$0xff]  ;;  %v15251_v26 = vld [vmem:[#allocation105_spill] sm:$0xff] }
 0x58f   :  { %v3596_v29 = vmax.f32 %v3595_v53, %v3013_v23  ;;  %v3382_v0 = vmax.f32 %v3381_v55, %v3016_v19  ;;  %v3425_v22 = vmax.f32 %v3424_v17, %v3017_v43  ;;  %v3468_v44 = vmax.f32 %v3467_v31, %v3018_v16  ;;  %v15253_v16 = vld [vmem:[#allocation106_spill] sm:$0xff] }
 0x590   :  { %v3511_v38 = vmax.f32 %v3510_v61, %v3019_v24  ;;  %v3554_v59 = vmax.f32 %v3553_v63, %v3020_v27  ;;  %v3301_v40 = vmax.f32 %v3300_v10, %v3296_v49  ;;  %v3344_v33 = vmax.f32 %v3343_v9, %v3339_v36  ;;  %v15264_v55 = vld [vmem:[#allocation74_spill] sm:$0xff]  ;;  %v15266_v61 = vld [vmem:[#allocation75_spill] sm:$0xff]  ;;  %v15268_v49 = vld [vmem:[#allocation76_spill] sm:$0xff] }
 0x591   :  { %v3597_v30 = vmax.f32 %v3596_v29, %v3021_v60  ;;  %v3387_v3 = vmax.f32 %v3386_v47, %v3382_v0  ;;  %v3430_v62 = vmax.f32 %v3429_v18, %v3425_v22  ;;  %v3473_v41 = vmax.f32 %v3472_v12, %v3468_v44  ;;  %v15255_v47 = vld [vmem:[#allocation182_spill] sm:$0xff]  ;;  %v15270_v22 = vld [vmem:[#allocation148_spill] sm:$0xff] }
 0x592   :  { %v3516_v2 = vmax.f32 %v3515_v8, %v3511_v38  ;;  %v3559_v56 = vmax.f32 %v3558_v5, %v3554_v59  ;;  %vm2969_vm0 = vcmp.eq.s32.totalorder %v2891_v20, 1  ;;  %vm2959_vm1 = vcmp.eq.s32.totalorder %v2861_v45, 1 }
 0x593   :  { %v3602_v35 = vmax.f32 %v3601_v51, %v3597_v30  ;;  %vm2958_vm2 = vcmp.eq.s32.totalorder %v2858_v13, 1  ;;  %v15250_v23 = vmax.f32 %v15249_v14, 0.0  ;;  %v15252_v19 = vmax.f32 %v15251_v26, 0.0  ;;  %v15257_v51 = vld [vmem:[#allocation253_spill] sm:$0xff] }
 0x594   :  { %v15254_v10 = vmax.f32 %v15253_v16, 0.0  ;;  %v15256_v18 = vmax.f32 %v15255_v47, 0.0  ;;  %vm2972_vm3 = vcmp.eq.s32.totalorder %v12384_v15, 1  ;;  %v15258_v60 = vmax.f32 %v15257_v51, 0.0  ;;  %v15283_v51 = vld [vmem:[#allocation73_spill] sm:$0xff] }
 0x595   :  { %v3126_v7 = vsel %vm2969_vm0, %v15250_v23, -inf  ;;  %v3127_v43 = vsel %vm2969_vm0, %v15252_v19, -inf  ;;  %v15260_v11 = vmax.f32 %v15259_v25, 0.0  ;;  %v15262_v21 = vmax.f32 %v15261_v34, 0.0  ;;  %v15276_v23 = vld [vmem:[#allocation216_spill] sm:$0xff]  ;;  %v15316_v15 = vld [vmem:[#allocation157_spill] sm:$0xff] }
 0x596   :  { %v3128_v9 = vsel %vm2969_vm0, %v15254_v10, -inf  ;;  %v3129_v12 = vsel %vm2969_vm0, %v15256_v18, -inf  ;;  %v3302_v8 = vmax.f32 %v3301_v40, %v3126_v7  ;;  %v3345_v5 = vmax.f32 %v3344_v33, %v3127_v43  ;;  %v15279_v18 = vld [vmem:[#allocation71_spill] sm:$0xff]  ;;  %v15285_v25 = vld [vmem:[#allocation144_spill] sm:$0xff] }
 0x597   :  { %v3388_v24 = vmax.f32 %v3387_v3, %v3128_v9  ;;  %v3431_v27 = vmax.f32 %v3430_v62, %v3129_v12  ;;  %v3130_v20 = vsel %vm2969_vm0, %v15258_v60, -inf  ;;  %v3131_v6 = vsel %vm2969_vm0, %v15260_v11, -inf  ;;  %v2870_v3 = vpop.permute.xlu1 %2869  ;;  %v15272_v62 = vld [vmem:[#allocation213_spill] sm:$0xff] }
 0x598   :  { %v3132_v28 = vsel %vm2969_vm0, %v15262_v21, -inf  ;;  %v15263_v39 = vmax.f32 %v11997_v42, 0.0  ;;  %v3474_v50 = vmax.f32 %v3473_v41, %v3130_v20  ;;  %v3517_v53 = vmax.f32 %v3516_v2, %v3131_v6 }
 0x599   :  { %v3560_v54 = vmax.f32 %v3559_v56, %v3132_v28  ;;  %v15265_v17 = vmax.f32 %v15264_v55, 0.0  ;;  %v15267_v63 = vmax.f32 %v15266_v61, 0.0  ;;  %v15269_v36 = vmax.f32 %v15268_v49, 0.0  ;;  %v15274_v56 = vld [vmem:[#allocation215_spill] sm:$0xff]  ;;  %v15291_v55 = vld [vmem:[#allocation212_spill] sm:$0xff]  ;;  %v15293_v61 = vld [vmem:[#allocation290_spill] sm:$0xff] }
 0x59a   :  { %v3133_v52 = vsel %vm2969_vm0, %v15263_v39, -inf  ;;  %v15271_v44 = vmax.f32 %v15270_v22, 0.0  ;;  %v15273_v41 = vmax.f32 %v15272_v62, 0.0  ;;  %v15277_v7 = vmax.f32 %v15276_v23, 0.0  ;;  %v15287_v39 = vld [vmem:[#allocation209_spill] sm:$0xff]  ;;  %v15299_v62 = vld [vmem:[#allocation115_spill] sm:$0xff] }
 0x59b   :  { %v3603_v4 = vmax.f32 %v3602_v35, %v3133_v52  ;;  %v3046_v31 = vsel %vm2959_vm1, %v15265_v17, -inf  ;;  %v3047_v29 = vsel %vm2959_vm1, %v15267_v63, -inf  ;;  %v3048_v0 = vsel %vm2959_vm1, %v15269_v36, -inf }
 0x59c   :  { %v3049_v38 = vsel %vm2959_vm1, %v15271_v44, -inf  ;;  %v3303_v59 = vmax.f32 %v3302_v8, %v3046_v31  ;;  %v3346_v30 = vmax.f32 %v3345_v5, %v3047_v29  ;;  %v3389_v40 = vmax.f32 %v3388_v24, %v3048_v0  ;;  %v15281_v5 = vld [vmem:[#allocation72_spill] sm:$0xff]  ;;  %v15295_v44 = vld [vmem:[#allocation113_spill] sm:$0xff] }
 0x59d   :  { %v3432_v33 = vmax.f32 %v3431_v27, %v3049_v38  ;;  %v3050_v2 = vsel %vm2959_vm1, %v15273_v41, -inf  ;;  %v15275_v35 = vmax.f32 %v15274_v56, 0.0  ;;  %v3052_v26 = vsel %vm2959_vm1, %v15277_v7, -inf }
 0x59e   :  { %v15278_v19 = vmax.f32 %v11832_v37, 0.0  ;;  %v3475_v16 = vmax.f32 %v3474_v50, %v3050_v2  ;;  %v3561_v9 = vmax.f32 %v3560_v54, %v3052_v26  ;;  %v15280_v12 = vmax.f32 %v15279_v18, 0.0  ;;  %v15301_v2 = vld [vmem:[#allocation194_spill] sm:$0xff] }
 0x59f   :  { %v3051_v14 = vsel %vm2959_vm1, %v15275_v35, -inf  ;;  %v15282_v24 = vmax.f32 %v15281_v5, 0.0  ;;  %v15284_v60 = vmax.f32 %v15283_v51, 0.0  ;;  %v15286_v11 = vmax.f32 %v15285_v25, 0.0 }
 0x5a0   :  { %v3053_v43 = vsel %vm2959_vm1, %v15278_v19, -inf  ;;  %v3518_v10 = vmax.f32 %v3517_v53, %v3051_v14  ;;  %v3038_v8 = vsel %vm2958_vm2, %v15280_v12, -inf  ;;  %v15288_v52 = vmax.f32 %v15287_v39, 0.0  ;;  %v15289_v53 = vld [vmem:[#allocation211_spill] sm:$0xff]  ;;  %v2867_v19 = vpop.permute.xlu0 %2866 }
 0x5a1   :  { %v3604_v47 = vmax.f32 %v3603_v4, %v3053_v43  ;;  %v3039_v27 = vsel %vm2958_vm2, %v15282_v24, -inf  ;;  %v3040_v20 = vsel %vm2958_vm2, %v15284_v60, -inf  ;;  %v3041_v45 = vsel %vm2958_vm2, %v15286_v11, -inf  ;;  %v2909_v43 = vpop.permute.xlu2 %2908  ;;  %v12483_v11 = vpop.permute.xlu1 %2878 }
 0x5a2   :  { %v3304_v6 = vmax.f32 %v3303_v59, %v3038_v8  ;;  %v3347_v34 = vmax.f32 %v3346_v30, %v3039_v27  ;;  %v3390_v21 = vmax.f32 %v3389_v40, %v3040_v20  ;;  %v3433_v28 = vmax.f32 %v3432_v33, %v3041_v45  ;;  %v15297_v30 = vld [vmem:[#allocation114_spill] sm:$0xff]  ;;  %v15307_v8 = vld [vmem:[#allocation268_spill] sm:$0xff] }
 0x5a3   :  { %v3042_v50 = vsel %vm2958_vm2, %v15288_v52, -inf  ;;  %v15290_v54 = vmax.f32 %v15289_v53, 0.0  ;;  %v15292_v17 = vmax.f32 %v15291_v55, 0.0  ;;  %v15294_v63 = vmax.f32 %v15293_v61, 0.0 }
 0x5a4   :  { %v3476_v49 = vmax.f32 %v3475_v16, %v3042_v50  ;;  %v15296_v38 = vmax.f32 %v15295_v44, 0.0  ;;  %v15298_v40 = vmax.f32 %v15297_v30, 0.0  ;;  %v15300_v41 = vmax.f32 %v15299_v62, 0.0  ;;  %v15303_v16 = vld [vmem:[#allocation265_spill] sm:$0xff]  ;;  %v15322_v44 = vld [vmem:[#allocation228_spill] sm:$0xff] }
 0x5a5   :  { %v3043_v4 = vsel %vm2958_vm2, %v15290_v54, -inf  ;;  %v3044_v31 = vsel %vm2958_vm2, %v15292_v17, -inf  ;;  %v3045_v29 = vsel %vm2958_vm2, %v15294_v63, -inf  ;;  %v15302_v56 = vmax.f32 %v15301_v2, 0.0  ;;  %v15314_v50 = vld [vmem:[#allocation85_spill] sm:$0xff] }
 0x5a6   :  { %v3519_v36 = vmax.f32 %v3518_v10, %v3043_v4  ;;  %v3562_v0 = vmax.f32 %v3561_v9, %v3044_v31  ;;  %v3605_v22 = vmax.f32 %v3604_v47, %v3045_v29  ;;  %v3150_v59 = vsel %vm2972_vm3, %v15296_v38, -inf  ;;  %v15305_v47 = vld [vmem:[#allocation267_spill] sm:$0xff]  ;;  %v15324_v30 = vld [vmem:[#allocation305_spill] sm:$0xff] }
 0x5a7   :  { %v3151_v33 = vsel %vm2972_vm3, %v15298_v40, -inf  ;;  %v3152_v13 = vsel %vm2972_vm3, %v15300_v41, -inf  ;;  %v3153_v35 = vsel %vm2972_vm3, %v15302_v56, -inf  ;;  %v3305_v14 = vmax.f32 %v3304_v6, %v3150_v59  ;;  %v15310_v6 = vld [vmem:[#allocation83_spill] sm:$0xff]  ;;  %v15326_v56 = vld [vmem:[#allocation80_spill] sm:$0xff] }
 0x5a8   :  { %v3348_v23 = vmax.f32 %v3347_v34, %v3151_v33  ;;  %v3391_v7 = vmax.f32 %v3390_v21, %v3152_v13  ;;  %v3434_v26 = vmax.f32 %v3433_v28, %v3153_v35  ;;  %v15304_v10 = vmax.f32 %v15303_v16, 0.0  ;;  %v15312_v28 = vld [vmem:[#allocation84_spill] sm:$0xff]  ;;  %v15330_v16 = vld [vmem:[#allocation82_spill] sm:$0xff] }
 0x5a9   :  { %v15306_v18 = vmax.f32 %v15305_v47, 0.0  ;;  %v15308_v5 = vmax.f32 %v15307_v8, 0.0  ;;  %v15309_v27 = vmax.f32 %v12018_v58, 0.0  ;;  %vm2962_vm4 = vcmp.eq.s32.totalorder %v2870_v3, 1  ;;  %v15318_v3 = vld [vmem:[#allocation225_spill] sm:$0xff] }
 0x5aa   :  { %v3154_v9 = vsel %vm2972_vm3, %v15304_v10, -inf  ;;  %vm2961_vm5 = vcmp.eq.s32.totalorder %v2867_v19, 1  ;;  %vm2975_vm6 = vcmp.eq.s32.totalorder %v2909_v43, 1  ;;  %v15311_v34 = vmax.f32 %v15310_v6, 0.0  ;;  %v15332_v47 = vld [vmem:[#allocation153_spill] sm:$0xff] }
 0x5ab   :  { %v3155_v12 = vsel %vm2972_vm3, %v15306_v18, -inf  ;;  %v3156_v24 = vsel %vm2972_vm3, %v15308_v5, -inf  ;;  %v3157_v51 = vsel %vm2972_vm3, %v15309_v27, -inf  ;;  %v3477_v60 = vmax.f32 %v3476_v49, %v3154_v9 }
 0x5ac   :  { %v3520_v20 = vmax.f32 %v3519_v36, %v3155_v12  ;;  %v3563_v25 = vmax.f32 %v3562_v0, %v3156_v24  ;;  %v3606_v45 = vmax.f32 %v3605_v22, %v3157_v51  ;;  %v3070_v21 = vsel %vm2962_vm4, %v15311_v34, -inf  ;;  %v15320_v36 = vld [vmem:[#allocation227_spill] sm:$0xff]  ;;  %v15334_v51 = vld [vmem:[#allocation221_spill] sm:$0xff]  ;;  %v15338_v34 = vld [vmem:[#allocation224_spill] sm:$0xff] }
 0x5ad   :  { %v15313_v39 = vmax.f32 %v15312_v28, 0.0  ;;  %v15315_v53 = vmax.f32 %v15314_v50, 0.0  ;;  %v15317_v4 = vmax.f32 %v15316_v15, 0.0  ;;  %v3306_v17 = vmax.f32 %v3305_v14, %v3070_v21 }
 0x5ae   :  { %vm2965_vm7 = vcmp.eq.s32.totalorder %v12483_v11, 1  ;;  %v15319_v29 = vmax.f32 %v15318_v3, 0.0  ;;  %v15321_v0 = vmax.f32 %v15320_v36, 0.0  ;;  %v15323_v38 = vmax.f32 %v15322_v44, 0.0 }
 0x5af   :  { %v3071_v52 = vsel %vm2962_vm4, %v15313_v39, -inf  ;;  %v3072_v54 = vsel %vm2962_vm4, %v15315_v53, -inf  ;;  %v3073_v55 = vsel %vm2962_vm4, %v15317_v4, -inf  ;;  %v15325_v40 = vmax.f32 %v15324_v30, 0.0  ;;  %v15340_v39 = vld [vmem:[#allocation301_spill] sm:$0xff] }
 0x5b0   :  { %v3349_v31 = vmax.f32 %v3348_v23, %v3071_v52  ;;  %v3392_v61 = vmax.f32 %v3391_v7, %v3072_v54  ;;  %v3435_v63 = vmax.f32 %v3434_v26, %v3073_v55  ;;  %v3074_v49 = vsel %vm2962_vm4, %v15319_v29, -inf  ;;  %v15328_v23 = vld [vmem:[#allocation81_spill] sm:$0xff]  ;;  %v15342_v55 = vld [vmem:[#allocation122_spill] sm:$0xff] }
 0x5b1   :  { %v3075_v22 = vsel %vm2962_vm4, %v15321_v0, -inf  ;;  %v3076_v59 = vsel %vm2962_vm4, %v15323_v38, -inf  ;;  %v3077_v33 = vsel %vm2962_vm4, %v15325_v40, -inf  ;;  %v3478_v62 = vmax.f32 %v3477_v60, %v3074_v49  ;;  %v15346_v29 = vld [vmem:[#allocation125_spill] sm:$0xff]  ;;  %v15348_v0 = vld [vmem:[#allocation206_spill] sm:$0xff] }
 0x5b2   :  { %v3521_v41 = vmax.f32 %v3520_v20, %v3075_v22  ;;  %v3564_v13 = vmax.f32 %v3563_v25, %v3076_v59  ;;  %v3607_v2 = vmax.f32 %v3606_v45, %v3077_v33  ;;  %v15327_v35 = vmax.f32 %v15326_v56, 0.0  ;;  %v15336_v25 = vld [vmem:[#allocation223_spill] sm:$0xff]  ;;  %v15350_v40 = vld [vmem:[#allocation277_spill] sm:$0xff]  ;;  %v15354_v56 = vld [vmem:[#allocation280_spill] sm:$0xff] }
 0x5b3   :  { %v15329_v7 = vmax.f32 %v15328_v23, 0.0  ;;  %v15331_v10 = vmax.f32 %v15330_v16, 0.0  ;;  %v15333_v18 = vmax.f32 %v15332_v47, 0.0  ;;  %v15335_v60 = vmax.f32 %v15334_v51, 0.0  ;;  %v15361_v51 = vld [vmem:[#allocation94_spill] sm:$0xff] }
 0x5b4   :  { %v3062_v14 = vsel %vm2961_vm5, %v15327_v35, -inf  ;;  %v15337_v45 = vmax.f32 %v15336_v25, 0.0  ;;  %v15339_v21 = vmax.f32 %v15338_v34, 0.0  ;;  %v15341_v52 = vmax.f32 %v15340_v39, 0.0  ;;  %v15363_v34 = vld [vmem:[#allocation169_spill] sm:$0xff]  ;;  %v12566_v39 = vpop.permute.xlu1 %2887 }
 0x5b5   :  { %v3063_v26 = vsel %vm2961_vm5, %v15329_v7, -inf  ;;  %v3064_v9 = vsel %vm2961_vm5, %v15331_v10, -inf  ;;  %v3065_v12 = vsel %vm2961_vm5, %v15333_v18, -inf  ;;  %v3307_v8 = vmax.f32 %v3306_v17, %v3062_v14  ;;  %v15357_v18 = vld [vmem:[#allocation92_spill] sm:$0xff] }
 0x5b6   :  { %v3350_v5 = vmax.f32 %v3349_v31, %v3063_v26  ;;  %v3393_v24 = vmax.f32 %v3392_v61, %v3064_v9  ;;  %v3436_v27 = vmax.f32 %v3435_v63, %v3065_v12  ;;  %v3066_v20 = vsel %vm2961_vm5, %v15335_v60, -inf  ;;  %v15344_v61 = vld [vmem:[#allocation124_spill] sm:$0xff]  ;;  %v2876_v26 = vpop.permute.xlu0 %2875 }
 0x5b7   :  { %v3067_v6 = vsel %vm2961_vm5, %v15337_v45, -inf  ;;  %v3068_v28 = vsel %vm2961_vm5, %v15339_v21, -inf  ;;  %v3069_v50 = vsel %vm2961_vm5, %v15341_v52, -inf  ;;  %v3479_v53 = vmax.f32 %v3478_v62, %v3066_v20  ;;  %v2918_v20 = vpop.permute.xlu2 %2917 }
 0x5b8   :  { %v3522_v54 = vmax.f32 %v3521_v41, %v3067_v6  ;;  %v3565_v15 = vmax.f32 %v3564_v13, %v3068_v28  ;;  %v3608_v4 = vmax.f32 %v3607_v2, %v3069_v50  ;;  %v15343_v17 = vmax.f32 %v15342_v55, 0.0  ;;  %v15352_v41 = vld [vmem:[#allocation279_spill] sm:$0xff]  ;;  %v15365_v50 = vld [vmem:[#allocation237_spill] sm:$0xff] }
 0x5b9   :  { %v15345_v63 = vmax.f32 %v15344_v61, 0.0  ;;  %v15347_v49 = vmax.f32 %v15346_v29, 0.0  ;;  %v15349_v22 = vmax.f32 %v15348_v0, 0.0  ;;  %v15351_v33 = vmax.f32 %v15350_v40, 0.0  ;;  %v15376_v40 = vld [vmem:[#allocation91_spill] sm:$0xff] }
 0x5ba   :  { %v3174_v31 = vsel %vm2975_vm6, %v15343_v17, -inf  ;;  %v15353_v13 = vmax.f32 %v15352_v41, 0.0  ;;  %v15355_v35 = vmax.f32 %v15354_v56, 0.0  ;;  %v15356_v23 = vmax.f32 %v12031_v57, 0.0  ;;  %v15369_v17 = vld [vmem:[#allocation240_spill] sm:$0xff]  ;;  %v15378_v41 = vld [vmem:[#allocation165_spill] sm:$0xff] }
 0x5bb   :  { %v3175_v3 = vsel %vm2975_vm6, %v15345_v63, -inf  ;;  %v3176_v36 = vsel %vm2975_vm6, %v15347_v49, -inf  ;;  %v3177_v19 = vsel %vm2975_vm6, %v15349_v22, -inf  ;;  %v3308_v44 = vmax.f32 %v3307_v8, %v3174_v31  ;;  %v15372_v22 = vld [vmem:[#allocation89_spill] sm:$0xff] }
 0x5bc   :  { %v3351_v38 = vmax.f32 %v3350_v5, %v3175_v3  ;;  %v3394_v59 = vmax.f32 %v3393_v24, %v3176_v36  ;;  %v3437_v30 = vmax.f32 %v3436_v27, %v3177_v19  ;;  %v3178_v62 = vsel %vm2975_vm6, %v15351_v33, -inf  ;;  %v15359_v5 = vld [vmem:[#allocation93_spill] sm:$0xff] }
 0x5bd   :  { %v3179_v2 = vsel %vm2975_vm6, %v15353_v13, -inf  ;;  %v3180_v14 = vsel %vm2975_vm6, %v15355_v35, -inf  ;;  %v3181_v7 = vsel %vm2975_vm6, %v15356_v23, -inf  ;;  %v3480_v16 = vmax.f32 %v3479_v53, %v3178_v62  ;;  %v15380_v23 = vld [vmem:[#allocation233_spill] sm:$0xff] }
 0x5be   :  { %v3523_v10 = vmax.f32 %v3522_v54, %v3179_v2  ;;  %v3566_v9 = vmax.f32 %v3565_v15, %v3180_v14  ;;  %v3609_v47 = vmax.f32 %v3608_v4, %v3181_v7  ;;  %v15358_v12 = vmax.f32 %v15357_v18, 0.0  ;;  %v15367_v15 = vld [vmem:[#allocation239_spill] sm:$0xff] }
 0x5bf   :  { %v15360_v24 = vmax.f32 %v15359_v5, 0.0  ;;  %v15362_v60 = vmax.f32 %v15361_v51, 0.0  ;;  %v15364_v21 = vmax.f32 %v15363_v34, 0.0  ;;  %v15366_v53 = vmax.f32 %v15365_v50, 0.0  ;;  %v15392_v50 = vld [vmem:[#allocation137_spill] sm:$0xff] }
 0x5c0   :  { %v3094_v8 = vsel %vm2965_vm7, %v15358_v12, -inf  ;;  %v15368_v4 = vmax.f32 %v15367_v15, 0.0  ;;  %v15370_v31 = vmax.f32 %v15369_v17, 0.0  ;;  %v15371_v49 = vmax.f32 %v11931_v32, 0.0  ;;  %v15394_v15 = vld [vmem:[#allocation218_spill] sm:$0xff] }
 0x5c1   :  { %v3095_v27 = vsel %vm2965_vm7, %v15360_v24, -inf  ;;  %v3096_v43 = vsel %vm2965_vm7, %v15362_v60, -inf  ;;  %v3309_v25 = vmax.f32 %v3308_v44, %v3094_v8  ;;  %v3097_v28 = vsel %vm2965_vm7, %v15364_v21, -inf  ;;  %v15386_v8 = vld [vmem:[#allocation313_spill] sm:$0xff]  ;;  %v15390_v21 = vld [vmem:[#allocation136_spill] sm:$0xff] }
 0x5c2   :  { %v3352_v45 = vmax.f32 %v3351_v38, %v3095_v27  ;;  %v3395_v6 = vmax.f32 %v3394_v59, %v3096_v43  ;;  %v3438_v52 = vmax.f32 %v3437_v30, %v3097_v28  ;;  %v3098_v54 = vsel %vm2965_vm7, %v15366_v53, -inf  ;;  %v15374_v38 = vld [vmem:[#allocation90_spill] sm:$0xff] }
 0x5c3   :  { %v3099_v55 = vsel %vm2965_vm7, %v15368_v4, -inf  ;;  %v3100_v61 = vsel %vm2965_vm7, %v15370_v31, -inf  ;;  %v3481_v63 = vmax.f32 %v3480_v16, %v3098_v54  ;;  %v3101_v36 = vsel %vm2965_vm7, %v15371_v49, -inf  ;;  %v15382_v16 = vld [vmem:[#allocation235_spill] sm:$0xff] }
 0x5c4   :  { %v3524_v3 = vmax.f32 %v3523_v10, %v3099_v55  ;;  %v3567_v29 = vmax.f32 %v3566_v9, %v3100_v61  ;;  %v3610_v0 = vmax.f32 %v3609_v47, %v3101_v36  ;;  %vm2964_vm8 = vcmp.eq.s32.totalorder %v2876_v26, 1  ;;  %v15384_v47 = vld [vmem:[#allocation236_spill] sm:$0xff] }
 0x5c5   :  { %vm2978_vm9 = vcmp.eq.s32.totalorder %v2918_v20, 1  ;;  %vm2968_vm10 = vcmp.eq.s32.totalorder %v12566_v39, 1  ;;  %v15373_v19 = vmax.f32 %v15372_v22, 0.0  ;;  %v15375_v59 = vmax.f32 %v15374_v38, 0.0 }
 0x5c6   :  { %v15377_v33 = vmax.f32 %v15376_v40, 0.0  ;;  %v15379_v13 = vmax.f32 %v15378_v41, 0.0  ;;  %v15381_v7 = vmax.f32 %v15380_v23, 0.0  ;;  %v15383_v10 = vmax.f32 %v15382_v16, 0.0 }
 0x5c7   :  { %v3086_v44 = vsel %vm2964_vm8, %v15373_v19, -inf  ;;  %v3087_v30 = vsel %vm2964_vm8, %v15375_v59, -inf  ;;  %v15385_v18 = vmax.f32 %v15384_v47, 0.0  ;;  %v15387_v5 = vmax.f32 %v15386_v8, 0.0  ;;  %v15409_v47 = vld [vmem:[#allocation178_spill] sm:$0xff]  ;;  %v2897_v8 = vpop.permute.xlu1 %2896 }
 0x5c8   :  { %v3088_v62 = vsel %vm2964_vm8, %v15377_v33, -inf  ;;  %v3089_v2 = vsel %vm2964_vm8, %v15379_v13, -inf  ;;  %v3310_v56 = vmax.f32 %v3309_v25, %v3086_v44  ;;  %v3353_v11 = vmax.f32 %v3352_v45, %v3087_v30  ;;  %v2885_v25 = vpop.permute.xlu0 %2884  ;;  %v15388_v45 = vld [vmem:[#allocation134_spill] sm:$0xff]  ;;  %v15400_v44 = vld [vmem:[#allocation292_spill] sm:$0xff] }
 0x5c9   :  { %v3396_v35 = vmax.f32 %v3395_v6, %v3088_v62  ;;  %v3439_v14 = vmax.f32 %v3438_v52, %v3089_v2  ;;  %v3090_v26 = vsel %vm2964_vm8, %v15381_v7, -inf  ;;  %v3091_v9 = vsel %vm2964_vm8, %v15383_v10, -inf  ;;  %v15403_v2 = vld [vmem:[#allocation101_spill] sm:$0xff]  ;;  %v15407_v7 = vld [vmem:[#allocation103_spill] sm:$0xff] }
 0x5ca   :  { %v3092_v12 = vsel %vm2964_vm8, %v15385_v18, -inf  ;;  %v3093_v24 = vsel %vm2964_vm8, %v15387_v5, -inf  ;;  %v3482_v27 = vmax.f32 %v3481_v63, %v3090_v26  ;;  %v3525_v51 = vmax.f32 %v3524_v3, %v3091_v9  ;;  %v2927_v3 = vpop.permute.xlu2 %2926 }
 0x5cb   :  { %v3568_v60 = vmax.f32 %v3567_v29, %v3092_v12  ;;  %v3611_v43 = vmax.f32 %v3610_v0, %v3093_v24  ;;  %v15389_v6 = vmax.f32 %v15388_v45, 0.0  ;;  %v15391_v28 = vmax.f32 %v15390_v21, 0.0  ;;  %v15396_v29 = vld [vmem:[#allocation289_spill] sm:$0xff]  ;;  %v15398_v0 = vld [vmem:[#allocation291_spill] sm:$0xff] }
 0x5cc   :  { %v15393_v53 = vmax.f32 %v15392_v50, 0.0  ;;  %v15395_v4 = vmax.f32 %v15394_v15, 0.0  ;;  %v15397_v49 = vmax.f32 %v15396_v29, 0.0  ;;  %v15399_v22 = vmax.f32 %v15398_v0, 0.0  ;;  %v15411_v24 = vld [vmem:[#allocation249_spill] sm:$0xff]  ;;  %v15422_v29 = vld [vmem:[#allocation100_spill] sm:$0xff] }
 0x5cd   :  { %v3198_v34 = vsel %vm2978_vm9, %v15389_v6, -inf  ;;  %v3199_v52 = vsel %vm2978_vm9, %v15391_v28, -inf  ;;  %v15401_v38 = vmax.f32 %v15400_v44, 0.0  ;;  %v15402_v30 = vmax.f32 %v12043_v48, 0.0  ;;  %v15415_v6 = vld [vmem:[#allocation252_spill] sm:$0xff] }
 0x5ce   :  { %v3200_v54 = vsel %vm2978_vm9, %v15393_v53, -inf  ;;  %v3201_v55 = vsel %vm2978_vm9, %v15395_v4, -inf  ;;  %v3311_v17 = vmax.f32 %v3310_v56, %v3198_v34  ;;  %v3354_v31 = vmax.f32 %v3353_v11, %v3199_v52  ;;  %v15418_v4 = vld [vmem:[#allocation98_spill] sm:$0xff]  ;;  %v15424_v44 = vld [vmem:[#allocation176_spill] sm:$0xff] }
 0x5cf   :  { %v3397_v61 = vmax.f32 %v3396_v35, %v3200_v54  ;;  %v3440_v63 = vmax.f32 %v3439_v14, %v3201_v55  ;;  %v3202_v36 = vsel %vm2978_vm9, %v15397_v49, -inf  ;;  %v3203_v19 = vsel %vm2978_vm9, %v15399_v22, -inf  ;;  %v15405_v35 = vld [vmem:[#allocation102_spill] sm:$0xff] }
 0x5d0   :  { %v3204_v59 = vsel %vm2978_vm9, %v15401_v38, -inf  ;;  %v3205_v40 = vsel %vm2978_vm9, %v15402_v30, -inf  ;;  %v3483_v33 = vmax.f32 %v3482_v27, %v3202_v36  ;;  %v3526_v62 = vmax.f32 %v3525_v51, %v3203_v19 }
 0x5d1   :  { %v3569_v41 = vmax.f32 %v3568_v60, %v3204_v59  ;;  %vm2967_vm11 = vcmp.eq.s32.totalorder %v2885_v25, 1  ;;  %v3612_v13 = vmax.f32 %v3611_v43, %v3205_v40  ;;  %v15404_v56 = vmax.f32 %v15403_v2, 0.0  ;;  %v15413_v60 = vld [vmem:[#allocation251_spill] sm:$0xff]  ;;  %v2894_v59 = vpop.permute.xlu0 %2893  ;;  %v15426_v40 = vld [vmem:[#allocation245_spill] sm:$0xff] }
 0x5d2   :  { %v15406_v14 = vmax.f32 %v15405_v35, 0.0  ;;  %v15408_v26 = vmax.f32 %v15407_v7, 0.0  ;;  %v15410_v18 = vmax.f32 %v15409_v47, 0.0  ;;  %v15412_v27 = vmax.f32 %v15411_v24, 0.0  ;;  %v15434_v47 = vld [vmem:[#allocation147_spill] sm:$0xff] }
 0x5d3   :  { %v3118_v11 = vsel %vm2968_vm10, %v15404_v56, -inf  ;;  %v15414_v43 = vmax.f32 %v15413_v60, 0.0  ;;  %v15416_v34 = vmax.f32 %v15415_v6, 0.0  ;;  %v15417_v53 = vmax.f32 %v11980_v46, 0.0  ;;  %v15430_v56 = vld [vmem:[#allocation248_spill] sm:$0xff] }
 0x5d4   :  { %v3119_v23 = vsel %vm2968_vm10, %v15406_v14, -inf  ;;  %v3120_v20 = vsel %vm2968_vm10, %v15408_v26, -inf  ;;  %v3312_v16 = vmax.f32 %v3311_v17, %v3118_v11  ;;  %v3121_v12 = vsel %vm2968_vm10, %v15410_v18, -inf  ;;  %v15432_v26 = vld [vmem:[#allocation324_spill] sm:$0xff] }
 0x5d5   :  { %v3355_v10 = vmax.f32 %v3354_v31, %v3119_v23  ;;  %v3398_v9 = vmax.f32 %v3397_v61, %v3120_v20  ;;  %v3441_v5 = vmax.f32 %v3440_v63, %v3121_v12  ;;  %v3122_v51 = vsel %vm2968_vm10, %v15412_v27, -inf  ;;  %v15420_v31 = vld [vmem:[#allocation99_spill] sm:$0xff] }
 0x5d6   :  { %v3123_v45 = vsel %vm2968_vm10, %v15414_v43, -inf  ;;  %v3124_v21 = vsel %vm2968_vm10, %v15416_v34, -inf  ;;  %v3484_v28 = vmax.f32 %v3483_v33, %v3122_v51  ;;  %v3125_v54 = vsel %vm2968_vm10, %v15417_v53, -inf  ;;  %v15438_v51 = vld [vmem:[#allocation150_spill] sm:$0xff] }
 0x5d7   :  { %v3527_v52 = vmax.f32 %v3526_v62, %v3123_v45  ;;  %v3570_v50 = vmax.f32 %v3569_v41, %v3124_v21  ;;  %v3613_v15 = vmax.f32 %v3612_v13, %v3125_v54  ;;  %v15419_v55 = vmax.f32 %v15418_v4, 0.0  ;;  %v15428_v41 = vld [vmem:[#allocation247_spill] sm:$0xff]  ;;  %v15440_v45 = vld [vmem:[#allocation230_spill] sm:$0xff] }
 0x5d8   :  { %v15421_v61 = vmax.f32 %v15420_v31, 0.0  ;;  %v15423_v49 = vmax.f32 %v15422_v29, 0.0  ;;  %v15425_v38 = vmax.f32 %v15424_v44, 0.0  ;;  %v15427_v33 = vmax.f32 %v15426_v40, 0.0  ;;  %v15444_v54 = vld [vmem:[#allocation302_spill] sm:$0xff]  ;;  %v12700_v29 = vpop.permute.xlu1 %2905 }
 0x5d9   :  { %v3110_v17 = vsel %vm2967_vm11, %v15419_v55, -inf  ;;  %v15429_v13 = vmax.f32 %v15428_v41, 0.0  ;;  %v15431_v11 = vmax.f32 %v15430_v56, 0.0  ;;  %v15433_v20 = vmax.f32 %v15432_v26, 0.0  ;;  %v15446_v55 = vld [vmem:[#allocation303_spill] sm:$0xff] }
 0x5da   :  { %v3111_v63 = vsel %vm2967_vm11, %v15421_v61, -inf  ;;  %v3112_v36 = vsel %vm2967_vm11, %v15423_v49, -inf  ;;  %v3313_v0 = vmax.f32 %v3312_v16, %v3110_v17  ;;  %v3113_v39 = vsel %vm2967_vm11, %v15425_v38, -inf }
 0x5db   :  { %v3356_v22 = vmax.f32 %v3355_v10, %v3111_v63  ;;  %v3399_v19 = vmax.f32 %v3398_v9, %v3112_v36  ;;  %v3442_v30 = vmax.f32 %v3441_v5, %v3113_v39  ;;  %v3114_v62 = vsel %vm2967_vm11, %v15427_v33, -inf  ;;  %v12681_v10 = vpop.permute.xlu2 %2935  ;;  %v15436_v5 = vld [vmem:[#allocation149_spill] sm:$0xff]  ;;  %v15451_v39 = vld [vmem:[#allocation111_spill] sm:$0xff]  ;;  %v15453_v33 = vld [vmem:[#allocation112_spill] sm:$0xff] }
 0x5dc   :  { %v3115_v2 = vsel %vm2967_vm11, %v15429_v13, -inf  ;;  %v3116_v35 = vsel %vm2967_vm11, %v15431_v11, -inf  ;;  %v3485_v14 = vmax.f32 %v3484_v28, %v3114_v62  ;;  %v3117_v16 = vsel %vm2967_vm11, %v15433_v20, -inf  ;;  %v15455_v13 = vld [vmem:[#allocation190_spill] sm:$0xff] }
 0x5dd   :  { %v3528_v23 = vmax.f32 %v3527_v52, %v3115_v2  ;;  %v3571_v7 = vmax.f32 %v3570_v50, %v3116_v35  ;;  %v3614_v9 = vmax.f32 %v3613_v15, %v3117_v16  ;;  %vm2981_vm12 = vcmp.eq.s32.totalorder %v2927_v3, 1  ;;  %v15442_v3 = vld [vmem:[#allocation300_spill] sm:$0xff]  ;;  %v15459_v16 = vld [vmem:[#allocation263_spill] sm:$0xff] }
 0x5de   :  { %vm2971_vm13 = vcmp.eq.s32.totalorder %v2897_v8, 1  ;;  %vm2970_vm14 = vcmp.eq.s32.totalorder %v2894_v59, 1  ;;  %v15435_v18 = vmax.f32 %v15434_v47, 0.0  ;;  %v15437_v24 = vmax.f32 %v15436_v5, 0.0  ;;  %v15471_v8 = vld [vmem:[#allocation186_spill] sm:$0xff] }
 0x5df   :  { %v15439_v60 = vmax.f32 %v15438_v51, 0.0  ;;  %v15441_v6 = vmax.f32 %v15440_v45, 0.0  ;;  %vm2984_vm15 = vcmp.eq.s32.totalorder %v12681_v10, 1  ;;  %v15443_v50 = vmax.f32 %v15442_v3, 0.0 }
 0x5e0   :  { %v3222_v12 = vsel %vm2981_vm12, %v15435_v18, -inf  ;;  %v3223_v27 = vsel %vm2981_vm12, %v15437_v24, -inf  ;;  %v15445_v15 = vmax.f32 %v15444_v54, 0.0  ;;  %v15447_v17 = vmax.f32 %v15446_v55, 0.0  ;;  %v15461_v18 = vld [vmem:[#allocation264_spill] sm:$0xff]  ;;  %v15463_v24 = vld [vmem:[#allocation334_spill] sm:$0xff] }
 0x5e1   :  { %v3224_v43 = vsel %vm2981_vm12, %v15439_v60, -inf  ;;  %v3225_v34 = vsel %vm2981_vm12, %v15441_v6, -inf  ;;  %v3314_v25 = vmax.f32 %v3313_v0, %v3222_v12  ;;  %v3357_v21 = vmax.f32 %v3356_v22, %v3223_v27 }
 0x5e2   :  { %v3400_v28 = vmax.f32 %v3399_v19, %v3224_v43  ;;  %v3443_v52 = vmax.f32 %v3442_v30, %v3225_v34  ;;  %v3226_v53 = vsel %vm2981_vm12, %v15443_v50, -inf  ;;  %v3227_v4 = vsel %vm2981_vm12, %v15445_v15, -inf  ;;  %v15449_v19 = vld [vmem:[#allocation110_spill] sm:$0xff]  ;;  %v12726_v34 = vpop.permute.xlu0 %2902 }
 0x5e3   :  { %v3228_v31 = vsel %vm2981_vm12, %v15447_v17, -inf  ;;  %v15448_v61 = vmax.f32 %v12055_v1, 0.0  ;;  %v3486_v49 = vmax.f32 %v3485_v14, %v3226_v53  ;;  %v3529_v36 = vmax.f32 %v3528_v23, %v3227_v4  ;;  %v15469_v53 = vld [vmem:[#allocation109_spill] sm:$0xff] }
 0x5e4   :  { %v3572_v0 = vmax.f32 %v3571_v7, %v3228_v31  ;;  %v15450_v44 = vmax.f32 %v15449_v19, 0.0  ;;  %v15452_v30 = vmax.f32 %v15451_v39, 0.0  ;;  %v15454_v62 = vmax.f32 %v15453_v33, 0.0  ;;  %v15457_v7 = vld [vmem:[#allocation261_spill] sm:$0xff] }
 0x5e5   :  { %v3229_v63 = vsel %vm2981_vm12, %v15448_v61, -inf  ;;  %v15456_v2 = vmax.f32 %v15455_v13, 0.0  ;;  %v15458_v26 = vmax.f32 %v15457_v7, 0.0  ;;  %v15462_v12 = vmax.f32 %v15461_v18, 0.0 }
 0x5e6   :  { %v3615_v22 = vmax.f32 %v3614_v9, %v3229_v63  ;;  %v3142_v38 = vsel %vm2971_vm13, %v15450_v44, -inf  ;;  %v3143_v40 = vsel %vm2971_vm13, %v15452_v30, -inf  ;;  %v3144_v41 = vsel %vm2971_vm13, %v15454_v62, -inf }
 0x5e7   :  { %v3145_v56 = vsel %vm2971_vm13, %v15456_v2, -inf  ;;  %v3315_v11 = vmax.f32 %v3314_v25, %v3142_v38  ;;  %v3358_v35 = vmax.f32 %v3357_v21, %v3143_v40  ;;  %v3401_v14 = vmax.f32 %v3400_v28, %v3144_v41  ;;  %v15465_v25 = vld [vmem:[#allocation107_spill] sm:$0xff]  ;;  %v15477_v38 = vld [vmem:[#allocation260_spill] sm:$0xff]  ;;  %v15479_v40 = vld [vmem:[#allocation333_spill] sm:$0xff] }
 0x5e8   :  { %v3444_v23 = vmax.f32 %v3443_v52, %v3145_v56  ;;  %v3146_v20 = vsel %vm2971_vm13, %v15458_v26, -inf  ;;  %v15460_v9 = vmax.f32 %v15459_v16, 0.0  ;;  %v3148_v5 = vsel %vm2971_vm13, %v15462_v12, -inf  ;;  %v15467_v52 = vld [vmem:[#allocation108_spill] sm:$0xff]  ;;  %v12768_v12 = vpop.permute.xlu1 %2914 }
 0x5e9   :  { %v15464_v27 = vmax.f32 %v15463_v24, 0.0  ;;  %v3487_v60 = vmax.f32 %v3486_v49, %v3146_v20  ;;  %v3573_v45 = vmax.f32 %v3572_v0, %v3148_v5  ;;  %v15466_v21 = vmax.f32 %v15465_v25, 0.0  ;;  %v15473_v49 = vld [vmem:[#allocation257_spill] sm:$0xff]  ;;  %v15485_v20 = vld [vmem:[#allocation163_spill] sm:$0xff]  ;;  %v15491_v25 = vld [vmem:[#allocation314_spill] sm:$0xff] }
 0x5ea   :  { %v3147_v47 = vsel %vm2971_vm13, %v15460_v9, -inf  ;;  %v15468_v3 = vmax.f32 %v15467_v52, 0.0  ;;  %v15470_v54 = vmax.f32 %v15469_v53, 0.0  ;;  %v15472_v4 = vmax.f32 %v15471_v8, 0.0  ;;  %v15487_v9 = vld [vmem:[#allocation242_spill] sm:$0xff]  ;;  %v15493_v52 = vld [vmem:[#allocation315_spill] sm:$0xff] }
 0x5eb   :  { %v3149_v51 = vsel %vm2971_vm13, %v15464_v27, -inf  ;;  %v3530_v43 = vmax.f32 %v3529_v36, %v3147_v47  ;;  %v3134_v28 = vsel %vm2970_vm14, %v15466_v21, -inf  ;;  %v15474_v36 = vmax.f32 %v15473_v49, 0.0  ;;  %v15495_v53 = vld [vmem:[#allocation343_spill] sm:$0xff]  ;;  %v15499_v49 = vld [vmem:[#allocation120_spill] sm:$0xff] }
 0x5ec   :  { %v3616_v6 = vmax.f32 %v3615_v22, %v3149_v51  ;;  %v3135_v50 = vsel %vm2970_vm14, %v15468_v3, -inf  ;;  %v3136_v15 = vsel %vm2970_vm14, %v15470_v54, -inf  ;;  %v3137_v55 = vsel %vm2970_vm14, %v15472_v4, -inf  ;;  %v15475_v22 = vld [vmem:[#allocation259_spill] sm:$0xff] }
 0x5ed   :  { %v3316_v17 = vmax.f32 %v3315_v11, %v3134_v28  ;;  %v3359_v31 = vmax.f32 %v3358_v35, %v3135_v50  ;;  %v3402_v61 = vmax.f32 %v3401_v14, %v3136_v15  ;;  %v3445_v63 = vmax.f32 %v3444_v23, %v3137_v55  ;;  %v15481_v11 = vld [vmem:[#allocation160_spill] sm:$0xff]  ;;  %v15483_v23 = vld [vmem:[#allocation162_spill] sm:$0xff] }
 0x5ee   :  { %v3138_v0 = vsel %vm2970_vm14, %v15474_v36, -inf  ;;  %v15476_v19 = vmax.f32 %v15475_v22, 0.0  ;;  %v15478_v39 = vmax.f32 %v15477_v38, 0.0  ;;  %v15480_v33 = vmax.f32 %v15479_v40, 0.0 }
 0x5ef   :  { %v3488_v41 = vmax.f32 %v3487_v60, %v3138_v0  ;;  %v15482_v35 = vmax.f32 %v15481_v11, 0.0  ;;  %v15484_v7 = vmax.f32 %v15483_v23, 0.0  ;;  %v15486_v16 = vmax.f32 %v15485_v20, 0.0  ;;  %v2945_v60 = vpop.permute.xlu2 %2944  ;;  %v15501_v0 = vld [vmem:[#allocation121_spill] sm:$0xff]  ;;  %v15507_v11 = vld [vmem:[#allocation275_spill] sm:$0xff]  ;;  %v15509_v23 = vld [vmem:[#allocation276_spill] sm:$0xff] }
 0x5f0   :  { %v3139_v44 = vsel %vm2970_vm14, %v15476_v19, -inf  ;;  %v3140_v30 = vsel %vm2970_vm14, %v15478_v39, -inf  ;;  %v3141_v62 = vsel %vm2970_vm14, %v15480_v33, -inf  ;;  %v15488_v47 = vmax.f32 %v15487_v9, 0.0  ;;  %v15511_v20 = vld [vmem:[#allocation336_spill] sm:$0xff] }
 0x5f1   :  { %v3531_v13 = vmax.f32 %v3530_v43, %v3139_v44  ;;  %v3574_v2 = vmax.f32 %v3573_v45, %v3140_v30  ;;  %v3617_v56 = vmax.f32 %v3616_v6, %v3141_v62  ;;  %v3246_v14 = vsel %vm2984_vm15, %v15482_v35, -inf  ;;  %v15489_v43 = vld [vmem:[#allocation312_spill] sm:$0xff]  ;;  %v15503_v44 = vld [vmem:[#allocation202_spill] sm:$0xff]  ;;  %v12804_v30 = vpop.permute.xlu0 %2911 }
 0x5f2   :  { %v3247_v26 = vsel %vm2984_vm15, %v15484_v7, -inf  ;;  %v3248_v59 = vsel %vm2984_vm15, %v15486_v16, -inf  ;;  %v3249_v18 = vsel %vm2984_vm15, %v15488_v47, -inf  ;;  %v3317_v5 = vmax.f32 %v3316_v17, %v3246_v14 }
 0x5f3   :  { %v3360_v24 = vmax.f32 %v3359_v31, %v3247_v26  ;;  %v3403_v27 = vmax.f32 %v3402_v61, %v3248_v59  ;;  %v3446_v51 = vmax.f32 %v3445_v63, %v3249_v18  ;;  %v15490_v45 = vmax.f32 %v15489_v43, 0.0  ;;  %v15497_v31 = vld [vmem:[#allocation119_spill] sm:$0xff]  ;;  %v15515_v43 = vld [vmem:[#allocation117_spill] sm:$0xff] }
 0x5f4   :  { %v15492_v21 = vmax.f32 %v15491_v25, 0.0  ;;  %v15494_v3 = vmax.f32 %v15493_v52, 0.0  ;;  %v15496_v54 = vmax.f32 %v15495_v53, 0.0  ;;  %vm2974_vm0 = vcmp.eq.s32.totalorder %v12700_v29, 1  ;;  %v15517_v25 = vld [vmem:[#allocation118_spill] sm:$0xff] }
 0x5f5   :  { %v3250_v6 = vsel %vm2984_vm15, %v15490_v45, -inf  ;;  %vm2973_vm1 = vcmp.eq.s32.totalorder %v12726_v34, 1  ;;  %vm2987_vm2 = vcmp.eq.s32.totalorder %v2945_v60, 1  ;;  %v15498_v61 = vmax.f32 %v15497_v31, 0.0  ;;  %v15523_v31 = vld [vmem:[#allocation271_spill] sm:$0xff] }
 0x5f6   :  { %v3251_v28 = vsel %vm2984_vm15, %v15492_v21, -inf  ;;  %v3252_v50 = vsel %vm2984_vm15, %v15494_v3, -inf  ;;  %v3253_v15 = vsel %vm2984_vm15, %v15496_v54, -inf  ;;  %v3489_v8 = vmax.f32 %v3488_v41, %v3250_v6 }
 0x5f7   :  { %v3532_v4 = vmax.f32 %v3531_v13, %v3251_v28  ;;  %v3575_v55 = vmax.f32 %v3574_v2, %v3252_v50  ;;  %v3618_v17 = vmax.f32 %v3617_v56, %v3253_v15  ;;  %v3166_v63 = vsel %vm2974_vm0, %v15498_v61, -inf  ;;  %v15505_v13 = vld [vmem:[#allocation273_spill] sm:$0xff]  ;;  %v15519_v28 = vld [vmem:[#allocation198_spill] sm:$0xff] }
 0x5f8   :  { %v15500_v36 = vmax.f32 %v15499_v49, 0.0  ;;  %v15502_v22 = vmax.f32 %v15501_v0, 0.0  ;;  %v15504_v38 = vmax.f32 %v15503_v44, 0.0  ;;  %v3318_v40 = vmax.f32 %v3317_v5, %v3166_v63  ;;  %v15525_v49 = vld [vmem:[#allocation272_spill] sm:$0xff]  ;;  %v15527_v0 = vld [vmem:[#allocation335_spill] sm:$0xff] }
 0x5f9   :  { %vm2977_vm3 = vcmp.eq.s32.totalorder %v12768_v12, 1  ;;  %v15506_v2 = vmax.f32 %v15505_v13, 0.0  ;;  %v15508_v35 = vmax.f32 %v15507_v11, 0.0  ;;  %v15510_v7 = vmax.f32 %v15509_v23, 0.0  ;;  %v15531_v13 = vld [vmem:[#allocation174_spill] sm:$0xff]  ;;  %v15533_v11 = vld [vmem:[#allocation175_spill] sm:$0xff] }
 0x5fa   :  { %v3167_v10 = vsel %vm2974_vm0, %v15500_v36, -inf  ;;  %v3168_v19 = vsel %vm2974_vm0, %v15502_v22, -inf  ;;  %v3169_v39 = vsel %vm2974_vm0, %v15504_v38, -inf  ;;  %v15512_v16 = vmax.f32 %v15511_v20, 0.0  ;;  %v15535_v23 = vld [vmem:[#allocation254_spill] sm:$0xff] }
 0x5fb   :  { %v3361_v33 = vmax.f32 %v3360_v24, %v3167_v10  ;;  %v3404_v62 = vmax.f32 %v3403_v27, %v3168_v19  ;;  %v3447_v41 = vmax.f32 %v3446_v51, %v3169_v39  ;;  %v3170_v56 = vsel %vm2974_vm0, %v15506_v2, -inf  ;;  %v15513_v24 = vld [vmem:[#allocation116_spill] sm:$0xff]  ;;  %v15567_v12 = vld [vmem:[#allocation210_spill] sm:$0xff] }
 0x5fc   :  { %v3171_v14 = vsel %vm2974_vm0, %v15508_v35, -inf  ;;  %v3172_v26 = vsel %vm2974_vm0, %v15510_v7, -inf  ;;  %v3173_v59 = vsel %vm2974_vm0, %v15512_v16, -inf  ;;  %v3490_v9 = vmax.f32 %v3489_v8, %v3170_v56  ;;  %v12839_v8 = vpop.permute.xlu1 %2923 }
 0x5fd   :  { %v3533_v47 = vmax.f32 %v3532_v4, %v3171_v14  ;;  %v3576_v18 = vmax.f32 %v3575_v55, %v3172_v26  ;;  %v3619_v5 = vmax.f32 %v3618_v17, %v3173_v59  ;;  %v15514_v27 = vmax.f32 %v15513_v24, 0.0  ;;  %v15521_v4 = vld [vmem:[#allocation269_spill] sm:$0xff] }
 0x5fe   :  { %v15516_v45 = vmax.f32 %v15515_v43, 0.0  ;;  %v15518_v21 = vmax.f32 %v15517_v25, 0.0  ;;  %v15520_v52 = vmax.f32 %v15519_v28, 0.0  ;;  %v15522_v55 = vmax.f32 %v15521_v4, 0.0  ;;  %v15547_v4 = vld [vmem:[#allocation132_spill] sm:$0xff] }
 0x5ff   :  { %v3158_v51 = vsel %vm2973_vm1, %v15514_v27, -inf  ;;  %v15524_v61 = vmax.f32 %v15523_v31, 0.0  ;;  %v15526_v36 = vmax.f32 %v15525_v49, 0.0  ;;  %v15528_v22 = vmax.f32 %v15527_v0, 0.0  ;;  %v15549_v31 = vld [vmem:[#allocation133_spill] sm:$0xff] }
 0x600   :  { %v3159_v6 = vsel %vm2973_vm1, %v15516_v45, -inf  ;;  %v3160_v29 = vsel %vm2973_vm1, %v15518_v21, -inf  ;;  %v3161_v3 = vsel %vm2973_vm1, %v15520_v52, -inf  ;;  %v3319_v50 = vmax.f32 %v3318_v40, %v3158_v51  ;;  %v15541_v51 = vld [vmem:[#allocation326_spill] sm:$0xff] }
 0x601   :  { %v3362_v53 = vmax.f32 %v3361_v33, %v3159_v6  ;;  %v3405_v54 = vmax.f32 %v3404_v62, %v3160_v29  ;;  %v3448_v15 = vmax.f32 %v3447_v41, %v3161_v3  ;;  %v3162_v17 = vsel %vm2973_vm1, %v15522_v55, -inf  ;;  %v15529_v33 = vld [vmem:[#allocation172_spill] sm:$0xff]  ;;  %v15543_v6 = vld [vmem:[#allocation346_spill] sm:$0xff]  ;;  %v12881_v29 = vpop.permute.xlu0 %2920 }
 0x602   :  { %v3163_v63 = vsel %vm2973_vm1, %v15524_v61, -inf  ;;  %v3164_v10 = vsel %vm2973_vm1, %v15526_v36, -inf  ;;  %v3165_v19 = vsel %vm2973_vm1, %v15528_v22, -inf  ;;  %v3491_v44 = vmax.f32 %v3490_v9, %v3162_v17  ;;  %v15537_v9 = vld [vmem:[#allocation323_spill] sm:$0xff] }
 0x603   :  { %v3534_v38 = vmax.f32 %v3533_v47, %v3163_v63  ;;  %v3577_v39 = vmax.f32 %v3576_v18, %v3164_v10  ;;  %v3620_v40 = vmax.f32 %v3619_v5, %v3165_v19  ;;  %v15530_v62 = vmax.f32 %v15529_v33, 0.0  ;;  %v15539_v5 = vld [vmem:[#allocation325_spill] sm:$0xff]  ;;  %v15551_v10 = vld [vmem:[#allocation214_spill] sm:$0xff] }
 0x604   :  { %v15532_v2 = vmax.f32 %v15531_v13, 0.0  ;;  %v15534_v35 = vmax.f32 %v15533_v11, 0.0  ;;  %v15536_v7 = vmax.f32 %v15535_v23, 0.0  ;;  %v15538_v47 = vmax.f32 %v15537_v9, 0.0  ;;  %v15563_v9 = vld [vmem:[#allocation128_spill] sm:$0xff] }
 0x605   :  { %v3270_v41 = vsel %vm2987_vm2, %v15530_v62, -inf  ;;  %v15540_v24 = vmax.f32 %v15539_v5, 0.0  ;;  %v15542_v43 = vmax.f32 %v15541_v51, 0.0  ;;  %v15544_v25 = vmax.f32 %v15543_v6, 0.0  ;;  %v15565_v5 = vld [vmem:[#allocation129_spill] sm:$0xff] }
 0x606   :  { %v3271_v56 = vsel %vm2987_vm2, %v15532_v2, -inf  ;;  %v3272_v14 = vsel %vm2987_vm2, %v15534_v35, -inf  ;;  %v3273_v34 = vsel %vm2987_vm2, %v15536_v7, -inf  ;;  %v3320_v26 = vmax.f32 %v3319_v50, %v3270_v41  ;;  %v15557_v41 = vld [vmem:[#allocation288_spill] sm:$0xff] }
 0x607   :  { %v3363_v20 = vmax.f32 %v3362_v53, %v3271_v56  ;;  %v3406_v16 = vmax.f32 %v3405_v54, %v3272_v14  ;;  %v3449_v59 = vmax.f32 %v3448_v15, %v3273_v34  ;;  %v3274_v18 = vsel %vm2987_vm2, %v15538_v47, -inf  ;;  %v15545_v53 = vld [vmem:[#allocation130_spill] sm:$0xff]  ;;  %v12915_v34 = vpop.permute.xlu1 %2932 }
 0x608   :  { %v3275_v27 = vsel %vm2987_vm2, %v15540_v24, -inf  ;;  %v3276_v45 = vsel %vm2987_vm2, %v15542_v43, -inf  ;;  %v3277_v21 = vsel %vm2987_vm2, %v15544_v25, -inf  ;;  %v3492_v28 = vmax.f32 %v3491_v44, %v3274_v18  ;;  %v15553_v44 = vld [vmem:[#allocation285_spill] sm:$0xff]  ;;  %v15559_v14 = vld [vmem:[#allocation338_spill] sm:$0xff] }
 0x609   :  { %v3535_v52 = vmax.f32 %v3534_v38, %v3275_v27  ;;  %v3578_v3 = vmax.f32 %v3577_v39, %v3276_v45  ;;  %v3621_v50 = vmax.f32 %v3620_v40, %v3277_v21  ;;  %v15546_v54 = vmax.f32 %v15545_v53, 0.0  ;;  %v15555_v40 = vld [vmem:[#allocation287_spill] sm:$0xff]  ;;  %v15569_v21 = vld [vmem:[#allocation281_spill] sm:$0xff] }
 0x60a   :  { %v15548_v55 = vmax.f32 %v15547_v4, 0.0  ;;  %v15550_v61 = vmax.f32 %v15549_v31, 0.0  ;;  %v15552_v0 = vmax.f32 %v15551_v10, 0.0  ;;  %v15554_v38 = vmax.f32 %v15553_v44, 0.0  ;;  %v15577_v10 = vld [vmem:[#allocation143_spill] sm:$0xff] }
 0x60b   :  { %v3190_v15 = vsel %vm2977_vm3, %v15546_v54, -inf  ;;  %v15556_v33 = vmax.f32 %v15555_v40, 0.0  ;;  %v15558_v13 = vmax.f32 %v15557_v41, 0.0  ;;  %v15560_v23 = vmax.f32 %v15559_v14, 0.0  ;;  %v15573_v54 = vld [vmem:[#allocation284_spill] sm:$0xff] }
 0x60c   :  { %v3191_v17 = vsel %vm2977_vm3, %v15548_v55, -inf  ;;  %v3192_v60 = vsel %vm2977_vm3, %v15550_v61, -inf  ;;  %v3321_v63 = vmax.f32 %v3320_v26, %v3190_v15  ;;  %v3193_v22 = vsel %vm2977_vm3, %v15552_v0, -inf  ;;  %v15575_v55 = vld [vmem:[#allocation337_spill] sm:$0xff]  ;;  %v15585_v14 = vld [vmem:[#allocation296_spill] sm:$0xff] }
 0x60d   :  { %v3364_v49 = vmax.f32 %v3363_v20, %v3191_v17  ;;  %v3407_v36 = vmax.f32 %v3406_v16, %v3192_v60  ;;  %v3450_v19 = vmax.f32 %v3449_v59, %v3193_v22  ;;  %v3194_v39 = vsel %vm2977_vm3, %v15554_v38, -inf  ;;  %v15561_v20 = vld [vmem:[#allocation126_spill] sm:$0xff] }
 0x60e   :  { %v3195_v62 = vsel %vm2977_vm3, %v15556_v33, -inf  ;;  %v3196_v2 = vsel %vm2977_vm3, %v15558_v13, -inf  ;;  %v3493_v56 = vmax.f32 %v3492_v28, %v3194_v39  ;;  %v3197_v7 = vsel %vm2977_vm3, %v15560_v23, -inf  ;;  %v15581_v39 = vld [vmem:[#allocation146_spill] sm:$0xff] }
 0x60f   :  { %v3536_v11 = vmax.f32 %v3535_v52, %v3195_v62  ;;  %v3579_v35 = vmax.f32 %v3578_v3, %v3196_v2  ;;  %v3622_v26 = vmax.f32 %v3621_v50, %v3197_v7  ;;  %vm2976_vm4 = vcmp.eq.s32.totalorder %v12804_v30, 1  ;;  %v15571_v3 = vld [vmem:[#allocation283_spill] sm:$0xff]  ;;  %v15583_v62 = vld [vmem:[#allocation226_spill] sm:$0xff] }
 0x610   :  { %vm2980_vm5 = vcmp.eq.s32.totalorder %v12839_v8, 1  ;;  %vm2979_vm6 = vcmp.eq.s32.totalorder %v12881_v29, 1  ;;  %v15562_v16 = vmax.f32 %v15561_v20, 0.0  ;;  %v15564_v47 = vmax.f32 %v15563_v9, 0.0 }
 0x611   :  { %v15566_v24 = vmax.f32 %v15565_v5, 0.0  ;;  %v15568_v51 = vmax.f32 %v15567_v12, 0.0  ;;  %vm2983_vm7 = vcmp.eq.s32.totalorder %v12915_v34, 1  ;;  %v15570_v28 = vmax.f32 %v15569_v21, 0.0 }
 0x612   :  { %v3182_v59 = vsel %vm2976_vm4, %v15562_v16, -inf  ;;  %v3183_v18 = vsel %vm2976_vm4, %v15564_v47, -inf  ;;  %v15572_v50 = vmax.f32 %v15571_v3, 0.0  ;;  %v15574_v15 = vmax.f32 %v15573_v54, 0.0 }
 0x613   :  { %v3184_v27 = vsel %vm2976_vm4, %v15566_v24, -inf  ;;  %v3185_v43 = vsel %vm2976_vm4, %v15568_v51, -inf  ;;  %v3322_v45 = vmax.f32 %v3321_v63, %v3182_v59  ;;  %v3365_v6 = vmax.f32 %v3364_v49, %v3183_v18  ;;  %v15589_v59 = vld [vmem:[#allocation299_spill] sm:$0xff]  ;;  %v15591_v18 = vld [vmem:[#allocation340_spill] sm:$0xff] }
 0x614   :  { %v3408_v25 = vmax.f32 %v3407_v36, %v3184_v27  ;;  %v3451_v30 = vmax.f32 %v3450_v19, %v3185_v43  ;;  %v3186_v52 = vsel %vm2976_vm4, %v15570_v28, -inf  ;;  %v3187_v53 = vsel %vm2976_vm4, %v15572_v50, -inf  ;;  %v12937_v36 = vpop.permute.xlu0 %2929  ;;  %v15579_v19 = vld [vmem:[#allocation145_spill] sm:$0xff]  ;;  %v15599_v50 = vld [vmem:[#allocation222_spill] sm:$0xff] }
 0x615   :  { %v3188_v4 = vsel %vm2976_vm4, %v15574_v15, -inf  ;;  %v15576_v17 = vmax.f32 %v15575_v55, 0.0  ;;  %v3494_v61 = vmax.f32 %v3493_v56, %v3186_v52  ;;  %v3537_v60 = vmax.f32 %v3536_v11, %v3187_v53  ;;  %v15597_v52 = vld [vmem:[#allocation141_spill] sm:$0xff] }
 0x616   :  { %v3580_v63 = vmax.f32 %v3579_v35, %v3188_v4  ;;  %v15578_v0 = vmax.f32 %v15577_v10, 0.0  ;;  %v15580_v44 = vmax.f32 %v15579_v19, 0.0  ;;  %v15582_v40 = vmax.f32 %v15581_v39, 0.0 }
 0x617   :  { %v3189_v31 = vsel %vm2976_vm4, %v15576_v17, -inf  ;;  %v15584_v41 = vmax.f32 %v15583_v62, 0.0  ;;  %v15586_v23 = vmax.f32 %v15585_v14, 0.0  ;;  %v15590_v9 = vmax.f32 %v15589_v59, 0.0 }
 0x618   :  { %v3623_v49 = vmax.f32 %v3622_v26, %v3189_v31  ;;  %v3214_v22 = vsel %vm2980_vm5, %v15578_v0, -inf  ;;  %v3215_v38 = vsel %vm2980_vm5, %v15580_v44, -inf  ;;  %v3216_v33 = vsel %vm2980_vm5, %v15582_v40, -inf  ;;  %v15587_v26 = vld [vmem:[#allocation298_spill] sm:$0xff]  ;;  %v15601_v31 = vld [vmem:[#allocation293_spill] sm:$0xff]  ;;  %v15605_v0 = vld [vmem:[#allocation295_spill] sm:$0xff] }
 0x619   :  { %v3217_v13 = vsel %vm2980_vm5, %v15584_v41, -inf  ;;  %v3323_v2 = vmax.f32 %v3322_v45, %v3214_v22  ;;  %v3366_v56 = vmax.f32 %v3365_v6, %v3215_v38  ;;  %v3409_v11 = vmax.f32 %v3408_v25, %v3216_v33  ;;  %v15593_v45 = vld [vmem:[#allocation138_spill] sm:$0xff]  ;;  %v15607_v44 = vld [vmem:[#allocation339_spill] sm:$0xff] }
 0x61a   :  { %v3452_v35 = vmax.f32 %v3451_v30, %v3217_v13  ;;  %v3218_v7 = vsel %vm2980_vm5, %v15586_v23, -inf  ;;  %v15588_v20 = vmax.f32 %v15587_v26, 0.0  ;;  %v3220_v47 = vsel %vm2980_vm5, %v15590_v9, -inf  ;;  %v15595_v30 = vld [vmem:[#allocation140_spill] sm:$0xff]  ;;  %v2942_v13 = vpop.permute.xlu1 %2941 }
 0x61b   :  { %v15592_v5 = vmax.f32 %v15591_v18, 0.0  ;;  %v3495_v27 = vmax.f32 %v3494_v61, %v3218_v7  ;;  %v3581_v51 = vmax.f32 %v3580_v63, %v3220_v47  ;;  %v15594_v6 = vmax.f32 %v15593_v45, 0.0  ;;  %v15603_v63 = vld [vmem:[#allocation294_spill] sm:$0xff]  ;;  %v15613_v7 = vld [vmem:[#allocation159_spill] sm:$0xff] }
 0x61c   :  { %v3219_v16 = vsel %vm2980_vm5, %v15588_v20, -inf  ;;  %v15596_v21 = vmax.f32 %v15595_v30, 0.0  ;;  %v15598_v3 = vmax.f32 %v15597_v52, 0.0  ;;  %v15600_v53 = vmax.f32 %v15599_v50, 0.0  ;;  %v15615_v20 = vld [vmem:[#allocation238_spill] sm:$0xff] }
 0x61d   :  { %v3221_v24 = vsel %vm2980_vm5, %v15592_v5, -inf  ;;  %v3538_v12 = vmax.f32 %v3537_v60, %v3219_v16  ;;  %v3206_v25 = vsel %vm2979_vm6, %v15594_v6, -inf  ;;  %v15602_v61 = vmax.f32 %v15601_v31, 0.0 }
 0x61e   :  { %v3624_v43 = vmax.f32 %v3623_v49, %v3221_v24  ;;  %v3207_v28 = vsel %vm2979_vm6, %v15596_v21, -inf  ;;  %v3208_v8 = vsel %vm2979_vm6, %v15598_v3, -inf  ;;  %v3209_v54 = vsel %vm2979_vm6, %v15600_v53, -inf  ;;  %v2939_v24 = vpop.permute.xlu0 %2938 }
 0x61f   :  { %v3324_v15 = vmax.f32 %v3323_v2, %v3206_v25  ;;  %v3367_v4 = vmax.f32 %v3366_v56, %v3207_v28  ;;  %v3410_v55 = vmax.f32 %v3409_v11, %v3208_v8  ;;  %v3453_v17 = vmax.f32 %v3452_v35, %v3209_v54  ;;  %v15609_v2 = vld [vmem:[#allocation156_spill] sm:$0xff]  ;;  %v15611_v35 = vld [vmem:[#allocation158_spill] sm:$0xff]  ;;  %v15621_v25 = vld [vmem:[#allocation311_spill] sm:$0xff] }
 0x620   :  { %v3210_v60 = vsel %vm2979_vm6, %v15602_v61, -inf  ;;  %v15604_v49 = vmax.f32 %v15603_v63, 0.0  ;;  %v15606_v22 = vmax.f32 %v15605_v0, 0.0  ;;  %v15608_v38 = vmax.f32 %v15607_v44, 0.0  ;;  %v15623_v28 = vld [vmem:[#allocation342_spill] sm:$0xff] }
 0x621   :  { %v3496_v40 = vmax.f32 %v3495_v27, %v3210_v60  ;;  %v15610_v56 = vmax.f32 %v15609_v2, 0.0  ;;  %v15612_v14 = vmax.f32 %v15611_v35, 0.0  ;;  %v15614_v26 = vmax.f32 %v15613_v7, 0.0  ;;  %v15617_v27 = vld [vmem:[#allocation308_spill] sm:$0xff]  ;;  %v15629_v60 = vld [vmem:[#allocation155_spill] sm:$0xff]  ;;  %v15639_v35 = vld [vmem:[#allocation341_spill] sm:$0xff] }
 0x622   :  { %v3211_v10 = vsel %vm2979_vm6, %v15604_v49, -inf  ;;  %v3212_v19 = vsel %vm2979_vm6, %v15606_v22, -inf  ;;  %v3213_v39 = vsel %vm2979_vm6, %v15608_v38, -inf  ;;  %v15616_v16 = vmax.f32 %v15615_v20, 0.0  ;;  %v15637_v2 = vld [vmem:[#allocation307_spill] sm:$0xff] }
 0x623   :  { %v3539_v33 = vmax.f32 %v3538_v12, %v3211_v10  ;;  %v3582_v62 = vmax.f32 %v3581_v51, %v3212_v19  ;;  %v3625_v41 = vmax.f32 %v3624_v43, %v3213_v39  ;;  %v3238_v11 = vsel %vm2983_vm7, %v15610_v56, -inf  ;;  %v15619_v43 = vld [vmem:[#allocation310_spill] sm:$0xff]  ;;  %v15633_v39 = vld [vmem:[#allocation304_spill] sm:$0xff] }
 0x624   :  { %v3239_v23 = vsel %vm2983_vm7, %v15612_v14, -inf  ;;  %v3240_v29 = vsel %vm2983_vm7, %v15614_v26, -inf  ;;  %v3241_v59 = vsel %vm2983_vm7, %v15616_v16, -inf  ;;  %v3325_v9 = vmax.f32 %v3324_v15, %v3238_v11  ;;  %v15625_v15 = vld [vmem:[#allocation152_spill] sm:$0xff]  ;;  %v15631_v10 = vld [vmem:[#allocation234_spill] sm:$0xff] }
 0x625   :  { %v3368_v47 = vmax.f32 %v3367_v4, %v3239_v23  ;;  %v3411_v18 = vmax.f32 %v3410_v55, %v3240_v29  ;;  %v3454_v5 = vmax.f32 %v3453_v17, %v3241_v59  ;;  %v15618_v12 = vmax.f32 %v15617_v27, 0.0  ;;  %v15627_v17 = vld [vmem:[#allocation154_spill] sm:$0xff]  ;;  %v15641_v16 = vld [vmem:[#allocation168_spill] sm:$0xff]  ;;  %v15645_v27 = vld [vmem:[#allocation171_spill] sm:$0xff] }
 0x626   :  { %v15620_v45 = vmax.f32 %v15619_v43, 0.0  ;;  %v15622_v30 = vmax.f32 %v15621_v25, 0.0  ;;  %v15624_v52 = vmax.f32 %v15623_v28, 0.0  ;;  %vm2982_vm8 = vcmp.eq.s32.totalorder %v12937_v36, 1  ;;  %v15647_v43 = vld [vmem:[#allocation250_spill] sm:$0xff]  ;;  %v2951_v25 = vpop.permute.xlu1 %2950 }
 0x627   :  { %v3242_v51 = vsel %vm2983_vm7, %v15618_v12, -inf  ;;  %vm2986_vm9 = vcmp.eq.s32.totalorder %v2942_v13, 1  ;;  %vm2985_vm10 = vcmp.eq.s32.totalorder %v2939_v24, 1  ;;  %v15626_v4 = vmax.f32 %v15625_v15, 0.0 }
 0x628   :  { %v3243_v6 = vsel %vm2983_vm7, %v15620_v45, -inf  ;;  %v3244_v21 = vsel %vm2983_vm7, %v15622_v30, -inf  ;;  %v3245_v3 = vsel %vm2983_vm7, %v15624_v52, -inf  ;;  %v3497_v8 = vmax.f32 %v3496_v40, %v3242_v51 }
 0x629   :  { %v3540_v50 = vmax.f32 %v3539_v33, %v3243_v6  ;;  %v3583_v53 = vmax.f32 %v3582_v62, %v3244_v21  ;;  %v3626_v54 = vmax.f32 %v3625_v41, %v3245_v3  ;;  %v3230_v55 = vsel %vm2982_vm8, %v15626_v4, -inf  ;;  %v15635_v33 = vld [vmem:[#allocation306_spill] sm:$0xff]  ;;  %v15649_v3 = vld [vmem:[#allocation319_spill] sm:$0xff] }
 0x62a   :  { %v15628_v31 = vmax.f32 %v15627_v17, 0.0  ;;  %v15630_v63 = vmax.f32 %v15629_v60, 0.0  ;;  %v15632_v34 = vmax.f32 %v15631_v10, 0.0  ;;  %v3326_v22 = vmax.f32 %v3325_v9, %v3230_v55  ;;  %v15653_v4 = vld [vmem:[#allocation322_spill] sm:$0xff] }
 0x62b   :  { %v15634_v36 = vmax.f32 %v15633_v39, 0.0  ;;  %v15636_v62 = vmax.f32 %v15635_v33, 0.0  ;;  %v15638_v56 = vmax.f32 %v15637_v2, 0.0  ;;  %v15640_v14 = vmax.f32 %v15639_v35, 0.0 }
 0x62c   :  { %v3231_v61 = vsel %vm2982_vm8, %v15628_v31, -inf  ;;  %v3232_v49 = vsel %vm2982_vm8, %v15630_v63, -inf  ;;  %v3233_v0 = vsel %vm2982_vm8, %v15632_v34, -inf  ;;  %v15642_v59 = vmax.f32 %v15641_v16, 0.0  ;;  %v15655_v31 = vld [vmem:[#allocation345_spill] sm:$0xff]  ;;  %v15669_v16 = vld [vmem:[#allocation318_spill] sm:$0xff] }
 0x62d   :  { %v3369_v19 = vmax.f32 %v3368_v47, %v3231_v61  ;;  %v3412_v44 = vmax.f32 %v3411_v18, %v3232_v49  ;;  %v3455_v38 = vmax.f32 %v3454_v5, %v3233_v0  ;;  %v3234_v40 = vsel %vm2982_vm8, %v15634_v36, -inf  ;;  %v15643_v47 = vld [vmem:[#allocation170_spill] sm:$0xff]  ;;  %v15657_v0 = vld [vmem:[#allocation164_spill] sm:$0xff]  ;;  %v15661_v36 = vld [vmem:[#allocation167_spill] sm:$0xff] }
 0x62e   :  { %v3235_v41 = vsel %vm2982_vm8, %v15636_v62, -inf  ;;  %v3236_v11 = vsel %vm2982_vm8, %v15638_v56, -inf  ;;  %v3237_v23 = vsel %vm2982_vm8, %v15640_v14, -inf  ;;  %v3498_v7 = vmax.f32 %v3497_v8, %v3234_v40  ;;  %v15663_v62 = vld [vmem:[#allocation246_spill] sm:$0xff]  ;;  %v15665_v14 = vld [vmem:[#allocation316_spill] sm:$0xff] }
 0x62f   :  { %v3541_v26 = vmax.f32 %v3540_v50, %v3235_v41  ;;  %v3584_v29 = vmax.f32 %v3583_v53, %v3236_v11  ;;  %v3627_v20 = vmax.f32 %v3626_v54, %v3237_v23  ;;  %v3262_v9 = vsel %vm2986_vm9, %v15642_v59, -inf  ;;  %v15651_v53 = vld [vmem:[#allocation321_spill] sm:$0xff] }
 0x630   :  { %v15644_v18 = vmax.f32 %v15643_v47, 0.0  ;;  %v15646_v12 = vmax.f32 %v15645_v27, 0.0  ;;  %v15648_v45 = vmax.f32 %v15647_v43, 0.0  ;;  %v3327_v30 = vmax.f32 %v3326_v22, %v3262_v9  ;;  %v15671_v47 = vld [vmem:[#allocation344_spill] sm:$0xff]  ;;  %v15673_v27 = vld [vmem:[#allocation181_spill] sm:$0xff]  ;;  %v15675_v43 = vld [vmem:[#allocation183_spill] sm:$0xff] }
 0x631   :  { %v15650_v8 = vmax.f32 %v15649_v3, 0.0  ;;  %v15652_v54 = vmax.f32 %v15651_v53, 0.0  ;;  %v15654_v55 = vmax.f32 %v15653_v4, 0.0  ;;  %v15656_v61 = vmax.f32 %v15655_v31, 0.0 }
 0x632   :  { %v3263_v5 = vsel %vm2986_vm9, %v15644_v18, -inf  ;;  %v3264_v51 = vsel %vm2986_vm9, %v15646_v12, -inf  ;;  %v3265_v6 = vsel %vm2986_vm9, %v15648_v45, -inf  ;;  %vm2989_vm11 = vcmp.eq.s32.totalorder %v2951_v25, 1 }
 0x633   :  { %v3370_v21 = vmax.f32 %v3369_v19, %v3263_v5  ;;  %v3413_v28 = vmax.f32 %v3412_v44, %v3264_v51  ;;  %v3456_v52 = vmax.f32 %v3455_v38, %v3265_v6  ;;  %v3266_v50 = vsel %vm2986_vm9, %v15650_v8, -inf  ;;  %v15659_v44 = vld [vmem:[#allocation166_spill] sm:$0xff] }
 0x634   :  { %v3267_v15 = vsel %vm2986_vm9, %v15652_v54, -inf  ;;  %v3268_v17 = vsel %vm2986_vm9, %v15654_v55, -inf  ;;  %v3269_v60 = vsel %vm2986_vm9, %v15656_v61, -inf  ;;  %v3499_v63 = vmax.f32 %v3498_v7, %v3266_v50 }
 0x635   :  { %v3542_v49 = vmax.f32 %v3541_v26, %v3267_v15  ;;  %v3585_v10 = vmax.f32 %v3584_v29, %v3268_v17  ;;  %v3628_v34 = vmax.f32 %v3627_v20, %v3269_v60  ;;  %v15658_v22 = vmax.f32 %v15657_v0, 0.0  ;;  %v15667_v26 = vld [vmem:[#allocation317_spill] sm:$0xff]  ;;  %v15681_v15 = vld [vmem:[#allocation330_spill] sm:$0xff]  ;;  %v15683_v17 = vld [vmem:[#allocation331_spill] sm:$0xff] }
 0x636   :  { %v15660_v38 = vmax.f32 %v15659_v44, 0.0  ;;  %v15662_v40 = vmax.f32 %v15661_v36, 0.0  ;;  %v15664_v13 = vmax.f32 %v15663_v62, 0.0  ;;  %v15666_v23 = vmax.f32 %v15665_v14, 0.0  ;;  %v15685_v60 = vld [vmem:[#allocation332_spill] sm:$0xff] }
 0x637   :  { %v3254_v19 = vsel %vm2985_vm10, %v15658_v22, -inf  ;;  %v15668_v29 = vmax.f32 %v15667_v26, 0.0  ;;  %v15670_v59 = vmax.f32 %v15669_v16, 0.0  ;;  %v15672_v18 = vmax.f32 %v15671_v47, 0.0  ;;  %v15695_v16 = vld [vmem:[#allocation258_spill] sm:$0xff]  ;;  %v15697_v47 = vld [vmem:[#allocation327_spill] sm:$0xff] }
 0x638   :  { %v3255_v39 = vsel %vm2985_vm10, %v15660_v38, -inf  ;;  %v3256_v33 = vsel %vm2985_vm10, %v15662_v40, -inf  ;;  %v3257_v41 = vsel %vm2985_vm10, %v15664_v13, -inf  ;;  %v3328_v2 = vmax.f32 %v3327_v30, %v3254_v19  ;;  %v15677_v30 = vld [vmem:[#allocation184_spill] sm:$0xff]  ;;  %v15689_v13 = vld [vmem:[#allocation177_spill] sm:$0xff] }
 0x639   :  { %v3371_v56 = vmax.f32 %v3370_v21, %v3255_v39  ;;  %v3414_v11 = vmax.f32 %v3413_v28, %v3256_v33  ;;  %v3457_v35 = vmax.f32 %v3456_v52, %v3257_v41  ;;  %v3258_v7 = vsel %vm2985_vm10, %v15666_v23, -inf  ;;  %v15679_v52 = vld [vmem:[#allocation262_spill] sm:$0xff]  ;;  %v15687_v19 = vld [vmem:[#allocation348_spill] sm:$0xff]  ;;  %v15691_v23 = vld [vmem:[#allocation179_spill] sm:$0xff] }
 0x63a   :  { %v3259_v20 = vsel %vm2985_vm10, %v15668_v29, -inf  ;;  %v3260_v9 = vsel %vm2985_vm10, %v15670_v59, -inf  ;;  %v3261_v5 = vsel %vm2985_vm10, %v15672_v18, -inf  ;;  %v15674_v12 = vmax.f32 %v15673_v27, 0.0  ;;  %v15693_v29 = vld [vmem:[#allocation180_spill] sm:$0xff] }
 0x63b   :  { %v15676_v45 = vmax.f32 %v15675_v43, 0.0  ;;  %v15678_v21 = vmax.f32 %v15677_v30, 0.0  ;;  %v15680_v3 = vmax.f32 %v15679_v52, 0.0  ;;  %v3500_v50 = vmax.f32 %v3499_v63, %v3258_v7  ;;  %v2948_v63 = vpop.permute.xlu0 %2947  ;;  %v15699_v27 = vld [vmem:[#allocation328_spill] sm:$0xff]  ;;  %v15701_v43 = vld [vmem:[#allocation329_spill] sm:$0xff]  ;;  %v15703_v30 = vld [vmem:[#allocation347_spill] sm:$0xff] }
 0x63c   :  { %v3286_v51 = vsel %vm2989_vm11, %v15674_v12, -inf  ;;  %v3543_v53 = vmax.f32 %v3542_v49, %v3259_v20  ;;  %v3586_v24 = vmax.f32 %v3585_v10, %v3260_v9  ;;  %v3629_v54 = vmax.f32 %v3628_v34, %v3261_v5 }
 0x63d   :  { %v3287_v6 = vsel %vm2989_vm11, %v15676_v45, -inf  ;;  %v3288_v28 = vsel %vm2989_vm11, %v15678_v21, -inf  ;;  %v3289_v8 = vsel %vm2989_vm11, %v15680_v3, -inf  ;;  %v15682_v4 = vmax.f32 %v15681_v15, 0.0 }
 0x63e   :  { %v15684_v31 = vmax.f32 %v15683_v17, 0.0  ;;  %v15686_v0 = vmax.f32 %v15685_v60, 0.0  ;;  %v15688_v44 = vmax.f32 %v15687_v19, 0.0  ;;  %v3329_v49 = vmax.f32 %v3328_v2, %v3286_v51 }
 0x63f   :  { %v3290_v55 = vsel %vm2989_vm11, %v15682_v4, -inf  ;;  %v3372_v10 = vmax.f32 %v3371_v56, %v3287_v6  ;;  %v3415_v34 = vmax.f32 %v3414_v11, %v3288_v28  ;;  %v3458_v39 = vmax.f32 %v3457_v35, %v3289_v8 }
 0x640   :  { %v3291_v61 = vsel %vm2989_vm11, %v15684_v31, -inf  ;;  %v3292_v22 = vsel %vm2989_vm11, %v15686_v0, -inf  ;;  %v3293_v38 = vsel %vm2989_vm11, %v15688_v44, -inf  ;;  %v3501_v36 = vmax.f32 %v3500_v50, %v3290_v55 }
 0x641   :  { %v3544_v40 = vmax.f32 %v3543_v53, %v3291_v61  ;;  %v3587_v33 = vmax.f32 %v3586_v24, %v3292_v22  ;;  %v3630_v62 = vmax.f32 %v3629_v54, %v3293_v38  ;;  %vm2988_vm12 = vcmp.eq.s32.totalorder %v2948_v63, 1 }
 0x642   :  { %v15690_v41 = vmax.f32 %v15689_v13, 0.0  ;;  %v15692_v7 = vmax.f32 %v15691_v23, 0.0  ;;  %v15694_v20 = vmax.f32 %v15693_v29, 0.0  ;;  %v15696_v59 = vmax.f32 %v15695_v16, 0.0 }
 0x643   :  { %v15698_v18 = vmax.f32 %v15697_v47, 0.0  ;;  %v15700_v12 = vmax.f32 %v15699_v27, 0.0  ;;  %v15702_v45 = vmax.f32 %v15701_v43, 0.0  ;;  %v15704_v21 = vmax.f32 %v15703_v30, 0.0 }
 0x644   :  { %v3278_v14 = vsel %vm2988_vm12, %v15690_v41, -inf  ;;  %v3279_v26 = vsel %vm2988_vm12, %v15692_v7, -inf  ;;  %v3280_v25 = vsel %vm2988_vm12, %v15694_v20, -inf  ;;  %v3281_v2 = vsel %vm2988_vm12, %v15696_v59, -inf }
 0x645   :  { %v3330_v56 = vmax.f32 %v3329_v49, %v3278_v14  ;;  %v3373_v11 = vmax.f32 %v3372_v10, %v3279_v26  ;;  %v3416_v35 = vmax.f32 %v3415_v34, %v3280_v25  ;;  %v3459_v9 = vmax.f32 %v3458_v39, %v3281_v2 }
 0x646   :  { %v3282_v5 = vsel %vm2988_vm12, %v15698_v18, -inf  ;;  %v3283_v51 = vsel %vm2988_vm12, %v15700_v12, -inf  ;;  %v3284_v6 = vsel %vm2988_vm12, %v15702_v45, -inf  ;;  %v3285_v28 = vsel %vm2988_vm12, %v15704_v21, -inf }
 0x647   :  { %v3502_v52 = vmax.f32 %v3501_v36, %v3282_v5  ;;  %v3545_v3 = vmax.f32 %v3544_v40, %v3283_v51  ;;  %v3588_v8 = vmax.f32 %v3587_v33, %v3284_v6  ;;  %v3631_v50 = vmax.f32 %v3630_v62, %v3285_v28 }
 0x648   :  { %v3331_v53 = vrot.slane %v3330_v56, 4  ;;  %v3374_v24 = vrot.slane %v3373_v11, 4  ;;  %v3417_v54 = vrot.slane %v3416_v35, 4  ;;  %v3460_v15 = vrot.slane %v3459_v9, 4 }
 0x649   :  { %v3503_v4 = vrot.slane %v3502_v52, 4  ;;  %v3546_v55 = vrot.slane %v3545_v3, 4  ;;  %v3589_v17 = vrot.slane %v3588_v8, 4  ;;  %v3632_v31 = vrot.slane %v3631_v50, 4 }
 0x64a   :  { %v3332_v61 = vmax.f32 %v3330_v56, %v3331_v53  ;;  %v3375_v60 = vmax.f32 %v3373_v11, %v3374_v24  ;;  %v3418_v0 = vmax.f32 %v3416_v35, %v3417_v54  ;;  %v3461_v22 = vmax.f32 %v3459_v9, %v3460_v15  ;;  %v3638_v24 = vld [vmem:[#allocation2] ss:$2 sm:$0xff] }
 0x64b   :  { %vm3654_vm13 = vcmask 1040384   ;;  %vm3656_vm14 = vcmask 1042434   ;;  %v3504_v19 = vmax.f32 %v3502_v52, %v3503_v4  ;;  %v3547_v44 = vmax.f32 %v3545_v3, %v3546_v55 }
 0x64c   :  { %v3590_v38 = vmax.f32 %v3588_v8, %v3589_v17  ;;  %v3633_v63 = vmax.f32 %v3631_v50, %v3632_v31  ;;  %vm3658_vm15 = vcmask 1041408   ;;  %vm3660_vm0 = vcmask 1044484  }
 0x64d   :  { %vm3662_vm1 = vcmask 1046534   ;;  %v3333_v49 = vrot.slane %v3332_v61, 2  ;;  %v3376_v10 = vrot.slane %v3375_v60, 2  ;;  %v3419_v34 = vrot.slane %v3418_v0, 2 }
 0x64e   :  { %v3462_v39 = vrot.slane %v3461_v22, 2  ;;  %v3505_v36 = vrot.slane %v3504_v19, 2  ;;  %v3548_v40 = vrot.slane %v3547_v44, 2  ;;  %v3591_v33 = vrot.slane %v3590_v38, 2 }
 0x64f   :  { %v3634_v62 = vrot.slane %v3633_v63, 2  ;;  %v3334_v13 = vmax.f32 %v3332_v61, %v3333_v49  ;;  %v3377_v41 = vmax.f32 %v3375_v60, %v3376_v10  ;;  %v3420_v14 = vmax.f32 %v3418_v0, %v3419_v34 }
 0x650   :  { %v3463_v23 = vmax.f32 %v3461_v22, %v3462_v39  ;;  %v3506_v7 = vmax.f32 %v3504_v19, %v3505_v36  ;;  %v3549_v26 = vmax.f32 %v3547_v44, %v3548_v40  ;;  %v3592_v29 = vmax.f32 %v3590_v38, %v3591_v33 }
 0x651   :  { %v3635_v20 = vmax.f32 %v3633_v63, %v3634_v62  ;;  %v3335_v25 = vrot.slane %v3334_v13, 1  ;;  %v3378_v16 = vrot.slane %v3377_v41, 1  ;;  %v3421_v59 = vrot.slane %v3420_v14, 1 }
 0x652   :  { %v3464_v2 = vrot.slane %v3463_v23, 1  ;;  %v3507_v56 = vrot.slane %v3506_v7, 1  ;;  %v3550_v11 = vrot.slane %v3549_v26, 1  ;;  %v3593_v35 = vrot.slane %v3592_v29, 1 }
 0x653   :  { %v3636_v9 = vrot.slane %v3635_v20, 1  ;;  %vm3664_vm2 = vcmask 1045508   ;;  %v3379_v47 = vmax.f32 %v3377_v41, %v3378_v16  ;;  %v3422_v18 = vmax.f32 %v3420_v14, %v3421_v59 }
 0x654   :  { %v3465_v5 = vmax.f32 %v3463_v23, %v3464_v2  ;;  %v3508_v27 = vmax.f32 %v3506_v7, %v3507_v56  ;;  %v3551_v12 = vmax.f32 %v3549_v26, %v3550_v11  ;;  %v3594_v51 = vmax.f32 %v3592_v29, %v3593_v35 }
 0x655   :  { %v3637_v43 = vmax.f32 %v3635_v20, %v3636_v9  ;;  %v3336_v45 = vmax.f32 %v3334_v13, %v3335_v25  ;;  %v3647_v6 = vrot.slane %v3379_v47, 7  ;;  %v3648_v30 = vrot.slane %v3422_v18, 6 }
 0x656   :  { %v3649_v21 = vrot.slane %v3465_v5, 5  ;;  %v3650_v28 = vrot.slane %v3508_v27, 4  ;;  %v3651_v52 = vrot.slane %v3551_v12, 3  ;;  %v3652_v3 = vrot.slane %v3594_v51, 2 }
 0x657   :  { %v3653_v8 = vrot.slane %v3637_v43, 1  ;;  %vm3666_vm3 = vcmask 1043456   ;;  %v3655_v50 = vsel %vm3654_vm13, %v3336_v45, %v3647_v6 }
 0x658   :  { %v3657_v53 = vsel %vm3656_vm14, %v3648_v30, %v3649_v21  ;;  %v3661_v15 = vsel %vm3660_vm0, %v3650_v28, %v3651_v52 }
 0x659   :  { %v3659_v54 = vsel %vm3658_vm15, %v3655_v50, %v3657_v53  ;;  %v3663_v4 = vsel %vm3662_vm1, %v3652_v3, %v3653_v8 }
 0x65a   :  { %v3665_v55 = vsel %vm3664_vm2, %v3661_v15, %v3663_v4 }
 0x65b   :  { %v3667_v17 = vsel %vm3666_vm3, %v3659_v54, %v3665_v55 }
 0x65c   :  { %v3669_v31 = vmax.f32 %v3638_v24, %v3667_v17 }
 0x65e   :  { %3670 = vst [vmem:[#allocation2] ss:$2 sm:$0xff] %v3669_v31 }
 0x65f PF:  { %p3671_p3 = scmp.le.s32.totalorder %s9482_s9, 1  ;;  %p3672_p4 = scmp.ge.s32.totalorder %s9486_s11, 1 }
 0x661   :  { %p3673_p5 = pnand %p3672_p4, %p3671_p3 }
 0x663   :  { %3676 = sbr.rel (%p3673_p5) target bundleno = 1997 (0x7cd), region = 77 }
 0x668   :  { %v15705_v61 = vld [vmem:[#allocation19_spill] sm:$0xff]  ;;  %v15706_v60 = vld [vmem:[#allocation17_spill] sm:$0xff]  ;;  %v9390_v22 = vmov 0   ;;  %v15708_v63 = vld [vmem:[#allocation20_spill] sm:$0xff] }
 0x669   :  { %vm3681_vm4 = vcmp.eq.s32.totalorder %v15705_v61, 1  ;;  %vm3679_vm5 = vcmp.eq.s32.totalorder %v15706_v60, 1  ;;  %v15707_v0 = vld [vmem:[#allocation15_spill] sm:$0xff]  ;;  %9283 = vset.pattern.permute.xlu2 %v9390_v22  ;;  %9282 = vset.pattern.permute.xlu1 %v9390_v22  ;;  %vm3682_vm7 = vcmp.eq.s32.totalorder %v15708_v63, 1  ;;  %v15709_v49 = vld [vmem:[#allocation18_spill] sm:$0xff]  ;;  %v15710_v10 = vld [vmem:[#allocation16_spill] sm:$0xff] }
 0x66a   :  { %vm3677_vm6 = vcmp.eq.s32.totalorder %v15707_v0, 1  ;;  %v3719_v19 = vsel %vm3681_vm4, 1, %v9390_v22  ;;  %v3717_v44 = vsel %vm3679_vm5, 1, %v9390_v22  ;;  %9281 = vset.pattern.permute.xlu0 %v9390_v22  ;;  %vm3680_vm8 = vcmp.eq.s32.totalorder %v15709_v49, 1  ;;  %v15711_v40 = vld [vmem:[#allocation23_spill] sm:$0xff]  ;;  %v15712_v33 = vld [vmem:[#allocation22_spill] sm:$0xff] }
 0x66b   :  { %v3715_v38 = vsel %vm3677_vm6, 1, %v9390_v22  ;;  %3766 = vperm.xlu2 %9283, %v3719_v19   ;;  %3760 = vperm.xlu1 %9282, %v3717_v44   ;;  %vm3678_vm9 = vcmp.eq.s32.totalorder %v15710_v10, 1  ;;  %v3720_v34 = vsel %vm3682_vm7, 1, %v9390_v22  ;;  %v3718_v39 = vsel %vm3680_vm8, 1, %v9390_v22  ;;  %v15713_v62 = vld [vmem:[#allocation21_spill] sm:$0xff]  ;;  %v15714_v23 = vld [vmem:[#allocation26_spill] sm:$0xff] }
 0x66c   :  { %3754 = vperm.xlu0 %9281, %v3715_v38   ;;  %v3716_v36 = vsel %vm3678_vm9, 1, %v9390_v22  ;;  %vm3685_vm10 = vcmp.eq.s32.totalorder %v15711_v40, 1  ;;  %vm3684_vm11 = vcmp.eq.s32.totalorder %v15712_v33, 1  ;;  %vm3683_vm12 = vcmp.eq.s32.totalorder %v15713_v62, 1  ;;  %v15715_v7 = vld [vmem:[#allocation25_spill] sm:$0xff]  ;;  %v15716_v26 = vld [vmem:[#allocation24_spill] sm:$0xff] }
 0x66d   :  { %v3723_v13 = vsel %vm3685_vm10, 1, %v9390_v22  ;;  %v3722_v41 = vsel %vm3684_vm11, 1, %v9390_v22  ;;  %v3721_v14 = vsel %vm3683_vm12, 1, %v9390_v22  ;;  %vm3688_vm13 = vcmp.eq.s32.totalorder %v15714_v23, 1  ;;  %v15717_v16 = vld [vmem:[#allocation29_spill] sm:$0xff]  ;;  %v15718_v59 = vld [vmem:[#allocation28_spill] sm:$0xff] }
 0x66e   :  { %vm3687_vm14 = vcmp.eq.s32.totalorder %v15715_v7, 1  ;;  %vm3686_vm15 = vcmp.eq.s32.totalorder %v15716_v26, 1  ;;  %v3726_v29 = vsel %vm3688_vm13, 1, %v9390_v22  ;;  %vm3691_vm0 = vcmp.eq.s32.totalorder %v15717_v16, 1  ;;  %v15719_v2 = vld [vmem:[#allocation27_spill] sm:$0xff]  ;;  %v15720_v9 = vld [vmem:[#allocation32_spill] sm:$0xff] }
 0x66f   :  { %v3725_v20 = vsel %vm3687_vm14, 1, %v9390_v22  ;;  %v3724_v25 = vsel %vm3686_vm15, 1, %v9390_v22  ;;  %vm3690_vm1 = vcmp.eq.s32.totalorder %v15718_v59, 1  ;;  %vm3689_vm2 = vcmp.eq.s32.totalorder %v15719_v2, 1  ;;  %v15721_v47 = vld [vmem:[#allocation31_spill] sm:$0xff]  ;;  %v15722_v18 = vld [vmem:[#allocation30_spill] sm:$0xff] }
 0x670   :  { %v3729_v56 = vsel %vm3691_vm0, 1, %v9390_v22  ;;  %v3728_v11 = vsel %vm3690_vm1, 1, %v9390_v22  ;;  %v3727_v35 = vsel %vm3689_vm2, 1, %v9390_v22  ;;  %vm3694_vm3 = vcmp.eq.s32.totalorder %v15720_v9, 1  ;;  %v15723_v51 = vld [vmem:[#allocation35_spill] sm:$0xff]  ;;  %v15724_v43 = vld [vmem:[#allocation34_spill] sm:$0xff] }
 0x671   :  { %vm3693_vm4 = vcmp.eq.s32.totalorder %v15721_v47, 1  ;;  %vm3692_vm5 = vcmp.eq.s32.totalorder %v15722_v18, 1  ;;  %v3732_v5 = vsel %vm3694_vm3, 1, %v9390_v22  ;;  %vm3697_vm6 = vcmp.eq.s32.totalorder %v15723_v51, 1  ;;  %v15725_v45 = vld [vmem:[#allocation33_spill] sm:$0xff]  ;;  %v15726_v28 = vld [vmem:[#allocation38_spill] sm:$0xff] }
 0x672   :  { %v3731_v27 = vsel %vm3693_vm4, 1, %v9390_v22  ;;  %v3730_v12 = vsel %vm3692_vm5, 1, %v9390_v22  ;;  %vm3696_vm7 = vcmp.eq.s32.totalorder %v15724_v43, 1  ;;  %vm3695_vm8 = vcmp.eq.s32.totalorder %v15725_v45, 1  ;;  %v15727_v52 = vld [vmem:[#allocation37_spill] sm:$0xff]  ;;  %v15728_v3 = vld [vmem:[#allocation36_spill] sm:$0xff] }
 0x673   :  { %3769 = vperm.xlu2 %9283, %v3720_v34   ;;  %3763 = vperm.xlu1 %9282, %v3718_v39   ;;  %v3735_v6 = vsel %vm3697_vm6, 1, %v9390_v22  ;;  %v3734_v30 = vsel %vm3696_vm7, 1, %v9390_v22  ;;  %v3733_v21 = vsel %vm3695_vm8, 1, %v9390_v22  ;;  %vm3700_vm9 = vcmp.eq.s32.totalorder %v15726_v28, 1  ;;  %v15729_v24 = vld [vmem:[#allocation41_spill] sm:$0xff]  ;;  %v15730_v54 = vld [vmem:[#allocation40_spill] sm:$0xff] }
 0x674   :  { %3757 = vperm.xlu0 %9281, %v3716_v36   ;;  %vm3699_vm10 = vcmp.eq.s32.totalorder %v15727_v52, 1  ;;  %vm3698_vm11 = vcmp.eq.s32.totalorder %v15728_v3, 1  ;;  %v3738_v8 = vsel %vm3700_vm9, 1, %v9390_v22  ;;  %vm3703_vm12 = vcmp.eq.s32.totalorder %v15729_v24, 1  ;;  %v15731_v15 = vld [vmem:[#allocation39_spill] sm:$0xff]  ;;  %v15732_v31 = vld [vmem:[#allocation44_spill] sm:$0xff] }
 0x675   :  { %v3737_v50 = vsel %vm3699_vm10, 1, %v9390_v22  ;;  %v3736_v53 = vsel %vm3698_vm11, 1, %v9390_v22  ;;  %vm3702_vm13 = vcmp.eq.s32.totalorder %v15730_v54, 1  ;;  %vm3701_vm14 = vcmp.eq.s32.totalorder %v15731_v15, 1  ;;  %v15733_v61 = vld [vmem:[#allocation43_spill] sm:$0xff]  ;;  %v15734_v60 = vld [vmem:[#allocation42_spill] sm:$0xff] }
 0x676   :  { %v3741_v4 = vsel %vm3703_vm12, 1, %v9390_v22  ;;  %v3740_v55 = vsel %vm3702_vm13, 1, %v9390_v22  ;;  %v3739_v17 = vsel %vm3701_vm14, 1, %v9390_v22  ;;  %vm3706_vm15 = vcmp.eq.s32.totalorder %v15732_v31, 1  ;;  %v15735_v38 = vld [vmem:[#allocation47_spill] sm:$0xff]  ;;  %v15736_v63 = vld [vmem:[#allocation46_spill] sm:$0xff] }
 0x677   :  { %vm3705_vm0 = vcmp.eq.s32.totalorder %v15733_v61, 1  ;;  %vm3704_vm1 = vcmp.eq.s32.totalorder %v15734_v60, 1  ;;  %v3744_v0 = vsel %vm3706_vm15, 1, %v9390_v22  ;;  %vm3709_vm2 = vcmp.eq.s32.totalorder %v15735_v38, 1  ;;  %v15737_v49 = vld [vmem:[#allocation45_spill] sm:$0xff]  ;;  %v15738_v36 = vld [vmem:[#allocation50_spill] sm:$0xff] }
 0x678   :  { %v3743_v19 = vsel %vm3705_vm0, 1, %v9390_v22  ;;  %v3742_v44 = vsel %vm3704_vm1, 1, %v9390_v22  ;;  %vm3708_vm3 = vcmp.eq.s32.totalorder %v15736_v63, 1  ;;  %vm3707_vm4 = vcmp.eq.s32.totalorder %v15737_v49, 1  ;;  %v15739_v40 = vld [vmem:[#allocation49_spill] sm:$0xff]  ;;  %v15740_v33 = vld [vmem:[#allocation48_spill] sm:$0xff] }
 0x679   :  { %v3747_v10 = vsel %vm3709_vm2, 1, %v9390_v22  ;;  %v3746_v34 = vsel %vm3708_vm3, 1, %v9390_v22  ;;  %v3745_v39 = vsel %vm3707_vm4, 1, %v9390_v22  ;;  %vm3712_vm5 = vcmp.eq.s32.totalorder %v15738_v36, 1  ;;  %v15741_v23 = vld [vmem:[#allocation52_spill] sm:$0xff]  ;;  %v15742_v7 = vld [vmem:[#allocation51_spill] sm:$0xff] }
 0x67a   :  { %vm3711_vm6 = vcmp.eq.s32.totalorder %v15739_v40, 1  ;;  %vm3710_vm7 = vcmp.eq.s32.totalorder %v15740_v33, 1  ;;  %v3750_v62 = vsel %vm3712_vm5, 1, %v9390_v22  ;;  %vm3714_vm8 = vcmp.eq.s32.totalorder %v15741_v23, 1  ;;  %v15745_v2 = vld [vmem:[#allocation66_spill] sm:$0xff]  ;;  %v15749_v18 = vld [vmem:[#allocation69_spill] sm:$0xff] }
 0x67b   :  { %3778 = vperm.xlu2 %9283, %v3723_v13   ;;  %3775 = vperm.xlu1 %9282, %v3722_v41   ;;  %v3749_v13 = vsel %vm3711_vm6, 1, %v9390_v22  ;;  %v3748_v41 = vsel %vm3710_vm7, 1, %v9390_v22  ;;  %vm3713_vm9 = vcmp.eq.s32.totalorder %v15742_v7, 1  ;;  %v3752_v26 = vsel %vm3714_vm8, 1, %v9390_v22  ;;  %v15753_v45 = vld [vmem:[#allocation139_spill] sm:$0xff]  ;;  %v15761_v15 = vld [vmem:[#allocation142_spill] sm:$0xff] }
 0x67c   :  { %3772 = vperm.xlu0 %9281, %v3721_v14   ;;  %v15757_v3 = vld [vmem:[#allocation203_spill] sm:$0xff]  ;;  %v15765_v60 = vld [vmem:[#allocation204_spill] sm:$0xff]  ;;  %v15775_v7 = vld [vmem:[#allocation77_spill] sm:$0xff] }
 0x67d   :  { %v15771_v40 = vld [vmem:[#allocation208_spill] sm:$0xff] }
 0x67e   :  { %v15772_v33 = vmax.f32 %v15771_v40, 0.0 }
 0x683   :  { %3787 = vperm.xlu2 %9283, %v3726_v29   ;;  %3784 = vperm.xlu1 %9282, %v3725_v20   ;;  %v3751_v29 = vsel %vm3713_vm9, 1, %v9390_v22 }
 0x684   :  { %3781 = vperm.xlu0 %9281, %v3724_v25   ;;  %v15743_v25 = vld [vmem:[#allocation65_spill] sm:$0xff] }
 0x685   :  { %v15744_v16 = vmax.f32 %v15743_v25, 0.0 }
 0x68b   :  { %3796 = vperm.xlu2 %9283, %v3729_v56   ;;  %3793 = vperm.xlu1 %9282, %v3728_v11   ;;  %v15746_v56 = vmax.f32 %v15745_v2, 0.0 }
 0x68c   :  { %3790 = vperm.xlu0 %9281, %v3727_v35   ;;  %v15747_v35 = vld [vmem:[#allocation68_spill] sm:$0xff] }
 0x68d   :  { %v15748_v9 = vmax.f32 %v15747_v35, 0.0 }
 0x693   :  { %3805 = vperm.xlu2 %9283, %v3732_v5   ;;  %3802 = vperm.xlu1 %9282, %v3731_v27   ;;  %v15750_v5 = vmax.f32 %v15749_v18, 0.0 }
 0x694   :  { %3799 = vperm.xlu0 %9281, %v3730_v12   ;;  %v15751_v12 = vld [vmem:[#allocation67_spill] sm:$0xff] }
 0x695   :  { %v15752_v51 = vmax.f32 %v15751_v12, 0.0 }
 0x69b   :  { %3814 = vperm.xlu2 %9283, %v3735_v6   ;;  %3811 = vperm.xlu1 %9282, %v3734_v30   ;;  %v15754_v6 = vmax.f32 %v15753_v45, 0.0 }
 0x69c   :  { %3808 = vperm.xlu0 %9281, %v3733_v21   ;;  %v15755_v21 = vld [vmem:[#allocation201_spill] sm:$0xff] }
 0x69d   :  { %v15756_v28 = vmax.f32 %v15755_v21, 0.0  ;;  %v15785_v21 = vld [vmem:[#allocation219_spill] sm:$0xff] }
 0x6a3   :  { %3823 = vperm.xlu2 %9283, %v3738_v8   ;;  %3820 = vperm.xlu1 %9282, %v3737_v50   ;;  %v15758_v8 = vmax.f32 %v15757_v3, 0.0  ;;  %v15787_v3 = vld [vmem:[#allocation220_spill] sm:$0xff] }
 0x6a4   :  { %3817 = vperm.xlu0 %9281, %v3736_v53   ;;  %v15759_v53 = vld [vmem:[#allocation70_spill] sm:$0xff] }
 0x6a5   :  { %v15760_v24 = vmax.f32 %v15759_v53, 0.0 }
 0x6ab   :  { %3832 = vperm.xlu2 %9283, %v3741_v4   ;;  %3829 = vperm.xlu1 %9282, %v3740_v55   ;;  %v15762_v4 = vmax.f32 %v15761_v15, 0.0 }
 0x6ac   :  { %3826 = vperm.xlu0 %9281, %v3739_v17   ;;  %v15763_v17 = vld [vmem:[#allocation205_spill] sm:$0xff] }
 0x6ad   :  { %v15764_v31 = vmax.f32 %v15763_v17, 0.0 }
 0x6b3   :  { %3841 = vperm.xlu2 %9283, %v3744_v0   ;;  %3838 = vperm.xlu1 %9282, %v3743_v19   ;;  %v15766_v0 = vmax.f32 %v15765_v60, 0.0  ;;  %v15791_v60 = vld [vmem:[#allocation86_spill] sm:$0xff] }
 0x6b4   :  { %3835 = vperm.xlu0 %9281, %v3742_v44   ;;  %v15767_v44 = vld [vmem:[#allocation282_spill] sm:$0xff] }
 0x6b5   :  { %v15768_v38 = vmax.f32 %v15767_v44, 0.0  ;;  %v15793_v44 = vld [vmem:[#allocation87_spill] sm:$0xff] }
 0x6bb   :  { %3850 = vperm.xlu2 %9283, %v3747_v10   ;;  %3847 = vperm.xlu1 %9282, %v3746_v34   ;;  %v15769_v34 = vld [vmem:[#allocation207_spill] sm:$0xff] }
 0x6bc   :  { %3844 = vperm.xlu0 %9281, %v3745_v39   ;;  %v15770_v39 = vmax.f32 %v15769_v34, 0.0 }
 0x6c3   :  { %3859 = vperm.xlu2 %9283, %v3750_v62   ;;  %3856 = vperm.xlu1 %9282, %v3749_v13   ;;  %v15773_v13 = vld [vmem:[#allocation286_spill] sm:$0xff] }
 0x6c4   :  { %3853 = vperm.xlu0 %9281, %v3748_v41   ;;  %v15774_v41 = vmax.f32 %v15773_v13, 0.0 }
 0x6c5   :  { %v3767_v14 = vpop.permute.xlu2 %3766 }
 0x6c6   :  { %vm3871_vm10 = vcmp.eq.s32.totalorder %v3767_v14, 1 }
 0x6c7   :  { %v3937_v59 = vsel %vm3871_vm10, %v15744_v16, -inf  ;;  %v3938_v11 = vsel %vm3871_vm10, %v15746_v56, -inf  ;;  %v3939_v43 = vsel %vm3871_vm10, %v15752_v51, -inf  ;;  %v3940_v30 = vsel %vm3871_vm10, %v15754_v6, -inf }
 0x6c8   :  { %v3941_v52 = vsel %vm3871_vm10, %v15756_v28, -inf  ;;  %v3942_v50 = vsel %vm3871_vm10, %v15758_v8, -inf  ;;  %v3943_v19 = vsel %vm3871_vm10, %v15766_v0, -inf  ;;  %v3944_v63 = vsel %vm3871_vm10, %v15768_v38, -inf }
 0x6c9   :  { %v15786_v28 = vmax.f32 %v15785_v21, 0.0  ;;  %v15788_v8 = vmax.f32 %v15787_v3, 0.0  ;;  %v15792_v0 = vmax.f32 %v15791_v60, 0.0  ;;  %v15794_v38 = vmax.f32 %v15793_v44, 0.0 }
 0x6cb   :  { %3865 = vperm.xlu1 %9282, %v3752_v26   ;;  %v15776_v26 = vmax.f32 %v15775_v7, 0.0 }
 0x6cc   :  { %3862 = vperm.xlu0 %9281, %v3751_v29  }
 0x6cd   :  { %v3770_v20 = vpop.permute.xlu2 %3769 }
 0x6ce   :  { %vm3872_vm11 = vcmp.eq.s32.totalorder %v3770_v20, 1 }
 0x6cf   :  { %v3945_v47 = vsel %vm3872_vm11, %v15748_v9, -inf  ;;  %v3946_v22 = vsel %vm3872_vm11, %v15750_v5, -inf  ;;  %v3947_v54 = vsel %vm3872_vm11, %v15760_v24, -inf  ;;  %v3948_v55 = vsel %vm3872_vm11, %v15762_v4, -inf  ;;  %v15783_v5 = vld [vmem:[#allocation217_spill] sm:$0xff] }
 0x6d0   :  { %v3949_v61 = vsel %vm3872_vm11, %v15764_v31, -inf  ;;  %v4212_v49 = vmax.f32 %v3945_v47, %v3937_v59  ;;  %v4255_v10 = vmax.f32 %v3946_v22, %v3938_v11  ;;  %v3950_v36 = vsel %vm3872_vm11, %v15770_v39, -inf  ;;  %v15777_v59 = vld [vmem:[#allocation78_spill] sm:$0xff]  ;;  %v15779_v11 = vld [vmem:[#allocation79_spill] sm:$0xff]  ;;  %v15789_v24 = vld [vmem:[#allocation297_spill] sm:$0xff] }
 0x6d1   :  { %v3951_v62 = vsel %vm3872_vm11, %v15772_v33, -inf  ;;  %v3952_v23 = vsel %vm3872_vm11, %v15774_v41, -inf  ;;  %v4298_v14 = vmax.f32 %v3947_v54, %v3939_v43  ;;  %v4341_v25 = vmax.f32 %v3948_v55, %v3940_v30  ;;  %v15781_v47 = vld [vmem:[#allocation151_spill] sm:$0xff]  ;;  %v15797_v39 = vld [vmem:[#allocation161_spill] sm:$0xff] }
 0x6d2   :  { %v4384_v16 = vmax.f32 %v3949_v61, %v3941_v52  ;;  %v15778_v2 = vmax.f32 %v15777_v59, 0.0  ;;  %v15780_v35 = vmax.f32 %v15779_v11, 0.0  ;;  %v15782_v18 = vmax.f32 %v15781_v47, 0.0  ;;  %v15799_v41 = vld [vmem:[#allocation229_spill] sm:$0xff] }
 0x6d3   :  { %v15784_v22 = vmax.f32 %v15783_v5, 0.0  ;;  %v4427_v51 = vmax.f32 %v3950_v36, %v3942_v50  ;;  %v4470_v43 = vmax.f32 %v3951_v62, %v3943_v19  ;;  %v4513_v45 = vmax.f32 %v3952_v23, %v3944_v63 }
 0x6d4   :  { %v15790_v54 = vmax.f32 %v15789_v24, 0.0  ;;  %v15798_v36 = vmax.f32 %v15797_v39, 0.0  ;;  %v15800_v23 = vmax.f32 %v15799_v41, 0.0  ;;  %v15815_v24 = vld [vmem:[#allocation193_spill] sm:$0xff] }
 0x6d5   :  { %v3779_v27 = vpop.permute.xlu2 %3778 }
 0x6d6   :  { %vm3875_vm12 = vcmp.eq.s32.totalorder %v3779_v27, 1 }
 0x6d7   :  { %v3969_v29 = vsel %vm3875_vm12, %v15776_v26, -inf  ;;  %v3970_v56 = vsel %vm3875_vm12, %v15778_v2, -inf  ;;  %v3971_v9 = vsel %vm3875_vm12, %v15780_v35, -inf  ;;  %v3972_v20 = vsel %vm3875_vm12, %v15782_v18, -inf  ;;  %v15801_v26 = vld [vmem:[#allocation231_spill] sm:$0xff]  ;;  %v15805_v2 = vld [vmem:[#allocation309_spill] sm:$0xff] }
 0x6d8   :  { %v3973_v12 = vsel %vm3875_vm12, %v15784_v22, -inf  ;;  %v4213_v6 = vmax.f32 %v4212_v49, %v3969_v29  ;;  %v4256_v30 = vmax.f32 %v4255_v10, %v3970_v56  ;;  %v3974_v52 = vsel %vm3875_vm12, %v15786_v28, -inf  ;;  %v15795_v49 = vld [vmem:[#allocation88_spill] sm:$0xff]  ;;  %v15811_v28 = vld [vmem:[#allocation61_spill] sm:$0xff] }
 0x6d9   :  { %v3975_v53 = vsel %vm3875_vm12, %v15788_v8, -inf  ;;  %v3976_v15 = vsel %vm3875_vm12, %v15790_v54, -inf  ;;  %v4299_v55 = vmax.f32 %v4298_v14, %v3971_v9  ;;  %v4342_v17 = vmax.f32 %v4341_v25, %v3972_v20  ;;  %v15803_v25 = vld [vmem:[#allocation232_spill] sm:$0xff] }
 0x6da   :  { %v4385_v50 = vmax.f32 %v4384_v16, %v3973_v12  ;;  %v15796_v10 = vmax.f32 %v15795_v49, 0.0  ;;  %v4428_v40 = vmax.f32 %v4427_v51, %v3974_v52  ;;  %v4471_v33 = vmax.f32 %v4470_v43, %v3975_v53  ;;  %v15807_v12 = vld [vmem:[#allocation59_spill] sm:$0xff] }
 0x6db   :  { %v4514_v62 = vmax.f32 %v4513_v45, %v3976_v15  ;;  %v15802_v29 = vmax.f32 %v15801_v26, 0.0  ;;  %v15804_v16 = vmax.f32 %v15803_v25, 0.0  ;;  %v15806_v56 = vmax.f32 %v15805_v2, 0.0  ;;  %v15809_v45 = vld [vmem:[#allocation60_spill] sm:$0xff] }
 0x6dc   :  { %v15808_v51 = vmax.f32 %v15807_v12, 0.0  ;;  %v15812_v52 = vmax.f32 %v15811_v28, 0.0  ;;  %v15816_v54 = vmax.f32 %v15815_v24, 0.0  ;;  %v15839_v28 = vld [vmem:[#allocation95_spill] sm:$0xff] }
 0x6dd   :  { %v3788_v4 = vpop.permute.xlu2 %3787  ;;  %v3761_v31 = vpop.permute.xlu1 %3760 }
 0x6de   :  { %vm3878_vm13 = vcmp.eq.s32.totalorder %v3788_v4, 1  ;;  %v3755_v61 = vpop.permute.xlu0 %3754  ;;  %vm3869_vm14 = vcmp.eq.s32.totalorder %v3761_v31, 1  ;;  %v15817_v4 = vld [vmem:[#allocation195_spill] sm:$0xff] }
 0x6df   :  { %v3993_v19 = vsel %vm3878_vm13, %v15792_v0, -inf  ;;  %v3994_v63 = vsel %vm3878_vm13, %v15794_v38, -inf  ;;  %v3995_v34 = vsel %vm3878_vm13, %v15796_v10, -inf  ;;  %v3996_v27 = vsel %vm3878_vm13, %v15798_v36, -inf }
 0x6e0   :  { %v4214_v13 = vmax.f32 %v4213_v6, %v3993_v19  ;;  %v3997_v7 = vsel %vm3878_vm13, %v15800_v23, -inf  ;;  %v3998_v14 = vsel %vm3878_vm13, %v15802_v29, -inf  ;;  %v3999_v59 = vsel %vm3878_vm13, %v15804_v16, -inf  ;;  %v15821_v19 = vld [vmem:[#allocation274_spill] sm:$0xff]  ;;  %v15829_v23 = vld [vmem:[#allocation123_spill] sm:$0xff]  ;;  %v15831_v29 = vld [vmem:[#allocation185_spill] sm:$0xff] }
 0x6e1   :  { %v4000_v11 = vsel %vm3878_vm13, %v15806_v56, -inf  ;;  %v4257_v35 = vmax.f32 %v4256_v30, %v3994_v63  ;;  %v4300_v9 = vmax.f32 %v4299_v55, %v3995_v34  ;;  %v4343_v47 = vmax.f32 %v4342_v17, %v3996_v27  ;;  %v15813_v30 = vld [vmem:[#allocation131_spill] sm:$0xff]  ;;  %v15823_v63 = vld [vmem:[#allocation53_spill] sm:$0xff]  ;;  %v15825_v34 = vld [vmem:[#allocation54_spill] sm:$0xff] }
 0x6e2   :  { %v4386_v18 = vmax.f32 %v4385_v50, %v3997_v7  ;;  %v4429_v20 = vmax.f32 %v4428_v40, %v3998_v14  ;;  %v4472_v5 = vmax.f32 %v4471_v33, %v3999_v59  ;;  %vm3867_vm15 = vcmp.eq.s32.totalorder %v3755_v61, 1  ;;  %v15819_v50 = vld [vmem:[#allocation196_spill] sm:$0xff]  ;;  %v15827_v27 = vld [vmem:[#allocation55_spill] sm:$0xff] }
 0x6e3   :  { %v4515_v22 = vmax.f32 %v4514_v62, %v4000_v11  ;;  %v13317_v43 = vsel %vm3869_vm14, %v15808_v51, -inf  ;;  %v15810_v6 = vmax.f32 %v15809_v45, 0.0  ;;  %v13325_v3 = vsel %vm3869_vm14, %v15812_v52, -inf  ;;  %v15833_v16 = vld [vmem:[#allocation187_spill] sm:$0xff]  ;;  %v15835_v56 = vld [vmem:[#allocation188_spill] sm:$0xff]  ;;  %v15837_v51 = vld [vmem:[#allocation266_spill] sm:$0xff] }
 0x6e4   :  { %v15814_v8 = vmax.f32 %v15813_v30, 0.0  ;;  %v13333_v15 = vsel %vm3869_vm14, %v15816_v54, -inf  ;;  %v15818_v55 = vmax.f32 %v15817_v4, 0.0  ;;  %v15820_v31 = vmax.f32 %v15819_v50, 0.0  ;;  %v15843_v4 = vld [vmem:[#allocation97_spill] sm:$0xff] }
 0x6e5   :  { %v13321_v21 = vsel %vm3869_vm14, %v15810_v6, -inf  ;;  %v3797_v0 = vpop.permute.xlu2 %3796  ;;  %v15822_v44 = vmax.f32 %v15821_v19, 0.0  ;;  %v15824_v49 = vmax.f32 %v15823_v63, 0.0  ;;  %v15826_v39 = vmax.f32 %v15825_v34, 0.0  ;;  %v3764_v62 = vpop.permute.xlu1 %3763 }
 0x6e6   :  { %v13329_v53 = vsel %vm3869_vm14, %v15814_v8, -inf  ;;  %v13337_v17 = vsel %vm3869_vm14, %v15818_v55, -inf  ;;  %v13341_v60 = vsel %vm3869_vm14, %v15820_v31, -inf  ;;  %v15828_v40 = vmax.f32 %v15827_v27, 0.0  ;;  %v3758_v41 = vpop.permute.xlu0 %3757  ;;  %v15841_v8 = vld [vmem:[#allocation96_spill] sm:$0xff]  ;;  %v15845_v31 = vld [vmem:[#allocation173_spill] sm:$0xff] }
 0x6e7   :  { %v3928_v38 = vsel %vm3869_vm14, %v15822_v44, -inf  ;;  %v3905_v10 = vsel %vm3867_vm15, %v15824_v49, -inf  ;;  %v3906_v36 = vsel %vm3867_vm15, %v15826_v39, -inf  ;;  %v15830_v7 = vmax.f32 %v15829_v23, 0.0  ;;  %v15847_v39 = vld [vmem:[#allocation241_spill] sm:$0xff] }
 0x6e8   :  { %v3907_v33 = vsel %vm3867_vm15, %v15828_v40, -inf  ;;  %v15832_v14 = vmax.f32 %v15831_v29, 0.0  ;;  %v15834_v59 = vmax.f32 %v15833_v16, 0.0  ;;  %v15836_v11 = vmax.f32 %v15835_v56, 0.0  ;;  %v15849_v40 = vld [vmem:[#allocation243_spill] sm:$0xff]  ;;  %v15851_v29 = vld [vmem:[#allocation244_spill] sm:$0xff] }
 0x6e9   :  { %v3908_v26 = vsel %vm3867_vm15, %v15830_v7, -inf  ;;  %v15838_v45 = vmax.f32 %v15837_v51, 0.0  ;;  %vm3881_vm0 = vcmp.eq.s32.totalorder %v3797_v0, 1  ;;  %vm3870_vm1 = vcmp.eq.s32.totalorder %v3764_v62, 1 }
 0x6ea   :  { %v3909_v25 = vsel %vm3867_vm15, %v15832_v14, -inf  ;;  %v3910_v2 = vsel %vm3867_vm15, %v15834_v59, -inf  ;;  %v3911_v12 = vsel %vm3867_vm15, %v15836_v11, -inf  ;;  %vm3868_vm2 = vcmp.eq.s32.totalorder %v3758_v41, 1  ;;  %v15853_v59 = vld [vmem:[#allocation320_spill] sm:$0xff] }
 0x6eb   :  { %v3912_v6 = vsel %vm3867_vm15, %v15838_v45, -inf  ;;  %v15840_v52 = vmax.f32 %v15839_v28, 0.0  ;;  %v15842_v24 = vmax.f32 %v15841_v8, 0.0  ;;  %v15844_v55 = vmax.f32 %v15843_v4, 0.0 }
 0x6ec   :  { %v15846_v19 = vmax.f32 %v15845_v31, 0.0  ;;  %v15848_v0 = vmax.f32 %v15847_v39, 0.0  ;;  %v15850_v23 = vmax.f32 %v15849_v40, 0.0  ;;  %v15852_v14 = vmax.f32 %v15851_v29, 0.0  ;;  %v15867_v39 = vld [vmem:[#allocation200_spill] sm:$0xff]  ;;  %v15869_v40 = vld [vmem:[#allocation278_spill] sm:$0xff] }
 0x6ed   :  { %v4017_v30 = vsel %vm3881_vm0, %v15840_v52, -inf  ;;  %v4018_v54 = vsel %vm3881_vm0, %v15842_v24, -inf  ;;  %v4019_v50 = vsel %vm3881_vm0, %v15844_v55, -inf  ;;  %v15854_v56 = vmax.f32 %v15853_v59, 0.0  ;;  %v15859_v24 = vld [vmem:[#allocation64_spill] sm:$0xff]  ;;  %v15861_v55 = vld [vmem:[#allocation135_spill] sm:$0xff]  ;;  %v3806_v29 = vpop.permute.xlu2 %3805 }
 0x6ee   :  { %v4020_v44 = vsel %vm3881_vm0, %v15846_v19, -inf  ;;  %v4215_v63 = vmax.f32 %v4214_v13, %v4017_v30  ;;  %v4258_v49 = vmax.f32 %v4257_v35, %v4018_v54  ;;  %v4301_v34 = vmax.f32 %v4300_v9, %v4019_v50  ;;  %v15855_v13 = vld [vmem:[#allocation62_spill] sm:$0xff] }
 0x6ef   :  { %v4344_v61 = vmax.f32 %v4343_v47, %v4020_v44  ;;  %v4021_v27 = vsel %vm3881_vm0, %v15848_v0, -inf  ;;  %v4022_v7 = vsel %vm3881_vm0, %v15850_v23, -inf  ;;  %v4023_v16 = vsel %vm3881_vm0, %v15852_v14, -inf  ;;  %v15857_v47 = vld [vmem:[#allocation63_spill] sm:$0xff]  ;;  %v15871_v14 = vld [vmem:[#allocation56_spill] sm:$0xff] }
 0x6f0   :  { %v4024_v11 = vsel %vm3881_vm0, %v15854_v56, -inf  ;;  %v4387_v51 = vmax.f32 %v4386_v18, %v4021_v27  ;;  %v4430_v45 = vmax.f32 %v4429_v20, %v4022_v7  ;;  %v4473_v28 = vmax.f32 %v4472_v5, %v4023_v16  ;;  %v15863_v18 = vld [vmem:[#allocation197_spill] sm:$0xff] }
 0x6f1   :  { %v4516_v52 = vmax.f32 %v4515_v22, %v4024_v11  ;;  %v15856_v35 = vmax.f32 %v15855_v13, 0.0  ;;  %v15858_v30 = vmax.f32 %v15857_v47, 0.0  ;;  %v15860_v54 = vmax.f32 %v15859_v24, 0.0  ;;  %v15865_v22 = vld [vmem:[#allocation199_spill] sm:$0xff]  ;;  %v15873_v56 = vld [vmem:[#allocation57_spill] sm:$0xff] }
 0x6f2   :  { %v15862_v50 = vmax.f32 %v15861_v55, 0.0  ;;  %v15864_v20 = vmax.f32 %v15863_v18, 0.0  ;;  %v15866_v19 = vmax.f32 %v15865_v22, 0.0  ;;  %v15868_v0 = vmax.f32 %v15867_v39, 0.0  ;;  %v15877_v24 = vld [vmem:[#allocation127_spill] sm:$0xff]  ;;  %v15883_v39 = vld [vmem:[#allocation192_spill] sm:$0xff] }
 0x6f3   :  { %v3929_v9 = vsel %vm3870_vm1, %v15856_v35, -inf  ;;  %v3930_v8 = vsel %vm3870_vm1, %v15858_v30, -inf  ;;  %v3931_v4 = vsel %vm3870_vm1, %v15860_v54, -inf  ;;  %v15870_v23 = vmax.f32 %v15869_v40, 0.0  ;;  %v15875_v35 = vld [vmem:[#allocation58_spill] sm:$0xff] }
 0x6f4   :  { %v3932_v31 = vsel %vm3870_vm1, %v15862_v50, -inf  ;;  %v3933_v5 = vsel %vm3870_vm1, %v15864_v20, -inf  ;;  %v3934_v44 = vsel %vm3870_vm1, %v15866_v19, -inf  ;;  %v3935_v27 = vsel %vm3870_vm1, %v15868_v0, -inf  ;;  %v15879_v50 = vld [vmem:[#allocation189_spill] sm:$0xff]  ;;  %v15881_v20 = vld [vmem:[#allocation191_spill] sm:$0xff] }
 0x6f5   :  { %v3936_v7 = vsel %vm3870_vm1, %v15870_v23, -inf  ;;  %v15872_v16 = vmax.f32 %v15871_v14, 0.0  ;;  %v15874_v11 = vmax.f32 %v15873_v56, 0.0  ;;  %v15876_v47 = vmax.f32 %v15875_v35, 0.0  ;;  %v15885_v23 = vld [vmem:[#allocation270_spill] sm:$0xff] }
 0x6f6   :  { %v15878_v54 = vmax.f32 %v15877_v24, 0.0  ;;  %v15880_v62 = vmax.f32 %v15879_v50, 0.0  ;;  %v15882_v22 = vmax.f32 %v15881_v20, 0.0  ;;  %v15884_v0 = vmax.f32 %v15883_v39, 0.0 }
 0x6f7   :  { %v3913_v59 = vsel %vm3868_vm2, %v15872_v16, -inf  ;;  %v3914_v13 = vsel %vm3868_vm2, %v15874_v11, -inf  ;;  %v3915_v30 = vsel %vm3868_vm2, %v15876_v47, -inf  ;;  %v15886_v14 = vmax.f32 %v15885_v23, 0.0 }
 0x6f8   :  { %v3916_v55 = vsel %vm3868_vm2, %v15878_v54, -inf  ;;  %v3917_v18 = vsel %vm3868_vm2, %v15880_v62, -inf  ;;  %v3918_v19 = vsel %vm3868_vm2, %v15882_v22, -inf  ;;  %v3919_v40 = vsel %vm3868_vm2, %v15884_v0, -inf }
 0x6f9   :  { %v3920_v16 = vsel %vm3868_vm2, %v15886_v14, -inf  ;;  %v4209_v56 = vmax.f32 %v3905_v10, %v3913_v59  ;;  %v4252_v11 = vmax.f32 %v3906_v36, %v3914_v13  ;;  %v4295_v35 = vmax.f32 %v3907_v33, %v3915_v30  ;;  %v3773_v13 = vpop.permute.xlu0 %3772  ;;  %v15897_v14 = vld [vmem:[#allocation255_spill] sm:$0xff] }
 0x6fa   :  { %v4338_v47 = vmax.f32 %v3908_v26, %v3916_v55  ;;  %v4381_v24 = vmax.f32 %v3909_v25, %v3917_v18  ;;  %v4424_v54 = vmax.f32 %v3910_v2, %v3918_v19  ;;  %v4467_v50 = vmax.f32 %v3911_v12, %v3919_v40  ;;  %v3776_v12 = vpop.permute.xlu1 %3775  ;;  %v13440_v19 = vpop.permute.xlu2 %3814 }
 0x6fb   :  { %v4510_v62 = vmax.f32 %v3912_v6, %v3920_v16  ;;  %v4210_v20 = vmax.f32 %v4209_v56, %v13317_v43  ;;  %v4253_v22 = vmax.f32 %v4252_v11, %v13321_v21  ;;  %v4296_v39 = vmax.f32 %v4295_v35, %v13325_v3  ;;  %v15899_v11 = vld [vmem:[#allocation256_spill] sm:$0xff] }
 0x6fc   :  { %v4339_v0 = vmax.f32 %v4338_v47, %v13329_v53  ;;  %v4382_v23 = vmax.f32 %v4381_v24, %v13333_v15  ;;  %v4425_v41 = vmax.f32 %v4424_v54, %v13337_v17  ;;  %v4468_v10 = vmax.f32 %v4467_v50, %v13341_v60 }
 0x6fd   :  { %v4511_v36 = vmax.f32 %v4510_v62, %v3928_v38  ;;  %v4211_v33 = vmax.f32 %v4210_v20, %v3929_v9  ;;  %v4254_v26 = vmax.f32 %v4253_v22, %v3930_v8  ;;  %v4297_v25 = vmax.f32 %v4296_v39, %v3931_v4  ;;  %v15887_v38 = vld [vmem:[#allocation104_spill] sm:$0xff]  ;;  %v15889_v4 = vld [vmem:[#allocation105_spill] sm:$0xff]  ;;  %v15902_v39 = vld [vmem:[#allocation74_spill] sm:$0xff] }
 0x6fe   :  { %v4340_v2 = vmax.f32 %v4339_v0, %v3932_v31  ;;  %v4383_v6 = vmax.f32 %v4382_v23, %v3933_v5  ;;  %v4426_v43 = vmax.f32 %v4425_v41, %v3934_v44  ;;  %v4469_v59 = vmax.f32 %v4468_v10, %v3935_v27  ;;  %v15891_v44 = vld [vmem:[#allocation106_spill] sm:$0xff]  ;;  %v15904_v41 = vld [vmem:[#allocation75_spill] sm:$0xff] }
 0x6ff   :  { %v4512_v21 = vmax.f32 %v4511_v36, %v3936_v7  ;;  %v4216_v3 = vmax.f32 %v4215_v63, %v4211_v33  ;;  %v4259_v30 = vmax.f32 %v4258_v49, %v4254_v26  ;;  %v4302_v53 = vmax.f32 %v4301_v34, %v4297_v25  ;;  %v15893_v34 = vld [vmem:[#allocation182_spill] sm:$0xff]  ;;  %v15906_v33 = vld [vmem:[#allocation76_spill] sm:$0xff] }
 0x700   :  { %v4345_v55 = vmax.f32 %v4344_v61, %v4340_v2  ;;  %v4388_v15 = vmax.f32 %v4387_v51, %v4383_v6  ;;  %v4431_v18 = vmax.f32 %v4430_v45, %v4426_v43  ;;  %v4474_v17 = vmax.f32 %v4473_v28, %v4469_v59  ;;  %v15908_v2 = vld [vmem:[#allocation148_spill] sm:$0xff] }
 0x701   :  { %v4517_v60 = vmax.f32 %v4516_v52, %v4512_v21  ;;  %vm3884_vm3 = vcmp.eq.s32.totalorder %v3806_v29, 1  ;;  %vm3874_vm4 = vcmp.eq.s32.totalorder %v3776_v12, 1  ;;  %vm3873_vm5 = vcmp.eq.s32.totalorder %v3773_v13, 1  ;;  %v15895_v52 = vld [vmem:[#allocation253_spill] sm:$0xff] }
 0x702   :  { %v15888_v9 = vmax.f32 %v15887_v38, 0.0  ;;  %v15890_v31 = vmax.f32 %v15889_v4, 0.0  ;;  %v15892_v63 = vmax.f32 %v15891_v44, 0.0  ;;  %v15894_v61 = vmax.f32 %v15893_v34, 0.0  ;;  %v15914_v38 = vld [vmem:[#allocation216_spill] sm:$0xff]  ;;  %v15917_v34 = vld [vmem:[#allocation71_spill] sm:$0xff] }
 0x703   :  { %vm3887_vm6 = vcmp.eq.s32.totalorder %v13440_v19, 1  ;;  %v15896_v29 = vmax.f32 %v15895_v52, 0.0  ;;  %v15898_v16 = vmax.f32 %v15897_v14, 0.0  ;;  %v15900_v35 = vmax.f32 %v15899_v11, 0.0  ;;  %v15954_v19 = vld [vmem:[#allocation157_spill] sm:$0xff] }
 0x704   :  { %v4041_v8 = vsel %vm3884_vm3, %v15888_v9, -inf  ;;  %v4042_v5 = vsel %vm3884_vm3, %v15890_v31, -inf  ;;  %v4043_v49 = vsel %vm3884_vm3, %v15892_v63, -inf  ;;  %v4044_v51 = vsel %vm3884_vm3, %v15894_v61, -inf }
 0x705   :  { %v4217_v45 = vmax.f32 %v4216_v3, %v4041_v8  ;;  %v4260_v28 = vmax.f32 %v4259_v30, %v4042_v5  ;;  %v4303_v27 = vmax.f32 %v4302_v53, %v4043_v49  ;;  %v4346_v7 = vmax.f32 %v4345_v55, %v4044_v51  ;;  %v3785_v30 = vpop.permute.xlu1 %3784  ;;  %v15910_v53 = vld [vmem:[#allocation213_spill] sm:$0xff] }
 0x706   :  { %v4045_v40 = vsel %vm3884_vm3, %v15896_v29, -inf  ;;  %v4046_v56 = vsel %vm3884_vm3, %v15898_v16, -inf  ;;  %v4047_v47 = vsel %vm3884_vm3, %v15900_v35, -inf  ;;  %v15901_v24 = vmax.f32 %v11997_v42, 0.0  ;;  %v15925_v35 = vld [vmem:[#allocation209_spill] sm:$0xff] }
 0x707   :  { %v4389_v50 = vmax.f32 %v4388_v15, %v4045_v40  ;;  %v4432_v62 = vmax.f32 %v4431_v18, %v4046_v56  ;;  %v4475_v20 = vmax.f32 %v4474_v17, %v4047_v47  ;;  %v15903_v0 = vmax.f32 %v15902_v39, 0.0  ;;  %v15912_v18 = vld [vmem:[#allocation215_spill] sm:$0xff]  ;;  %v15923_v40 = vld [vmem:[#allocation144_spill] sm:$0xff] }
 0x708   :  { %v4048_v54 = vsel %vm3884_vm3, %v15901_v24, -inf  ;;  %v15905_v10 = vmax.f32 %v15904_v41, 0.0  ;;  %v15907_v26 = vmax.f32 %v15906_v33, 0.0  ;;  %v15909_v6 = vmax.f32 %v15908_v2, 0.0 }
 0x709   :  { %v4518_v22 = vmax.f32 %v4517_v60, %v4048_v54  ;;  %v3961_v23 = vsel %vm3874_vm4, %v15903_v0, -inf  ;;  %v15911_v55 = vmax.f32 %v15910_v53, 0.0  ;;  %v15913_v17 = vmax.f32 %v15912_v18, 0.0  ;;  %v15927_v54 = vld [vmem:[#allocation211_spill] sm:$0xff]  ;;  %v15931_v0 = vld [vmem:[#allocation290_spill] sm:$0xff] }
 0x70a   :  { %v3962_v36 = vsel %vm3874_vm4, %v15905_v10, -inf  ;;  %v3963_v25 = vsel %vm3874_vm4, %v15907_v26, -inf  ;;  %v3964_v42 = vsel %vm3874_vm4, %v15909_v6, -inf  ;;  %v4218_v43 = vmax.f32 %v4217_v45, %v3961_v23  ;;  %v15919_v45 = vld [vmem:[#allocation72_spill] sm:$0xff]  ;;  %v15939_v53 = vld [vmem:[#allocation194_spill] sm:$0xff] }
 0x70b   :  { %v4261_v59 = vmax.f32 %v4260_v28, %v3962_v36  ;;  %v4304_v21 = vmax.f32 %v4303_v27, %v3963_v25  ;;  %v4347_v3 = vmax.f32 %v4346_v7, %v3964_v42  ;;  %v3965_v15 = vsel %vm3874_vm4, %v15911_v55, -inf  ;;  %v15921_v7 = vld [vmem:[#allocation73_spill] sm:$0xff]  ;;  %v15935_v42 = vld [vmem:[#allocation114_spill] sm:$0xff] }
 0x70c   :  { %v3966_v60 = vsel %vm3874_vm4, %v15913_v17, -inf  ;;  %v15915_v9 = vmax.f32 %v15914_v38, 0.0  ;;  %v15916_v4 = vmax.f32 %v11832_v37, 0.0  ;;  %v4390_v5 = vmax.f32 %v4389_v50, %v3965_v15  ;;  %v15933_v25 = vld [vmem:[#allocation113_spill] sm:$0xff] }
 0x70d   :  { %v4433_v44 = vmax.f32 %v4432_v62, %v3966_v60  ;;  %v15918_v61 = vmax.f32 %v15917_v34, 0.0  ;;  %v15920_v28 = vmax.f32 %v15919_v45, 0.0  ;;  %v15922_v52 = vmax.f32 %v15921_v7, 0.0  ;;  %v15945_v34 = vld [vmem:[#allocation268_spill] sm:$0xff] }
 0x70e   :  { %v3967_v8 = vsel %vm3874_vm4, %v15915_v9, -inf  ;;  %v3968_v31 = vsel %vm3874_vm4, %v15916_v4, -inf  ;;  %v15924_v37 = vmax.f32 %v15923_v40, 0.0  ;;  %v15926_v47 = vmax.f32 %v15925_v35, 0.0  ;;  %v3782_v9 = vpop.permute.xlu0 %3781  ;;  %v15941_v4 = vld [vmem:[#allocation265_spill] sm:$0xff] }
 0x70f   :  { %v4476_v63 = vmax.f32 %v4475_v20, %v3967_v8  ;;  %v4519_v49 = vmax.f32 %v4518_v22, %v3968_v31  ;;  %v3953_v51 = vsel %vm3873_vm5, %v15918_v61, -inf  ;;  %v3954_v27 = vsel %vm3873_vm5, %v15920_v28, -inf  ;;  %v15929_v20 = vld [vmem:[#allocation212_spill] sm:$0xff]  ;;  %v3824_v8 = vpop.permute.xlu2 %3823  ;;  %v15952_v35 = vld [vmem:[#allocation85_spill] sm:$0xff] }
 0x710   :  { %v3955_v29 = vsel %vm3873_vm5, %v15922_v52, -inf  ;;  %v3956_v12 = vsel %vm3873_vm5, %v15924_v37, -inf  ;;  %v4219_v14 = vmax.f32 %v4218_v43, %v3953_v51  ;;  %v4262_v16 = vmax.f32 %v4261_v59, %v3954_v27  ;;  %v15948_v37 = vld [vmem:[#allocation83_spill] sm:$0xff] }
 0x711   :  { %v4305_v56 = vmax.f32 %v4304_v21, %v3955_v29  ;;  %v4348_v11 = vmax.f32 %v4347_v3, %v3956_v12  ;;  %v3957_v24 = vsel %vm3873_vm5, %v15926_v47, -inf  ;;  %v15928_v50 = vmax.f32 %v15927_v54, 0.0  ;;  %v15937_v21 = vld [vmem:[#allocation115_spill] sm:$0xff]  ;;  %v13539_v29 = vpop.permute.xlu1 %3793 }
 0x712   :  { %v15930_v22 = vmax.f32 %v15929_v20, 0.0  ;;  %v15932_v23 = vmax.f32 %v15931_v0, 0.0  ;;  %v4391_v10 = vmax.f32 %v4390_v5, %v3957_v24  ;;  %v15934_v2 = vmax.f32 %v15933_v25, 0.0  ;;  %v15962_v25 = vld [vmem:[#allocation305_spill] sm:$0xff] }
 0x713   :  { %v3958_v62 = vsel %vm3873_vm5, %v15928_v50, -inf  ;;  %v15936_v43 = vmax.f32 %v15935_v42, 0.0  ;;  %v15938_v3 = vmax.f32 %v15937_v21, 0.0  ;;  %v15940_v55 = vmax.f32 %v15939_v53, 0.0 }
 0x714   :  { %v3959_v39 = vsel %vm3873_vm5, %v15930_v22, -inf  ;;  %v3960_v41 = vsel %vm3873_vm5, %v15932_v23, -inf  ;;  %v4434_v36 = vmax.f32 %v4433_v44, %v3958_v62  ;;  %v4065_v6 = vsel %vm3887_vm6, %v15934_v2, -inf  ;;  %v15943_v44 = vld [vmem:[#allocation267_spill] sm:$0xff] }
 0x715   :  { %v4477_v33 = vmax.f32 %v4476_v63, %v3959_v39  ;;  %v4520_v26 = vmax.f32 %v4519_v49, %v3960_v41  ;;  %v4066_v59 = vsel %vm3887_vm6, %v15936_v43, -inf  ;;  %v4067_v13 = vsel %vm3887_vm6, %v15938_v3, -inf  ;;  %v15958_v23 = vld [vmem:[#allocation227_spill] sm:$0xff]  ;;  %v15964_v3 = vld [vmem:[#allocation80_spill] sm:$0xff] }
 0x716   :  { %v4068_v15 = vsel %vm3887_vm6, %v15940_v55, -inf  ;;  %v4220_v18 = vmax.f32 %v4219_v14, %v4065_v6  ;;  %v4263_v17 = vmax.f32 %v4262_v16, %v4066_v59  ;;  %v4306_v60 = vmax.f32 %v4305_v56, %v4067_v13  ;;  %v15950_v16 = vld [vmem:[#allocation84_spill] sm:$0xff]  ;;  %v15966_v55 = vld [vmem:[#allocation81_spill] sm:$0xff] }
 0x717   :  { %v4349_v38 = vmax.f32 %v4348_v11, %v4068_v15  ;;  %v15942_v31 = vmax.f32 %v15941_v4, 0.0  ;;  %v15944_v63 = vmax.f32 %v15943_v44, 0.0  ;;  %v15946_v61 = vmax.f32 %v15945_v34, 0.0  ;;  %v15970_v4 = vld [vmem:[#allocation153_spill] sm:$0xff] }
 0x718   :  { %v15947_v45 = vmax.f32 %v12018_v58, 0.0  ;;  %vm3877_vm7 = vcmp.eq.s32.totalorder %v3785_v30, 1  ;;  %vm3876_vm8 = vcmp.eq.s32.totalorder %v3782_v9, 1  ;;  %vm3890_vm9 = vcmp.eq.s32.totalorder %v3824_v8, 1  ;;  %v15956_v30 = vld [vmem:[#allocation225_spill] sm:$0xff]  ;;  %v3833_v8 = vpop.permute.xlu2 %3832 }
 0x719   :  { %v4069_v5 = vsel %vm3887_vm6, %v15942_v31, -inf  ;;  %v4070_v49 = vsel %vm3887_vm6, %v15944_v63, -inf  ;;  %v4071_v51 = vsel %vm3887_vm6, %v15946_v61, -inf  ;;  %v15949_v12 = vmax.f32 %v15948_v37, 0.0  ;;  %v15972_v61 = vld [vmem:[#allocation221_spill] sm:$0xff] }
 0x71a   :  { %v4072_v28 = vsel %vm3887_vm6, %v15947_v45, -inf  ;;  %v4392_v27 = vmax.f32 %v4391_v10, %v4069_v5  ;;  %v4435_v7 = vmax.f32 %v4434_v36, %v4070_v49  ;;  %v4478_v52 = vmax.f32 %v4477_v33, %v4071_v51  ;;  %v15960_v36 = vld [vmem:[#allocation228_spill] sm:$0xff] }
 0x71b   :  { %v4521_v40 = vmax.f32 %v4520_v26, %v4072_v28  ;;  %v3985_v14 = vsel %vm3877_vm7, %v15949_v12, -inf  ;;  %v15951_v56 = vmax.f32 %v15950_v16, 0.0  ;;  %v15953_v58 = vmax.f32 %v15952_v35, 0.0  ;;  %v15974_v28 = vld [vmem:[#allocation223_spill] sm:$0xff]  ;;  %v15978_v12 = vld [vmem:[#allocation301_spill] sm:$0xff] }
 0x71c   :  { %v15955_v24 = vmax.f32 %v15954_v19, 0.0  ;;  %v4221_v50 = vmax.f32 %v4220_v18, %v3985_v14  ;;  %vm3880_vm10 = vcmp.eq.s32.totalorder %v13539_v29, 1  ;;  %v15957_v39 = vmax.f32 %v15956_v30, 0.0 }
 0x71d   :  { %v3986_v11 = vsel %vm3877_vm7, %v15951_v56, -inf  ;;  %v3987_v47 = vsel %vm3877_vm7, %v15953_v58, -inf  ;;  %v15959_v41 = vmax.f32 %v15958_v23, 0.0  ;;  %v15961_v33 = vmax.f32 %v15960_v36, 0.0 }
 0x71e   :  { %v3988_v54 = vsel %vm3877_vm7, %v15955_v24, -inf  ;;  %v4264_v62 = vmax.f32 %v4263_v17, %v3986_v11  ;;  %v4307_v20 = vmax.f32 %v4306_v60, %v3987_v47  ;;  %v3989_v0 = vsel %vm3877_vm7, %v15957_v39, -inf  ;;  %v15968_v17 = vld [vmem:[#allocation82_spill] sm:$0xff] }
 0x71f   :  { %v4350_v22 = vmax.f32 %v4349_v38, %v3988_v54  ;;  %v3990_v10 = vsel %vm3877_vm7, %v15959_v41, -inf  ;;  %v3991_v26 = vsel %vm3877_vm7, %v15961_v33, -inf  ;;  %v15963_v2 = vmax.f32 %v15962_v25, 0.0  ;;  %v15980_v47 = vld [vmem:[#allocation122_spill] sm:$0xff]  ;;  %v15982_v54 = vld [vmem:[#allocation124_spill] sm:$0xff]  ;;  %v15988_v33 = vld [vmem:[#allocation277_spill] sm:$0xff] }
 0x720   :  { %v4393_v42 = vmax.f32 %v4392_v27, %v3989_v0  ;;  %v4436_v43 = vmax.f32 %v4435_v7, %v3990_v10  ;;  %v4479_v59 = vmax.f32 %v4478_v52, %v3991_v26  ;;  %v15965_v13 = vmax.f32 %v15964_v3, 0.0  ;;  %v15976_v52 = vld [vmem:[#allocation224_spill] sm:$0xff]  ;;  %v15986_v39 = vld [vmem:[#allocation206_spill] sm:$0xff] }
 0x721   :  { %v3992_v6 = vsel %vm3877_vm7, %v15963_v2, -inf  ;;  %v15967_v15 = vmax.f32 %v15966_v55, 0.0  ;;  %v15969_v60 = vmax.f32 %v15968_v17, 0.0  ;;  %v15971_v31 = vmax.f32 %v15970_v4, 0.0  ;;  %v15990_v2 = vld [vmem:[#allocation279_spill] sm:$0xff] }
 0x722   :  { %v4522_v21 = vmax.f32 %v4521_v40, %v3992_v6  ;;  %v3977_v53 = vsel %vm3876_vm8, %v15965_v13, -inf  ;;  %v15973_v51 = vmax.f32 %v15972_v61, 0.0  ;;  %v15975_v27 = vmax.f32 %v15974_v28, 0.0 }
 0x723   :  { %v3978_v18 = vsel %vm3876_vm8, %v15967_v15, -inf  ;;  %v3979_v38 = vsel %vm3876_vm8, %v15969_v60, -inf  ;;  %v3980_v5 = vsel %vm3876_vm8, %v15971_v31, -inf  ;;  %v4222_v44 = vmax.f32 %v4221_v50, %v3977_v53  ;;  %v3791_v53 = vpop.permute.xlu0 %3790  ;;  %v15995_v60 = vld [vmem:[#allocation92_spill] sm:$0xff]  ;;  %v15997_v31 = vld [vmem:[#allocation93_spill] sm:$0xff] }
 0x724   :  { %v4265_v63 = vmax.f32 %v4264_v62, %v3978_v18  ;;  %v4308_v49 = vmax.f32 %v4307_v20, %v3979_v38  ;;  %v4351_v34 = vmax.f32 %v4350_v22, %v3980_v5  ;;  %v3981_v45 = vsel %vm3876_vm8, %v15973_v51, -inf  ;;  %v15984_v20 = vld [vmem:[#allocation125_spill] sm:$0xff] }
 0x725   :  { %v3982_v7 = vsel %vm3876_vm8, %v15975_v27, -inf  ;;  %v15977_v40 = vmax.f32 %v15976_v52, 0.0  ;;  %v15979_v14 = vmax.f32 %v15978_v12, 0.0  ;;  %v4394_v56 = vmax.f32 %v4393_v42, %v3981_v45  ;;  %v16001_v45 = vld [vmem:[#allocation169_spill] sm:$0xff] }
 0x726   :  { %v4437_v11 = vmax.f32 %v4436_v43, %v3982_v7  ;;  %v15981_v19 = vmax.f32 %v15980_v47, 0.0  ;;  %v15983_v50 = vmax.f32 %v15982_v54, 0.0  ;;  %v15985_v22 = vmax.f32 %v15984_v20, 0.0  ;;  %v15992_v43 = vld [vmem:[#allocation280_spill] sm:$0xff]  ;;  %v13622_v7 = vpop.permute.xlu1 %3802  ;;  %v16010_v20 = vld [vmem:[#allocation89_spill] sm:$0xff] }
 0x727   :  { %v3983_v37 = vsel %vm3876_vm8, %v15977_v40, -inf  ;;  %v3984_v16 = vsel %vm3876_vm8, %v15979_v14, -inf  ;;  %v15987_v0 = vmax.f32 %v15986_v39, 0.0  ;;  %v15989_v26 = vmax.f32 %v15988_v33, 0.0  ;;  %v16003_v40 = vld [vmem:[#allocation237_spill] sm:$0xff]  ;;  %v16005_v14 = vld [vmem:[#allocation239_spill] sm:$0xff] }
 0x728   :  { %v4480_v35 = vmax.f32 %v4479_v59, %v3983_v37  ;;  %v4523_v58 = vmax.f32 %v4522_v21, %v3984_v16  ;;  %v4089_v24 = vsel %vm3890_vm9, %v15981_v19, -inf  ;;  %v4090_v62 = vsel %vm3890_vm9, %v15983_v50, -inf  ;;  %v16012_v39 = vld [vmem:[#allocation90_spill] sm:$0xff] }
 0x729   :  { %v4091_v30 = vsel %vm3890_vm9, %v15985_v22, -inf  ;;  %v4092_v9 = vsel %vm3890_vm9, %v15987_v0, -inf  ;;  %v4223_v23 = vmax.f32 %v4222_v44, %v4089_v24  ;;  %v4266_v41 = vmax.f32 %v4265_v63, %v4090_v62  ;;  %v15999_v63 = vld [vmem:[#allocation94_spill] sm:$0xff] }
 0x72a   :  { %v4309_v10 = vmax.f32 %v4308_v49, %v4091_v30  ;;  %v4352_v36 = vmax.f32 %v4351_v34, %v4092_v9  ;;  %v4093_v25 = vsel %vm3890_vm9, %v15989_v26, -inf  ;;  %v15991_v6 = vmax.f32 %v15990_v2, 0.0 }
 0x72b   :  { %v15993_v59 = vmax.f32 %v15992_v43, 0.0  ;;  %v15994_v3 = vmax.f32 %v12031_v57, 0.0  ;;  %v4395_v55 = vmax.f32 %v4394_v56, %v4093_v25  ;;  %v15996_v38 = vmax.f32 %v15995_v60, 0.0 }
 0x72c   :  { %v4094_v42 = vsel %vm3890_vm9, %v15991_v6, -inf  ;;  %v15998_v5 = vmax.f32 %v15997_v31, 0.0  ;;  %v16000_v49 = vmax.f32 %v15999_v63, 0.0  ;;  %v16002_v28 = vmax.f32 %v16001_v45, 0.0  ;;  %v16018_v6 = vld [vmem:[#allocation233_spill] sm:$0xff] }
 0x72d   :  { %v4095_v21 = vsel %vm3890_vm9, %v15993_v59, -inf  ;;  %v4096_v13 = vsel %vm3890_vm9, %v15994_v3, -inf  ;;  %v4438_v15 = vmax.f32 %v4437_v11, %v4094_v42  ;;  %v4009_v4 = vsel %vm3880_vm10, %v15996_v38, -inf  ;;  %v16007_v11 = vld [vmem:[#allocation240_spill] sm:$0xff]  ;;  %v16020_v59 = vld [vmem:[#allocation235_spill] sm:$0xff] }
 0x72e   :  { %v4481_v18 = vmax.f32 %v4480_v35, %v4095_v21  ;;  %v4524_v17 = vmax.f32 %v4523_v58, %v4096_v13  ;;  %v4010_v44 = vsel %vm3880_vm10, %v15998_v5, -inf  ;;  %v4011_v57 = vsel %vm3880_vm10, %v16000_v49, -inf  ;;  %v16022_v13 = vld [vmem:[#allocation236_spill] sm:$0xff]  ;;  %v3800_v5 = vpop.permute.xlu0 %3799 }
 0x72f   :  { %v4224_v34 = vmax.f32 %v4223_v23, %v4009_v4  ;;  %v4267_v61 = vmax.f32 %v4266_v41, %v4010_v44  ;;  %v4310_v51 = vmax.f32 %v4309_v10, %v4011_v57  ;;  %v4012_v27 = vsel %vm3880_vm10, %v16002_v28, -inf  ;;  %v16014_v23 = vld [vmem:[#allocation91_spill] sm:$0xff]  ;;  %v16026_v44 = vld [vmem:[#allocation134_spill] sm:$0xff]  ;;  %v16028_v57 = vld [vmem:[#allocation136_spill] sm:$0xff] }
 0x730   :  { %v4353_v52 = vmax.f32 %v4352_v36, %v4012_v27  ;;  %v16004_v37 = vmax.f32 %v16003_v40, 0.0  ;;  %v16006_v16 = vmax.f32 %v16005_v14, 0.0  ;;  %v16008_v35 = vmax.f32 %v16007_v11, 0.0  ;;  %v16016_v36 = vld [vmem:[#allocation165_spill] sm:$0xff]  ;;  %v16032_v27 = vld [vmem:[#allocation218_spill] sm:$0xff] }
 0x731   :  { %v16009_v54 = vmax.f32 %v11931_v32, 0.0  ;;  %vm3879_vm11 = vcmp.eq.s32.totalorder %v3791_v53, 1  ;;  %vm3893_vm12 = vcmp.eq.s32.totalorder %v3833_v8, 1  ;;  %vm3883_vm13 = vcmp.eq.s32.totalorder %v13622_v7, 1  ;;  %v16034_v11 = vld [vmem:[#allocation289_spill] sm:$0xff] }
 0x732   :  { %v4013_v12 = vsel %vm3880_vm10, %v16004_v37, -inf  ;;  %v4014_v56 = vsel %vm3880_vm10, %v16006_v16, -inf  ;;  %v4015_v58 = vsel %vm3880_vm10, %v16008_v35, -inf  ;;  %v16011_v22 = vmax.f32 %v16010_v20, 0.0 }
 0x733   :  { %v4396_v47 = vmax.f32 %v4395_v55, %v4013_v12  ;;  %v4439_v19 = vmax.f32 %v4438_v15, %v4014_v56  ;;  %v4482_v24 = vmax.f32 %v4481_v18, %v4015_v58  ;;  %v4016_v50 = vsel %vm3880_vm10, %v16009_v54, -inf  ;;  %v16024_v15 = vld [vmem:[#allocation313_spill] sm:$0xff]  ;;  %v3842_v56 = vpop.permute.xlu2 %3841  ;;  %v16038_v54 = vld [vmem:[#allocation292_spill] sm:$0xff] }
 0x734   :  { %v4525_v62 = vmax.f32 %v4524_v17, %v4016_v50  ;;  %v4001_v30 = vsel %vm3879_vm11, %v16011_v22, -inf  ;;  %v16013_v0 = vmax.f32 %v16012_v39, 0.0  ;;  %v16015_v41 = vmax.f32 %v16014_v23, 0.0  ;;  %v16041_v23 = vld [vmem:[#allocation101_spill] sm:$0xff] }
 0x735   :  { %v16017_v33 = vmax.f32 %v16016_v36, 0.0  ;;  %v4225_v26 = vmax.f32 %v4224_v34, %v4001_v30  ;;  %v16019_v42 = vmax.f32 %v16018_v6, 0.0  ;;  %v16021_v21 = vmax.f32 %v16020_v59, 0.0  ;;  %v16043_v36 = vld [vmem:[#allocation102_spill] sm:$0xff]  ;;  %v3812_v59 = vpop.permute.xlu1 %3811 }
 0x736   :  { %v4002_v9 = vsel %vm3879_vm11, %v16013_v0, -inf  ;;  %v4003_v10 = vsel %vm3879_vm11, %v16015_v41, -inf  ;;  %v16023_v53 = vmax.f32 %v16022_v13, 0.0  ;;  %v16025_v18 = vmax.f32 %v16024_v15, 0.0  ;;  %v16047_v6 = vld [vmem:[#allocation178_spill] sm:$0xff] }
 0x737   :  { %v4004_v32 = vsel %vm3879_vm11, %v16017_v33, -inf  ;;  %v4268_v29 = vmax.f32 %v4267_v61, %v4002_v9  ;;  %v4311_v25 = vmax.f32 %v4310_v51, %v4003_v10  ;;  %v4005_v43 = vsel %vm3879_vm11, %v16019_v42, -inf  ;;  %v16030_v51 = vld [vmem:[#allocation137_spill] sm:$0xff] }
 0x738   :  { %v4354_v2 = vmax.f32 %v4353_v52, %v4004_v32  ;;  %v4006_v3 = vsel %vm3879_vm11, %v16021_v21, -inf  ;;  %v4007_v55 = vsel %vm3879_vm11, %v16023_v53, -inf  ;;  %v4008_v17 = vsel %vm3879_vm11, %v16025_v18, -inf }
 0x739   :  { %v4397_v60 = vmax.f32 %v4396_v47, %v4005_v43  ;;  %v4440_v38 = vmax.f32 %v4439_v19, %v4006_v3  ;;  %v4483_v4 = vmax.f32 %v4482_v24, %v4007_v55  ;;  %v4526_v31 = vmax.f32 %v4525_v62, %v4008_v17  ;;  %v16036_v47 = vld [vmem:[#allocation291_spill] sm:$0xff]  ;;  %v16049_v3 = vld [vmem:[#allocation249_spill] sm:$0xff]  ;;  %v16053_v17 = vld [vmem:[#allocation252_spill] sm:$0xff] }
 0x73a   :  { %v16027_v63 = vmax.f32 %v16026_v44, 0.0  ;;  %v16029_v34 = vmax.f32 %v16028_v57, 0.0  ;;  %v16031_v45 = vmax.f32 %v16030_v51, 0.0  ;;  %v16033_v52 = vmax.f32 %v16032_v27, 0.0  ;;  %v16051_v55 = vld [vmem:[#allocation251_spill] sm:$0xff] }
 0x73b   :  { %v16035_v35 = vmax.f32 %v16034_v11, 0.0  ;;  %v16037_v19 = vmax.f32 %v16036_v47, 0.0  ;;  %v16039_v50 = vmax.f32 %v16038_v54, 0.0  ;;  %v16040_v20 = vmax.f32 %v12043_v48, 0.0  ;;  %v16064_v47 = vld [vmem:[#allocation245_spill] sm:$0xff]  ;;  %v16066_v54 = vld [vmem:[#allocation247_spill] sm:$0xff] }
 0x73c   :  { %v4113_v49 = vsel %vm3893_vm12, %v16027_v63, -inf  ;;  %v4114_v61 = vsel %vm3893_vm12, %v16029_v34, -inf  ;;  %v4115_v28 = vsel %vm3893_vm12, %v16031_v45, -inf  ;;  %v4116_v40 = vsel %vm3893_vm12, %v16033_v52, -inf  ;;  %v16056_v34 = vld [vmem:[#allocation98_spill] sm:$0xff]  ;;  %v16058_v45 = vld [vmem:[#allocation99_spill] sm:$0xff] }
 0x73d   :  { %v4226_v37 = vmax.f32 %v4225_v26, %v4113_v49  ;;  %v4269_v12 = vmax.f32 %v4268_v29, %v4114_v61  ;;  %v4312_v14 = vmax.f32 %v4311_v25, %v4115_v28  ;;  %v4355_v16 = vmax.f32 %v4354_v2, %v4116_v40  ;;  %v16045_v26 = vld [vmem:[#allocation103_spill] sm:$0xff]  ;;  %v16060_v52 = vld [vmem:[#allocation100_spill] sm:$0xff] }
 0x73e   :  { %v4117_v58 = vsel %vm3893_vm12, %v16035_v35, -inf  ;;  %v4118_v24 = vsel %vm3893_vm12, %v16037_v19, -inf  ;;  %v4119_v62 = vsel %vm3893_vm12, %v16039_v50, -inf  ;;  %v4120_v22 = vsel %vm3893_vm12, %v16040_v20, -inf  ;;  %v3809_v35 = vpop.permute.xlu0 %3808  ;;  %v16068_v20 = vld [vmem:[#allocation248_spill] sm:$0xff] }
 0x73f   :  { %v4398_v30 = vmax.f32 %v4397_v60, %v4117_v58  ;;  %v4441_v39 = vmax.f32 %v4440_v38, %v4118_v24  ;;  %v4484_v0 = vmax.f32 %v4483_v4, %v4119_v62  ;;  %vm3882_vm14 = vcmp.eq.s32.totalorder %v3800_v5, 1 }
 0x740   :  { %v4527_v9 = vmax.f32 %v4526_v31, %v4120_v22  ;;  %v16042_v41 = vmax.f32 %v16041_v23, 0.0  ;;  %v16044_v33 = vmax.f32 %v16043_v36, 0.0  ;;  %v16046_v29 = vmax.f32 %v16045_v26, 0.0  ;;  %v16070_v23 = vld [vmem:[#allocation324_spill] sm:$0xff]  ;;  %v13737_v36 = vpop.permute.xlu2 %3850 }
 0x741   :  { %v16048_v42 = vmax.f32 %v16047_v6, 0.0  ;;  %v16050_v13 = vmax.f32 %v16049_v3, 0.0  ;;  %v16052_v15 = vmax.f32 %v16051_v55, 0.0  ;;  %v16054_v60 = vmax.f32 %v16053_v17, 0.0  ;;  %v16082_v17 = vld [vmem:[#allocation302_spill] sm:$0xff] }
 0x742   :  { %v4033_v10 = vsel %vm3883_vm13, %v16042_v41, -inf  ;;  %v4034_v32 = vsel %vm3883_vm13, %v16044_v33, -inf  ;;  %v4035_v48 = vsel %vm3883_vm13, %v16046_v29, -inf  ;;  %v16055_v63 = vmax.f32 %v11980_v46, 0.0  ;;  %v16062_v46 = vld [vmem:[#allocation176_spill] sm:$0xff] }
 0x743   :  { %v4227_v8 = vmax.f32 %v4226_v37, %v4033_v10  ;;  %v4270_v25 = vmax.f32 %v4269_v12, %v4034_v32  ;;  %v4313_v2 = vmax.f32 %v4312_v14, %v4035_v48  ;;  %v4036_v43 = vsel %vm3883_vm13, %v16048_v42, -inf  ;;  %v16072_v32 = vld [vmem:[#allocation147_spill] sm:$0xff]  ;;  %v16074_v48 = vld [vmem:[#allocation149_spill] sm:$0xff] }
 0x744   :  { %v4356_v21 = vmax.f32 %v4355_v16, %v4036_v43  ;;  %v4037_v53 = vsel %vm3883_vm13, %v16050_v13, -inf  ;;  %v4038_v18 = vsel %vm3883_vm13, %v16052_v15, -inf  ;;  %v4039_v38 = vsel %vm3883_vm13, %v16054_v60, -inf  ;;  %v16078_v43 = vld [vmem:[#allocation230_spill] sm:$0xff] }
 0x745   :  { %v4399_v4 = vmax.f32 %v4398_v30, %v4037_v53  ;;  %v4442_v31 = vmax.f32 %v4441_v39, %v4038_v18  ;;  %v4485_v44 = vmax.f32 %v4484_v0, %v4039_v38  ;;  %v4040_v49 = vsel %vm3883_vm13, %v16055_v63, -inf }
 0x746   :  { %v4528_v57 = vmax.f32 %v4527_v9, %v4040_v49  ;;  %v16057_v61 = vmax.f32 %v16056_v34, 0.0  ;;  %v16059_v28 = vmax.f32 %v16058_v45, 0.0  ;;  %v16061_v40 = vmax.f32 %v16060_v52, 0.0 }
 0x747   :  { %v16063_v11 = vmax.f32 %v16062_v46, 0.0  ;;  %v16065_v19 = vmax.f32 %v16064_v47, 0.0  ;;  %v16067_v50 = vmax.f32 %v16066_v54, 0.0  ;;  %v16069_v22 = vmax.f32 %v16068_v20, 0.0  ;;  %v16095_v54 = vld [vmem:[#allocation261_spill] sm:$0xff]  ;;  %v16097_v20 = vld [vmem:[#allocation263_spill] sm:$0xff] }
 0x748   :  { %v4025_v51 = vsel %vm3882_vm14, %v16057_v61, -inf  ;;  %v4026_v27 = vsel %vm3882_vm14, %v16059_v28, -inf  ;;  %v4027_v37 = vsel %vm3882_vm14, %v16061_v40, -inf  ;;  %v16071_v41 = vmax.f32 %v16070_v23, 0.0  ;;  %v16087_v28 = vld [vmem:[#allocation110_spill] sm:$0xff]  ;;  %v16089_v40 = vld [vmem:[#allocation111_spill] sm:$0xff] }
 0x749   :  { %v4228_v12 = vmax.f32 %v4227_v8, %v4025_v51  ;;  %v4271_v14 = vmax.f32 %v4270_v25, %v4026_v27  ;;  %v4314_v16 = vmax.f32 %v4313_v2, %v4027_v37  ;;  %v4028_v7 = vsel %vm3882_vm14, %v16063_v11, -inf  ;;  %v16076_v2 = vld [vmem:[#allocation150_spill] sm:$0xff] }
 0x74a   :  { %v4357_v58 = vmax.f32 %v4356_v21, %v4028_v7  ;;  %v4029_v24 = vsel %vm3882_vm14, %v16065_v19, -inf  ;;  %v4030_v62 = vsel %vm3882_vm14, %v16067_v50, -inf  ;;  %v4031_v30 = vsel %vm3882_vm14, %v16069_v22, -inf  ;;  %v16101_v23 = vld [vmem:[#allocation334_spill] sm:$0xff] }
 0x74b   :  { %v4400_v39 = vmax.f32 %v4399_v4, %v4029_v24  ;;  %v4443_v0 = vmax.f32 %v4442_v31, %v4030_v62  ;;  %v4486_v9 = vmax.f32 %v4485_v44, %v4031_v30  ;;  %v4032_v10 = vsel %vm3882_vm14, %v16071_v41, -inf  ;;  %v16084_v4 = vld [vmem:[#allocation303_spill] sm:$0xff] }
 0x74c   :  { %v4529_v33 = vmax.f32 %v4528_v57, %v4032_v10  ;;  %vm3896_vm15 = vcmp.eq.s32.totalorder %v3842_v56, 1  ;;  %vm3886_vm0 = vcmp.eq.s32.totalorder %v3812_v59, 1  ;;  %vm3885_vm1 = vcmp.eq.s32.totalorder %v3809_v35, 1  ;;  %v16080_v56 = vld [vmem:[#allocation300_spill] sm:$0xff]  ;;  %v13756_v57 = vpop.permute.xlu1 %3820  ;;  %v16109_v59 = vld [vmem:[#allocation186_spill] sm:$0xff] }
 0x74d   :  { %v16073_v26 = vmax.f32 %v16072_v32, 0.0  ;;  %v16075_v8 = vmax.f32 %v16074_v48, 0.0  ;;  %v16077_v6 = vmax.f32 %v16076_v2, 0.0  ;;  %v16079_v21 = vmax.f32 %v16078_v43, 0.0  ;;  %v13782_v48 = vpop.permute.xlu0 %3817 }
 0x74e   :  { %vm3899_vm2 = vcmp.eq.s32.totalorder %v13737_v36, 1  ;;  %v16081_v15 = vmax.f32 %v16080_v56, 0.0  ;;  %v16083_v60 = vmax.f32 %v16082_v17, 0.0  ;;  %v16085_v31 = vmax.f32 %v16084_v4, 0.0  ;;  %v16111_v17 = vld [vmem:[#allocation257_spill] sm:$0xff]  ;;  %v16113_v4 = vld [vmem:[#allocation259_spill] sm:$0xff] }
 0x74f   :  { %v4137_v29 = vsel %vm3896_vm15, %v16073_v26, -inf  ;;  %v4138_v25 = vsel %vm3896_vm15, %v16075_v8, -inf  ;;  %v4139_v42 = vsel %vm3896_vm15, %v16077_v6, -inf  ;;  %v4140_v3 = vsel %vm3896_vm15, %v16079_v21, -inf  ;;  %v16103_v8 = vld [vmem:[#allocation107_spill] sm:$0xff]  ;;  %v16105_v6 = vld [vmem:[#allocation108_spill] sm:$0xff] }
 0x750   :  { %v4229_v5 = vmax.f32 %v4228_v12, %v4137_v29  ;;  %v4272_v13 = vmax.f32 %v4271_v14, %v4138_v25  ;;  %v4315_v53 = vmax.f32 %v4314_v16, %v4139_v42  ;;  %v4358_v55 = vmax.f32 %v4357_v58, %v4140_v3  ;;  %v16091_v14 = vld [vmem:[#allocation112_spill] sm:$0xff]  ;;  %v16107_v21 = vld [vmem:[#allocation109_spill] sm:$0xff] }
 0x751   :  { %v4141_v18 = vsel %vm3896_vm15, %v16081_v15, -inf  ;;  %v4142_v38 = vsel %vm3896_vm15, %v16083_v60, -inf  ;;  %v4143_v44 = vsel %vm3896_vm15, %v16085_v31, -inf  ;;  %v16086_v63 = vmax.f32 %v12055_v1, 0.0  ;;  %v16093_v1 = vld [vmem:[#allocation190_spill] sm:$0xff] }
 0x752   :  { %v4401_v34 = vmax.f32 %v4400_v39, %v4141_v18  ;;  %v4444_v61 = vmax.f32 %v4443_v0, %v4142_v38  ;;  %v4487_v51 = vmax.f32 %v4486_v9, %v4143_v44  ;;  %v16088_v27 = vmax.f32 %v16087_v28, 0.0  ;;  %v16099_v39 = vld [vmem:[#allocation264_spill] sm:$0xff] }
 0x753   :  { %v4144_v49 = vsel %vm3896_vm15, %v16086_v63, -inf  ;;  %v16090_v37 = vmax.f32 %v16089_v40, 0.0  ;;  %v16092_v16 = vmax.f32 %v16091_v14, 0.0  ;;  %v16094_v11 = vmax.f32 %v16093_v1, 0.0  ;;  %v16115_v63 = vld [vmem:[#allocation260_spill] sm:$0xff] }
 0x754   :  { %v4530_v45 = vmax.f32 %v4529_v33, %v4144_v49  ;;  %v4057_v52 = vsel %vm3886_vm0, %v16088_v27, -inf  ;;  %v16096_v50 = vmax.f32 %v16095_v54, 0.0  ;;  %v16098_v22 = vmax.f32 %v16097_v20, 0.0 }
 0x755   :  { %v4058_v12 = vsel %vm3886_vm0, %v16090_v37, -inf  ;;  %v4059_v46 = vsel %vm3886_vm0, %v16092_v16, -inf  ;;  %v4060_v7 = vsel %vm3886_vm0, %v16094_v11, -inf  ;;  %v4230_v58 = vmax.f32 %v4229_v5, %v4057_v52  ;;  %v16119_v37 = vld [vmem:[#allocation160_spill] sm:$0xff]  ;;  %v16121_v16 = vld [vmem:[#allocation162_spill] sm:$0xff]  ;;  %v16123_v11 = vld [vmem:[#allocation163_spill] sm:$0xff] }
 0x756   :  { %v4273_v47 = vmax.f32 %v4272_v13, %v4058_v12  ;;  %v4316_v19 = vmax.f32 %v4315_v53, %v4059_v46  ;;  %v4359_v24 = vmax.f32 %v4358_v55, %v4060_v7  ;;  %v4061_v62 = vsel %vm3886_vm0, %v16096_v50, -inf }
 0x757   :  { %v4062_v30 = vsel %vm3886_vm0, %v16098_v22, -inf  ;;  %v16100_v0 = vmax.f32 %v16099_v39, 0.0  ;;  %v16102_v41 = vmax.f32 %v16101_v23, 0.0  ;;  %v4402_v33 = vmax.f32 %v4401_v34, %v4061_v62  ;;  %v3860_v22 = vpop.permute.xlu2 %3859 }
 0x758   :  { %v4445_v32 = vmax.f32 %v4444_v61, %v4062_v30  ;;  %v16104_v25 = vmax.f32 %v16103_v8, 0.0  ;;  %v16106_v42 = vmax.f32 %v16105_v6, 0.0  ;;  %v16108_v3 = vmax.f32 %v16107_v21, 0.0  ;;  %v16117_v61 = vld [vmem:[#allocation333_spill] sm:$0xff]  ;;  %v16127_v30 = vld [vmem:[#allocation312_spill] sm:$0xff] }
 0x759   :  { %v4063_v9 = vsel %vm3886_vm0, %v16100_v0, -inf  ;;  %v4064_v10 = vsel %vm3886_vm0, %v16102_v41, -inf  ;;  %v16110_v13 = vmax.f32 %v16109_v59, 0.0  ;;  %v16112_v60 = vmax.f32 %v16111_v17, 0.0  ;;  %v13860_v17 = vpop.permute.xlu0 %3826 }
 0x75a   :  { %v4488_v26 = vmax.f32 %v4487_v51, %v4063_v9  ;;  %v4531_v29 = vmax.f32 %v4530_v45, %v4064_v10  ;;  %v4049_v2 = vsel %vm3885_vm1, %v16104_v25, -inf  ;;  %v4050_v43 = vsel %vm3885_vm1, %v16106_v42, -inf  ;;  %v16129_v9 = vld [vmem:[#allocation314_spill] sm:$0xff]  ;;  %v16131_v10 = vld [vmem:[#allocation315_spill] sm:$0xff] }
 0x75b   :  { %v4051_v5 = vsel %vm3885_vm1, %v16108_v3, -inf  ;;  %v4052_v53 = vsel %vm3885_vm1, %v16110_v13, -inf  ;;  %v4231_v55 = vmax.f32 %v4230_v58, %v4049_v2  ;;  %v4274_v56 = vmax.f32 %v4273_v47, %v4050_v43  ;;  %v16125_v58 = vld [vmem:[#allocation242_spill] sm:$0xff]  ;;  %v16135_v43 = vld [vmem:[#allocation119_spill] sm:$0xff]  ;;  %v16139_v13 = vld [vmem:[#allocation121_spill] sm:$0xff] }
 0x75c   :  { %v4317_v15 = vmax.f32 %v4316_v19, %v4051_v5  ;;  %v4360_v18 = vmax.f32 %v4359_v24, %v4052_v53  ;;  %v4053_v38 = vsel %vm3885_vm1, %v16112_v60, -inf  ;;  %v16114_v31 = vmax.f32 %v16113_v4, 0.0  ;;  %v13824_v24 = vpop.permute.xlu1 %3829  ;;  %v16137_v5 = vld [vmem:[#allocation120_spill] sm:$0xff] }
 0x75d   :  { %v16116_v49 = vmax.f32 %v16115_v63, 0.0  ;;  %v16118_v51 = vmax.f32 %v16117_v61, 0.0  ;;  %v4403_v28 = vmax.f32 %v4402_v33, %v4053_v38  ;;  %v16120_v12 = vmax.f32 %v16119_v37, 0.0 }
 0x75e   :  { %v4054_v44 = vsel %vm3885_vm1, %v16114_v31, -inf  ;;  %v16122_v46 = vmax.f32 %v16121_v16, 0.0  ;;  %v16124_v7 = vmax.f32 %v16123_v11, 0.0  ;;  %v16126_v47 = vmax.f32 %v16125_v58, 0.0 }
 0x75f   :  { %v4055_v34 = vsel %vm3885_vm1, %v16116_v49, -inf  ;;  %v4056_v45 = vsel %vm3885_vm1, %v16118_v51, -inf  ;;  %v4446_v27 = vmax.f32 %v4445_v32, %v4054_v44  ;;  %v4161_v14 = vsel %vm3899_vm2, %v16120_v12, -inf  ;;  %v16143_v44 = vld [vmem:[#allocation273_spill] sm:$0xff] }
 0x760   :  { %v4489_v52 = vmax.f32 %v4488_v26, %v4055_v34  ;;  %v4532_v40 = vmax.f32 %v4531_v29, %v4056_v45  ;;  %v4162_v1 = vsel %vm3899_vm2, %v16122_v46, -inf  ;;  %v4163_v35 = vsel %vm3899_vm2, %v16124_v7, -inf  ;;  %v16133_v26 = vld [vmem:[#allocation343_spill] sm:$0xff]  ;;  %v16147_v45 = vld [vmem:[#allocation276_spill] sm:$0xff] }
 0x761   :  { %v4164_v19 = vsel %vm3899_vm2, %v16126_v47, -inf  ;;  %v4232_v54 = vmax.f32 %v4231_v55, %v4161_v14  ;;  %v4275_v50 = vmax.f32 %v4274_v56, %v4162_v1  ;;  %v4318_v62 = vmax.f32 %v4317_v15, %v4163_v35  ;;  %v16141_v56 = vld [vmem:[#allocation202_spill] sm:$0xff]  ;;  %v16145_v34 = vld [vmem:[#allocation275_spill] sm:$0xff]  ;;  %v16151_v1 = vld [vmem:[#allocation116_spill] sm:$0xff] }
 0x762   :  { %v4361_v20 = vmax.f32 %v4360_v18, %v4164_v19  ;;  %v16128_v39 = vmax.f32 %v16127_v30, 0.0  ;;  %v16130_v23 = vmax.f32 %v16129_v9, 0.0  ;;  %v16132_v33 = vmax.f32 %v16131_v10, 0.0  ;;  %v16153_v35 = vld [vmem:[#allocation117_spill] sm:$0xff]  ;;  %v16155_v19 = vld [vmem:[#allocation118_spill] sm:$0xff] }
 0x763   :  { %v16134_v29 = vmax.f32 %v16133_v26, 0.0  ;;  %vm3889_vm3 = vcmp.eq.s32.totalorder %v13756_v57, 1  ;;  %vm3888_vm4 = vcmp.eq.s32.totalorder %v13782_v48, 1  ;;  %vm3902_vm5 = vcmp.eq.s32.totalorder %v3860_v22, 1 }
 0x764   :  { %v4165_v0 = vsel %vm3899_vm2, %v16128_v39, -inf  ;;  %v4166_v41 = vsel %vm3899_vm2, %v16130_v23, -inf  ;;  %v4167_v32 = vsel %vm3899_vm2, %v16132_v33, -inf  ;;  %v16136_v21 = vmax.f32 %v16135_v43, 0.0  ;;  %v13895_v23 = vpop.permute.xlu1 %3838 }
 0x765   :  { %v4168_v8 = vsel %vm3899_vm2, %v16134_v29, -inf  ;;  %v4404_v25 = vmax.f32 %v4403_v28, %v4165_v0  ;;  %v4447_v2 = vmax.f32 %v4446_v27, %v4166_v41  ;;  %v4490_v6 = vmax.f32 %v4489_v52, %v4167_v32  ;;  %v16149_v52 = vld [vmem:[#allocation336_spill] sm:$0xff]  ;;  %v16159_v41 = vld [vmem:[#allocation269_spill] sm:$0xff]  ;;  %v16161_v32 = vld [vmem:[#allocation271_spill] sm:$0xff] }
 0x766   :  { %v4533_v42 = vmax.f32 %v4532_v40, %v4168_v8  ;;  %v4081_v3 = vsel %vm3889_vm3, %v16136_v21, -inf  ;;  %v16138_v59 = vmax.f32 %v16137_v5, 0.0  ;;  %v16140_v53 = vmax.f32 %v16139_v13, 0.0  ;;  %v16163_v8 = vld [vmem:[#allocation272_spill] sm:$0xff] }
 0x767   :  { %v16142_v15 = vmax.f32 %v16141_v56, 0.0  ;;  %v4233_v60 = vmax.f32 %v4232_v54, %v4081_v3  ;;  %vm3892_vm6 = vcmp.eq.s32.totalorder %v13824_v24, 1  ;;  %v16144_v63 = vmax.f32 %v16143_v44, 0.0  ;;  %v16205_v24 = vld [vmem:[#allocation210_spill] sm:$0xff] }
 0x768   :  { %v4082_v36 = vsel %vm3889_vm3, %v16138_v59, -inf  ;;  %v4083_v55 = vsel %vm3889_vm3, %v16140_v53, -inf  ;;  %v16146_v61 = vmax.f32 %v16145_v34, 0.0  ;;  %v16148_v28 = vmax.f32 %v16147_v45, 0.0 }
 0x769   :  { %v4084_v18 = vsel %vm3889_vm3, %v16142_v15, -inf  ;;  %v4276_v38 = vmax.f32 %v4275_v50, %v4082_v36  ;;  %v4319_v4 = vmax.f32 %v4318_v62, %v4083_v55  ;;  %v4085_v49 = vsel %vm3889_vm3, %v16144_v63, -inf  ;;  %v16157_v50 = vld [vmem:[#allocation198_spill] sm:$0xff]  ;;  %v16167_v36 = vld [vmem:[#allocation172_spill] sm:$0xff] }
 0x76a   :  { %v4362_v31 = vmax.f32 %v4361_v20, %v4084_v18  ;;  %v4086_v51 = vsel %vm3889_vm3, %v16146_v61, -inf  ;;  %v4087_v27 = vsel %vm3889_vm3, %v16148_v28, -inf  ;;  %v16150_v40 = vmax.f32 %v16149_v52, 0.0  ;;  %v16169_v55 = vld [vmem:[#allocation174_spill] sm:$0xff]  ;;  %v16171_v18 = vld [vmem:[#allocation175_spill] sm:$0xff]  ;;  %v16177_v28 = vld [vmem:[#allocation325_spill] sm:$0xff] }
 0x76b   :  { %v4405_v12 = vmax.f32 %v4404_v25, %v4085_v49  ;;  %v4448_v14 = vmax.f32 %v4447_v2, %v4086_v51  ;;  %v4491_v16 = vmax.f32 %v4490_v6, %v4087_v27  ;;  %v16152_v11 = vmax.f32 %v16151_v1, 0.0  ;;  %v16165_v6 = vld [vmem:[#allocation335_spill] sm:$0xff]  ;;  %v13937_v1 = vpop.permute.xlu0 %3835 }
 0x76c   :  { %v4088_v37 = vsel %vm3889_vm3, %v16150_v40, -inf  ;;  %v16154_v58 = vmax.f32 %v16153_v35, 0.0  ;;  %v16156_v54 = vmax.f32 %v16155_v19, 0.0  ;;  %v16158_v62 = vmax.f32 %v16157_v50, 0.0  ;;  %v16175_v61 = vld [vmem:[#allocation323_spill] sm:$0xff]  ;;  %v16179_v40 = vld [vmem:[#allocation326_spill] sm:$0xff] }
 0x76d   :  { %v4534_v46 = vmax.f32 %v4533_v42, %v4088_v37  ;;  %v4073_v7 = vsel %vm3888_vm4, %v16152_v11, -inf  ;;  %v16160_v10 = vmax.f32 %v16159_v41, 0.0  ;;  %v16162_v26 = vmax.f32 %v16161_v32, 0.0  ;;  %v16189_v41 = vld [vmem:[#allocation214_spill] sm:$0xff] }
 0x76e   :  { %v4074_v47 = vsel %vm3888_vm4, %v16154_v58, -inf  ;;  %v4075_v57 = vsel %vm3888_vm4, %v16156_v54, -inf  ;;  %v4076_v20 = vsel %vm3888_vm4, %v16158_v62, -inf  ;;  %v4234_v30 = vmax.f32 %v4233_v60, %v4073_v7 }
 0x76f   :  { %v4277_v39 = vmax.f32 %v4276_v38, %v4074_v47  ;;  %v4320_v0 = vmax.f32 %v4319_v4, %v4075_v57  ;;  %v4363_v9 = vmax.f32 %v4362_v31, %v4076_v20  ;;  %v4077_v33 = vsel %vm3888_vm4, %v16160_v10, -inf  ;;  %v16173_v4 = vld [vmem:[#allocation254_spill] sm:$0xff]  ;;  %v16185_v57 = vld [vmem:[#allocation132_spill] sm:$0xff]  ;;  %v16187_v20 = vld [vmem:[#allocation133_spill] sm:$0xff] }
 0x770   :  { %v4078_v29 = vsel %vm3888_vm4, %v16162_v26, -inf  ;;  %v16164_v25 = vmax.f32 %v16163_v8, 0.0  ;;  %v16166_v42 = vmax.f32 %v16165_v6, 0.0  ;;  %v4406_v21 = vmax.f32 %v4405_v12, %v4077_v33  ;;  %v16183_v47 = vld [vmem:[#allocation130_spill] sm:$0xff]  ;;  %v16191_v26 = vld [vmem:[#allocation285_spill] sm:$0xff] }
 0x771   :  { %v4449_v3 = vmax.f32 %v4448_v14, %v4078_v29  ;;  %v16168_v13 = vmax.f32 %v16167_v36, 0.0  ;;  %v16170_v56 = vmax.f32 %v16169_v55, 0.0  ;;  %v16172_v60 = vmax.f32 %v16171_v18, 0.0  ;;  %v16181_v14 = vld [vmem:[#allocation346_spill] sm:$0xff]  ;;  %v13971_v55 = vpop.permute.xlu1 %3847 }
 0x772   :  { %v4079_v2 = vsel %vm3888_vm4, %v16164_v25, -inf  ;;  %v4080_v43 = vsel %vm3888_vm4, %v16166_v42, -inf  ;;  %v16174_v31 = vmax.f32 %v16173_v4, 0.0  ;;  %v16176_v51 = vmax.f32 %v16175_v61, 0.0  ;;  %v16193_v25 = vld [vmem:[#allocation287_spill] sm:$0xff]  ;;  %v16195_v42 = vld [vmem:[#allocation288_spill] sm:$0xff] }
 0x773   :  { %v4492_v5 = vmax.f32 %v4491_v16, %v4079_v2  ;;  %v4535_v59 = vmax.f32 %v4534_v46, %v4080_v43  ;;  %v4185_v53 = vsel %vm3902_vm5, %v16168_v13, -inf  ;;  %v4186_v15 = vsel %vm3902_vm5, %v16170_v56, -inf  ;;  %v16197_v36 = vld [vmem:[#allocation338_spill] sm:$0xff] }
 0x774   :  { %v4187_v38 = vsel %vm3902_vm5, %v16172_v60, -inf  ;;  %v4188_v48 = vsel %vm3902_vm5, %v16174_v31, -inf  ;;  %v4235_v44 = vmax.f32 %v4234_v30, %v4185_v53  ;;  %v4278_v63 = vmax.f32 %v4277_v39, %v4186_v15  ;;  %v16199_v15 = vld [vmem:[#allocation126_spill] sm:$0xff] }
 0x775   :  { %v4321_v49 = vmax.f32 %v4320_v0, %v4187_v38  ;;  %v4364_v34 = vmax.f32 %v4363_v9, %v4188_v48  ;;  %v4189_v45 = vsel %vm3902_vm5, %v16176_v51, -inf  ;;  %v16178_v27 = vmax.f32 %v16177_v28, 0.0  ;;  %v16201_v38 = vld [vmem:[#allocation128_spill] sm:$0xff]  ;;  %v16203_v48 = vld [vmem:[#allocation129_spill] sm:$0xff] }
 0x776   :  { %v16180_v37 = vmax.f32 %v16179_v40, 0.0  ;;  %v16182_v16 = vmax.f32 %v16181_v14, 0.0  ;;  %v4407_v11 = vmax.f32 %v4406_v21, %v4189_v45  ;;  %v16184_v19 = vmax.f32 %v16183_v47, 0.0  ;;  %v16207_v28 = vld [vmem:[#allocation281_spill] sm:$0xff]  ;;  %v16209_v40 = vld [vmem:[#allocation283_spill] sm:$0xff]  ;;  %v16211_v14 = vld [vmem:[#allocation284_spill] sm:$0xff] }
 0x777   :  { %v4190_v52 = vsel %vm3902_vm5, %v16178_v27, -inf  ;;  %v16186_v50 = vmax.f32 %v16185_v57, 0.0  ;;  %v16188_v30 = vmax.f32 %v16187_v20, 0.0  ;;  %v16190_v10 = vmax.f32 %v16189_v41, 0.0  ;;  %v13993_v57 = vpop.permute.xlu0 %3844 }
 0x778   :  { %v4191_v12 = vsel %vm3902_vm5, %v16180_v37, -inf  ;;  %v4192_v46 = vsel %vm3902_vm5, %v16182_v16, -inf  ;;  %v4450_v7 = vmax.f32 %v4449_v3, %v4190_v52  ;;  %v4105_v54 = vsel %vm3892_vm6, %v16184_v19, -inf }
 0x779   :  { %v4493_v35 = vmax.f32 %v4492_v5, %v4191_v12  ;;  %v4536_v58 = vmax.f32 %v4535_v59, %v4192_v46  ;;  %v4106_v62 = vsel %vm3892_vm6, %v16186_v50, -inf  ;;  %v4107_v22 = vsel %vm3892_vm6, %v16188_v30, -inf  ;;  %v16215_v50 = vld [vmem:[#allocation143_spill] sm:$0xff]  ;;  %v16217_v30 = vld [vmem:[#allocation145_spill] sm:$0xff] }
 0x77a   :  { %v4236_v39 = vmax.f32 %v4235_v44, %v4105_v54  ;;  %v4279_v0 = vmax.f32 %v4278_v63, %v4106_v62  ;;  %v4322_v9 = vmax.f32 %v4321_v49, %v4107_v22  ;;  %v4108_v33 = vsel %vm3892_vm6, %v16190_v10, -inf  ;;  %v16221_v10 = vld [vmem:[#allocation226_spill] sm:$0xff] }
 0x77b   :  { %v4365_v32 = vmax.f32 %v4364_v34, %v4108_v33  ;;  %v16192_v29 = vmax.f32 %v16191_v26, 0.0  ;;  %v16194_v2 = vmax.f32 %v16193_v25, 0.0  ;;  %v16196_v43 = vmax.f32 %v16195_v42, 0.0 }
 0x77c   :  { %v16198_v13 = vmax.f32 %v16197_v36, 0.0  ;;  %vm3891_vm7 = vcmp.eq.s32.totalorder %v13860_v17, 1  ;;  %vm3895_vm8 = vcmp.eq.s32.totalorder %v13895_v23, 1  ;;  %vm3894_vm9 = vcmp.eq.s32.totalorder %v13937_v1, 1 }
 0x77d   :  { %v4109_v8 = vsel %vm3892_vm6, %v16192_v29, -inf  ;;  %v4110_v6 = vsel %vm3892_vm6, %v16194_v2, -inf  ;;  %v4111_v21 = vsel %vm3892_vm6, %v16196_v43, -inf  ;;  %v16200_v18 = vmax.f32 %v16199_v15, 0.0  ;;  %v16223_v2 = vld [vmem:[#allocation296_spill] sm:$0xff]  ;;  %v16225_v43 = vld [vmem:[#allocation298_spill] sm:$0xff] }
 0x77e   :  { %v4408_v3 = vmax.f32 %v4407_v11, %v4109_v8  ;;  %v4451_v5 = vmax.f32 %v4450_v7, %v4110_v6  ;;  %v4494_v59 = vmax.f32 %v4493_v35, %v4111_v21  ;;  %v4112_v53 = vsel %vm3892_vm6, %v16198_v13, -inf  ;;  %v16213_v11 = vld [vmem:[#allocation337_spill] sm:$0xff]  ;;  %v16229_v13 = vld [vmem:[#allocation340_spill] sm:$0xff] }
 0x77f   :  { %v4537_v56 = vmax.f32 %v4536_v58, %v4112_v53  ;;  %v4097_v60 = vsel %vm3891_vm7, %v16200_v18, -inf  ;;  %v16202_v4 = vmax.f32 %v16201_v38, 0.0  ;;  %v16204_v44 = vmax.f32 %v16203_v48, 0.0 }
 0x780   :  { %v16206_v49 = vmax.f32 %v16205_v24, 0.0  ;;  %v4237_v61 = vmax.f32 %v4236_v39, %v4097_v60  ;;  %vm3898_vm10 = vcmp.eq.s32.totalorder %v13971_v55, 1  ;;  %v16208_v27 = vmax.f32 %v16207_v28, 0.0 }
 0x781   :  { %v4098_v31 = vsel %vm3891_vm7, %v16202_v4, -inf  ;;  %v4099_v63 = vsel %vm3891_vm7, %v16204_v44, -inf  ;;  %v16210_v37 = vmax.f32 %v16209_v40, 0.0  ;;  %v16212_v16 = vmax.f32 %v16211_v14, 0.0  ;;  %v16231_v4 = vld [vmem:[#allocation138_spill] sm:$0xff]  ;;  %v16233_v44 = vld [vmem:[#allocation140_spill] sm:$0xff] }
 0x782   :  { %v4100_v34 = vsel %vm3891_vm7, %v16206_v49, -inf  ;;  %v4280_v51 = vmax.f32 %v4279_v0, %v4098_v31  ;;  %v4323_v45 = vmax.f32 %v4322_v9, %v4099_v63  ;;  %v4101_v52 = vsel %vm3891_vm7, %v16208_v27, -inf  ;;  %v16219_v0 = vld [vmem:[#allocation146_spill] sm:$0xff]  ;;  %v16235_v49 = vld [vmem:[#allocation141_spill] sm:$0xff] }
 0x783   :  { %v4366_v17 = vmax.f32 %v4365_v32, %v4100_v34  ;;  %v4102_v12 = vsel %vm3891_vm7, %v16210_v37, -inf  ;;  %v4103_v46 = vsel %vm3891_vm7, %v16212_v16, -inf  ;;  %v16214_v7 = vmax.f32 %v16213_v11, 0.0  ;;  %v16239_v40 = vld [vmem:[#allocation293_spill] sm:$0xff]  ;;  %v16241_v14 = vld [vmem:[#allocation294_spill] sm:$0xff]  ;;  %v16243_v11 = vld [vmem:[#allocation295_spill] sm:$0xff] }
 0x784   :  { %v4409_v58 = vmax.f32 %v4408_v3, %v4101_v52  ;;  %v4452_v47 = vmax.f32 %v4451_v5, %v4102_v12  ;;  %v4495_v19 = vmax.f32 %v4494_v59, %v4103_v46  ;;  %v16216_v62 = vmax.f32 %v16215_v50, 0.0  ;;  %v16227_v5 = vld [vmem:[#allocation299_spill] sm:$0xff] }
 0x785   :  { %v4104_v35 = vsel %vm3891_vm7, %v16214_v7, -inf  ;;  %v16218_v22 = vmax.f32 %v16217_v30, 0.0  ;;  %v16220_v9 = vmax.f32 %v16219_v0, 0.0  ;;  %v16222_v33 = vmax.f32 %v16221_v10, 0.0  ;;  %v3857_v30 = vpop.permute.xlu1 %3856 }
 0x786   :  { %v4538_v54 = vmax.f32 %v4537_v56, %v4104_v35  ;;  %v4129_v20 = vsel %vm3895_vm8, %v16216_v62, -inf  ;;  %v16224_v6 = vmax.f32 %v16223_v2, 0.0  ;;  %v16226_v21 = vmax.f32 %v16225_v43, 0.0  ;;  %v3854_v43 = vpop.permute.xlu0 %3853 }
 0x787   :  { %v4130_v39 = vsel %vm3895_vm8, %v16218_v22, -inf  ;;  %v4131_v41 = vsel %vm3895_vm8, %v16220_v9, -inf  ;;  %v4132_v32 = vsel %vm3895_vm8, %v16222_v33, -inf  ;;  %v4238_v26 = vmax.f32 %v4237_v61, %v4129_v20  ;;  %v16237_v61 = vld [vmem:[#allocation222_spill] sm:$0xff]  ;;  %v16247_v22 = vld [vmem:[#allocation156_spill] sm:$0xff]  ;;  %v16251_v33 = vld [vmem:[#allocation159_spill] sm:$0xff] }
 0x788   :  { %v4281_v29 = vmax.f32 %v4280_v51, %v4130_v39  ;;  %v4324_v8 = vmax.f32 %v4323_v45, %v4131_v41  ;;  %v4367_v25 = vmax.f32 %v4366_v17, %v4132_v32  ;;  %v4133_v42 = vsel %vm3895_vm8, %v16224_v6, -inf  ;;  %v16249_v9 = vld [vmem:[#allocation158_spill] sm:$0xff] }
 0x789   :  { %v4134_v3 = vsel %vm3895_vm8, %v16226_v21, -inf  ;;  %v16228_v59 = vmax.f32 %v16227_v5, 0.0  ;;  %v16230_v53 = vmax.f32 %v16229_v13, 0.0  ;;  %v4410_v15 = vmax.f32 %v4409_v58, %v4133_v42  ;;  %v16245_v58 = vld [vmem:[#allocation339_spill] sm:$0xff]  ;;  %v16255_v21 = vld [vmem:[#allocation308_spill] sm:$0xff] }
 0x78a   :  { %v4453_v18 = vmax.f32 %v4452_v47, %v4134_v3  ;;  %v16232_v31 = vmax.f32 %v16231_v4, 0.0  ;;  %v16234_v63 = vmax.f32 %v16233_v44, 0.0  ;;  %v16236_v34 = vmax.f32 %v16235_v49, 0.0 }
 0x78b   :  { %v4135_v36 = vsel %vm3895_vm8, %v16228_v59, -inf  ;;  %v4136_v56 = vsel %vm3895_vm8, %v16230_v53, -inf  ;;  %v16238_v51 = vmax.f32 %v16237_v61, 0.0  ;;  %v16240_v37 = vmax.f32 %v16239_v40, 0.0  ;;  %v16257_v59 = vld [vmem:[#allocation310_spill] sm:$0xff]  ;;  %v16259_v53 = vld [vmem:[#allocation311_spill] sm:$0xff] }
 0x78c   :  { %v4496_v60 = vmax.f32 %v4495_v19, %v4135_v36  ;;  %v4539_v38 = vmax.f32 %v4538_v54, %v4136_v56  ;;  %v4121_v48 = vsel %vm3894_vm9, %v16232_v31, -inf  ;;  %v4122_v24 = vsel %vm3894_vm9, %v16234_v63, -inf  ;;  %v16263_v63 = vld [vmem:[#allocation152_spill] sm:$0xff] }
 0x78d   :  { %v4123_v23 = vsel %vm3894_vm9, %v16236_v34, -inf  ;;  %v4124_v45 = vsel %vm3894_vm9, %v16238_v51, -inf  ;;  %v4239_v17 = vmax.f32 %v4238_v26, %v4121_v48  ;;  %v4282_v28 = vmax.f32 %v4281_v29, %v4122_v24  ;;  %v16253_v26 = vld [vmem:[#allocation238_spill] sm:$0xff]  ;;  %v16267_v51 = vld [vmem:[#allocation155_spill] sm:$0xff] }
 0x78e   :  { %v4325_v27 = vmax.f32 %v4324_v8, %v4123_v23  ;;  %v4368_v52 = vmax.f32 %v4367_v25, %v4124_v45  ;;  %v4125_v12 = vsel %vm3894_vm9, %v16240_v37, -inf  ;;  %v16242_v16 = vmax.f32 %v16241_v14, 0.0  ;;  %v16265_v34 = vld [vmem:[#allocation154_spill] sm:$0xff]  ;;  %v16271_v14 = vld [vmem:[#allocation304_spill] sm:$0xff] }
 0x78f   :  { %v16244_v7 = vmax.f32 %v16243_v11, 0.0  ;;  %v16246_v47 = vmax.f32 %v16245_v58, 0.0  ;;  %v4411_v54 = vmax.f32 %v4410_v15, %v4125_v12  ;;  %v16248_v39 = vmax.f32 %v16247_v22, 0.0 }
 0x790   :  { %v4126_v46 = vsel %vm3894_vm9, %v16242_v16, -inf  ;;  %v16250_v41 = vmax.f32 %v16249_v9, 0.0  ;;  %v16252_v32 = vmax.f32 %v16251_v33, 0.0  ;;  %v16254_v29 = vmax.f32 %v16253_v26, 0.0 }
 0x791   :  { %v4127_v35 = vsel %vm3894_vm9, %v16244_v7, -inf  ;;  %v4128_v19 = vsel %vm3894_vm9, %v16246_v47, -inf  ;;  %v4454_v50 = vmax.f32 %v4453_v18, %v4126_v46  ;;  %v4153_v0 = vsel %vm3898_vm10, %v16248_v39, -inf  ;;  %v16261_v18 = vld [vmem:[#allocation342_spill] sm:$0xff] }
 0x792   :  { %v4497_v62 = vmax.f32 %v4496_v60, %v4127_v35  ;;  %v4540_v20 = vmax.f32 %v4539_v38, %v4128_v19  ;;  %v4154_v10 = vsel %vm3898_vm10, %v16250_v41, -inf  ;;  %v4155_v1 = vsel %vm3898_vm10, %v16252_v32, -inf  ;;  %v16273_v46 = vld [vmem:[#allocation306_spill] sm:$0xff]  ;;  %v16275_v35 = vld [vmem:[#allocation307_spill] sm:$0xff]  ;;  %v16277_v19 = vld [vmem:[#allocation341_spill] sm:$0xff] }
 0x793   :  { %v4156_v8 = vsel %vm3898_vm10, %v16254_v29, -inf  ;;  %v4240_v25 = vmax.f32 %v4239_v17, %v4153_v0  ;;  %v4283_v2 = vmax.f32 %v4282_v28, %v4154_v10  ;;  %v4326_v6 = vmax.f32 %v4325_v27, %v4155_v1  ;;  %v16269_v28 = vld [vmem:[#allocation234_spill] sm:$0xff]  ;;  %v16279_v0 = vld [vmem:[#allocation168_spill] sm:$0xff]  ;;  %v16283_v1 = vld [vmem:[#allocation171_spill] sm:$0xff] }
 0x794   :  { %v4369_v42 = vmax.f32 %v4368_v52, %v4156_v8  ;;  %v16256_v3 = vmax.f32 %v16255_v21, 0.0  ;;  %v16258_v36 = vmax.f32 %v16257_v59, 0.0  ;;  %v16260_v56 = vmax.f32 %v16259_v53, 0.0  ;;  %v16281_v10 = vld [vmem:[#allocation170_spill] sm:$0xff]  ;;  %v16287_v59 = vld [vmem:[#allocation319_spill] sm:$0xff]  ;;  %v16289_v53 = vld [vmem:[#allocation321_spill] sm:$0xff] }
 0x795   :  { %v16262_v60 = vmax.f32 %v16261_v18, 0.0  ;;  %vm3897_vm11 = vcmp.eq.s32.totalorder %v13993_v57, 1  ;;  %vm3901_vm12 = vcmp.eq.s32.totalorder %v3857_v30, 1  ;;  %vm3900_vm13 = vcmp.eq.s32.totalorder %v3854_v43, 1  ;;  %v16285_v8 = vld [vmem:[#allocation250_spill] sm:$0xff] }
 0x796   :  { %v4157_v5 = vsel %vm3898_vm10, %v16256_v3, -inf  ;;  %v4158_v13 = vsel %vm3898_vm10, %v16258_v36, -inf  ;;  %v4159_v15 = vsel %vm3898_vm10, %v16260_v56, -inf  ;;  %v16264_v24 = vmax.f32 %v16263_v63, 0.0  ;;  %v16291_v18 = vld [vmem:[#allocation322_spill] sm:$0xff] }
 0x797   :  { %v4160_v38 = vsel %vm3898_vm10, %v16262_v60, -inf  ;;  %v4412_v4 = vmax.f32 %v4411_v54, %v4157_v5  ;;  %v4455_v31 = vmax.f32 %v4454_v50, %v4158_v13  ;;  %v4498_v48 = vmax.f32 %v4497_v62, %v4159_v15 }
 0x798   :  { %v4541_v44 = vmax.f32 %v4540_v20, %v4160_v38  ;;  %v4145_v49 = vsel %vm3897_vm11, %v16264_v24, -inf  ;;  %v16266_v23 = vmax.f32 %v16265_v34, 0.0  ;;  %v16268_v45 = vmax.f32 %v16267_v51, 0.0  ;;  %v16295_v34 = vld [vmem:[#allocation164_spill] sm:$0xff]  ;;  %v16297_v51 = vld [vmem:[#allocation166_spill] sm:$0xff] }
 0x799   :  { %v16270_v55 = vmax.f32 %v16269_v28, 0.0  ;;  %v4241_v52 = vmax.f32 %v4240_v25, %v4145_v49  ;;  %v16272_v57 = vmax.f32 %v16271_v14, 0.0  ;;  %v16274_v11 = vmax.f32 %v16273_v46, 0.0  ;;  %v16299_v28 = vld [vmem:[#allocation167_spill] sm:$0xff] }
 0x79a   :  { %v4146_v61 = vsel %vm3897_vm11, %v16266_v23, -inf  ;;  %v4147_v17 = vsel %vm3897_vm11, %v16268_v45, -inf  ;;  %v16276_v58 = vmax.f32 %v16275_v35, 0.0  ;;  %v16278_v54 = vmax.f32 %v16277_v19, 0.0 }
 0x79b   :  { %v4148_v27 = vsel %vm3897_vm11, %v16270_v55, -inf  ;;  %v4284_v40 = vmax.f32 %v4283_v2, %v4146_v61  ;;  %v4327_v37 = vmax.f32 %v4326_v6, %v4147_v17  ;;  %v4149_v16 = vsel %vm3897_vm11, %v16272_v57, -inf  ;;  %v3866_v6 = vpop.permute.xlu1 %3865 }
 0x79c   :  { %v4370_v12 = vmax.f32 %v4369_v42, %v4148_v27  ;;  %v4150_v7 = vsel %vm3897_vm11, %v16274_v11, -inf  ;;  %v4151_v47 = vsel %vm3897_vm11, %v16276_v58, -inf  ;;  %v4152_v50 = vsel %vm3897_vm11, %v16278_v54, -inf }
 0x79d   :  { %v4413_v62 = vmax.f32 %v4412_v4, %v4149_v16  ;;  %v4456_v20 = vmax.f32 %v4455_v31, %v4150_v7  ;;  %v4499_v22 = vmax.f32 %v4498_v48, %v4151_v47  ;;  %v4542_v39 = vmax.f32 %v4541_v44, %v4152_v50  ;;  %v16293_v4 = vld [vmem:[#allocation345_spill] sm:$0xff]  ;;  %v16303_v16 = vld [vmem:[#allocation316_spill] sm:$0xff]  ;;  %v16307_v47 = vld [vmem:[#allocation318_spill] sm:$0xff] }
 0x79e   :  { %v16280_v9 = vmax.f32 %v16279_v0, 0.0  ;;  %v16282_v33 = vmax.f32 %v16281_v10, 0.0  ;;  %v16284_v26 = vmax.f32 %v16283_v1, 0.0  ;;  %v16286_v25 = vmax.f32 %v16285_v8, 0.0  ;;  %v16305_v7 = vld [vmem:[#allocation317_spill] sm:$0xff]  ;;  %v16309_v50 = vld [vmem:[#allocation344_spill] sm:$0xff] }
 0x79f   :  { %v16288_v36 = vmax.f32 %v16287_v59, 0.0  ;;  %v16290_v56 = vmax.f32 %v16289_v53, 0.0  ;;  %v16292_v60 = vmax.f32 %v16291_v18, 0.0  ;;  %v16294_v31 = vmax.f32 %v16293_v4, 0.0  ;;  %v16321_v59 = vld [vmem:[#allocation331_spill] sm:$0xff]  ;;  %v16323_v53 = vld [vmem:[#allocation332_spill] sm:$0xff]  ;;  %v3863_v4 = vpop.permute.xlu0 %3862 }
 0x7a0   :  { %v4177_v41 = vsel %vm3901_vm12, %v16280_v9, -inf  ;;  %v4178_v32 = vsel %vm3901_vm12, %v16282_v33, -inf  ;;  %v4179_v29 = vsel %vm3901_vm12, %v16284_v26, -inf  ;;  %v4180_v2 = vsel %vm3901_vm12, %v16286_v25, -inf  ;;  %v16313_v9 = vld [vmem:[#allocation183_spill] sm:$0xff]  ;;  %v16315_v33 = vld [vmem:[#allocation184_spill] sm:$0xff] }
 0x7a1   :  { %v4242_v42 = vmax.f32 %v4241_v52, %v4177_v41  ;;  %v4285_v21 = vmax.f32 %v4284_v40, %v4178_v32  ;;  %v4328_v3 = vmax.f32 %v4327_v37, %v4179_v29  ;;  %v4371_v5 = vmax.f32 %v4370_v12, %v4180_v2  ;;  %v16301_v52 = vld [vmem:[#allocation246_spill] sm:$0xff]  ;;  %v16325_v18 = vld [vmem:[#allocation348_spill] sm:$0xff] }
 0x7a2   :  { %v4181_v13 = vsel %vm3901_vm12, %v16288_v36, -inf  ;;  %v4182_v15 = vsel %vm3901_vm12, %v16290_v56, -inf  ;;  %v4183_v38 = vsel %vm3901_vm12, %v16292_v60, -inf  ;;  %v4184_v48 = vsel %vm3901_vm12, %v16294_v31, -inf  ;;  %v16317_v26 = vld [vmem:[#allocation262_spill] sm:$0xff] }
 0x7a3   :  { %vm3904_vm14 = vcmp.eq.s32.totalorder %v3866_v6, 1  ;;  %v4414_v44 = vmax.f32 %v4413_v62, %v4181_v13  ;;  %v4457_v63 = vmax.f32 %v4456_v20, %v4182_v15  ;;  %v4500_v24 = vmax.f32 %v4499_v22, %v4183_v38  ;;  %v16311_v22 = vld [vmem:[#allocation181_spill] sm:$0xff] }
 0x7a4   :  { %v4543_v49 = vmax.f32 %v4542_v39, %v4184_v48  ;;  %v16296_v23 = vmax.f32 %v16295_v34, 0.0  ;;  %v16298_v45 = vmax.f32 %v16297_v51, 0.0  ;;  %v16300_v55 = vmax.f32 %v16299_v28, 0.0 }
 0x7a5   :  { %v16302_v30 = vmax.f32 %v16301_v52, 0.0  ;;  %v16304_v46 = vmax.f32 %v16303_v16, 0.0  ;;  %v16306_v35 = vmax.f32 %v16305_v7, 0.0  ;;  %v16308_v19 = vmax.f32 %v16307_v47, 0.0 }
 0x7a6   :  { %v4169_v61 = vsel %vm3900_vm13, %v16296_v23, -inf  ;;  %v4170_v17 = vsel %vm3900_vm13, %v16298_v45, -inf  ;;  %v4171_v27 = vsel %vm3900_vm13, %v16300_v55, -inf  ;;  %v16310_v62 = vmax.f32 %v16309_v50, 0.0 }
 0x7a7   :  { %v4172_v40 = vsel %vm3900_vm13, %v16302_v30, -inf  ;;  %v4243_v37 = vmax.f32 %v4242_v42, %v4169_v61  ;;  %v4286_v12 = vmax.f32 %v4285_v21, %v4170_v17  ;;  %v4329_v14 = vmax.f32 %v4328_v3, %v4171_v27  ;;  %v16319_v21 = vld [vmem:[#allocation330_spill] sm:$0xff]  ;;  %v16327_v61 = vld [vmem:[#allocation177_spill] sm:$0xff]  ;;  %v16329_v17 = vld [vmem:[#allocation179_spill] sm:$0xff] }
 0x7a8   :  { %v4372_v57 = vmax.f32 %v4371_v5, %v4172_v40  ;;  %v4173_v11 = vsel %vm3900_vm13, %v16304_v46, -inf  ;;  %v4174_v58 = vsel %vm3900_vm13, %v16306_v35, -inf  ;;  %v4175_v54 = vsel %vm3900_vm13, %v16308_v19, -inf  ;;  %v16331_v27 = vld [vmem:[#allocation180_spill] sm:$0xff]  ;;  %v16333_v30 = vld [vmem:[#allocation258_spill] sm:$0xff]  ;;  %v16335_v46 = vld [vmem:[#allocation327_spill] sm:$0xff] }
 0x7a9   :  { %v4176_v20 = vsel %vm3900_vm13, %v16310_v62, -inf  ;;  %v16312_v39 = vmax.f32 %v16311_v22, 0.0  ;;  %v16314_v41 = vmax.f32 %v16313_v9, 0.0  ;;  %v16316_v32 = vmax.f32 %v16315_v33, 0.0  ;;  %v16337_v35 = vld [vmem:[#allocation328_spill] sm:$0xff]  ;;  %v16339_v19 = vld [vmem:[#allocation329_spill] sm:$0xff] }
 0x7aa   :  { %v16318_v29 = vmax.f32 %v16317_v26, 0.0  ;;  %v4415_v25 = vmax.f32 %v4414_v44, %v4173_v11  ;;  %v4458_v2 = vmax.f32 %v4457_v63, %v4174_v58  ;;  %v4501_v43 = vmax.f32 %v4500_v24, %v4175_v54  ;;  %v16341_v62 = vld [vmem:[#allocation347_spill] sm:$0xff] }
 0x7ab   :  { %v4201_v0 = vsel %vm3904_vm14, %v16312_v39, -inf  ;;  %v4202_v10 = vsel %vm3904_vm14, %v16314_v41, -inf  ;;  %v4203_v1 = vsel %vm3904_vm14, %v16316_v32, -inf  ;;  %v4544_v42 = vmax.f32 %v4543_v49, %v4176_v20 }
 0x7ac   :  { %v4204_v8 = vsel %vm3904_vm14, %v16318_v29, -inf  ;;  %v16320_v3 = vmax.f32 %v16319_v21, 0.0  ;;  %v16322_v36 = vmax.f32 %v16321_v59, 0.0  ;;  %v16324_v56 = vmax.f32 %v16323_v53, 0.0 }
 0x7ad   :  { %v16326_v60 = vmax.f32 %v16325_v18, 0.0  ;;  %v4244_v31 = vmax.f32 %v4243_v37, %v4201_v0  ;;  %v4287_v48 = vmax.f32 %v4286_v12, %v4202_v10  ;;  %v4330_v44 = vmax.f32 %v4329_v14, %v4203_v1 }
 0x7ae   :  { %v4205_v5 = vsel %vm3904_vm14, %v16320_v3, -inf  ;;  %v4206_v13 = vsel %vm3904_vm14, %v16322_v36, -inf  ;;  %v4207_v15 = vsel %vm3904_vm14, %v16324_v56, -inf  ;;  %v4373_v63 = vmax.f32 %v4372_v57, %v4204_v8 }
 0x7af   :  { %v4208_v38 = vsel %vm3904_vm14, %v16326_v60, -inf  ;;  %v4416_v24 = vmax.f32 %v4415_v25, %v4205_v5  ;;  %v4459_v49 = vmax.f32 %v4458_v2, %v4206_v13  ;;  %v4502_v34 = vmax.f32 %v4501_v43, %v4207_v15 }
 0x7b0   :  { %v4545_v23 = vmax.f32 %v4544_v42, %v4208_v38  ;;  %vm3903_vm15 = vcmp.eq.s32.totalorder %v3863_v4, 1  ;;  %v16328_v51 = vmax.f32 %v16327_v61, 0.0  ;;  %v16330_v28 = vmax.f32 %v16329_v17, 0.0 }
 0x7b1   :  { %v16332_v52 = vmax.f32 %v16331_v27, 0.0  ;;  %v16334_v40 = vmax.f32 %v16333_v30, 0.0  ;;  %v16336_v11 = vmax.f32 %v16335_v46, 0.0  ;;  %v16338_v58 = vmax.f32 %v16337_v35, 0.0 }
 0x7b2   :  { %v4193_v45 = vsel %vm3903_vm15, %v16328_v51, -inf  ;;  %v4194_v55 = vsel %vm3903_vm15, %v16330_v28, -inf  ;;  %v16340_v54 = vmax.f32 %v16339_v19, 0.0  ;;  %v16342_v20 = vmax.f32 %v16341_v62, 0.0  ;;  %v4554_v62 = vld [vmem:[#allocation2 + $0x1] ss:$2 sm:$0xff] }
 0x7b3   :  { %v4195_v6 = vsel %vm3903_vm15, %v16332_v52, -inf  ;;  %v4196_v37 = vsel %vm3903_vm15, %v16334_v40, -inf  ;;  %v4245_v12 = vmax.f32 %v4244_v31, %v4193_v45  ;;  %v4288_v14 = vmax.f32 %v4287_v48, %v4194_v55 }
 0x7b4   :  { %v4331_v57 = vmax.f32 %v4330_v44, %v4195_v6  ;;  %v4374_v16 = vmax.f32 %v4373_v63, %v4196_v37  ;;  %v4197_v7 = vsel %vm3903_vm15, %v16336_v11, -inf  ;;  %v4198_v47 = vsel %vm3903_vm15, %v16338_v58, -inf }
 0x7b5   :  { %v4199_v50 = vsel %vm3903_vm15, %v16340_v54, -inf  ;;  %v4200_v22 = vsel %vm3903_vm15, %v16342_v20, -inf  ;;  %v4417_v39 = vmax.f32 %v4416_v24, %v4197_v7  ;;  %v4460_v0 = vmax.f32 %v4459_v49, %v4198_v47 }
 0x7b6   :  { %v4503_v9 = vmax.f32 %v4502_v34, %v4199_v50  ;;  %v4546_v41 = vmax.f32 %v4545_v23, %v4200_v22  ;;  %v4246_v10 = vrot.slane %v4245_v12, 4  ;;  %v4289_v33 = vrot.slane %v4288_v14, 4 }
 0x7b7   :  { %v4332_v32 = vrot.slane %v4331_v57, 4  ;;  %v4375_v1 = vrot.slane %v4374_v16, 4  ;;  %v4418_v26 = vrot.slane %v4417_v39, 4  ;;  %v4461_v29 = vrot.slane %v4460_v0, 4 }
 0x7b8   :  { %v4504_v8 = vrot.slane %v4503_v9, 4  ;;  %v4547_v25 = vrot.slane %v4546_v41, 4  ;;  %v4247_v2 = vmax.f32 %v4245_v12, %v4246_v10  ;;  %v4290_v43 = vmax.f32 %v4288_v14, %v4289_v33 }
 0x7b9   :  { %v4333_v42 = vmax.f32 %v4331_v57, %v4332_v32  ;;  %v4376_v21 = vmax.f32 %v4374_v16, %v4375_v1  ;;  %vm4570_vm0 = vcmask 1040384   ;;  %vm4572_vm1 = vcmask 1042434  }
 0x7ba   :  { %v4419_v3 = vmax.f32 %v4417_v39, %v4418_v26  ;;  %v4462_v5 = vmax.f32 %v4460_v0, %v4461_v29  ;;  %v4505_v59 = vmax.f32 %v4503_v9, %v4504_v8  ;;  %v4548_v36 = vmax.f32 %v4546_v41, %v4547_v25 }
 0x7bb   :  { %vm4574_vm2 = vcmask 1041408   ;;  %vm4576_vm3 = vcmask 1044484   ;;  %vm4578_vm4 = vcmask 1046534   ;;  %v4248_v13 = vrot.slane %v4247_v2, 2 }
 0x7bc   :  { %v4291_v53 = vrot.slane %v4290_v43, 2  ;;  %v4334_v56 = vrot.slane %v4333_v42, 2  ;;  %v4377_v15 = vrot.slane %v4376_v21, 2  ;;  %v4420_v18 = vrot.slane %v4419_v3, 2 }
 0x7bd   :  { %v4463_v60 = vrot.slane %v4462_v5, 2  ;;  %v4506_v38 = vrot.slane %v4505_v59, 2  ;;  %v4549_v4 = vrot.slane %v4548_v36, 2  ;;  %v4249_v31 = vmax.f32 %v4247_v2, %v4248_v13 }
 0x7be   :  { %v4292_v48 = vmax.f32 %v4290_v43, %v4291_v53  ;;  %v4335_v44 = vmax.f32 %v4333_v42, %v4334_v56  ;;  %v4378_v63 = vmax.f32 %v4376_v21, %v4377_v15  ;;  %v4421_v24 = vmax.f32 %v4419_v3, %v4420_v18 }
 0x7bf   :  { %v4464_v49 = vmax.f32 %v4462_v5, %v4463_v60  ;;  %v4507_v34 = vmax.f32 %v4505_v59, %v4506_v38  ;;  %v4550_v23 = vmax.f32 %v4548_v36, %v4549_v4  ;;  %v4250_v61 = vrot.slane %v4249_v31, 1 }
 0x7c0   :  { %v4293_v51 = vrot.slane %v4292_v48, 1  ;;  %v4336_v45 = vrot.slane %v4335_v44, 1  ;;  %v4379_v17 = vrot.slane %v4378_v63, 1  ;;  %v4422_v28 = vrot.slane %v4421_v24, 1 }
 0x7c1   :  { %v4465_v55 = vrot.slane %v4464_v49, 1  ;;  %v4508_v27 = vrot.slane %v4507_v34, 1  ;;  %v4551_v52 = vrot.slane %v4550_v23, 1  ;;  %vm4580_vm5 = vcmask 1045508  }
 0x7c2   :  { %v4294_v6 = vmax.f32 %v4292_v48, %v4293_v51  ;;  %v4337_v30 = vmax.f32 %v4335_v44, %v4336_v45  ;;  %v4380_v40 = vmax.f32 %v4378_v63, %v4379_v17  ;;  %v4423_v37 = vmax.f32 %v4421_v24, %v4422_v28 }
 0x7c3   :  { %v4466_v12 = vmax.f32 %v4464_v49, %v4465_v55  ;;  %v4509_v14 = vmax.f32 %v4507_v34, %v4508_v27  ;;  %v4552_v57 = vmax.f32 %v4550_v23, %v4551_v52  ;;  %v4251_v16 = vmax.f32 %v4249_v31, %v4250_v61 }
 0x7c4   :  { %v4563_v46 = vrot.slane %v4294_v6, 7  ;;  %v4564_v11 = vrot.slane %v4337_v30, 6  ;;  %v4565_v7 = vrot.slane %v4380_v40, 5  ;;  %v4566_v35 = vrot.slane %v4423_v37, 4 }
 0x7c5   :  { %v4567_v58 = vrot.slane %v4466_v12, 3  ;;  %v4568_v47 = vrot.slane %v4509_v14, 2  ;;  %v4569_v19 = vrot.slane %v4552_v57, 1  ;;  %vm4582_vm6 = vcmask 1043456  }
 0x7c6   :  { %v4571_v54 = vsel %vm4570_vm0, %v4251_v16, %v4563_v46  ;;  %v4573_v50 = vsel %vm4572_vm1, %v4564_v11, %v4565_v7 }
 0x7c7   :  { %v4575_v20 = vsel %vm4574_vm2, %v4571_v54, %v4573_v50  ;;  %v4577_v22 = vsel %vm4576_vm3, %v4566_v35, %v4567_v58  ;;  %v4579_v39 = vsel %vm4578_vm4, %v4568_v47, %v4569_v19 }
 0x7c8   :  { %v4581_v0 = vsel %vm4580_vm5, %v4577_v22, %v4579_v39 }
 0x7c9   :  { %v4583_v9 = vsel %vm4582_vm6, %v4575_v20, %v4581_v0 }
 0x7ca   :  { %v4585_v41 = vmax.f32 %v4554_v62, %v4583_v9 }
 0x7cc   :  { %4586 = vst [vmem:[#allocation2 + $0x1] ss:$2 sm:$0xff] %v4585_v41 }
 0x7cd PF:  { %v7606_v10 = vld [vmem:[#allocation5 + $0xe0] sm:$0xf]  ;;  %v8870_v33 = vld [vmem:[#allocation5 + $0xec] sm:$0xf0]  ;;  %s9392_s24 = smov [#allocation10]   ;;  %s7189_s26 = sshll.u32 %s14443_s15, 4  ;;  %s7190_s26 = int_to_ptr.hbm [resolvable:$true] %s7189_s26 }
 0x7ce   :  { %v7734_v32 = vld [vmem:[#allocation5 + $0x1e0] sm:$0xf]  ;;  %v7607_v1 = vor.u32 %v8870_v33, %v7606_v10  ;;  %v8902_v26 = vld [vmem:[#allocation5 + $0x1ec] sm:$0xf0]  ;;  %s7187_s25 = sshll.u32 %s9392_s24, 4  ;;  %vm7180_vm8 = vcmask 66560   ;;  %s7188_s25 = int_to_ptr.vmem [resolvable:$true] %s7187_s25 }
 0x7cf   :  { %v7862_v29 = vld [vmem:[#allocation5 + $0x2e0] sm:$0xf]  ;;  %v8934_v8 = vld [vmem:[#allocation5 + $0x2ec] sm:$0xf0]  ;;  %v7735_v25 = vor.u32 %v8902_v26, %v7734_v32 }
 0x7d0   :  { %v7863_v2 = vor.u32 %v8934_v8, %v7862_v29  ;;  %v7590_v43 = vld [vmem:[#allocation5 + $0xc0] sm:$0xf]  ;;  %v8866_v42 = vld [vmem:[#allocation5 + $0xcc] sm:$0xf0]  ;;  %6167 = vmatpush.bf16.msra.mxu1 %v7607_v1 }
 0x7d1   :  { %v7718_v21 = vld [vmem:[#allocation5 + $0x1c0] sm:$0xf]  ;;  %v7591_v3 = vor.u32 %v8866_v42, %v7590_v43  ;;  %v8898_v5 = vld [vmem:[#allocation5 + $0x1cc] sm:$0xf0]  ;;  %6180 = vmatpush.bf16.msra.mxu2 %v7735_v25 }
 0x7d2   :  { %v7846_v59 = vld [vmem:[#allocation5 + $0x2c0] sm:$0xf]  ;;  %v8930_v36 = vld [vmem:[#allocation5 + $0x2cc] sm:$0xf0]  ;;  %6193 = vmatpush.bf16.msra.mxu3 %v7863_v2  ;;  %v7719_v13 = vor.u32 %v8898_v5, %v7718_v21 }
 0x7d3   :  { %v7847_v53 = vor.u32 %v8930_v36, %v7846_v59  ;;  %v7574_v56 = vld [vmem:[#allocation5 + $0xa0] sm:$0xf]  ;;  %v8862_v15 = vld [vmem:[#allocation5 + $0xac] sm:$0xf0] }
 0x7d4   :  { %v7702_v18 = vld [vmem:[#allocation5 + $0x1a0] sm:$0xf]  ;;  %v8894_v60 = vld [vmem:[#allocation5 + $0x1ac] sm:$0xf0]  ;;  %6168 = vmatpush.bf16.msra.mxu1 %v7591_v3  ;;  %v7575_v31 = vor.u32 %v8862_v15, %v7574_v56 }
 0x7d5   :  { %v7830_v38 = vld [vmem:[#allocation5 + $0x2a0] sm:$0xf]  ;;  %v8926_v4 = vld [vmem:[#allocation5 + $0x2ac] sm:$0xf0]  ;;  %6181 = vmatpush.bf16.msra.mxu2 %v7719_v13  ;;  %v7703_v48 = vor.u32 %v8894_v60, %v7702_v18 }
 0x7d6   :  { %6194 = vmatpush.bf16.msra.mxu3 %v7847_v53  ;;  %v7831_v44 = vor.u32 %v8926_v4, %v7830_v38  ;;  %v7558_v63 = vld [vmem:[#allocation5 + $0x80] sm:$0xf]  ;;  %v8858_v24 = vld [vmem:[#allocation5 + $0x8c] sm:$0xf0] }
 0x7d7   :  { %v7686_v49 = vld [vmem:[#allocation5 + $0x180] sm:$0xf]  ;;  %v8890_v34 = vld [vmem:[#allocation5 + $0x18c] sm:$0xf0]  ;;  %v7559_v51 = vor.u32 %v8858_v24, %v7558_v63 }
 0x7d8   :  { %v7814_v23 = vld [vmem:[#allocation5 + $0x280] sm:$0xf]  ;;  %v8922_v61 = vld [vmem:[#allocation5 + $0x28c] sm:$0xf0]  ;;  %6169 = vmatpush.bf16.msra.mxu1 %v7575_v31  ;;  %v7687_v45 = vor.u32 %v8890_v34, %v7686_v49 }
 0x7d9   :  { %6182 = vmatpush.bf16.msra.mxu2 %v7703_v48  ;;  %v7815_v17 = vor.u32 %v8922_v61, %v7814_v23  ;;  %v7542_v28 = vld [vmem:[#allocation5 + $0x60] sm:$0xf]  ;;  %v8854_v55 = vld [vmem:[#allocation5 + $0x6c] sm:$0xf0] }
 0x7da   :  { %6195 = vmatpush.bf16.msra.mxu3 %v7831_v44  ;;  %v7670_v27 = vld [vmem:[#allocation5 + $0x160] sm:$0xf]  ;;  %v8886_v52 = vld [vmem:[#allocation5 + $0x16c] sm:$0xf0]  ;;  %v7543_v40 = vor.u32 %v8854_v55, %v7542_v28 }
 0x7db   :  { %v7798_v6 = vld [vmem:[#allocation5 + $0x260] sm:$0xf]  ;;  %v8918_v30 = vld [vmem:[#allocation5 + $0x26c] sm:$0xf0]  ;;  %v7671_v37 = vor.u32 %v8886_v52, %v7670_v27  ;;  %v4591_v27 = vld [vmem:[#allocation2 + $0x8] sm:$0xff] }
 0x7dc   :  { %6170 = vmatpush.bf16.msra.mxu1 %v7559_v51  ;;  %v7799_v12 = vor.u32 %v8918_v30, %v7798_v6  ;;  %v7526_v14 = vld [vmem:[#allocation5 + $0x40] sm:$0xf]  ;;  %v8850_v57 = vld [vmem:[#allocation5 + $0x4c] sm:$0xf0]  ;;  %4596 = vst [vmem:[#allocation1 + $0x20] ss:$4 sm:$0xff] %v4591_v27 }
 0x7dd   :  { %6183 = vmatpush.bf16.msra.mxu2 %v7687_v45  ;;  %v7654_v16 = vld [vmem:[#allocation5 + $0x140] sm:$0xf]  ;;  %v8882_v46 = vld [vmem:[#allocation5 + $0x14c] sm:$0xf0]  ;;  %v7527_v35 = vor.u32 %v8850_v57, %v7526_v14 }
 0x7de   :  { %6196 = vmatpush.bf16.msra.mxu3 %v7815_v17  ;;  %v7782_v11 = vld [vmem:[#allocation5 + $0x240] sm:$0xf]  ;;  %v8914_v7 = vld [vmem:[#allocation5 + $0x24c] sm:$0xf0]  ;;  %v7655_v58 = vor.u32 %v8882_v46, %v7654_v16 }
 0x7df   :  { %v7783_v47 = vor.u32 %v8914_v7, %v7782_v11  ;;  %v7510_v19 = vld [vmem:[#allocation5 + $0x20] sm:$0xf]  ;;  %v8846_v54 = vld [vmem:[#allocation5 + $0x2c] sm:$0xf0] }
 0x7e0   :  { %6171 = vmatpush.bf16.msra.mxu1 %v7543_v40  ;;  %v7638_v50 = vld [vmem:[#allocation5 + $0x120] sm:$0xf]  ;;  %v8878_v62 = vld [vmem:[#allocation5 + $0x12c] sm:$0xf0]  ;;  %v7511_v39 = vor.u32 %v8846_v54, %v7510_v19 }
 0x7e1   :  { %6184 = vmatpush.bf16.msra.mxu2 %v7671_v37  ;;  %v7766_v20 = vld [vmem:[#allocation5 + $0x220] sm:$0xf]  ;;  %v8910_v22 = vld [vmem:[#allocation5 + $0x22c] sm:$0xf0]  ;;  %v7639_v41 = vor.u32 %v8878_v62, %v7638_v50 }
 0x7e2   :  { %6197 = vmatpush.bf16.msra.mxu3 %v7799_v12  ;;  %v7494_v0 = vld [vmem:[#allocation5] sm:$0xf]  ;;  %v8842_v9 = vld [vmem:[#allocation5 + $0xc] sm:$0xf0]  ;;  %v7767_v10 = vor.u32 %v8910_v22, %v7766_v20 }
 0x7e3   :  { %v7622_v33 = vld [vmem:[#allocation5 + $0x100] sm:$0xf]  ;;  %v8874_v32 = vld [vmem:[#allocation5 + $0x10c] sm:$0xf0]  ;;  %v7495_v42 = vor.u32 %v8842_v9, %v7494_v0 }
 0x7e4   :  { %6172 = vmatpush.bf16.msra.mxu1 %v7527_v35  ;;  %v7750_v1 = vld [vmem:[#allocation5 + $0x200] sm:$0xf]  ;;  %v8906_v26 = vld [vmem:[#allocation5 + $0x20c] sm:$0xf0]  ;;  %v7623_v5 = vor.u32 %v8874_v32, %v7622_v33 }
 0x7e5   :  { %6185 = vmatpush.bf16.msra.mxu2 %v7655_v58  ;;  %v7990_v29 = vld [vmem:[#allocation5 + $0x3e0] sm:$0xf]  ;;  %v8966_v8 = vld [vmem:[#allocation5 + $0x3ec] sm:$0xf0]  ;;  %v7751_v59 = vor.u32 %v8906_v26, %v7750_v1 }
 0x7e6   :  { %6198 = vmatpush.bf16.msra.mxu3 %v7783_v47  ;;  %v8118_v25 = vld [vmem:[#allocation5 + $0x4e0] sm:$0xf]  ;;  %v8998_v2 = vld [vmem:[#allocation5 + $0x4ec] sm:$0xf0]  ;;  %v7991_v36 = vor.u32 %v8966_v8, %v7990_v29 }
 0x7e7   :  { %v4590_v43 = vld [vmem:[#allocation2] sm:$0xff]  ;;  %v8246_v21 = vld [vmem:[#allocation5 + $0x5e0] sm:$0xf]  ;;  %v8119_v13 = vor.u32 %v8998_v2, %v8118_v25 }
 0x7e8   :  { %6173 = vmatpush.bf16.msra.mxu1 %v7511_v39  ;;  %v9030_v3 = vld [vmem:[#allocation5 + $0x5ec] sm:$0xf0]  ;;  %4594 = vst [vmem:[#allocation1] ss:$4 sm:$0xff] %v4590_v43  ;;  %v7974_v53 = vld [vmem:[#allocation5 + $0x3c0] sm:$0xf] }
 0x7e9   :  { %6186 = vmatpush.bf16.msra.mxu2 %v7639_v41  ;;  %v8247_v56 = vor.u32 %v9030_v3, %v8246_v21  ;;  %v8962_v15 = vld [vmem:[#allocation5 + $0x3cc] sm:$0xf0]  ;;  %v8102_v18 = vld [vmem:[#allocation5 + $0x4c0] sm:$0xf] }
 0x7ea   :  { %6199 = vmatpush.bf16.msra.mxu3 %v7767_v10  ;;  %v8994_v60 = vld [vmem:[#allocation5 + $0x4cc] sm:$0xf0]  ;;  %v8230_v38 = vld [vmem:[#allocation5 + $0x5c0] sm:$0xf]  ;;  %v7975_v44 = vor.u32 %v8962_v15, %v7974_v53 }
 0x7eb   :  { %v9026_v4 = vld [vmem:[#allocation5 + $0x5cc] sm:$0xf0]  ;;  %v7958_v31 = vld [vmem:[#allocation5 + $0x3a0] sm:$0xf]  ;;  %v8103_v63 = vor.u32 %v8994_v60, %v8102_v18 }
 0x7ec   :  { %6174 = vmatpush.bf16.msra.mxu1 %v7495_v42  ;;  %v8958_v48 = vld [vmem:[#allocation5 + $0x3ac] sm:$0xf0]  ;;  %v8086_v24 = vld [vmem:[#allocation5 + $0x4a0] sm:$0xf]  ;;  %v8231_v23 = vor.u32 %v9026_v4, %v8230_v38 }
 0x7ed   :  { %6187 = vmatpush.bf16.msra.mxu2 %v7623_v5  ;;  %v8990_v49 = vld [vmem:[#allocation5 + $0x4ac] sm:$0xf0]  ;;  %v8214_v34 = vld [vmem:[#allocation5 + $0x5a0] sm:$0xf]  ;;  %v7959_v6 = vor.u32 %v8958_v48, %v7958_v31  ;;  %v8868_v48 = vld [vmem:[#allocation5 + $0xe4] sm:$0xf] }
 0x7ee   :  { %6200 = vmatpush.bf16.msra.mxu3 %v7751_v59  ;;  %v9022_v45 = vld [vmem:[#allocation5 + $0x5ac] sm:$0xf0]  ;;  %v8087_v30 = vor.u32 %v8990_v49, %v8086_v24  ;;  %v7942_v40 = vld [vmem:[#allocation5 + $0x380] sm:$0xf] }
 0x7ef   :  { %v4598_v61 = vld.sshfl [vmem:[#allocation1 + $0x8] sm:$0xff pattern:$0x73625140]  ;;  %v4599_v51 = vld.sshfl [vmem:[#allocation1 + $0x10] sm:$0xff pattern:$0x73625140]  ;;  %v8215_v12 = vor.u32 %v9022_v45, %v8214_v34 }
 0x7f0   :  { %6206 = vmatpush.bf16.msrb.mxu1 %v7991_v36  ;;  %v14202_v17 = vpack.c.bf16 %v4598_v61, %v4598_v61  ;;  %v14204_v28 = vpack.c.bf16 %v4599_v51, %v4599_v51  ;;  %v4597_v55 = vld.sshfl [vmem:[#allocation1] sm:$0xff pattern:$0x73625140]  ;;  %v8954_v37 = vld [vmem:[#allocation5 + $0x38c] sm:$0xf0] }
 0x7f1   :  { %6219 = vmatpush.bf16.msrb.mxu2 %v8119_v13  ;;  %v14206_v52 = vpack.c.bf16 %v4597_v55, %v4597_v55  ;;  %v8070_v14 = vld [vmem:[#allocation5 + $0x480] sm:$0xf]  ;;  %v8986_v57 = vld [vmem:[#allocation5 + $0x48c] sm:$0xf0]  ;;  %v7943_v11 = vor.u32 %v8954_v37, %v7942_v40  ;;  %v8864_v37 = vld [vmem:[#allocation5 + $0xc4] sm:$0xf] }
 0x7f2   :  { %6232 = vmatpush.bf16.msrb.mxu3 %v8247_v56  ;;  %6188 = vmatmul.bf16.vlgmr.msra.gmra.mxu2 %v14202_v17  ;;  %v8198_v16 = vld [vmem:[#allocation5 + $0x580] sm:$0xf]  ;;  %v9018_v46 = vld [vmem:[#allocation5 + $0x58c] sm:$0xf0]  ;;  %v8071_v7 = vor.u32 %v8986_v57, %v8070_v14 }
 0x7f3   :  { %6201 = vmatmul.bf16.vlgmr.msra.gmra.mxu3 %v14204_v28  ;;  %6175 = vmatmul.bf16.vlgmr.msra.gmra.mxu1 %v14206_v52  ;;  %v7926_v35 = vld [vmem:[#allocation5 + $0x360] sm:$0xf]  ;;  %v8199_v58 = vor.u32 %v9018_v46, %v8198_v16  ;;  %v8950_v47 = vld [vmem:[#allocation5 + $0x36c] sm:$0xf0] }
 0x7f4   :  { %6207 = vmatpush.bf16.msrb.mxu1 %v7975_v44  ;;  %v8054_v19 = vld [vmem:[#allocation5 + $0x460] sm:$0xf]  ;;  %v8982_v54 = vld [vmem:[#allocation5 + $0x46c] sm:$0xf0]  ;;  %v7927_v20 = vor.u32 %v8950_v47, %v7926_v35  ;;  %v7608_v44 = vld [vmem:[#allocation5 + $0xf0] sm:$0xf0] }
 0x7f5   :  { %6220 = vmatpush.bf16.msrb.mxu2 %v8103_v63  ;;  %v8182_v50 = vld [vmem:[#allocation5 + $0x560] sm:$0xf]  ;;  %v9014_v62 = vld [vmem:[#allocation5 + $0x56c] sm:$0xf0]  ;;  %v8055_v22 = vor.u32 %v8982_v54, %v8054_v19  ;;  %v7611_v55 = vor.u32 %v8868_v48, %v7608_v44  ;;  %v8860_v54 = vld [vmem:[#allocation5 + $0xa4] sm:$0xf] }
 0x7f6   :  { %6233 = vmatpush.bf16.msrb.mxu3 %v8231_v23  ;;  %v7910_v39 = vld [vmem:[#allocation5 + $0x340] sm:$0xf]  ;;  %v8946_v0 = vld [vmem:[#allocation5 + $0x34c] sm:$0xf0]  ;;  %v8183_v9 = vor.u32 %v9014_v62, %v8182_v50  ;;  %v7576_v50 = vld [vmem:[#allocation5 + $0xb0] sm:$0xf0] }
 0x7f7   :  { %v8038_v41 = vld [vmem:[#allocation5 + $0x440] sm:$0xf]  ;;  %v8978_v10 = vld [vmem:[#allocation5 + $0x44c] sm:$0xf0]  ;;  %v7911_v1 = vor.u32 %v8946_v0, %v7910_v39 }
 0x7f8   :  { %6208 = vmatpush.bf16.msrb.mxu1 %v7959_v6  ;;  %v8166_v33 = vld [vmem:[#allocation5 + $0x540] sm:$0xf]  ;;  %v9010_v32 = vld [vmem:[#allocation5 + $0x54c] sm:$0xf0]  ;;  %v8039_v26 = vor.u32 %v8978_v10, %v8038_v41  ;;  %v8856_v10 = vld [vmem:[#allocation5 + $0x84] sm:$0xf] }
 0x7f9   :  { %6221 = vmatpush.bf16.msrb.mxu2 %v8087_v30  ;;  %v7894_v29 = vld [vmem:[#allocation5 + $0x320] sm:$0xf]  ;;  %v8167_v8 = vor.u32 %v9010_v32, %v8166_v33  ;;  %v8942_v25 = vld [vmem:[#allocation5 + $0x32c] sm:$0xf0]  ;;  %v7560_v33 = vld [vmem:[#allocation5 + $0x90] sm:$0xf0] }
 0x7fa   :  { %6234 = vmatpush.bf16.msrb.mxu3 %v8215_v12  ;;  %v8022_v2 = vld [vmem:[#allocation5 + $0x420] sm:$0xf]  ;;  %v8974_v43 = vld [vmem:[#allocation5 + $0x42c] sm:$0xf0]  ;;  %v7895_v3 = vor.u32 %v8942_v25, %v7894_v29  ;;  %v7592_v12 = vld [vmem:[#allocation5 + $0xd0] sm:$0xf0] }
 0x7fb   :  { %v8150_v42 = vld [vmem:[#allocation5 + $0x520] sm:$0xf]  ;;  %v9006_v21 = vld [vmem:[#allocation5 + $0x52c] sm:$0xf0]  ;;  %v8023_v5 = vor.u32 %v8974_v43, %v8022_v2  ;;  %v8852_v43 = vld [vmem:[#allocation5 + $0x64] sm:$0xf] }
 0x7fc   :  { %6209 = vmatpush.bf16.msrb.mxu1 %v7943_v11  ;;  %v7878_v59 = vld [vmem:[#allocation5 + $0x300] sm:$0xf]  ;;  %v8938_v36 = vld [vmem:[#allocation5 + $0x30c] sm:$0xf0]  ;;  %v8151_v53 = vor.u32 %v9006_v21, %v8150_v42  ;;  %v7544_v42 = vld [vmem:[#allocation5 + $0x70] sm:$0xf0] }
 0x7fd   :  { %6222 = vmatpush.bf16.msrb.mxu2 %v8071_v7  ;;  %v8006_v13 = vld [vmem:[#allocation5 + $0x400] sm:$0xf]  ;;  %v8970_v56 = vld [vmem:[#allocation5 + $0x40c] sm:$0xf0]  ;;  %v7879_v63 = vor.u32 %v8938_v36, %v7878_v59  ;;  %v7595_v7 = vor.u32 %v8864_v37, %v7592_v12  ;;  %v8932_v37 = vld [vmem:[#allocation5 + $0x2e4] sm:$0xf] }
 0x7fe   :  { %6235 = vmatpush.bf16.msrb.mxu3 %v8199_v58  ;;  %v8134_v15 = vld [vmem:[#allocation5 + $0x500] sm:$0xf]  ;;  %v9002_v18 = vld [vmem:[#allocation5 + $0x50c] sm:$0xf0]  ;;  %v8007_v24 = vor.u32 %v8970_v56, %v8006_v13  ;;  %v8848_v56 = vld [vmem:[#allocation5 + $0x44] sm:$0xf] }
 0x7ff   :  { %v8374_v60 = vld [vmem:[#allocation5 + $0x6e0] sm:$0xf]  ;;  %v9062_v38 = vld [vmem:[#allocation5 + $0x6ec] sm:$0xf0]  ;;  %v8135_v23 = vor.u32 %v9002_v18, %v8134_v15  ;;  %v7528_v15 = vld [vmem:[#allocation5 + $0x50] sm:$0xf0] }
 0x800   :  { %6210 = vmatpush.bf16.msrb.mxu1 %v7927_v20  ;;  %v8502_v4 = vld [vmem:[#allocation5 + $0x7e0] sm:$0xf]  ;;  %v9094_v31 = vld [vmem:[#allocation5 + $0x7ec] sm:$0xf0]  ;;  %v8375_v61 = vor.u32 %v9062_v38, %v8374_v60  ;;  %v7531_v38 = vor.u32 %v8848_v56, %v7528_v15  ;;  %v7864_v12 = vld [vmem:[#allocation5 + $0x2f0] sm:$0xf0] }
 0x801   :  { %6223 = vmatpush.bf16.msrb.mxu2 %v8055_v22  ;;  %v4601_v49 = vld.sshfl [vmem:[#allocation1 + $0x20] sm:$0xff pattern:$0x73625140]  ;;  %v4600_v34 = vld.sshfl [vmem:[#allocation1 + $0x18] sm:$0xff pattern:$0x73625140]  ;;  %v8503_v45 = vor.u32 %v9094_v31, %v8502_v4  ;;  %v7579_v22 = vor.u32 %v8860_v54, %v7576_v50  ;;  %v7867_v50 = vor.u32 %v8932_v37, %v7864_v12 }
 0x802   :  { %6236 = vmatpush.bf16.msrb.mxu3 %v8183_v9  ;;  %v4602_v51 = vld.sshfl [vmem:[#allocation1 + $0x28] sm:$0xff pattern:$0x73625140]  ;;  %v8358_v27 = vld [vmem:[#allocation5 + $0x6c0] sm:$0xf]  ;;  %v14211_v14 = vpack.c.bf16 %v4601_v49, %v4601_v49  ;;  %v14213_v57 = vpack.c.bf16 %v4600_v34, %v4600_v34 }
 0x803   :  { %v9058_v6 = vld [vmem:[#allocation5 + $0x6cc] sm:$0xf0]  ;;  %v8486_v30 = vld [vmem:[#allocation5 + $0x7c0] sm:$0xf]  ;;  %v14215_v16 = vpack.c.bf16 %v4602_v51, %v4602_v51  ;;  %v8952_v56 = vld [vmem:[#allocation5 + $0x384] sm:$0xf] }
 0x804   :  { %6211 = vmatpush.bf16.msrb.mxu1 %v7911_v1  ;;  %v9090_v40 = vld [vmem:[#allocation5 + $0x7cc] sm:$0xf0]  ;;  %v8359_v46 = vor.u32 %v9058_v6, %v8358_v27  ;;  %v8342_v35 = vld [vmem:[#allocation5 + $0x6a0] sm:$0xf]  ;;  %v8840_v27 = vld [vmem:[#allocation5 + $0x4] sm:$0xf] }
 0x805   :  { %6224 = vmatpush.bf16.msrb.mxu2 %v8039_v26  ;;  %v8487_v11 = vor.u32 %v9090_v40, %v8486_v30  ;;  %v9054_v58 = vld [vmem:[#allocation5 + $0x6ac] sm:$0xf0]  ;;  %v8470_v47 = vld [vmem:[#allocation5 + $0x7a0] sm:$0xf]  ;;  %v7563_v26 = vor.u32 %v8856_v10, %v7560_v33  ;;  %v7496_v6 = vld [vmem:[#allocation5 + $0x10] sm:$0xf0] }
 0x806   :  { %6237 = vmatpush.bf16.msrb.mxu3 %v8167_v8  ;;  %v9086_v19 = vld [vmem:[#allocation5 + $0x7ac] sm:$0xf0]  ;;  %v8343_v62 = vor.u32 %v9054_v58, %v8342_v35  ;;  %v8326_v39 = vld [vmem:[#allocation5 + $0x680] sm:$0xf]  ;;  %v8900_v30 = vld [vmem:[#allocation5 + $0x1e4] sm:$0xf] }
 0x807   :  { %v8471_v20 = vor.u32 %v9086_v19, %v8470_v47  ;;  %v9050_v0 = vld [vmem:[#allocation5 + $0x68c] sm:$0xf0]  ;;  %v8454_v9 = vld [vmem:[#allocation5 + $0x780] sm:$0xf]  ;;  %v7736_v40 = vld [vmem:[#allocation5 + $0x1f0] sm:$0xf0]  ;;  %v7499_v47 = vor.u32 %v8840_v27, %v7496_v6 }
 0x808   :  { %6212 = vmatpush.bf16.msrb.mxu1 %v7895_v3  ;;  %v9082_v41 = vld [vmem:[#allocation5 + $0x78c] sm:$0xf0]  ;;  %v8327_v32 = vor.u32 %v9050_v0, %v8326_v39  ;;  %v8310_v29 = vld [vmem:[#allocation5 + $0x660] sm:$0xf]  ;;  %v7739_v54 = vor.u32 %v8900_v30, %v7736_v40  ;;  %v7720_v39 = vld [vmem:[#allocation5 + $0x1d0] sm:$0xf0] }
 0x809   :  { %6225 = vmatpush.bf16.msrb.mxu2 %v8023_v5  ;;  %v8455_v1 = vor.u32 %v9082_v41, %v8454_v9  ;;  %v9046_v8 = vld [vmem:[#allocation5 + $0x66c] sm:$0xf0]  ;;  %v8438_v25 = vld [vmem:[#allocation5 + $0x760] sm:$0xf]  ;;  %v7547_v5 = vor.u32 %v8852_v43, %v7544_v42  ;;  %v8928_v0 = vld [vmem:[#allocation5 + $0x2c4] sm:$0xf] }
 0x80a   :  { %6238 = vmatpush.bf16.msrb.mxu3 %v8151_v53  ;;  %v9078_v2 = vld [vmem:[#allocation5 + $0x76c] sm:$0xf0]  ;;  %v8311_v21 = vor.u32 %v9046_v8, %v8310_v29  ;;  %v8294_v59 = vld [vmem:[#allocation5 + $0x640] sm:$0xf]  ;;  %v7848_v9 = vld [vmem:[#allocation5 + $0x2d0] sm:$0xf0] }
 0x80b   :  { %v8439_v3 = vor.u32 %v9078_v2, %v8438_v25  ;;  %v9042_v36 = vld [vmem:[#allocation5 + $0x64c] sm:$0xf0]  ;;  %v8422_v13 = vld [vmem:[#allocation5 + $0x740] sm:$0xf]  ;;  %v8960_v10 = vld [vmem:[#allocation5 + $0x3c4] sm:$0xf] }
 0x80c   :  { %6213 = vmatpush.bf16.msrb.mxu1 %v7879_v63  ;;  %v9074_v53 = vld [vmem:[#allocation5 + $0x74c] sm:$0xf0]  ;;  %v8295_v18 = vor.u32 %v9042_v36, %v8294_v59  ;;  %v8278_v4 = vld [vmem:[#allocation5 + $0x620] sm:$0xf]  ;;  %v8844_v63 = vld [vmem:[#allocation5 + $0x24] sm:$0xf] }
 0x80d   :  { %6226 = vmatpush.bf16.msrb.mxu2 %v8007_v24  ;;  %v8423_v60 = vor.u32 %v9074_v53, %v8422_v13  ;;  %v9038_v31 = vld [vmem:[#allocation5 + $0x62c] sm:$0xf0]  ;;  %v8406_v48 = vld [vmem:[#allocation5 + $0x720] sm:$0xf]  ;;  %v7512_v24 = vld [vmem:[#allocation5 + $0x30] sm:$0xf0] }
 0x80e   :  { %6239 = vmatpush.bf16.msrb.mxu3 %v8135_v23  ;;  %v9070_v44 = vld [vmem:[#allocation5 + $0x72c] sm:$0xf0]  ;;  %v8279_v49 = vor.u32 %v9038_v31, %v8278_v4  ;;  %v8262_v34 = vld [vmem:[#allocation5 + $0x600] sm:$0xf]  ;;  %v7515_v51 = vor.u32 %v8844_v63, %v7512_v24  ;;  %v7976_v33 = vld [vmem:[#allocation5 + $0x3d0] sm:$0xf0] }
 0x80f   :  { %6214 = vmatmul.bf16.vlgmr.msrb.gmra.mxu1 %v14213_v57  ;;  %v9034_v23 = vld [vmem:[#allocation5 + $0x60c] sm:$0xf0]  ;;  %v4603_v35 = vld.sshfl [vmem:[#allocation1 + $0x30] sm:$0xff pattern:$0x73625140]  ;;  %v7979_v29 = vor.u32 %v8960_v10, %v7976_v33 }
 0x810   :  { %6245 = vmatpush.bf16.msra.mxu1 %v8375_v61  ;;  %6227 = vmatmul.bf16.vlgmr.msrb.gmra.mxu2 %v14211_v14  ;;  %v8407_v61 = vor.u32 %v9070_v44, %v8406_v48  ;;  %v4604_v19 = vld.sshfl [vmem:[#allocation1 + $0x38] sm:$0xff pattern:$0x73625140]  ;;  %v7704_v8 = vld [vmem:[#allocation5 + $0x1b0] sm:$0xf0] }
 0x811   :  { %6258 = vmatpush.bf16.msra.mxu2 %v8503_v45  ;;  %6240 = vmatmul.bf16.vlgmr.msrb.gmra.mxu3 %v14215_v16  ;;  %v8390_v45 = vld [vmem:[#allocation5 + $0x700] sm:$0xf]  ;;  %v14222_v41 = vpack.c.bf16 %v4604_v19, %v4604_v19  ;;  %v8924_v25 = vld [vmem:[#allocation5 + $0x2a4] sm:$0xf]  ;;  %v7832_v2 = vld [vmem:[#allocation5 + $0x2b0] sm:$0xf0] }
 0x812   :  { %6271 = vmatpush.bf16.msra.mxu3 %v7611_v55  ;;  %v9066_v55 = vld [vmem:[#allocation5 + $0x70c] sm:$0xf0]  ;;  %v8956_v43 = vld [vmem:[#allocation5 + $0x3a4] sm:$0xf]  ;;  %v7960_v42 = vld [vmem:[#allocation5 + $0x3b0] sm:$0xf0] }
 0x813   :  { %v8391_v58 = vor.u32 %v9066_v55, %v8390_v45  ;;  %v7963_v59 = vor.u32 %v8956_v43, %v7960_v42  ;;  %v7688_v36 = vld [vmem:[#allocation5 + $0x190] sm:$0xf0]  ;;  %v8920_v13 = vld [vmem:[#allocation5 + $0x284] sm:$0xf] }
 0x814   :  { %6246 = vmatpush.bf16.msra.mxu1 %v8359_v46  ;;  %v8964_v46 = vld [vmem:[#allocation5 + $0x3e4] sm:$0xf]  ;;  %v7816_v53 = vld [vmem:[#allocation5 + $0x290] sm:$0xf0] }
 0x815   :  { %6259 = vmatpush.bf16.msra.mxu2 %v8487_v11  ;;  %v8263_v11 = vor.u32 %v9034_v23, %v8262_v34  ;;  %v7944_v15 = vld [vmem:[#allocation5 + $0x390] sm:$0xf0]  ;;  %v8916_v48 = vld [vmem:[#allocation5 + $0x264] sm:$0xf] }
 0x816   :  { %6272 = vmatpush.bf16.msra.mxu3 %v7595_v7  ;;  %v7992_v7 = vld [vmem:[#allocation5 + $0x3f0] sm:$0xf0]  ;;  %v7947_v4 = vor.u32 %v8952_v56, %v7944_v15  ;;  %v8948_v63 = vld [vmem:[#allocation5 + $0x364] sm:$0xf] }
 0x817   :  { %v7672_v31 = vld [vmem:[#allocation5 + $0x170] sm:$0xf0]  ;;  %v8880_v23 = vld [vmem:[#allocation5 + $0x144] sm:$0xf] }
 0x818   :  { %6247 = vmatpush.bf16.msra.mxu1 %v8343_v62  ;;  %v8896_v62 = vld [vmem:[#allocation5 + $0x1c4] sm:$0xf]  ;;  %v7800_v44 = vld [vmem:[#allocation5 + $0x270] sm:$0xf0] }
 0x819   :  { %6260 = vmatpush.bf16.msra.mxu2 %v8471_v20  ;;  %v7995_v20 = vor.u32 %v8964_v46, %v7992_v7  ;;  %v7928_v24 = vld [vmem:[#allocation5 + $0x370] sm:$0xf0]  ;;  %v7803_v34 = vor.u32 %v8916_v48, %v7800_v44  ;;  %v8912_v45 = vld [vmem:[#allocation5 + $0x244] sm:$0xf] }
 0x81a   :  { %6273 = vmatpush.bf16.msra.mxu3 %v7579_v22  ;;  %v14220_v22 = vpack.c.bf16 %v4603_v35, %v4603_v35  ;;  %v7784_v55 = vld [vmem:[#allocation5 + $0x250] sm:$0xf0]  ;;  %v8944_v27 = vld [vmem:[#allocation5 + $0x344] sm:$0xf] }
 0x81b   :  { %v7912_v6 = vld [vmem:[#allocation5 + $0x350] sm:$0xf0]  ;;  %v7787_v40 = vor.u32 %v8912_v45, %v7784_v55  ;;  %v8876_v37 = vld [vmem:[#allocation5 + $0x124] sm:$0xf] }
 0x81c   :  { %6248 = vmatpush.bf16.msra.mxu1 %v8327_v32  ;;  %v7723_v32 = vor.u32 %v8896_v62, %v7720_v39  ;;  %v7915_v12 = vor.u32 %v8944_v27, %v7912_v6  ;;  %v7640_v46 = vld [vmem:[#allocation5 + $0x130] sm:$0xf0]  ;;  %v8940_v35 = vld [vmem:[#allocation5 + $0x324] sm:$0xf] }
 0x81d   :  { %6261 = vmatpush.bf16.msra.mxu2 %v8455_v1  ;;  %v7851_v1 = vor.u32 %v8928_v0, %v7848_v9  ;;  %v7768_v7 = vld [vmem:[#allocation5 + $0x230] sm:$0xf0]  ;;  %v8904_v62 = vld [vmem:[#allocation5 + $0x204] sm:$0xf] }
 0x81e   :  { %6274 = vmatpush.bf16.msra.mxu3 %v7563_v26  ;;  %v8892_v26 = vld [vmem:[#allocation5 + $0x1a4] sm:$0xf]  ;;  %v7752_v39 = vld [vmem:[#allocation5 + $0x210] sm:$0xf0] }
 0x81f   :  { %v8936_v0 = vld [vmem:[#allocation5 + $0x304] sm:$0xf]  ;;  %v7880_v9 = vld [vmem:[#allocation5 + $0x310] sm:$0xf0] }
 0x820   :  { %6249 = vmatpush.bf16.msra.mxu1 %v8311_v21  ;;  %v7707_v21 = vor.u32 %v8892_v26, %v7704_v8  ;;  %v8996_v10 = vld [vmem:[#allocation5 + $0x4e4] sm:$0xf]  ;;  %v8120_v33 = vld [vmem:[#allocation5 + $0x4f0] sm:$0xf0] }
 0x821   :  { %6262 = vmatpush.bf16.msra.mxu2 %v8439_v3  ;;  %v7835_v3 = vor.u32 %v8924_v25, %v7832_v2  ;;  %v9060_v26 = vld [vmem:[#allocation5 + $0x6e4] sm:$0xf]  ;;  %v7755_v25 = vor.u32 %v8904_v62, %v7752_v39  ;;  %v7883_v2 = vor.u32 %v8936_v0, %v7880_v9  ;;  %v8123_v43 = vor.u32 %v8996_v10, %v8120_v33  ;;  %v8344_v44 = vld [vmem:[#allocation5 + $0x6b0] sm:$0xf0] }
 0x822   :  { %6275 = vmatpush.bf16.msra.mxu3 %v7547_v5  ;;  %v8888_v5 = vld [vmem:[#allocation5 + $0x184] sm:$0xf]  ;;  %v8328_v55 = vld [vmem:[#allocation5 + $0x690] sm:$0xf0] }
 0x823   :  { %v9052_v48 = vld [vmem:[#allocation5 + $0x6a4] sm:$0xf]  ;;  %v8168_v62 = vld [vmem:[#allocation5 + $0x550] sm:$0xf0] }
 0x824   :  { %6250 = vmatpush.bf16.msra.mxu1 %v8295_v18  ;;  %v7691_v18 = vor.u32 %v8888_v5, %v7688_v36  ;;  %v8104_v5 = vld [vmem:[#allocation5 + $0x4d0] sm:$0xf0]  ;;  %v9048_v45 = vld [vmem:[#allocation5 + $0x684] sm:$0xf] }
 0x825   :  { %6263 = vmatpush.bf16.msra.mxu2 %v8423_v60  ;;  %v7819_v60 = vor.u32 %v8920_v13, %v7816_v53  ;;  %v8232_v36 = vld [vmem:[#allocation5 + $0x5d0] sm:$0xf0]  ;;  %v9056_v13 = vld [vmem:[#allocation5 + $0x6c4] sm:$0xf] }
 0x826   :  { %6276 = vmatpush.bf16.msra.mxu3 %v7531_v38  ;;  %v8884_v38 = vld [vmem:[#allocation5 + $0x164] sm:$0xf]  ;;  %v8360_v53 = vld [vmem:[#allocation5 + $0x6d0] sm:$0xf0] }
 0x827   :  { %v8296_v39 = vld [vmem:[#allocation5 + $0x650] sm:$0xf0]  ;;  %v8972_v33 = vld [vmem:[#allocation5 + $0x424] sm:$0xf] }
 0x828   :  { %6251 = vmatpush.bf16.msra.mxu1 %v8279_v49  ;;  %v7675_v49 = vor.u32 %v8884_v38, %v7672_v31  ;;  %v8088_v38 = vld [vmem:[#allocation5 + $0x4b0] sm:$0xf0] }
 0x829   :  { %6264 = vmatpush.bf16.msra.mxu2 %v8407_v61  ;;  %v7931_v61 = vor.u32 %v8948_v63, %v7928_v24  ;;  %v8216_v31 = vld [vmem:[#allocation5 + $0x5b0] sm:$0xf0] }
 0x82a   :  { %6277 = vmatpush.bf16.msra.mxu3 %v7515_v51  ;;  %v7656_v51 = vld [vmem:[#allocation5 + $0x150] sm:$0xf0] }
 0x82b   :  { %v7659_v30 = vor.u32 %v8880_v23, %v7656_v51  ;;  %v8072_v23 = vld [vmem:[#allocation5 + $0x490] sm:$0xf0] }
 0x82c   :  { %6252 = vmatpush.bf16.msra.mxu1 %v8263_v11  ;;  %v8908_v11 = vld [vmem:[#allocation5 + $0x224] sm:$0xf]  ;;  %v8200_v51 = vld [vmem:[#allocation5 + $0x590] sm:$0xf0] }
 0x82d   :  { %6265 = vmatpush.bf16.msra.mxu2 %v8391_v58  ;;  %v7896_v58 = vld [vmem:[#allocation5 + $0x330] sm:$0xf0]  ;;  %v7771_v19 = vor.u32 %v8908_v11, %v7768_v7  ;;  %v9044_v11 = vld [vmem:[#allocation5 + $0x664] sm:$0xf] }
 0x82e   :  { %6278 = vmatpush.bf16.msra.mxu3 %v7499_v47  ;;  %v7643_v47 = vor.u32 %v8876_v37, %v7640_v46  ;;  %v8056_v37 = vld [vmem:[#allocation5 + $0x470] sm:$0xf0] }
 0x82f   :  { %6253 = vmatmul.bf16.vlgmr.msra.gmra.mxu1 %v14220_v22  ;;  %v8184_v46 = vld [vmem:[#allocation5 + $0x570] sm:$0xf0] }
 0x830   :  { %6284 = vmatpush.bf16.msrb.mxu1 %v7739_v54  ;;  %6266 = vmatmul.bf16.vlgmr.msra.gmra.mxu2 %v14222_v41  ;;  %v8872_v54 = vld [vmem:[#allocation5 + $0x104] sm:$0xf]  ;;  %v8312_v7 = vld [vmem:[#allocation5 + $0x670] sm:$0xf0] }
 0x831   :  { %6297 = vmatpush.bf16.msrb.mxu2 %v7867_v50  ;;  %6279 = vmatmul.bf16.vlgmr.msra.gmra.mxu3 %v14206_v52  ;;  %v7624_v50 = vld [vmem:[#allocation5 + $0x110] sm:$0xf0] }
 0x832   :  { %6310 = vmatpush.bf16.msrb.mxu3 %v7995_v20  ;;  %v7899_v20 = vor.u32 %v8940_v35, %v7896_v58  ;;  %v7627_v8 = vor.u32 %v8872_v54, %v7624_v50  ;;  %v8040_v54 = vld [vmem:[#allocation5 + $0x450] sm:$0xf0]  ;;  %v9008_v50 = vld [vmem:[#allocation5 + $0x544] sm:$0xf] }
 0x833   :  { %v8171_v9 = vor.u32 %v9008_v50, %v8168_v62  ;;  %v7694_v50 = vld [vmem:[#allocation5 + $0x188] sm:$0xf]  ;;  %v8891_v62 = vld [vmem:[#allocation5 + $0x194] sm:$0xf0] }
 0x834   :  { %6285 = vmatpush.bf16.msrb.mxu1 %v7723_v32  ;;  %v9028_v32 = vld [vmem:[#allocation5 + $0x5e4] sm:$0xf] }
 0x835   :  { %6298 = vmatpush.bf16.msrb.mxu2 %v7851_v1  ;;  %v8248_v1 = vld [vmem:[#allocation5 + $0x5f0] sm:$0xf0] }
 0x836   :  { %6311 = vmatpush.bf16.msrb.mxu3 %v7979_v29  ;;  %v8376_v29 = vld [vmem:[#allocation5 + $0x6f0] sm:$0xf0]  ;;  %v8251_v42 = vor.u32 %v9028_v32, %v8248_v1  ;;  %v9004_v1 = vld [vmem:[#allocation5 + $0x524] sm:$0xf] }
 0x837   :  { %v8024_v32 = vld [vmem:[#allocation5 + $0x430] sm:$0xf0] }
 0x838   :  { %6286 = vmatpush.bf16.msrb.mxu1 %v7707_v21  ;;  %v8379_v21 = vor.u32 %v9060_v26, %v8376_v29  ;;  %v8152_v26 = vld [vmem:[#allocation5 + $0x530] sm:$0xf0]  ;;  %v9036_v29 = vld [vmem:[#allocation5 + $0x624] sm:$0xf] }
 0x839   :  { %6299 = vmatpush.bf16.msrb.mxu2 %v7835_v3  ;;  %v8992_v3 = vld [vmem:[#allocation5 + $0x4c4] sm:$0xf] }
 0x83a   :  { %6312 = vmatpush.bf16.msrb.mxu3 %v7963_v59  ;;  %v9024_v59 = vld [vmem:[#allocation5 + $0x5c4] sm:$0xf]  ;;  %v8107_v56 = vor.u32 %v8992_v3, %v8104_v5  ;;  %v8136_v5 = vld [vmem:[#allocation5 + $0x510] sm:$0xf0] }
 0x83b   :  { %v8235_v15 = vor.u32 %v9024_v59, %v8232_v36  ;;  %v9000_v3 = vld [vmem:[#allocation5 + $0x504] sm:$0xf]  ;;  %v8264_v36 = vld [vmem:[#allocation5 + $0x610] sm:$0xf0] }
 0x83c   :  { %6287 = vmatpush.bf16.msrb.mxu1 %v7691_v18  ;;  %v8363_v18 = vor.u32 %v9056_v13, %v8360_v53  ;;  %v9032_v59 = vld [vmem:[#allocation5 + $0x604] sm:$0xf]  ;;  %v8504_v53 = vld [vmem:[#allocation5 + $0x7f0] sm:$0xf0] }
 0x83d   :  { %6300 = vmatpush.bf16.msrb.mxu2 %v7819_v60  ;;  %v8988_v60 = vld [vmem:[#allocation5 + $0x4a4] sm:$0xf] }
 0x83e   :  { %6313 = vmatpush.bf16.msrb.mxu3 %v7947_v4  ;;  %v9020_v4 = vld [vmem:[#allocation5 + $0x5a4] sm:$0xf]  ;;  %v8091_v63 = vor.u32 %v8988_v60, %v8088_v38  ;;  %v7742_v60 = vld [vmem:[#allocation5 + $0x1e8] sm:$0xf]  ;;  %v8903_v38 = vld [vmem:[#allocation5 + $0x1f4] sm:$0xf0] }
 0x83f   :  { %v8219_v24 = vor.u32 %v9020_v4, %v8216_v31  ;;  %v9092_v13 = vld [vmem:[#allocation5 + $0x7e4] sm:$0xf]  ;;  %v8139_v4 = vor.u32 %v9000_v3, %v8136_v5  ;;  %v8267_v31 = vor.u32 %v9032_v59, %v8264_v36  ;;  %v7662_v5 = vld [vmem:[#allocation5 + $0x148] sm:$0xf]  ;;  %v8883_v59 = vld [vmem:[#allocation5 + $0x154] sm:$0xf0] }
 0x840   :  { %6288 = vmatpush.bf16.msrb.mxu1 %v7675_v49  ;;  %v8347_v49 = vor.u32 %v9052_v48, %v8344_v44  ;;  %v8507_v48 = vor.u32 %v9092_v13, %v8504_v53  ;;  %v9068_v53 = vld [vmem:[#allocation5 + $0x724] sm:$0xf] }
 0x841   :  { %6301 = vmatpush.bf16.msrb.mxu2 %v7803_v34  ;;  %v8984_v34 = vld [vmem:[#allocation5 + $0x484] sm:$0xf] }
 0x842   :  { %6314 = vmatpush.bf16.msrb.mxu3 %v7931_v61  ;;  %v9016_v61 = vld [vmem:[#allocation5 + $0x584] sm:$0xf]  ;;  %v8075_v27 = vor.u32 %v8984_v34, %v8072_v23  ;;  %v7598_v34 = vld [vmem:[#allocation5 + $0xc8] sm:$0xf]  ;;  %v8867_v23 = vld [vmem:[#allocation5 + $0xd4] sm:$0xf0] }
 0x843   :  { %v8203_v6 = vor.u32 %v9016_v61, %v8200_v51  ;;  %v7726_v61 = vld [vmem:[#allocation5 + $0x1c8] sm:$0xf]  ;;  %v8899_v51 = vld [vmem:[#allocation5 + $0x1d4] sm:$0xf0] }
 0x844   :  { %6289 = vmatpush.bf16.msrb.mxu1 %v7659_v30  ;;  %v8331_v30 = vor.u32 %v9048_v45, %v8328_v55  ;;  %v7599_v55 = vor.u32 %v8867_v23, %v7598_v34  ;;  %v7502_v34 = vld [vmem:[#allocation5 + $0x8] sm:$0xf]  ;;  %v8843_v23 = vld [vmem:[#allocation5 + $0x14] sm:$0xf0] }
 0x845   :  { %6302 = vmatpush.bf16.msrb.mxu2 %v7787_v40  ;;  %v8980_v40 = vld [vmem:[#allocation5 + $0x464] sm:$0xf] }
 0x846   :  { %6315 = vmatpush.bf16.msrb.mxu3 %v7915_v12  ;;  %v9012_v12 = vld [vmem:[#allocation5 + $0x564] sm:$0xf]  ;;  %v8059_v35 = vor.u32 %v8980_v40, %v8056_v37  ;;  %v7582_v40 = vld [vmem:[#allocation5 + $0xa8] sm:$0xf]  ;;  %v8863_v37 = vld [vmem:[#allocation5 + $0xb4] sm:$0xf0] }
 0x847   :  { %v8187_v58 = vor.u32 %v9012_v12, %v8184_v46  ;;  %v7710_v12 = vld [vmem:[#allocation5 + $0x1a8] sm:$0xf]  ;;  %v8895_v46 = vld [vmem:[#allocation5 + $0x1b4] sm:$0xf0] }
 0x848   :  { %6290 = vmatpush.bf16.msrb.mxu1 %v7643_v47  ;;  %v8315_v47 = vor.u32 %v9044_v11, %v8312_v7  ;;  %v7583_v7 = vor.u32 %v8863_v37, %v7582_v40  ;;  %v7998_v40 = vld [vmem:[#allocation5 + $0x3e8] sm:$0xf]  ;;  %v8967_v37 = vld [vmem:[#allocation5 + $0x3f4] sm:$0xf0] }
 0x849   :  { %6303 = vmatpush.bf16.msrb.mxu2 %v7771_v19  ;;  %v8976_v19 = vld [vmem:[#allocation5 + $0x444] sm:$0xf] }
 0x84a   :  { %6316 = vmatpush.bf16.msrb.mxu3 %v7899_v20  ;;  %v9040_v20 = vld [vmem:[#allocation5 + $0x644] sm:$0xf]  ;;  %v8043_v0 = vor.u32 %v8976_v19, %v8040_v54  ;;  %v7566_v19 = vld [vmem:[#allocation5 + $0x88] sm:$0xf]  ;;  %v8859_v54 = vld [vmem:[#allocation5 + $0x94] sm:$0xf0] }
 0x84b   :  { %v8299_v10 = vor.u32 %v9040_v20, %v8296_v39  ;;  %v7567_v39 = vor.u32 %v8859_v54, %v7566_v19  ;;  %v7999_v19 = vor.u32 %v8967_v37, %v7998_v40  ;;  %v8915_v40 = vld [vmem:[#allocation5 + $0x254] sm:$0xf0]  ;;  %v7918_v37 = vld [vmem:[#allocation5 + $0x348] sm:$0xf] }
 0x84c   :  { %6291 = vmatpush.bf16.msrb.mxu1 %v7627_v8  ;;  %v8280_v8 = vld [vmem:[#allocation5 + $0x630] sm:$0xf0] }
 0x84d   :  { %6304 = vmatpush.bf16.msrb.mxu2 %v7755_v25  ;;  %v8027_v25 = vor.u32 %v8972_v33, %v8024_v32  ;;  %v7550_v33 = vld [vmem:[#allocation5 + $0x68] sm:$0xf]  ;;  %v8855_v32 = vld [vmem:[#allocation5 + $0x74] sm:$0xf0] }
 0x84e   :  { %6317 = vmatpush.bf16.msrb.mxu3 %v7883_v2  ;;  %v8968_v2 = vld [vmem:[#allocation5 + $0x404] sm:$0xf] }
 0x84f   :  { %6292 = vmatmul.bf16.vlgmr.msrb.gmra.mxu1 %v14202_v17 }
 0x850   :  { %6323 = vmatpush.bf16.msra.mxu1 %v8123_v43  ;;  %6305 = vmatmul.bf16.vlgmr.msrb.gmra.mxu2 %v14204_v28  ;;  %v8155_v43 = vor.u32 %v9004_v1, %v8152_v26  ;;  %v7678_v1 = vld [vmem:[#allocation5 + $0x168] sm:$0xf]  ;;  %v8887_v26 = vld [vmem:[#allocation5 + $0x174] sm:$0xf0] }
 0x851   :  { %6336 = vmatpush.bf16.msra.mxu2 %v8251_v42  ;;  %6318 = vmatmul.bf16.vlgmr.msrb.gmra.mxu3 %v14213_v57  ;;  %v8283_v42 = vor.u32 %v9036_v29, %v8280_v8  ;;  %v7551_v8 = vor.u32 %v8855_v32, %v7550_v33  ;;  %v8995_v33 = vld [vmem:[#allocation5 + $0x4d4] sm:$0xf0] }
 0x852   :  { %6349 = vmatpush.bf16.msra.mxu3 %v8379_v21  ;;  %v8008_v21 = vld [vmem:[#allocation5 + $0x410] sm:$0xf0] }
 0x854   :  { %6324 = vmatpush.bf16.msra.mxu1 %v8107_v56  ;;  %v7614_v56 = vld [vmem:[#allocation5 + $0xe8] sm:$0xf] }
 0x855   :  { %6337 = vmatpush.bf16.msra.mxu2 %v8235_v15  ;;  %v8871_v15 = vld [vmem:[#allocation5 + $0xf4] sm:$0xf0] }
 0x856   :  { %6350 = vmatpush.bf16.msra.mxu3 %v8363_v18  ;;  %v8011_v18 = vor.u32 %v8968_v2, %v8008_v21  ;;  %v7615_v44 = vor.u32 %v8871_v15, %v7614_v56  ;;  %v7679_v2 = vor.u32 %v8887_v26, %v7678_v1  ;;  %v8851_v21 = vld [vmem:[#allocation5 + $0x54] sm:$0xf0]  ;;  %v7663_v56 = vor.u32 %v8883_v59, %v7662_v5  ;;  %v8408_v15 = vld [vmem:[#allocation5 + $0x730] sm:$0xf0] }
 0x858   :  { %6325 = vmatpush.bf16.msra.mxu1 %v8091_v63  ;;  %v9088_v63 = vld [vmem:[#allocation5 + $0x7c4] sm:$0xf] }
 0x859   :  { %6338 = vmatpush.bf16.msra.mxu2 %v8219_v24  ;;  %v7743_v24 = vor.u32 %v8903_v38, %v7742_v60  ;;  %v8847_v60 = vld [vmem:[#allocation5 + $0x34] sm:$0xf0]  ;;  %v7646_v38 = vld [vmem:[#allocation5 + $0x128] sm:$0xf] }
 0x85a   :  { %6351 = vmatpush.bf16.msra.mxu3 %v8347_v49  ;;  %v8488_v49 = vld [vmem:[#allocation5 + $0x7d0] sm:$0xf0] }
 0x85b   :  { %v8491_v45 = vor.u32 %v9088_v63, %v8488_v49 }
 0x85c   :  { %6326 = vmatpush.bf16.msra.mxu1 %v8075_v27  ;;  %v9084_v27 = vld [vmem:[#allocation5 + $0x7a4] sm:$0xf] }
 0x85d   :  { %6339 = vmatpush.bf16.msra.mxu2 %v8203_v6  ;;  %v7727_v6 = vor.u32 %v8899_v51, %v7726_v61  ;;  %v14238_v61 = vld [vmem:[%s14438_s10] sm:$0xf] }
 0x85e   :  { %6352 = vmatpush.bf16.msra.mxu3 %v8331_v30  ;;  %v8472_v30 = vld [vmem:[#allocation5 + $0x7b0] sm:$0xf0] }
 0x85f   :  { %v8475_v11 = vor.u32 %v9084_v27, %v8472_v30  ;;  %v7870_v27 = vld [vmem:[#allocation5 + $0x2e8] sm:$0xf]  ;;  %v8935_v30 = vld [vmem:[#allocation5 + $0x2f4] sm:$0xf0] }
 0x860   :  { %6327 = vmatpush.bf16.msra.mxu1 %v8059_v35  ;;  %v9080_v35 = vld [vmem:[#allocation5 + $0x784] sm:$0xf] }
 0x861   :  { %6340 = vmatpush.bf16.msra.mxu2 %v8187_v58  ;;  %v7711_v58 = vor.u32 %v8895_v46, %v7710_v12  ;;  %v8126_v12 = vld [vmem:[#allocation5 + $0x4e8] sm:$0xf]  ;;  %v8999_v46 = vld [vmem:[#allocation5 + $0x4f4] sm:$0xf0] }
 0x862   :  { %6353 = vmatpush.bf16.msra.mxu3 %v8315_v47  ;;  %v8456_v47 = vld [vmem:[#allocation5 + $0x790] sm:$0xf0]  ;;  %v8127_v54 = vor.u32 %v8999_v46, %v8126_v12  ;;  %v8947_v12 = vld [vmem:[#allocation5 + $0x354] sm:$0xf0]  ;;  %v8046_v46 = vld [vmem:[#allocation5 + $0x448] sm:$0xf] }
 0x863   :  { %v8459_v20 = vor.u32 %v9080_v35, %v8456_v47  ;;  %v7503_v35 = vor.u32 %v8843_v23, %v7502_v34  ;;  %v7871_v47 = vor.u32 %v8935_v30, %v7870_v27  ;;  %v8951_v23 = vld [vmem:[#allocation5 + $0x374] sm:$0xf0]  ;;  %v7790_v30 = vld [vmem:[#allocation5 + $0x248] sm:$0xf] }
 0x864   :  { %6328 = vmatpush.bf16.msra.mxu1 %v8043_v0  ;;  %v9076_v0 = vld [vmem:[#allocation5 + $0x764] sm:$0xf] }
 0x865   :  { %6341 = vmatpush.bf16.msra.mxu2 %v8171_v9  ;;  %v7695_v9 = vor.u32 %v8891_v62, %v7694_v50  ;;  %v7854_v50 = vld [vmem:[#allocation5 + $0x2c8] sm:$0xf]  ;;  %v8931_v62 = vld [vmem:[#allocation5 + $0x2d4] sm:$0xf0] }
 0x866   :  { %6354 = vmatpush.bf16.msra.mxu3 %v8299_v10  ;;  %v8440_v10 = vld [vmem:[#allocation5 + $0x770] sm:$0xf0]  ;;  %v7855_v1 = vor.u32 %v8931_v62, %v7854_v50  ;;  %v7774_v50 = vld [vmem:[#allocation5 + $0x228] sm:$0xf]  ;;  %v8911_v62 = vld [vmem:[#allocation5 + $0x234] sm:$0xf0] }
 0x867   :  { %v8443_v29 = vor.u32 %v9076_v0, %v8440_v10  ;;  %v8110_v10 = vld [vmem:[#allocation5 + $0x4c8] sm:$0xf] }
 0x868   :  { %6329 = vmatpush.bf16.msra.mxu1 %v8027_v25  ;;  %v9072_v25 = vld [vmem:[#allocation5 + $0x744] sm:$0xf] }
 0x869   :  { %6342 = vmatpush.bf16.msra.mxu2 %v8155_v43  ;;  %v8424_v43 = vld [vmem:[#allocation5 + $0x750] sm:$0xf0] }
 0x86a   :  { %6355 = vmatpush.bf16.msra.mxu3 %v8283_v42  ;;  %v7534_v42 = vld [vmem:[#allocation5 + $0x48] sm:$0xf]  ;;  %v8427_v36 = vor.u32 %v9072_v25, %v8424_v43  ;;  %v8927_v25 = vld [vmem:[#allocation5 + $0x2b4] sm:$0xf0] }
 0x86b   :  { %v7535_v13 = vor.u32 %v8851_v21, %v7534_v42  ;;  %v8959_v42 = vld [vmem:[#allocation5 + $0x3b4] sm:$0xf0]  ;;  %v8094_v21 = vld [vmem:[#allocation5 + $0x4a8] sm:$0xf] }
 0x86c   :  { %6330 = vmatpush.bf16.msra.mxu1 %v8011_v18  ;;  %v7518_v18 = vld [vmem:[#allocation5 + $0x28] sm:$0xf] }
 0x86d   :  { %6343 = vmatpush.bf16.msra.mxu2 %v8139_v4  ;;  %v8879_v4 = vld [vmem:[#allocation5 + $0x134] sm:$0xf0]  ;;  %v7519_v49 = vor.u32 %v8847_v60, %v7518_v18  ;;  %v8078_v60 = vld [vmem:[#allocation5 + $0x488] sm:$0xf] }
 0x86e   :  { %6356 = vmatpush.bf16.msra.mxu3 %v8267_v31  ;;  %v7647_v51 = vor.u32 %v8879_v4, %v7646_v38  ;;  %v8955_v18 = vld [vmem:[#allocation5 + $0x394] sm:$0xf0] }
 0x86f   :  { %6331 = vmatmul.bf16.vlgmr.msra.gmra.mxu1 %v14211_v14  ;;  %v8987_v38 = vld [vmem:[#allocation5 + $0x494] sm:$0xf0] }
 0x870   :  { %6362 = vmatpush.bf16.msrb.mxu1 %v8507_v48  ;;  %6344 = vmatmul.bf16.vlgmr.msra.gmra.mxu2 %v14215_v16  ;;  %v6176_v3 = vpop.f32.mrf.mxu1  ;;  %v9064_v48 = vld [vmem:[#allocation5 + $0x704] sm:$0xf] }
 0x871   :  { %6375 = vmatpush.bf16.msrb.mxu2 %v7615_v44  ;;  %6357 = vmatmul.bf16.vlgmr.msra.gmra.mxu3 %v14220_v22  ;;  %v8392_v44 = vld [vmem:[#allocation5 + $0x710] sm:$0xf0] }
 0x872   :  { %6388 = vmatpush.bf16.msrb.mxu3 %v7743_v24  ;;  %v8411_v24 = vor.u32 %v9068_v53, %v8408_v15  ;;  %v8923_v53 = vld [vmem:[#allocation5 + $0x294] sm:$0xf0] }
 0x874   :  { %6363 = vmatpush.bf16.msrb.mxu1 %v8491_v45  ;;  %v7630_v45 = vld [vmem:[#allocation5 + $0x108] sm:$0xf] }
 0x875   :  { %6376 = vmatpush.bf16.msrb.mxu2 %v7599_v55  ;;  %v6189_v31 = vpop.f32.mrf.mxu2  ;;  %v8875_v55 = vld [vmem:[#allocation5 + $0x114] sm:$0xf0] }
 0x876   :  { %6389 = vmatpush.bf16.msrb.mxu3 %v7727_v6  ;;  %v14233_v63 = vpop.f32.mrf.mxu3 }
 0x878   :  { %6364 = vmatpush.bf16.msrb.mxu1 %v8475_v11  ;;  %v6178_v6 = vpop.f32.mrf.mxu1  ;;  %v4879_v11 = vperm.slane %v14238_v61, 0 }
 0x879   :  { %6377 = vmatpush.bf16.msrb.mxu2 %v7583_v7  ;;  %v8395_v7 = vor.u32 %v9064_v48, %v8392_v44  ;;  %v8079_v48 = vor.u32 %v8987_v38, %v8078_v60  ;;  %v7806_v44 = vld [vmem:[#allocation5 + $0x268] sm:$0xf] }
 0x87a   :  { %6390 = vmatpush.bf16.msrb.mxu3 %v7711_v58  ;;  %v7631_v58 = vor.u32 %v8875_v55, %v7630_v45  ;;  %v6177_v0 = vadd.f32 %v6176_v3, %v4879_v11  ;;  %v8991_v3 = vld [vmem:[#allocation5 + $0x4b4] sm:$0xf0] }
 0x87b   :  { %v8983_v45 = vld [vmem:[#allocation5 + $0x474] sm:$0xf0] }
 0x87c   :  { %6365 = vmatpush.bf16.msrb.mxu1 %v8459_v20  ;;  %v7982_v20 = vld [vmem:[#allocation5 + $0x3c8] sm:$0xf]  ;;  %v6190_v43 = vadd.f32 %v6189_v31, %v6177_v0  ;;  %v8979_v11 = vld [vmem:[#allocation5 + $0x454] sm:$0xf0] }
 0x87d   :  { %6378 = vmatpush.bf16.msrb.mxu2 %v7567_v39  ;;  %v6191_v39 = vpop.f32.mrf.mxu2 }
 0x87e   :  { %6391 = vmatpush.bf16.msrb.mxu3 %v7695_v9  ;;  %v8963_v9 = vld [vmem:[#allocation5 + $0x3d4] sm:$0xf0]  ;;  %v6204_v32 = vpop.f32.mrf.mxu3  ;;  %v6203_v15 = vadd.f32 %v14233_v63, %v6190_v43  ;;  %v8014_v43 = vld [vmem:[#allocation5 + $0x408] sm:$0xf] }
 0x87f   :  { %v7983_v26 = vor.u32 %v8963_v9, %v7982_v20  ;;  %v7902_v20 = vld [vmem:[#allocation5 + $0x328] sm:$0xf]  ;;  %v8943_v9 = vld [vmem:[#allocation5 + $0x334] sm:$0xf0]  ;;  %v7775_v32 = vor.u32 %v8911_v62, %v7774_v50 }
 0x880   :  { %6366 = vmatpush.bf16.msrb.mxu1 %v8443_v29  ;;  %v8111_v29 = vor.u32 %v8995_v33, %v8110_v10  ;;  %v8030_v10 = vld [vmem:[#allocation5 + $0x428] sm:$0xf]  ;;  %v8975_v33 = vld [vmem:[#allocation5 + $0x434] sm:$0xf0] }
 0x881   :  { %6379 = vmatpush.bf16.msrb.mxu2 %v7551_v8  ;;  %v7838_v8 = vld [vmem:[#allocation5 + $0x2a8] sm:$0xf]  ;;  %v9019_v50 = vld [vmem:[#allocation5 + $0x594] sm:$0xf0] }
 0x882   :  { %6392 = vmatpush.bf16.msrb.mxu3 %v7679_v2  ;;  %v7966_v2 = vld [vmem:[#allocation5 + $0x3a8] sm:$0xf]  ;;  %v7839_v5 = vor.u32 %v8927_v25, %v7838_v8  ;;  %v8907_v8 = vld [vmem:[#allocation5 + $0x214] sm:$0xf0] }
 0x883   :  { %v7967_v59 = vor.u32 %v8959_v42, %v7966_v2  ;;  %v7886_v25 = vld [vmem:[#allocation5 + $0x308] sm:$0xf]  ;;  %v8939_v2 = vld [vmem:[#allocation5 + $0x314] sm:$0xf0] }
 0x884   :  { %6367 = vmatpush.bf16.msrb.mxu1 %v8427_v36  ;;  %v8095_v36 = vor.u32 %v8991_v3, %v8094_v21  ;;  %v8971_v42 = vld [vmem:[#allocation5 + $0x414] sm:$0xf0]  ;;  %v8254_v21 = vld [vmem:[#allocation5 + $0x5e8] sm:$0xf] }
 0x885   :  { %6380 = vmatpush.bf16.msrb.mxu2 %v7535_v13  ;;  %v7822_v13 = vld [vmem:[#allocation5 + $0x288] sm:$0xf]  ;;  %v9031_v3 = vld [vmem:[#allocation5 + $0x5f4] sm:$0xf0]  ;;  %v8015_v60 = vor.u32 %v8971_v42, %v8014_v43 }
 0x886   :  { %6393 = vmatpush.bf16.msrb.mxu3 %v7663_v56  ;;  %v7950_v56 = vld [vmem:[#allocation5 + $0x388] sm:$0xf]  ;;  %v7823_v4 = vor.u32 %v8923_v53, %v7822_v13  ;;  %v8255_v38 = vor.u32 %v9031_v3, %v8254_v21  ;;  %v9047_v3 = vld [vmem:[#allocation5 + $0x674] sm:$0xf0] }
 0x887   :  { %v7951_v31 = vor.u32 %v8955_v18, %v7950_v56  ;;  %v8510_v53 = vld [vmem:[#allocation5 + $0x7e8] sm:$0xf]  ;;  %v9095_v56 = vld [vmem:[#allocation5 + $0x7f4] sm:$0xf0]  ;;  %v7887_v18 = vor.u32 %v8939_v2, %v7886_v25 }
 0x888   :  { %6368 = vmatpush.bf16.msrb.mxu1 %v8411_v24  ;;  %v8919_v24 = vld [vmem:[#allocation5 + $0x274] sm:$0xf0]  ;;  %v8334_v62 = vld [vmem:[#allocation5 + $0x688] sm:$0xf] }
 0x889   :  { %6381 = vmatpush.bf16.msrb.mxu2 %v7519_v49  ;;  %v7934_v49 = vld [vmem:[#allocation5 + $0x368] sm:$0xf]  ;;  %v7807_v27 = vor.u32 %v8919_v24, %v7806_v44  ;;  %v8511_v24 = vor.u32 %v9095_v56, %v8510_v53  ;;  %v9015_v2 = vld [vmem:[#allocation5 + $0x574] sm:$0xf0] }
 0x88a   :  { %6394 = vmatpush.bf16.msrb.mxu3 %v7647_v51  ;;  %v8062_v51 = vld [vmem:[#allocation5 + $0x468] sm:$0xf]  ;;  %v7935_v63 = vor.u32 %v8951_v23, %v7934_v49  ;;  %v9059_v49 = vld [vmem:[#allocation5 + $0x6d4] sm:$0xf0]  ;;  %v8000_v23 = vld [vmem:[#allocation5 + $0x3f8] sm:$0xf0] }
 0x88b   :  { %v8063_v6 = vor.u32 %v8983_v45, %v8062_v51  ;;  %v8366_v44 = vld [vmem:[#allocation5 + $0x6c8] sm:$0xf]  ;;  %v9091_v45 = vld [vmem:[#allocation5 + $0x7d4] sm:$0xf0] }
 0x88c   :  { %6369 = vmatpush.bf16.msrb.mxu1 %v8395_v7  ;;  %v6215_v34 = vpop.f32.mrf.mxu1  ;;  %v8494_v51 = vld [vmem:[#allocation5 + $0x7c8] sm:$0xf] }
 0x88d   :  { %6382 = vmatpush.bf16.msrb.mxu2 %v7503_v35  ;;  %v6216_v55 = vadd.f32 %v6215_v34, %v6203_v15  ;;  %v7791_v35 = vor.u32 %v8915_v40, %v7790_v30  ;;  %v8965_v34 = vld [vmem:[#allocation5 + $0x3ec] sm:$0xf]  ;;  %v9023_v30 = vld [vmem:[#allocation5 + $0x5b4] sm:$0xf0]  ;;  %v8350_v40 = vld [vmem:[#allocation5 + $0x6a8] sm:$0xf] }
 0x88e   :  { %6395 = vmatpush.bf16.msrb.mxu3 %v7631_v58  ;;  %v8190_v25 = vld [vmem:[#allocation5 + $0x568] sm:$0xf] }
 0x88f   :  { %6370 = vmatmul.bf16.vlgmr.msrb.gmra.mxu1 %v14222_v41  ;;  %v8318_v43 = vld [vmem:[#allocation5 + $0x668] sm:$0xf]  ;;  %v8191_v56 = vor.u32 %v9015_v2, %v8190_v25  ;;  %v7872_v25 = vld [vmem:[#allocation5 + $0x2f8] sm:$0xf0] }
 0x890   :  { %6401 = vmatpush.bf16.msra.mxu1 %v7871_v47  ;;  %6383 = vmatmul.bf16.vlgmr.msrb.gmra.mxu2 %v14206_v52 }
 0x891   :  { %6414 = vmatpush.bf16.msra.mxu2 %v7999_v19  ;;  %6396 = vmatmul.bf16.vlgmr.msrb.gmra.mxu3 %v14202_v17  ;;  %v7919_v19 = vor.u32 %v8947_v12, %v7918_v37  ;;  %v8495_v37 = vor.u32 %v9091_v45, %v8494_v51  ;;  %v9055_v12 = vld [vmem:[#allocation5 + $0x6b4] sm:$0xf0] }
 0x892   :  { %6427 = vmatpush.bf16.msra.mxu3 %v8127_v54  ;;  %v8047_v54 = vor.u32 %v8979_v11, %v8046_v46  ;;  %v8961_v46 = vld [vmem:[#allocation5 + $0x3cc] sm:$0xf]  ;;  %v7984_v11 = vld [vmem:[#allocation5 + $0x3d8] sm:$0xf0] }
 0x893   :  { %v6228_v7 = vpop.f32.mrf.mxu2 }
 0x894   :  { %6402 = vmatpush.bf16.msra.mxu1 %v7855_v1  ;;  %v6229_v58 = vadd.f32 %v6228_v7, %v6216_v55  ;;  %v6241_v47 = vpop.f32.mrf.mxu3  ;;  %v6217_v39 = vpop.f32.mrf.mxu1  ;;  %v7758_v1 = vld [vmem:[#allocation5 + $0x208] sm:$0xf]  ;;  %v8003_v55 = vor.u32 %v8965_v34, %v8000_v23 }
 0x895   :  { %6415 = vmatpush.bf16.msra.mxu2 %v7983_v26  ;;  %v7903_v26 = vor.u32 %v8943_v9, %v7902_v20  ;;  %v7759_v13 = vor.u32 %v8907_v8, %v7758_v1  ;;  %v8478_v7 = vld [vmem:[#allocation5 + $0x7a8] sm:$0xf]  ;;  %v9051_v39 = vld [vmem:[#allocation5 + $0x694] sm:$0xf0]  ;;  %v8957_v9 = vld [vmem:[#allocation5 + $0x3ac] sm:$0xf] }
 0x896   :  { %6428 = vmatpush.bf16.msra.mxu3 %v8111_v29  ;;  %v14245_v0 = vadd.f32 %v6241_v47, %v6229_v58  ;;  %v8031_v29 = vor.u32 %v8975_v33, %v8030_v10  ;;  %6518 = vmatpush.bf16.msrb.mxu0 %v8003_v55  ;;  %v7987_v58 = vor.u32 %v8961_v46, %v7984_v11  ;;  %v7968_v10 = vld [vmem:[#allocation5 + $0x3b8] sm:$0xf0]  ;;  %v8462_v33 = vld [vmem:[#allocation5 + $0x788] sm:$0xf] }
 0x897   :  { %v7971_v1 = vor.u32 %v8957_v9, %v7968_v10  ;;  %v8335_v8 = vor.u32 %v9051_v39, %v8334_v62  ;;  %v7920_v46 = vld [vmem:[#allocation5 + $0x358] sm:$0xf0]  ;;  %v8414_v11 = vld [vmem:[#allocation5 + $0x728] sm:$0xf]  ;;  %v9035_v62 = vld [vmem:[#allocation5 + $0x614] sm:$0xf0] }
 0x898   :  { %6403 = vmatpush.bf16.msra.mxu1 %v7839_v5  ;;  %v8382_v5 = vld [vmem:[#allocation5 + $0x6e8] sm:$0xf]  ;;  %v9067_v9 = vld [vmem:[#allocation5 + $0x714] sm:$0xf0]  ;;  %v8941_v10 = vld [vmem:[#allocation5 + $0x32c] sm:$0xf] }
 0x899   :  { %6416 = vmatpush.bf16.msra.mxu2 %v7967_v59  ;;  %v9063_v59 = vld [vmem:[#allocation5 + $0x6f4] sm:$0xf0] }
 0x89a   :  { %6429 = vmatpush.bf16.msra.mxu3 %v8095_v36  ;;  %6519 = vmatpush.bf16.msrb.mxu0 %v7987_v58  ;;  %v9003_v58 = vld [vmem:[#allocation5 + $0x514] sm:$0xf0] }
 0x89b   :  { %v6230_v36 = vpop.f32.mrf.mxu2 }
 0x89c   :  { %6404 = vmatpush.bf16.msra.mxu1 %v7823_v4  ;;  %v6243_v15 = vpop.f32.mrf.mxu3  ;;  %v8383_v4 = vor.u32 %v9063_v59, %v8382_v5  ;;  %v8953_v5 = vld [vmem:[#allocation5 + $0x38c] sm:$0xf]  ;;  %v7952_v59 = vld [vmem:[#allocation5 + $0x398] sm:$0xf0]  ;;  %v8446_v36 = vld [vmem:[#allocation5 + $0x768] sm:$0xf] }
 0x89d   :  { %6417 = vmatpush.bf16.msra.mxu2 %v7951_v31  ;;  %v8238_v31 = vld [vmem:[#allocation5 + $0x5c8] sm:$0xf]  ;;  %v7955_v53 = vor.u32 %v8953_v5, %v7952_v59  ;;  %v8319_v15 = vor.u32 %v9047_v3, %v8318_v43  ;;  %v8865_v5 = vld [vmem:[#allocation5 + $0xcc] sm:$0xf] }
 0x89e   :  { %6430 = vmatpush.bf16.msra.mxu3 %v8079_v48  ;;  %v9027_v48 = vld [vmem:[#allocation5 + $0x5d4] sm:$0xf0]  ;;  %6520 = vmatpush.bf16.msrb.mxu0 %v7971_v1  ;;  %v7616_v1 = vld [vmem:[#allocation5 + $0xf8] sm:$0xf0] }
 0x8a0   :  { %6405 = vmatpush.bf16.msra.mxu1 %v7807_v27  ;;  %v8239_v27 = vor.u32 %v9027_v48, %v8238_v31  ;;  %v9043_v31 = vld [vmem:[#allocation5 + $0x654] sm:$0xf0]  ;;  %v8949_v48 = vld [vmem:[#allocation5 + $0x36c] sm:$0xf] }
 0x8a1   :  { %6418 = vmatpush.bf16.msra.mxu2 %v7935_v63  ;;  %v8367_v63 = vor.u32 %v9059_v49, %v8366_v44  ;;  %v8430_v44 = vld [vmem:[#allocation5 + $0x748] sm:$0xf] }
 0x8a2   :  { %6431 = vmatpush.bf16.msra.mxu3 %v8063_v6  ;;  %v8222_v6 = vld [vmem:[#allocation5 + $0x5a8] sm:$0xf]  ;;  %6521 = vmatpush.bf16.msrb.mxu0 %v7955_v53  ;;  %v8897_v53 = vld [vmem:[#allocation5 + $0x1cc] sm:$0xf] }
 0x8a3   :  { %v8223_v47 = vor.u32 %v9023_v30, %v8222_v6  ;;  %v8286_v6 = vld [vmem:[#allocation5 + $0x628] sm:$0xf] }
 0x8a4   :  { %6406 = vmatpush.bf16.msra.mxu1 %v7791_v35  ;;  %v9087_v35 = vld [vmem:[#allocation5 + $0x7b4] sm:$0xf0] }
 0x8a5   :  { %6419 = vmatpush.bf16.msra.mxu2 %v7919_v19  ;;  %v8351_v19 = vor.u32 %v9055_v12, %v8350_v40  ;;  %v8479_v20 = vor.u32 %v9087_v35, %v8478_v7  ;;  %v8945_v12 = vld [vmem:[#allocation5 + $0x34c] sm:$0xf]  ;;  %v9071_v7 = vld [vmem:[#allocation5 + $0x734] sm:$0xf0]  ;;  %v8142_v35 = vld [vmem:[#allocation5 + $0x508] sm:$0xf] }
 0x8a6   :  { %6432 = vmatpush.bf16.msra.mxu3 %v8047_v54  ;;  %v8206_v54 = vld [vmem:[#allocation5 + $0x588] sm:$0xf]  ;;  %v8415_v39 = vor.u32 %v9071_v7, %v8414_v11  ;;  %v8857_v11 = vld [vmem:[#allocation5 + $0x8c] sm:$0xf]  ;;  %v7568_v7 = vld [vmem:[#allocation5 + $0x98] sm:$0xf0] }
 0x8a8   :  { %6407 = vmatpush.bf16.msra.mxu1 %v7775_v32  ;;  %v9083_v32 = vld [vmem:[#allocation5 + $0x794] sm:$0xf0] }
 0x8a9   :  { %6420 = vmatpush.bf16.msra.mxu2 %v7903_v26  ;;  %v8463_v21 = vor.u32 %v9083_v32, %v8462_v33  ;;  %v7904_v33 = vld [vmem:[#allocation5 + $0x338] sm:$0xf0]  ;;  %v8869_v32 = vld [vmem:[#allocation5 + $0xec] sm:$0xf] }
 0x8aa   :  { %6433 = vmatpush.bf16.msra.mxu3 %v8031_v29  ;;  %v8207_v29 = vor.u32 %v9019_v50, %v8206_v54  ;;  %v8270_v50 = vld [vmem:[#allocation5 + $0x608] sm:$0xf] }
 0x8ab   :  { %v8271_v3 = vor.u32 %v9035_v62, %v8270_v50  ;;  %v8921_v50 = vld [vmem:[#allocation5 + $0x28c] sm:$0xf]  ;;  %v7824_v62 = vld [vmem:[#allocation5 + $0x298] sm:$0xf0] }
 0x8ac   :  { %6408 = vmatpush.bf16.msra.mxu1 %v7759_v13  ;;  %v6254_v26 = vpop.f32.mrf.mxu1  ;;  %v9079_v13 = vld [vmem:[#allocation5 + $0x774] sm:$0xf0] }
 0x8ad   :  { %6421 = vmatpush.bf16.msra.mxu2 %v7887_v18  ;;  %v6255_v42 = vadd.f32 %v6254_v26, %v14245_v0  ;;  %v8174_v18 = vld [vmem:[#allocation5 + $0x548] sm:$0xf]  ;;  %v7936_v0 = vld [vmem:[#allocation5 + $0x378] sm:$0xf0]  ;;  %v8901_v26 = vld [vmem:[#allocation5 + $0x1ec] sm:$0xf] }
 0x8ae   :  { %6434 = vmatpush.bf16.msra.mxu3 %v8015_v60  ;;  %v9011_v60 = vld [vmem:[#allocation5 + $0x554] sm:$0xf0]  ;;  %v7939_v23 = vor.u32 %v8949_v48, %v7936_v0  ;;  %v9093_v48 = vld [vmem:[#allocation5 + $0x7ec] sm:$0xf]  ;;  %v8512_v0 = vld [vmem:[#allocation5 + $0x7f8] sm:$0xf0] }
 0x8af   :  { %6409 = vmatmul.bf16.vlgmr.msra.gmra.mxu1 %v14204_v28  ;;  %v8175_v45 = vor.u32 %v9011_v60, %v8174_v18  ;;  %v8929_v60 = vld [vmem:[#allocation5 + $0x2cc] sm:$0xf] }
 0x8b0   :  { %6440 = vmatpush.bf16.msrb.mxu1 %v8255_v38  ;;  %6422 = vmatmul.bf16.vlgmr.msra.gmra.mxu2 %v14213_v57  ;;  %v8302_v38 = vld [vmem:[#allocation5 + $0x648] sm:$0xf] }
 0x8b1   :  { %6453 = vmatpush.bf16.msrb.mxu2 %v8383_v4  ;;  %6435 = vmatmul.bf16.vlgmr.msra.gmra.mxu3 %v14211_v14  ;;  %v8447_v4 = vor.u32 %v9079_v13, %v8446_v36  ;;  %v8303_v55 = vor.u32 %v9043_v31, %v8302_v38  ;;  %v7619_v36 = vor.u32 %v8869_v32, %v7616_v1  ;;  %v7600_v13 = vld [vmem:[#allocation5 + $0xd8] sm:$0xf0]  ;;  %v8937_v38 = vld [vmem:[#allocation5 + $0x30c] sm:$0xf] }
 0x8b2   :  { %6466 = vmatpush.bf16.msrb.mxu3 %v8511_v24  ;;  %v9075_v24 = vld [vmem:[#allocation5 + $0x754] sm:$0xf0]  ;;  %6522 = vmatpush.bf16.msrb.mxu0 %v7939_v23  ;;  %v7856_v31 = vld [vmem:[#allocation5 + $0x2d8] sm:$0xf0] }
 0x8b3   :  { %v6267_v49 = vpop.f32.mrf.mxu2  ;;  %v8431_v40 = vor.u32 %v9075_v24, %v8430_v44  ;;  %v7603_v24 = vor.u32 %v8865_v5, %v7600_v13  ;;  %v7584_v23 = vld [vmem:[#allocation5 + $0xb8] sm:$0xf0] }
 0x8b4   :  { %6441 = vmatpush.bf16.msrb.mxu1 %v8239_v27  ;;  %v14251_v34 = vpop.f32.mrf.mxu3  ;;  %v14253_v51 = vadd.f32 %v6267_v49, %v6255_v42  ;;  %v8158_v27 = vld [vmem:[#allocation5 + $0x528] sm:$0xf]  ;;  %v6256_v30 = vpop.f32.mrf.mxu1  ;;  %v7907_v42 = vor.u32 %v8941_v10, %v7904_v33  ;;  %v8861_v49 = vld [vmem:[#allocation5 + $0xac] sm:$0xf]  ;;  %v7552_v33 = vld [vmem:[#allocation5 + $0x78] sm:$0xf0] }
 0x8b5   :  { %6454 = vmatpush.bf16.msrb.mxu2 %v8367_v63  ;;  %v9007_v63 = vld [vmem:[#allocation5 + $0x534] sm:$0xf0]  ;;  %v8925_v30 = vld [vmem:[#allocation5 + $0x2ac] sm:$0xf]  ;;  %v7536_v5 = vld [vmem:[#allocation5 + $0x58] sm:$0xf0] }
 0x8b6   :  { %6467 = vmatpush.bf16.msrb.mxu3 %v8495_v37  ;;  %v9039_v37 = vld [vmem:[#allocation5 + $0x634] sm:$0xf0]  ;;  %v8853_v10 = vld [vmem:[#allocation5 + $0x6c] sm:$0xf] }
 0x8b7   :  { %v8287_v54 = vor.u32 %v9039_v37, %v8286_v6  ;;  %v7712_v6 = vld [vmem:[#allocation5 + $0x1b8] sm:$0xf0]  ;;  %v9089_v37 = vld [vmem:[#allocation5 + $0x7cc] sm:$0xf] }
 0x8b8   :  { %6442 = vmatpush.bf16.msrb.mxu1 %v8223_v47  ;;  %v7923_v47 = vor.u32 %v8945_v12, %v7920_v46  ;;  %v8496_v12 = vld [vmem:[#allocation5 + $0x7d8] sm:$0xf0]  ;;  %v7587_v46 = vor.u32 %v8861_v49, %v7584_v23 }
 0x8b9   :  { %6455 = vmatpush.bf16.msrb.mxu2 %v8351_v19  ;;  %v8159_v19 = vor.u32 %v9007_v63, %v8158_v27  ;;  %v7859_v27 = vor.u32 %v8929_v60, %v7856_v31  ;;  %v8893_v63 = vld [vmem:[#allocation5 + $0x1ac] sm:$0xf] }
 0x8ba   :  { %6468 = vmatpush.bf16.msrb.mxu3 %v8479_v20  ;;  %v8398_v20 = vld [vmem:[#allocation5 + $0x708] sm:$0xf]  ;;  %6523 = vmatpush.bf16.msrb.mxu0 %v7923_v47  ;;  %v9077_v60 = vld [vmem:[#allocation5 + $0x76c] sm:$0xf] }
 0x8bb   :  { %v6269_v2 = vpop.f32.mrf.mxu2  ;;  %v8399_v59 = vor.u32 %v9067_v9, %v8398_v20  ;;  %v9085_v20 = vld [vmem:[#allocation5 + $0x7ac] sm:$0xf]  ;;  %v7571_v9 = vor.u32 %v8857_v11, %v7568_v7 }
 0x8bc   :  { %6443 = vmatpush.bf16.msrb.mxu1 %v8207_v29  ;;  %v7744_v29 = vld [vmem:[#allocation5 + $0x1f8] sm:$0xf0]  ;;  %v6282_v43 = vpop.f32.mrf.mxu3  ;;  %v8873_v11 = vld [vmem:[#allocation5 + $0x10c] sm:$0xf] }
 0x8bd   :  { %6456 = vmatpush.bf16.msrb.mxu2 %v8335_v8  ;;  %v8933_v8 = vld [vmem:[#allocation5 + $0x2ec] sm:$0xf]  ;;  %v7808_v43 = vld [vmem:[#allocation5 + $0x278] sm:$0xf0] }
 0x8be   :  { %6469 = vmatpush.bf16.msrb.mxu3 %v8463_v21  ;;  %v8143_v21 = vor.u32 %v9003_v58, %v8142_v35  ;;  %v7875_v18 = vor.u32 %v8933_v8, %v7872_v25  ;;  %6524 = vmatpush.bf16.msrb.mxu0 %v7907_v42  ;;  %v8499_v35 = vor.u32 %v9089_v37, %v8496_v12  ;;  %v7680_v8 = vld [vmem:[#allocation5 + $0x178] sm:$0xf0]  ;;  %v8917_v25 = vld [vmem:[#allocation5 + $0x26c] sm:$0xf] }
 0x8bf   :  { %v7715_v58 = vor.u32 %v8893_v63, %v7712_v6  ;;  %v9081_v42 = vld [vmem:[#allocation5 + $0x78c] sm:$0xf]  ;;  %v7811_v13 = vor.u32 %v8917_v25, %v7808_v43  ;;  %v7776_v6 = vld [vmem:[#allocation5 + $0x238] sm:$0xf0] }
 0x8c0   :  { %6444 = vmatpush.bf16.msrb.mxu1 %v8191_v56  ;;  %v7728_v56 = vld [vmem:[#allocation5 + $0x1d8] sm:$0xf0]  ;;  %v8841_v12 = vld [vmem:[#allocation5 + $0xc] sm:$0xf] }
 0x8c1   :  { %6457 = vmatpush.bf16.msrb.mxu2 %v8319_v15  ;;  %v7747_v15 = vor.u32 %v8901_v26, %v7744_v29  ;;  %v7827_v26 = vor.u32 %v8921_v50, %v7824_v62  ;;  %v8885_v29 = vld [vmem:[#allocation5 + $0x16c] sm:$0xf] }
 0x8c2   :  { %6470 = vmatpush.bf16.msrb.mxu3 %v8447_v4  ;;  %v7888_v4 = vld [vmem:[#allocation5 + $0x318] sm:$0xf0]  ;;  %v8997_v50 = vld [vmem:[#allocation5 + $0x4ec] sm:$0xf] }
 0x8c3   :  { %v7891_v44 = vor.u32 %v8937_v38, %v7888_v4  ;;  %v8448_v38 = vld [vmem:[#allocation5 + $0x778] sm:$0xf0]  ;;  %v9069_v62 = vld [vmem:[#allocation5 + $0x72c] sm:$0xf] }
 0x8c4   :  { %6445 = vmatpush.bf16.msrb.mxu1 %v8175_v45  ;;  %v8515_v45 = vor.u32 %v9093_v48, %v8512_v0  ;;  %v8845_v0 = vld [vmem:[#allocation5 + $0x2c] sm:$0xf] }
 0x8c5   :  { %6458 = vmatpush.bf16.msrb.mxu2 %v8303_v55  ;;  %v7731_v55 = vor.u32 %v8897_v53, %v7728_v56  ;;  %6525 = vmatpush.bf16.msrb.mxu0 %v7891_v44  ;;  %v8881_v53 = vld [vmem:[#allocation5 + $0x14c] sm:$0xf]  ;;  %v7664_v56 = vld [vmem:[#allocation5 + $0x158] sm:$0xf0] }
 0x8c6   :  { %6471 = vmatpush.bf16.msrb.mxu3 %v8431_v40  ;;  %v7840_v40 = vld [vmem:[#allocation5 + $0x2b8] sm:$0xf0]  ;;  %v7667_v49 = vor.u32 %v8881_v53, %v7664_v56  ;;  %v9057_v56 = vld [vmem:[#allocation5 + $0x6cc] sm:$0xf] }
 0x8c7   :  { %v7843_v47 = vor.u32 %v8925_v30, %v7840_v40  ;;  %v7520_v44 = vld [vmem:[#allocation5 + $0x38] sm:$0xf0]  ;;  %v9073_v30 = vld [vmem:[#allocation5 + $0x74c] sm:$0xf] }
 0x8c8   :  { %6446 = vmatpush.bf16.msrb.mxu1 %v8159_v19  ;;  %v8889_v19 = vld [vmem:[#allocation5 + $0x18c] sm:$0xf]  ;;  %6526 = vmatmul.bf16.vlgmr.msrb.gmra.mxu0 %v14213_v57  ;;  %v7555_v57 = vor.u32 %v8853_v10, %v7552_v33  ;;  %v8432_v40 = vld [vmem:[#allocation5 + $0x758] sm:$0xf0]  ;;  %v7523_v37 = vor.u32 %v8845_v0, %v7520_v44 }
 0x8c9   :  { %6459 = vmatpush.bf16.msrb.mxu2 %v8287_v54  ;;  %6570 = vmatpush.bf16.msra.mxu0 %v8515_v45  ;;  %v7696_v54 = vld [vmem:[#allocation5 + $0x198] sm:$0xf0]  ;;  %v8877_v45 = vld [vmem:[#allocation5 + $0x12c] sm:$0xf]  ;;  %v8435_v7 = vor.u32 %v9073_v30, %v8432_v40 }
 0x8ca   :  { %6472 = vmatpush.bf16.msrb.mxu3 %v8415_v39  ;;  %v8480_v39 = vld [vmem:[#allocation5 + $0x7b8] sm:$0xf0]  ;;  %v7699_v1 = vor.u32 %v8889_v19, %v7696_v54  ;;  %v8905_v19 = vld [vmem:[#allocation5 + $0x20c] sm:$0xf] }
 0x8cb   :  { %v8483_v32 = vor.u32 %v9085_v20, %v8480_v39  ;;  %v7760_v54 = vld [vmem:[#allocation5 + $0x218] sm:$0xf0]  ;;  %v9017_v40 = vld [vmem:[#allocation5 + $0x58c] sm:$0xf] }
 0x8cc   :  { %6447 = vmatpush.bf16.msrb.mxu1 %v8143_v21  ;;  %v14259_v2 = vpop.f32.mrf.mxu1  ;;  %v8464_v21 = vld [vmem:[#allocation5 + $0x798] sm:$0xf0]  ;;  %v7763_v43 = vor.u32 %v8905_v19, %v7760_v54  ;;  %v9045_v19 = vld [vmem:[#allocation5 + $0x66c] sm:$0xf] }
 0x8cd   :  { %6460 = vmatpush.bf16.msrb.mxu2 %v8271_v3  ;;  %6571 = vmatpush.bf16.msra.mxu0 %v8499_v35  ;;  %v8849_v3 = vld [vmem:[#allocation5 + $0x4c] sm:$0xf]  ;;  %v8416_v20 = vld [vmem:[#allocation5 + $0x738] sm:$0xf0] }
 0x8ce   :  { %6473 = vmatpush.bf16.msrb.mxu3 %v8399_v59  ;;  %v8467_v59 = vor.u32 %v9081_v42, %v8464_v21  ;;  %v7539_v31 = vor.u32 %v8849_v3, %v7536_v5  ;;  %v8128_v39 = vld [vmem:[#allocation5 + $0x4f8] sm:$0xf0]  ;;  %v9065_v5 = vld [vmem:[#allocation5 + $0x70c] sm:$0xf] }
 0x8cf   :  { %6448 = vmatmul.bf16.vlgmr.msrb.gmra.mxu1 %v14215_v16  ;;  %v8256_v10 = vld [vmem:[#allocation5 + $0x5f8] sm:$0xf0]  ;;  %v8131_v42 = vor.u32 %v8997_v50, %v8128_v39 }
 0x8d0   :  { %6479 = vmatpush.bf16.msra.mxu1 %v7619_v36  ;;  %6461 = vmatmul.bf16.vlgmr.msrb.gmra.mxu2 %v14220_v22  ;;  %v7683_v36 = vor.u32 %v8885_v29, %v7680_v8  ;;  %v8419_v8 = vor.u32 %v9069_v62, %v8416_v20  ;;  %v8112_v3 = vld [vmem:[#allocation5 + $0x4d8] sm:$0xf0]  ;;  %v8977_v20 = vld [vmem:[#allocation5 + $0x44c] sm:$0xf] }
 0x8d1   :  { %6492 = vmatpush.bf16.msra.mxu2 %v7747_v15  ;;  %6474 = vmatmul.bf16.vlgmr.msrb.gmra.mxu3 %v14222_v41  ;;  %v8913_v15 = vld [vmem:[#allocation5 + $0x24c] sm:$0xf]  ;;  %v8400_v53 = vld [vmem:[#allocation5 + $0x718] sm:$0xf0] }
 0x8d2   :  { %6505 = vmatpush.bf16.msra.mxu3 %v7875_v18  ;;  %6572 = vmatpush.bf16.msra.mxu0 %v8483_v32  ;;  %v7792_v18 = vld [vmem:[#allocation5 + $0x258] sm:$0xf0] }
 0x8d3   :  { %v14261_v4 = vpop.f32.mrf.mxu2  ;;  %v7795_v23 = vor.u32 %v8913_v15, %v7792_v18  ;;  %v8368_v15 = vld [vmem:[#allocation5 + $0x6d8] sm:$0xf0]  ;;  %v8403_v18 = vor.u32 %v9065_v5, %v8400_v53  ;;  %v9037_v5 = vld [vmem:[#allocation5 + $0x62c] sm:$0xf] }
 0x8d4   :  { %6480 = vmatpush.bf16.msra.mxu1 %v7603_v24  ;;  %v14263_v48 = vpop.f32.mrf.mxu3  ;;  %v8451_v24 = vor.u32 %v9077_v60, %v8448_v38  ;;  %v6295_v63 = vpop.f32.mrf.mxu1  ;;  %v8371_v0 = vor.u32 %v9057_v56, %v8368_v15  ;;  %v8096_v44 = vld [vmem:[#allocation5 + $0x4b8] sm:$0xf0]  ;;  %v8969_v53 = vld [vmem:[#allocation5 + $0x40c] sm:$0xf] }
 0x8d5   :  { %6493 = vmatpush.bf16.msra.mxu2 %v7731_v55  ;;  %v7648_v55 = vld [vmem:[#allocation5 + $0x138] sm:$0xf0]  ;;  %v8985_v63 = vld [vmem:[#allocation5 + $0x48c] sm:$0xf] }
 0x8d6   :  { %6506 = vmatpush.bf16.msra.mxu3 %v7859_v27  ;;  %6573 = vmatpush.bf16.msra.mxu0 %v8467_v59  ;;  %v8909_v27 = vld [vmem:[#allocation5 + $0x22c] sm:$0xf]  ;;  %v7651_v35 = vor.u32 %v8877_v45, %v7648_v55  ;;  %v8352_v45 = vld [vmem:[#allocation5 + $0x6b8] sm:$0xf0] }
 0x8d7   :  { %v8080_v30 = vld [vmem:[#allocation5 + $0x498] sm:$0xf0] }
 0x8d8   :  { %6481 = vmatpush.bf16.msra.mxu1 %v7587_v46  ;;  %v7504_v46 = vld [vmem:[#allocation5 + $0x18] sm:$0xf0] }
 0x8d9   :  { %6494 = vmatpush.bf16.msra.mxu2 %v7715_v58  ;;  %v7779_v58 = vor.u32 %v8909_v27, %v7776_v6  ;;  %v7507_v32 = vor.u32 %v8841_v12, %v7504_v46  ;;  %v9049_v12 = vld [vmem:[#allocation5 + $0x68c] sm:$0xf]  ;;  %v8336_v46 = vld [vmem:[#allocation5 + $0x698] sm:$0xf0] }
 0x8da   :  { %6507 = vmatpush.bf16.msra.mxu3 %v7843_v47  ;;  %6574 = vmatpush.bf16.msra.mxu0 %v8451_v24  ;;  %v7632_v47 = vld [vmem:[#allocation5 + $0x118] sm:$0xf0]  ;;  %v9021_v24 = vld [vmem:[#allocation5 + $0x5ac] sm:$0xf] }
 0x8db   :  { %v6308_v33 = vpop.f32.mrf.mxu2  ;;  %v7635_v25 = vor.u32 %v8873_v11, %v7632_v47  ;;  %v8981_v11 = vld [vmem:[#allocation5 + $0x46c] sm:$0xf]  ;;  %v8192_v47 = vld [vmem:[#allocation5 + $0x578] sm:$0xf0] }
 0x8dc   :  { %6482 = vmatpush.bf16.msra.mxu1 %v7571_v9  ;;  %v9029_v9 = vld [vmem:[#allocation5 + $0x5ec] sm:$0xf]  ;;  %v6321_v29 = vpop.f32.mrf.mxu3  ;;  %v8320_v54 = vld [vmem:[#allocation5 + $0x678] sm:$0xf0] }
 0x8dd   :  { %6495 = vmatpush.bf16.msra.mxu2 %v7699_v1  ;;  %v9061_v1 = vld [vmem:[#allocation5 + $0x6ec] sm:$0xf]  ;;  %v8259_v21 = vor.u32 %v9029_v9, %v8256_v10  ;;  %v8048_v39 = vld [vmem:[#allocation5 + $0x458] sm:$0xf0] }
 0x8de   :  { %6508 = vmatpush.bf16.msra.mxu3 %v7827_v26  ;;  %v8384_v26 = vld [vmem:[#allocation5 + $0x6f8] sm:$0xf0]  ;;  %6575 = vmatpush.bf16.msra.mxu0 %v8435_v7  ;;  %v8339_v7 = vor.u32 %v9049_v12, %v8336_v46  ;;  %v9009_v9 = vld [vmem:[#allocation5 + $0x54c] sm:$0xf]  ;;  %v8051_v29 = vor.u32 %v8977_v20, %v8048_v39  ;;  %v9109_v12 = vld [vmem:[#allocation8 + $0x64] sm:$0xf0] }
 0x8df   :  { %v8387_v59 = vor.u32 %v9061_v1, %v8384_v26  ;;  %v8176_v10 = vld [vmem:[#allocation5 + $0x558] sm:$0xf0]  ;;  %v9041_v33 = vld [vmem:[#allocation5 + $0x64c] sm:$0xf]  ;;  %v8630_v46 = vld [vmem:[#allocation8 + $0xe0] sm:$0xf] }
 0x8e0   :  { %6483 = vmatpush.bf16.msra.mxu1 %v7555_v57  ;;  %v8993_v57 = vld [vmem:[#allocation5 + $0x4cc] sm:$0xf]  ;;  %v8016_v56 = vld [vmem:[#allocation5 + $0x418] sm:$0xf0]  ;;  %v8614_v20 = vld [vmem:[#allocation8 + $0xc0] sm:$0xf] }
 0x8e1   :  { %6496 = vmatpush.bf16.msra.mxu2 %v7683_v36  ;;  %v9025_v36 = vld [vmem:[#allocation5 + $0x5cc] sm:$0xf]  ;;  %v8115_v60 = vor.u32 %v8993_v57, %v8112_v3  ;;  %v8160_v3 = vld [vmem:[#allocation5 + $0x538] sm:$0xf0]  ;;  %v8702_v39 = vld [vmem:[#allocation8 + $0x170] sm:$0xf] }
 0x8e2   :  { %6509 = vmatpush.bf16.msra.mxu3 %v7811_v13  ;;  %v8240_v13 = vld [vmem:[#allocation5 + $0x5d8] sm:$0xf0]  ;;  %6576 = vmatpush.bf16.msra.mxu0 %v8419_v8  ;;  %v8179_v8 = vor.u32 %v9009_v9, %v8176_v10  ;;  %v9005_v57 = vld [vmem:[#allocation5 + $0x52c] sm:$0xf]  ;;  %v9143_v9 = vld [vmem:[#allocation8 + $0x174] sm:$0xf0] }
 0x8e3   :  { %v8243_v38 = vor.u32 %v9025_v36, %v8240_v13  ;;  %v8163_v13 = vor.u32 %v9005_v57, %v8160_v3  ;;  %v8703_v10 = vor.u32 %v9143_v9, %v8702_v39  ;;  %v8662_v39 = vld [vmem:[#allocation8 + $0x120] sm:$0xf]  ;;  %v9133_v9 = vld [vmem:[#allocation8 + $0x124] sm:$0xf0] }
 0x8e4   :  { %6484 = vmatpush.bf16.msra.mxu1 %v7539_v31  ;;  %v8989_v31 = vld [vmem:[#allocation5 + $0x4ac] sm:$0xf] }
 0x8e5   :  { %6497 = vmatpush.bf16.msra.mxu2 %v7667_v49  ;;  %v8224_v49 = vld [vmem:[#allocation5 + $0x5b8] sm:$0xf0]  ;;  %v8099_v55 = vor.u32 %v8989_v31, %v8096_v44  ;;  %v9111_v44 = vld [vmem:[#allocation8 + $0x74] sm:$0xf0] }
 0x8e6   :  { %6510 = vmatpush.bf16.msra.mxu3 %v7795_v23  ;;  %v9053_v23 = vld [vmem:[#allocation5 + $0x6ac] sm:$0xf]  ;;  %6577 = vmatpush.bf16.msra.mxu0 %v8403_v18  ;;  %v8227_v27 = vor.u32 %v9021_v24, %v8224_v49  ;;  %v8272_v31 = vld [vmem:[#allocation5 + $0x618] sm:$0xf0]  ;;  %v8638_v24 = vld [vmem:[#allocation8 + $0xf0] sm:$0xf] }
 0x8e7   :  { %v8355_v6 = vor.u32 %v9053_v23, %v8352_v45  ;;  %v9001_v18 = vld [vmem:[#allocation5 + $0x50c] sm:$0xf]  ;;  %v9127_v49 = vld [vmem:[#allocation8 + $0xf4] sm:$0xf0] }
 0x8e8   :  { %6485 = vmatpush.bf16.msra.mxu1 %v7523_v37  ;;  %v8208_v37 = vld [vmem:[#allocation5 + $0x598] sm:$0xf0] }
 0x8e9   :  { %6498 = vmatpush.bf16.msra.mxu2 %v7651_v35  ;;  %6578 = vmatmul.bf16.vlgmr.msra.gmra.mxu0 %v14222_v41  ;;  %v8064_v35 = vld [vmem:[#allocation5 + $0x478] sm:$0xf0]  ;;  %v8323_v41 = vor.u32 %v9045_v19, %v8320_v54 }
 0x8ea   :  { %6511 = vmatpush.bf16.msra.mxu3 %v7779_v58  ;;  %v9013_v58 = vld [vmem:[#allocation5 + $0x56c] sm:$0xf]  ;;  %v8067_v50 = vor.u32 %v8981_v11, %v8064_v35  ;;  %v8558_v35 = vld [vmem:[#allocation8 + $0x50] sm:$0xf] }
 0x8eb   :  { %v8195_v62 = vor.u32 %v9013_v58, %v8192_v47  ;;  %v9107_v58 = vld [vmem:[#allocation8 + $0x54] sm:$0xf0] }
 0x8ec   :  { %6486 = vmatpush.bf16.msra.mxu1 %v7507_v32  ;;  %v8304_v32 = vld [vmem:[#allocation5 + $0x658] sm:$0xf0]  ;;  %v9123_v47 = vld [vmem:[#allocation8 + $0xd4] sm:$0xf0]  ;;  %v8559_v54 = vor.u32 %v9107_v58, %v8558_v35 }
 0x8ed   :  { %6499 = vmatpush.bf16.msra.mxu2 %v7635_v25  ;;  %v8973_v25 = vld [vmem:[#allocation5 + $0x42c] sm:$0xf]  ;;  %v8640_v35 = vld [vmem:[#allocation8 + $0xf8] sm:$0xf0] }
 0x8ee   :  { %6512 = vmatpush.bf16.msra.mxu3 %v7763_v43 }
 0x8ef   :  { %6487 = vmatmul.bf16.vlgmr.msra.gmra.mxu1 %v14206_v52  ;;  %v8211_v52 = vor.u32 %v9017_v40, %v8208_v37  ;;  %v8639_v40 = vor.u32 %v9127_v49, %v8638_v24  ;;  %v8566_v37 = vld [vmem:[#allocation8 + $0x60] sm:$0xf]  ;;  %v8590_v24 = vld [vmem:[#allocation8 + $0x90] sm:$0xf] }
 0x8f0   :  { %6531 = vmatpush.bf16.msrb.mxu1 %v8131_v42  ;;  %6500 = vmatmul.bf16.vlgmr.msra.gmra.mxu2 %v14202_v17  ;;  %v14269_v17 = vpop.f32.mrf.mxu1  ;;  %v8307_v42 = vor.u32 %v9041_v33, %v8304_v32  ;;  %v8567_v11 = vor.u32 %v9109_v12, %v8566_v37  ;;  %v8542_v32 = vld [vmem:[#allocation8 + $0x30] sm:$0xf]  ;;  %v9113_v37 = vld [vmem:[#allocation8 + $0x84] sm:$0xf0]  ;;  %v9110_v12 = vld [vmem:[#allocation8 + $0x74] sm:$0xf] }
 0x8f1   :  { %6544 = vmatpush.bf16.msrb.mxu2 %v8259_v21  ;;  %6513 = vmatmul.bf16.vlgmr.msra.gmra.mxu3 %v14204_v28  ;;  %v8083_v28 = vor.u32 %v8985_v63, %v8080_v30  ;;  %v8032_v21 = vld [vmem:[#allocation5 + $0x438] sm:$0xf0]  ;;  %v4880_v63 = vperm.slane %v14238_v61, 1  ;;  %v8622_v61 = vld [vmem:[#allocation8 + $0xd0] sm:$0xf] }
 0x8f2   :  { %6557 = vmatpush.bf16.msrb.mxu3 %v8387_v59  ;;  %v8288_v59 = vld [vmem:[#allocation5 + $0x638] sm:$0xf0]  ;;  %v8035_v36 = vor.u32 %v8973_v25, %v8032_v21  ;;  %v8694_v25 = vld [vmem:[#allocation8 + $0x160] sm:$0xf] }
 0x8f3   :  { %v14271_v1 = vpop.f32.mrf.mxu2  ;;  %v8291_v15 = vor.u32 %v9037_v5, %v8288_v59  ;;  %v9101_v5 = vld [vmem:[#allocation8 + $0x24] sm:$0xf0]  ;;  %v8598_v59 = vld [vmem:[#allocation8 + $0xa0] sm:$0xf] }
 0x8f4   :  { %6532 = vmatpush.bf16.msrb.mxu1 %v8115_v60  ;;  %v14273_v26 = vpop.f32.mrf.mxu3  ;;  %v8144_v60 = vld [vmem:[#allocation5 + $0x518] sm:$0xf0] }
 0x8f5   :  { %6545 = vmatpush.bf16.msrb.mxu2 %v8243_v38  ;;  %v9033_v38 = vld [vmem:[#allocation5 + $0x60c] sm:$0xf] }
 0x8f6   :  { %6558 = vmatpush.bf16.msrb.mxu3 %v8371_v0  ;;  %v8574_v0 = vld [vmem:[#allocation8 + $0x70] sm:$0xf] }
 0x8f7   :  { %v8575_v30 = vor.u32 %v9111_v44, %v8574_v0  ;;  %v8526_v0 = vld [vmem:[#allocation8 + $0x10] sm:$0xf]  ;;  %v9099_v44 = vld [vmem:[#allocation8 + $0x14] sm:$0xf0] }
 0x8f8   :  { %6533 = vmatpush.bf16.msrb.mxu1 %v8099_v55  ;;  %v6334_v43 = vpop.f32.mrf.mxu1  ;;  %v8019_v55 = vor.u32 %v8969_v53, %v8016_v56  ;;  %v8686_v53 = vld [vmem:[#allocation8 + $0x150] sm:$0xf]  ;;  %v9139_v56 = vld [vmem:[#allocation8 + $0x154] sm:$0xf0] }
 0x8f9   :  { %6546 = vmatpush.bf16.msrb.mxu2 %v8227_v27  ;;  %v8147_v27 = vor.u32 %v9001_v18, %v8144_v60  ;;  %v9141_v43 = vld [vmem:[#allocation8 + $0x164] sm:$0xf0]  ;;  %v8687_v18 = vor.u32 %v9139_v56, %v8686_v53  ;;  %v8616_v56 = vld [vmem:[#allocation8 + $0xc8] sm:$0xf0] }
 0x8fa   :  { %6559 = vmatpush.bf16.msrb.mxu3 %v8355_v6  ;;  %v8275_v6 = vor.u32 %v9033_v38, %v8272_v31 }
 0x8fb   :  { %v6347_v23 = vpop.f32.mrf.mxu2 }
 0x8fc   :  { %6534 = vmatpush.bf16.msrb.mxu1 %v8083_v28  ;;  %v6360_v45 = vpop.f32.mrf.mxu3  ;;  %v9125_v28 = vld [vmem:[#allocation8 + $0xe4] sm:$0xf0]  ;;  %v8678_v23 = vld [vmem:[#allocation8 + $0x140] sm:$0xf] }
 0x8fd   :  { %6547 = vmatpush.bf16.msrb.mxu2 %v8211_v52  ;;  %v6281_v52 = vadd.f32 %v14251_v34, %v4880_v63  ;;  %v8623_v34 = vor.u32 %v9123_v47, %v8622_v61  ;;  %v9137_v45 = vld [vmem:[#allocation8 + $0x144] sm:$0xf0]  ;;  %v8527_v63 = vor.u32 %v9099_v44, %v8526_v0  ;;  %v9140_v0 = vld [vmem:[#allocation8 + $0x164] sm:$0xf]  ;;  %v8696_v44 = vld [vmem:[#allocation8 + $0x168] sm:$0xf0] }
 0x8fe   :  { %6560 = vmatpush.bf16.msrb.mxu3 %v8339_v7  ;;  %v8631_v7 = vor.u32 %v9125_v28, %v8630_v46  ;;  %v8576_v28 = vld [vmem:[#allocation8 + $0x78] sm:$0xf0] }
 0x8ff   :  { %v6294_v19 = vadd.f32 %v14259_v2, %v6281_v52  ;;  %v9103_v2 = vld [vmem:[#allocation8 + $0x34] sm:$0xf0]  ;;  %v8670_v52 = vld [vmem:[#allocation8 + $0x130] sm:$0xf] }
 0x900   :  { %6535 = vmatpush.bf16.msrb.mxu1 %v8067_v50  ;;  %v8550_v50 = vld [vmem:[#allocation8 + $0x40] sm:$0xf]  ;;  %v8543_v57 = vor.u32 %v9103_v2, %v8542_v32  ;;  %v9131_v32 = vld [vmem:[#allocation8 + $0x114] sm:$0xf0] }
 0x901   :  { %6548 = vmatpush.bf16.msrb.mxu2 %v8195_v62  ;;  %v9105_v62 = vld [vmem:[#allocation8 + $0x44] sm:$0xf0] }
 0x902   :  { %6561 = vmatpush.bf16.msrb.mxu3 %v8323_v41  ;;  %v9121_v41 = vld [vmem:[#allocation8 + $0xc4] sm:$0xf0] }
 0x904   :  { %6536 = vmatpush.bf16.msrb.mxu1 %v8051_v29  ;;  %v8606_v29 = vld [vmem:[#allocation8 + $0xb0] sm:$0xf] }
 0x905   :  { %6549 = vmatpush.bf16.msrb.mxu2 %v8179_v8  ;;  %v9119_v8 = vld [vmem:[#allocation8 + $0xb4] sm:$0xf0] }
 0x906   :  { %6562 = vmatpush.bf16.msrb.mxu3 %v8307_v42  ;;  %v8695_v42 = vor.u32 %v9141_v43, %v8694_v25  ;;  %v8607_v3 = vor.u32 %v9119_v8, %v8606_v29  ;;  %v9106_v8 = vld [vmem:[#allocation8 + $0x54] sm:$0xf]  ;;  %v8560_v25 = vld [vmem:[#allocation8 + $0x58] sm:$0xf0] }
 0x907   :  { %v9122_v43 = vld [vmem:[#allocation8 + $0xd4] sm:$0xf] }
 0x908   :  { %6537 = vmatpush.bf16.msrb.mxu1 %v8035_v36 }
 0x909   :  { %6550 = vmatpush.bf16.msrb.mxu2 %v8163_v13  ;;  %v9117_v13 = vld [vmem:[#allocation8 + $0xa4] sm:$0xf0] }
 0x90a   :  { %6563 = vmatpush.bf16.msrb.mxu3 %v8291_v15  ;;  %v8599_v31 = vor.u32 %v9117_v13, %v8598_v59  ;;  %v9104_v59 = vld [vmem:[#allocation8 + $0x44] sm:$0xf] }
 0x90b   :  { %v9120_v13 = vld [vmem:[#allocation8 + $0xc4] sm:$0xf] }
 0x90c   :  { %6538 = vmatpush.bf16.msrb.mxu1 %v8019_v55  ;;  %v6371_v33 = vpop.f32.mrf.mxu1  ;;  %v8679_v55 = vor.u32 %v9137_v45, %v8678_v23  ;;  %v9118_v45 = vld [vmem:[#allocation8 + $0xb4] sm:$0xf] }
 0x90d   :  { %6551 = vmatpush.bf16.msrb.mxu2 %v8147_v27 }
 0x90e   :  { %6564 = vmatpush.bf16.msrb.mxu3 %v8275_v6  ;;  %v9097_v6 = vld [vmem:[#allocation8 + $0x4] sm:$0xf0] }
 0x90f   :  { %6539 = vmatmul.bf16.vlgmr.msrb.gmra.mxu1 %v14211_v14  ;;  %v6307_v14 = vadd.f32 %v14261_v4, %v6294_v19  ;;  %v8534_v4 = vld [vmem:[#allocation8 + $0x20] sm:$0xf]  ;;  %v6583_v19 = vmax.f32 %v14253_v51, 0.0  ;;  %v8654_v51 = vld [vmem:[#allocation8 + $0x110] sm:$0xf] }
 0x910   :  { %6981 = vmatpush.bf16.msra.mxu1 %v8575_v30  ;;  %6552 = vmatmul.bf16.vlgmr.msrb.gmra.mxu2 %v14215_v16  ;;  %v8551_v16 = vor.u32 %v9105_v62, %v8550_v50  ;;  %v9108_v50 = vld [vmem:[#allocation8 + $0x64] sm:$0xf]  ;;  %v8568_v62 = vld [vmem:[#allocation8 + $0x68] sm:$0xf0] }
 0x911   :  { %6994 = vmatpush.bf16.msra.mxu2 %v8639_v40  ;;  %6565 = vmatmul.bf16.vlgmr.msrb.gmra.mxu3 %v14220_v22  ;;  %v8615_v22 = vor.u32 %v9121_v41, %v8614_v20  ;;  %v6320_v21 = vadd.f32 %v14263_v48, %v6307_v14  ;;  %v8535_v48 = vor.u32 %v9101_v5, %v8534_v4  ;;  %v8582_v40 = vld [vmem:[#allocation8 + $0x80] sm:$0xf]  ;;  %v8632_v14 = vld [vmem:[#allocation8 + $0xe8] sm:$0xf0] }
 0x912   :  { %7007 = vmatpush.bf16.msra.mxu3 %v8703_v10  ;;  %v9124_v10 = vld [vmem:[#allocation8 + $0xe4] sm:$0xf]  ;;  %v8563_v4 = vor.u32 %v9106_v8, %v8560_v25  ;;  %v8664_v8 = vld [vmem:[#allocation8 + $0x128] sm:$0xf0] }
 0x913   :  { %v6333_v36 = vadd.f32 %v14269_v17, %v6320_v21  ;;  %v14284_v15 = vpop.f32.mrf.mxu2  ;;  %v9115_v17 = vld [vmem:[#allocation8 + $0x94] sm:$0xf0]  ;;  %v8635_v29 = vor.u32 %v9124_v10, %v8632_v14  ;;  %v8624_v21 = vld [vmem:[#allocation8 + $0xd8] sm:$0xf0]  ;;  %v8520_v10 = vld [vmem:[#allocation8 + $0x8] sm:$0xf0] }
 0x914   :  { %6982 = vmatpush.bf16.msra.mxu1 %v8567_v11  ;;  %v14287_v38 = vpop.f32.mrf.mxu3  ;;  %v6373_v49 = vpop.f32.mrf.mxu1  ;;  %v8591_v30 = vor.u32 %v9115_v17, %v8590_v24  ;;  %v9135_v11 = vld [vmem:[#allocation8 + $0x134] sm:$0xf0]  ;;  %v8627_v5 = vor.u32 %v9122_v43, %v8624_v21  ;;  %v8619_v24 = vor.u32 %v9120_v13, %v8616_v56  ;;  %v8544_v17 = vld [vmem:[#allocation8 + $0x38] sm:$0xf0]  ;;  %v9112_v14 = vld [vmem:[#allocation8 + $0x84] sm:$0xf] }
 0x915   :  { %6995 = vmatpush.bf16.msra.mxu2 %v8631_v7  ;;  %v6346_v60 = vadd.f32 %v14271_v1, %v6333_v36  ;;  %v8518_v1 = vld [vmem:[#allocation8] sm:$0xf]  ;;  %v9126_v7 = vld [vmem:[#allocation8 + $0xf4] sm:$0xf]  ;;  %v8671_v61 = vor.u32 %v9135_v11, %v8670_v52  ;;  %v8552_v36 = vld [vmem:[#allocation8 + $0x48] sm:$0xf0] }
 0x916   :  { %7008 = vmatpush.bf16.msra.mxu3 %v8695_v42  ;;  %v8643_v41 = vor.u32 %v9126_v7, %v8640_v35  ;;  %v8655_v42 = vor.u32 %v9131_v32, %v8654_v51  ;;  %v9102_v49 = vld [vmem:[#allocation8 + $0x34] sm:$0xf]  ;;  %v8672_v51 = vld [vmem:[#allocation8 + $0x138] sm:$0xf0]  ;;  %v8766_v21 = vld [vmem:[#allocation8 + $0x1f0] sm:$0xf] }
 0x917   :  { %v6359_v27 = vadd.f32 %v14273_v26, %v6346_v60  ;;  %v8519_v26 = vor.u32 %v9097_v6, %v8518_v1  ;;  %v8704_v60 = vld [vmem:[#allocation8 + $0x178] sm:$0xf0]  ;;  %v9100_v6 = vld [vmem:[#allocation8 + $0x24] sm:$0xf] }
 0x918   :  { %6983 = vmatpush.bf16.msra.mxu1 %v8559_v54  ;;  %v8583_v54 = vor.u32 %v9113_v37, %v8582_v40  ;;  %v9116_v40 = vld [vmem:[#allocation8 + $0xa4] sm:$0xf]  ;;  %v8600_v37 = vld [vmem:[#allocation8 + $0xa8] sm:$0xf0]  ;;  %v8656_v13 = vld [vmem:[#allocation8 + $0x118] sm:$0xf0] }
 0x919   :  { %6996 = vmatpush.bf16.msra.mxu2 %v8623_v34  ;;  %v6372_v46 = vadd.f32 %v6371_v33, %v6359_v27  ;;  %v8579_v34 = vor.u32 %v9110_v12, %v8576_v28  ;;  %v14291_v33 = vpack.c.bf16 %v6583_v19, %v6583_v19  ;;  %v8699_v27 = vor.u32 %v9140_v0, %v8696_v44  ;;  %v9138_v12 = vld [vmem:[#allocation8 + $0x154] sm:$0xf]  ;;  %v8592_v19 = vld [vmem:[#allocation8 + $0x98] sm:$0xf0]  ;;  %v8758_v0 = vld [vmem:[#allocation8 + $0x1e0] sm:$0xf] }
 0x91a   :  { %7009 = vmatpush.bf16.msra.mxu3 %v8687_v18  ;;  %v9142_v18 = vld [vmem:[#allocation8 + $0x174] sm:$0xf]  ;;  %v8603_v35 = vor.u32 %v9116_v40, %v8600_v37  ;;  %v9157_v44 = vld [vmem:[#allocation8 + $0x1e4] sm:$0xf0] }
 0x91b   :  { %v6386_v58 = vpop.f32.mrf.mxu2  ;;  %v6584_v20 = vmax.f32 %v6372_v46, 0.0  ;;  %v8688_v46 = vld [vmem:[#allocation8 + $0x158] sm:$0xf0] }
 0x91c   :  { %6984 = vmatpush.bf16.msra.mxu1 %v8551_v16  ;;  %v6399_v47 = vpop.f32.mrf.mxu3  ;;  %v8663_v16 = vor.u32 %v9133_v9, %v8662_v39  ;;  %v8691_v28 = vor.u32 %v9138_v12, %v8688_v46  ;;  %v9098_v58 = vld [vmem:[#allocation8 + $0x14] sm:$0xf]  ;;  %v9096_v9 = vld [vmem:[#allocation8 + $0x4] sm:$0xf]  ;;  %v8734_v12 = vld [vmem:[#allocation8 + $0x1b0] sm:$0xf] }
 0x91d   :  { %6997 = vmatpush.bf16.msra.mxu2 %v8615_v22  ;;  %v8571_v22 = vor.u32 %v9108_v50, %v8568_v62  ;;  %v14293_v2 = vpack.c.bf16 %v6584_v20, %v6584_v20  ;;  %v14304_v62 = vld [vmem:[%s14438_s10] sm:$0xf]  ;;  %v8523_v25 = vor.u32 %v9096_v9, %v8520_v10  ;;  %v9151_v46 = vld [vmem:[#allocation8 + $0x1b4] sm:$0xf0]  ;;  %v8768_v9 = vld [vmem:[#allocation8 + $0x1f8] sm:$0xf0] }
 0x91e   :  { %7010 = vmatpush.bf16.msra.mxu3 %v8679_v55  ;;  %v8608_v55 = vld [vmem:[#allocation8 + $0xb8] sm:$0xf0]  ;;  %v4881_v20 = vperm.slane %v14304_v62, 2 }
 0x91f   :  { %v8611_v1 = vor.u32 %v9118_v45, %v8608_v55 }
 0x920   :  { %6985 = vmatpush.bf16.msra.mxu1 %v8543_v57  ;;  %v8646_v57 = vld [vmem:[#allocation8 + $0x100] sm:$0xf] }
 0x921   :  { %6998 = vmatpush.bf16.msra.mxu2 %v8607_v3  ;;  %v9129_v3 = vld [vmem:[#allocation8 + $0x104] sm:$0xf0] }
 0x922   :  { %7011 = vmatpush.bf16.msra.mxu3 %v8671_v61  ;;  %v8647_v53 = vor.u32 %v9129_v3, %v8646_v57  ;;  %v8528_v61 = vld [vmem:[#allocation8 + $0x18] sm:$0xf0]  ;;  %v9159_v3 = vld [vmem:[#allocation8 + $0x1f4] sm:$0xf0] }
 0x924   :  { %6986 = vmatpush.bf16.msra.mxu1 %v8535_v48  ;;  %v8707_v48 = vor.u32 %v9142_v18, %v8704_v60  ;;  %v9128_v18 = vld [vmem:[#allocation8 + $0x104] sm:$0xf]  ;;  %v8648_v60 = vld [vmem:[#allocation8 + $0x108] sm:$0xf0] }
 0x925   :  { %6999 = vmatpush.bf16.msra.mxu2 %v8599_v31  ;;  %v8555_v31 = vor.u32 %v9104_v59, %v8552_v36  ;;  %v8767_v59 = vor.u32 %v9159_v3, %v8766_v21  ;;  %v9130_v36 = vld [vmem:[#allocation8 + $0x114] sm:$0xf]  ;;  %v8744_v3 = vld [vmem:[#allocation8 + $0x1c8] sm:$0xf0] }
 0x926   :  { %7012 = vmatpush.bf16.msra.mxu3 %v8663_v16  ;;  %v8584_v16 = vld [vmem:[#allocation8 + $0x88] sm:$0xf0]  ;;  %v8659_v56 = vor.u32 %v9130_v36, %v8656_v13  ;;  %v8736_v36 = vld [vmem:[#allocation8 + $0x1b8] sm:$0xf0] }
 0x927   :  { %v8587_v57 = vor.u32 %v9112_v14, %v8584_v16  ;;  %7020 = vmatpush.bf16.msrb.mxu0 %v8767_v59  ;;  %v9156_v16 = vld [vmem:[#allocation8 + $0x1e4] sm:$0xf]  ;;  %v9150_v59 = vld [vmem:[#allocation8 + $0x1b4] sm:$0xf] }
 0x928   :  { %6987 = vmatpush.bf16.msra.mxu1 %v8527_v63  ;;  %v8547_v63 = vor.u32 %v9102_v49, %v8544_v17  ;;  %v8759_v49 = vor.u32 %v9157_v44, %v8758_v0  ;;  %v8750_v17 = vld [vmem:[#allocation8 + $0x1d0] sm:$0xf]  ;;  %v8720_v0 = vld [vmem:[#allocation8 + $0x198] sm:$0xf0] }
 0x929   :  { %7000 = vmatpush.bf16.msra.mxu2 %v8591_v30  ;;  %v8536_v30 = vld [vmem:[#allocation8 + $0x28] sm:$0xf0] }
 0x92a   :  { %7013 = vmatpush.bf16.msra.mxu3 %v8655_v42  ;;  %v8539_v52 = vor.u32 %v9100_v6, %v8536_v30 }
 0x92b   :  { %7021 = vmatpush.bf16.msrb.mxu0 %v8759_v49 }
 0x92c   :  { %6988 = vmatpush.bf16.msra.mxu1 %v8519_v26  ;;  %v14297_v23 = vpop.f32.mrf.mxu1  ;;  %v9114_v26 = vld [vmem:[#allocation8 + $0x94] sm:$0xf] }
 0x92d   :  { %7001 = vmatpush.bf16.msra.mxu2 %v8583_v54  ;;  %v9136_v54 = vld [vmem:[#allocation8 + $0x144] sm:$0xf]  ;;  %v8595_v39 = vor.u32 %v9114_v26, %v8592_v19  ;;  %v8718_v19 = vld [vmem:[#allocation8 + $0x190] sm:$0xf] }
 0x92e   :  { %7014 = vmatpush.bf16.msra.mxu3 %v8647_v53 }
 0x92f   :  { %6989 = vmatmul.bf16.vlgmr.msra.gmra.mxu1 %v14291_v33 }
 0x930   :  { %7033 = vmatpush.bf16.msrb.mxu1 %v8579_v34  ;;  %7002 = vmatmul.bf16.vlgmr.msra.gmra.mxu2 %v14293_v2  ;;  %v8680_v34 = vld [vmem:[#allocation8 + $0x148] sm:$0xf0] }
 0x931   :  { %7046 = vmatpush.bf16.msrb.mxu2 %v8643_v41  ;;  %v8683_v50 = vor.u32 %v9136_v54, %v8680_v34  ;;  %v8531_v41 = vor.u32 %v9098_v58, %v8528_v61  ;;  %v9147_v54 = vld [vmem:[#allocation8 + $0x194] sm:$0xf0] }
 0x932   :  { %7059 = vmatpush.bf16.msrb.mxu3 %v8707_v48  ;;  %v8651_v48 = vor.u32 %v9128_v18, %v8648_v60  ;;  %v8719_v34 = vor.u32 %v9147_v54, %v8718_v19  ;;  %v9148_v18 = vld [vmem:[#allocation8 + $0x1a4] sm:$0xf]  ;;  %v8728_v60 = vld [vmem:[#allocation8 + $0x1a8] sm:$0xf0] }
 0x933   :  { %v6423_v11 = vpop.f32.mrf.mxu2 }
 0x934   :  { %7034 = vmatpush.bf16.msrb.mxu1 %v8571_v22  ;;  %v14299_v7 = vpop.f32.mrf.mxu3  ;;  %v6412_v47 = vpop.f32.mrf.mxu1  ;;  %v9134_v22 = vld [vmem:[#allocation8 + $0x134] sm:$0xf] }
 0x935   :  { %7047 = vmatpush.bf16.msrb.mxu2 %v8635_v29  ;;  %v8675_v32 = vor.u32 %v9134_v22, %v8672_v51  ;;  %v9132_v29 = vld [vmem:[#allocation8 + $0x124] sm:$0xf]  ;;  %v8760_v22 = vld [vmem:[#allocation8 + $0x1e8] sm:$0xf0] }
 0x936   :  { %7060 = vmatpush.bf16.msrb.mxu3 %v8699_v27  ;;  %v8763_v51 = vor.u32 %v9156_v16, %v8760_v22  ;;  %v7117_v16 = vld [vmem:[%s14441_s13 + $0xf0] sm:$0xff]  ;;  %v7099_v22 = vld [vmem:[%s14441_s13 + $0x60] sm:$0xff] }
 0x938   :  { %7035 = vmatpush.bf16.msrb.mxu1 %v8563_v4  ;;  %v6385_v4 = vadd.f32 %v14284_v15, %v4881_v20  ;;  %v9145_v20 = vld [vmem:[#allocation8 + $0x184] sm:$0xf0] }
 0x939   :  { %7048 = vmatpush.bf16.msrb.mxu2 %v8627_v5  ;;  %v8667_v5 = vor.u32 %v9132_v29, %v8664_v8  ;;  %v9154_v29 = vld [vmem:[#allocation8 + $0x1d4] sm:$0xf]  ;;  %v8752_v8 = vld [vmem:[#allocation8 + $0x1d8] sm:$0xf0] }
 0x93a   :  { %7061 = vmatpush.bf16.msrb.mxu3 %v8691_v28  ;;  %v6398_v53 = vadd.f32 %v14287_v38, %v6385_v4  ;;  %v9155_v38 = vld [vmem:[#allocation8 + $0x1d4] sm:$0xf0]  ;;  %v8735_v28 = vor.u32 %v9151_v46, %v8734_v12 }
 0x93b   :  { %v6425_v43 = vpop.f32.mrf.mxu2  ;;  %v8751_v45 = vor.u32 %v9155_v38, %v8750_v17  ;;  %v9144_v17 = vld [vmem:[#allocation8 + $0x184] sm:$0xf]  ;;  %v8712_v38 = vld [vmem:[#allocation8 + $0x188] sm:$0xf0] }
 0x93c   :  { %7036 = vmatpush.bf16.msrb.mxu1 %v8555_v31  ;;  %v6438_v42 = vpop.f32.mrf.mxu3  ;;  %v6411_v15 = vadd.f32 %v14297_v23, %v6398_v53  ;;  %v8742_v23 = vld [vmem:[#allocation8 + $0x1c0] sm:$0xf] }
 0x93d   :  { %7049 = vmatpush.bf16.msrb.mxu2 %v8619_v24  ;;  %7022 = vmatpush.bf16.msrb.mxu0 %v8751_v45  ;;  %v8755_v42 = vor.u32 %v9154_v29, %v8752_v8  ;;  %v8715_v45 = vor.u32 %v9144_v17, %v8712_v38  ;;  %v7115_v29 = vld [vmem:[%s14441_s13 + $0xe0] sm:$0xff]  ;;  %v7106_v17 = vld [vmem:[%s14441_s13 + $0x98] sm:$0xff]  ;;  %v7105_v38 = vld [vmem:[%s14441_s13 + $0x90] sm:$0xff] }
 0x93e   :  { %7062 = vmatpush.bf16.msrb.mxu3 %v8683_v50  ;;  %v6424_v31 = vadd.f32 %v6423_v11, %v6411_v15  ;;  %v8726_v11 = vld [vmem:[#allocation8 + $0x1a0] sm:$0xf]  ;;  %v4882_v15 = vperm.slane %v14304_v62, 3 }
 0x93f   :  { %v8710_v50 = vld [vmem:[#allocation8 + $0x180] sm:$0xf] }
 0x940   :  { %7037 = vmatpush.bf16.msrb.mxu1 %v8547_v63 }
 0x941   :  { %7050 = vmatpush.bf16.msrb.mxu2 %v8611_v1  ;;  %v9153_v1 = vld [vmem:[#allocation8 + $0x1c4] sm:$0xf0] }
 0x942   :  { %7063 = vmatpush.bf16.msrb.mxu3 %v8675_v32  ;;  %v8743_v40 = vor.u32 %v9153_v1, %v8742_v23 }
 0x944   :  { %7038 = vmatpush.bf16.msrb.mxu1 %v8539_v52  ;;  %7023 = vmatpush.bf16.msrb.mxu0 %v8743_v40 }
 0x945   :  { %7051 = vmatpush.bf16.msrb.mxu2 %v8603_v35  ;;  %v14313_v6 = vpop.f32.mrf.mxu0  ;;  %v9149_v35 = vld [vmem:[#allocation8 + $0x1a4] sm:$0xf0] }
 0x946   :  { %7064 = vmatpush.bf16.msrb.mxu3 %v8667_v5  ;;  %v8727_v61 = vor.u32 %v9149_v35, %v8726_v11 }
 0x948   :  { %7039 = vmatpush.bf16.msrb.mxu1 %v8531_v41  ;;  %7024 = vmatpush.bf16.msrb.mxu0 %v8735_v28  ;;  %v8711_v41 = vor.u32 %v9145_v20, %v8710_v50 }
 0x949   :  { %7052 = vmatpush.bf16.msrb.mxu2 %v8595_v39  ;;  %v9158_v39 = vld [vmem:[#allocation8 + $0x1f4] sm:$0xf] }
 0x94a   :  { %7065 = vmatpush.bf16.msrb.mxu3 %v8659_v56  ;;  %v8771_v10 = vor.u32 %v9158_v39, %v8768_v9  ;;  %v8739_v56 = vor.u32 %v9150_v59, %v8736_v36  ;;  %v7102_v39 = vld [vmem:[%s14441_s13 + $0x78] sm:$0xff]  ;;  %v7101_v9 = vld [vmem:[%s14441_s13 + $0x70] sm:$0xff]  ;;  %v7091_v59 = vld [vmem:[%s14441_s13 + $0x20] sm:$0xff] }
 0x94b   :  { %v7090_v36 = vld [vmem:[%s14441_s13 + $0x18] sm:$0xff] }
 0x94c   :  { %7040 = vmatpush.bf16.msrb.mxu1 %v8523_v25  ;;  %v6449_v24 = vpop.f32.mrf.mxu1  ;;  %7025 = vmatpush.bf16.msrb.mxu0 %v8727_v61 }
 0x94d   :  { %7053 = vmatpush.bf16.msrb.mxu2 %v8587_v57  ;;  %v6529_v47 = vpop.f32.mrf.mxu0  ;;  %v9152_v57 = vld [vmem:[#allocation8 + $0x1c4] sm:$0xf] }
 0x94e   :  { %7066 = vmatpush.bf16.msrb.mxu3 %v8651_v48  ;;  %v8747_v4 = vor.u32 %v9152_v57, %v8744_v3  ;;  %v8731_v48 = vor.u32 %v9148_v18, %v8728_v60  ;;  %v7094_v57 = vld [vmem:[%s14441_s13 + $0x38] sm:$0xff]  ;;  %v7088_v60 = vld [vmem:[%s14441_s13 + $0x8] sm:$0xff] }
 0x94f   :  { %7041 = vmatmul.bf16.vlgmr.msrb.gmra.mxu1 %v14291_v33  ;;  %v6437_v33 = vadd.f32 %v14299_v7, %v6424_v31  ;;  %v9146_v31 = vld [vmem:[#allocation8 + $0x194] sm:$0xf] }
 0x950   :  { %7054 = vmatmul.bf16.vlgmr.msrb.gmra.mxu2 %v14293_v2  ;;  %7026 = vmatpush.bf16.msrb.mxu0 %v8719_v34 }
 0x951   :  { %v6450_v55 = vadd.f32 %v6449_v24, %v6437_v33  ;;  %v8723_v24 = vor.u32 %v9146_v31, %v8720_v0  ;;  %7123 = vmatpush.msra.mxu1 %v7102_v39  ;;  %v7111_v31 = vld [vmem:[%s14441_s13 + $0xc0] sm:$0xff]  ;;  %v7110_v0 = vld [vmem:[%s14441_s13 + $0xb8] sm:$0xff] }
 0x953   :  { %v6462_v27 = vpop.f32.mrf.mxu2  ;;  %7124 = vmatpush.msra.mxu1 %v7101_v9 }
 0x954   :  { %v6463_v2 = vadd.f32 %v6462_v27, %v6450_v55  ;;  %v6475_v63 = vpop.f32.mrf.mxu3  ;;  %v6451_v30 = vpop.f32.mrf.mxu1  ;;  %7027 = vmatpush.bf16.msrb.mxu0 %v8711_v41 }
 0x956   :  { %v6476_v37 = vadd.f32 %v6475_v63, %v6463_v2 }
 0x958   :  { %v6585_v52 = vmax.f32 %v6476_v37, 0.0  ;;  %7072 = vmatpush.bf16.msra.mxu0 %v8771_v10  ;;  %v7100_v10 = vld [vmem:[%s14441_s13 + $0x68] sm:$0xff] }
 0x959   :  { %7125 = vmatpush.msra.mxu1 %v7100_v10 }
 0x95a   :  { %v6589_v7 = vpack.c.bf16 %v6585_v52, %v6585_v52  ;;  %v6655_v52 = vld [vmem:[%s14440_s12] sm:$0x3] }
 0x95b   :  { %v6464_v58 = vpop.f32.mrf.mxu2  ;;  %v6657_v35 = vperm.slane %v6655_v52, 0  ;;  %v6658_v19 = vperm.slane %v6655_v52, 1  ;;  %7126 = vmatpush.msra.mxu1 %v7099_v22  ;;  %v9284_v52 = vld [vmem:[%s14442_s14] ss:$0 sm:$0xff] }
 0x95c   :  { %7015 = vmatmul.bf16.vlgmr.msra.gmra.mxu3 %v6589_v7  ;;  %v6477_v26 = vpop.f32.mrf.mxu3  ;;  %7073 = vmatpush.bf16.msra.mxu0 %v8763_v51  ;;  %v7116_v51 = vld [vmem:[%s14441_s13 + $0xe8] sm:$0xff] }
 0x960   :  { %7074 = vmatpush.bf16.msra.mxu0 %v8755_v42  ;;  %v7096_v42 = vld [vmem:[%s14441_s13 + $0x48] sm:$0xff] }
 0x964   :  { %7075 = vmatpush.bf16.msra.mxu0 %v8747_v4  ;;  %v7093_v4 = vld [vmem:[%s14441_s13 + $0x30] sm:$0xff] }
 0x966   :  { %v6579_v32 = vpop.f32.mrf.mxu0 }
 0x968   :  { %7076 = vmatpush.bf16.msra.mxu0 %v8739_v56  ;;  %v7113_v56 = vld [vmem:[%s14441_s13 + $0xd0] sm:$0xff] }
 0x96c   :  { %v6488_v14 = vpop.f32.mrf.mxu1  ;;  %7067 = vmatmul.bf16.vlgmr.msrb.gmra.mxu3 %v6589_v7  ;;  %7077 = vmatpush.bf16.msra.mxu0 %v8731_v48  ;;  %v7087_v48 = vld [vmem:[%s14441_s13] sm:$0xff] }
 0x96d   :  { %v6489_v44 = vadd.f32 %v6488_v14, %v4882_v15  ;;  %v7118_v14 = vld [vmem:[%s14441_s13 + $0xf8] sm:$0xff]  ;;  %v7112_v15 = vld [vmem:[%s14441_s13 + $0xc8] sm:$0xff] }
 0x96e   :  { %v6581_v5 = vpop.f32.mrf.mxu0  ;;  %7143 = vmatpush.msra.mxu2 %v7118_v14 }
 0x96f   :  { %v7092_v5 = vld [vmem:[%s14441_s13 + $0x28] sm:$0xff] }
 0x970   :  { %7078 = vmatpush.bf16.msra.mxu0 %v8723_v24  ;;  %7144 = vmatpush.msra.mxu2 %v7117_v16  ;;  %v7108_v24 = vld [vmem:[%s14441_s13 + $0xa8] sm:$0xff] }
 0x972   :  { %7145 = vmatpush.msra.mxu2 %v7116_v51 }
 0x973   :  { %v6501_v25 = vpop.f32.mrf.mxu2 }
 0x974   :  { %v6514_v43 = vpop.f32.mrf.mxu3  ;;  %v6490_v21 = vpop.f32.mrf.mxu1  ;;  %v6502_v49 = vadd.f32 %v6501_v25, %v6489_v44  ;;  %7079 = vmatpush.bf16.msra.mxu0 %v8715_v45  ;;  %v7097_v25 = vld [vmem:[%s14441_s13 + $0x50] sm:$0xff]  ;;  %7146 = vmatpush.msra.mxu2 %v7115_v29  ;;  %v7104_v45 = vld [vmem:[%s14441_s13 + $0x88] sm:$0xff] }
 0x975   :  { %v7095_v21 = vld [vmem:[%s14441_s13 + $0x40] sm:$0xff]  ;;  %v7109_v44 = vld [vmem:[%s14441_s13 + $0xb0] sm:$0xff] }
 0x976   :  { %v6515_v33 = vadd.f32 %v6514_v43, %v6502_v49  ;;  %v7114_v43 = vld [vmem:[%s14441_s13 + $0xd8] sm:$0xff]  ;;  %v7107_v49 = vld [vmem:[%s14441_s13 + $0xa0] sm:$0xff] }
 0x977   :  { %7147 = vmatpush.msra.mxu2 %v7114_v43 }
 0x978   :  { %v6528_v27 = vadd.f32 %v14313_v6, %v6515_v33  ;;  %v7103_v33 = vld [vmem:[%s14441_s13 + $0x80] sm:$0xff] }
 0x979   :  { %7148 = vmatpush.msra.mxu2 %v7113_v56 }
 0x97b   :  { %v6503_v13 = vpop.f32.mrf.mxu2  ;;  %7149 = vmatpush.msra.mxu2 %v7112_v15 }
 0x97c   :  { %v6516_v53 = vpop.f32.mrf.mxu3 }
 0x97d   :  { %v7089_v53 = vld [vmem:[%s14441_s13 + $0x10] sm:$0xff]  ;;  %7150 = vmatpush.msra.mxu2 %v7111_v31 }
 0x97f   :  { %7151 = vmatpush.msra.mxu2 %v7110_v0 }
 0x981   :  { %7152 = vmatpush.msra.mxu2 %v7109_v44 }
 0x983   :  { %7153 = vmatpush.msra.mxu2 %v7108_v24 }
 0x985   :  { %7154 = vmatpush.msra.mxu2 %v7107_v49 }
 0x987   :  { %7155 = vmatpush.msra.mxu2 %v7106_v17 }
 0x989   :  { %7156 = vmatpush.msra.mxu2 %v7105_v38 }
 0x98b   :  { %7157 = vmatpush.msra.mxu2 %v7104_v45 }
 0x98c   :  { %v6540_v55 = vpop.f32.mrf.mxu1 }
 0x98d   :  { %v6541_v2 = vadd.f32 %v6540_v55, %v6528_v27  ;;  %7158 = vmatpush.msra.mxu2 %v7103_v33 }
 0x993   :  { %v6553_v63 = vpop.f32.mrf.mxu2 }
 0x994   :  { %v6554_v62 = vadd.f32 %v6553_v63, %v6541_v2  ;;  %v6566_v23 = vpop.f32.mrf.mxu3  ;;  %v6542_v1 = vpop.f32.mrf.mxu1 }
 0x996   :  { %v6567_v30 = vadd.f32 %v6566_v23, %v6554_v62 }
 0x998   :  { %v6580_v40 = vadd.f32 %v6579_v32, %v6567_v30  ;;  %v7098_v32 = vld [vmem:[%s14441_s13 + $0x58] sm:$0xff] }
 0x999   :  { %7127 = vmatpush.msra.mxu1 %v7098_v32 }
 0x99a   :  { %v6586_v37 = vmax.f32 %v6580_v40, 0.0 }
 0x99b   :  { %v6555_v12 = vpop.f32.mrf.mxu2  ;;  %7128 = vmatpush.msra.mxu1 %v7097_v25 }
 0x99c   :  { %v6590_v46 = vpack.c.bf16 %v6586_v37, %v6586_v37  ;;  %v6568_v28 = vpop.f32.mrf.mxu3  ;;  %v7163_v12 = vlaneseq }
 0x99d   :  { %7129 = vmatpush.msra.mxu1 %v7096_v42 }
 0x99e   :  { %7028 = vmatmul.bf16.vlgmr.msrb.gmra.mxu0 %v6590_v46 }
 0x99f   :  { %7130 = vmatpush.msra.mxu1 %v7095_v21 }
 0x9a1   :  { %7131 = vmatpush.msra.mxu1 %v7094_v57 }
 0x9a3   :  { %7132 = vmatpush.msra.mxu1 %v7093_v4 }
 0x9a5   :  { %7133 = vmatpush.msra.mxu1 %v7092_v5 }
 0x9a7   :  { %7134 = vmatpush.msra.mxu1 %v7091_v59 }
 0x9a9   :  { %7135 = vmatpush.msra.mxu1 %v7090_v36 }
 0x9ab   :  { %7136 = vmatpush.msra.mxu1 %v7089_v53 }
 0x9ac   :  { %v6990_v11 = vpop.f32.mrf.mxu1 }
 0x9ad   :  { %v6991_v6 = vadd.f32 %v6990_v11, %v6657_v35  ;;  %7137 = vmatpush.msra.mxu1 %v7088_v60 }
 0x9ae   :  { %7080 = vmatmul.bf16.vlgmr.msra.gmra.mxu0 %v6590_v46  ;;  %v7164_v46 = vand.u32 127, %v7163_v12 }
 0x9af   :  { %7138 = vmatpush.msra.mxu1 %v7087_v48 }
 0x9b0   :  { %v7169_v28 = vand.u32 3, %v7164_v46 }
 0x9b2   :  { %vm7177_vm7 = vcmp.eq.s32.totalorder %v7169_v28, 0 }
 0x9b3   :  { %v7003_v7 = vpop.f32.mrf.mxu2 }
 0x9b4   :  { %v14320_v58 = vadd.f32 %v7003_v7, %v6991_v6  ;;  %v6992_v61 = vpop.f32.mrf.mxu1  ;;  %v9391_v7 = vmov 0.0  }
 0x9bb   :  { %v7005_v26 = vpop.f32.mrf.mxu2 }
 0x9cc   :  { %v7042_v47 = vpop.f32.mrf.mxu1 }
 0x9cd   :  { %v7043_v54 = vadd.f32 %v7042_v47, %v6658_v19 }
 0x9d3   :  { %v7055_v34 = vpop.f32.mrf.mxu2 }
 0x9d4   :  { %v14322_v50 = vadd.f32 %v7055_v34, %v7043_v54  ;;  %v7044_v20 = vpop.f32.mrf.mxu1 }
 0x9db   :  { %v7057_v41 = vpop.f32.mrf.mxu2 }
 0x9df   :  { %v7016_v8 = vpop.f32.mrf.mxu3 }
 0x9e0   :  { %v7017_v55 = vadd.f32 %v7016_v8, %v14320_v58  ;;  %v7178_v58 = vsel %vm7177_vm7, 1.0, %v9391_v7 }
 0x9e7   :  { %v7018_v3 = vpop.f32.mrf.mxu3 }
 0x9ef   :  { %v7068_v13 = vpop.f32.mrf.mxu3 }
 0x9f0   :  { %v7069_v23 = vadd.f32 %v7068_v13, %v14322_v50 }
 0x9f7   :  { %v7070_v18 = vpop.f32.mrf.mxu3 }
 0xa1b   :  { %v7029_v27 = vpop.f32.mrf.mxu0 }
 0xa1c   :  { %v7030_v2 = vadd.f32 %v7029_v27, %v7017_v55 }
 0xa1e   :  { %v7085_v63 = vmax.f32 %v7030_v2, 0.0 }
 0xa20   :  { %7139 = vmatmul.f32.vlgmr.msra.gmra.mxu1 %v7085_v63 }
 0xa23   :  { %v7031_v62 = vpop.f32.mrf.mxu0 }
 0xa2b   :  { %v7081_v1 = vpop.f32.mrf.mxu0 }
 0xa2c   :  { %v7082_v30 = vadd.f32 %v7081_v1, %v7069_v23 }
 0xa2e   :  { %v7086_v40 = vmax.f32 %v7082_v30, 0.0 }
 0xa30   :  { %7159 = vmatmul.f32.vlgmr.msra.gmra.mxu2 %v7086_v40 }
 0xa33   :  { %v7083_v37 = vpop.f32.mrf.mxu0 }
 0xa9d   :  { %v7140_v11 = vpop.f32.mrf.mxu1 }
 0xa9e   :  { %v7141_v35 = vadd.f32 %v9284_v52, %v7140_v11 }
 0xab3   :  { %v7160_v6 = vpop.f32.mrf.mxu2 }
 0xab4   :  { %v7161_v61 = vadd.f32 %v7160_v6, %v7141_v35 }
 0xab6   :  { %v7179_v26 = vadd.f32 %v7178_v58, %v7161_v61 }
 0xab8   :  { %7181 = vst.msk [vmem:[#allocation10] sm:$0x3] %vm7180_vm8, %v7179_v26 }
 0xab9   :  { %7192 = dma.vmem_to_hbm [thread:$0]  %s7188_s25, 32, %s7190_s26, [#allocation7]  }
 0xaba   :  { %9376 = dma.done.wait [#allocation7], 32  }
 0xabb   :  { %9377 = vsyncadd [#allocation7], 4294967264 }
 0xabc   :  { %7197 = vsyncpa [#allocation6], 1 }
 0xabd   :  { %7198 = vsyncpa [#allocation9], 1 }
 0xabe   :  { %7199 = vsyncpa [#allocation7], 1 }

</bundles_post_ra>
